<compile_context>
chip_gen: v7x
topology: tpu7x:2x2x1
jax: 0.10.0
libtpu: 0.0.40
codegen_flags: <defaults>
</compile_context>

<pallas_src>
import functools

import jax
import jax.numpy as jnp
import numpy as np
from jax import lax
from jax.experimental import pallas as pl
from jax.experimental.pallas import tpu as pltpu

_EPS = 1e-5                      # nn.LayerNorm default eps
_VMEM_LIMIT = 48 * 1024 * 1024   # below v7x's 64 MiB physical VMEM


# ---------------------------------------------------------------------------
# Kernel 1: input LayerNorm + fused channel-first projections + gates
# ---------------------------------------------------------------------------
def _make_proj_gate_kernel(hidden: int):
    H = hidden
    bf16 = jnp.bfloat16

    def kernel(x_ref, mask_ref, lnw_ref, lnb_ref, wlr_ref, blr_ref,
               wg_ref, bg_ref, left_ref, right_ref, gate_ref):
        x = x_ref[...]                                        # [TM, C] f32
        mu = jnp.mean(x, axis=-1, keepdims=True)
        var = jnp.mean((x - mu) ** 2, axis=-1, keepdims=True)
        xn = (x - mu) * lax.rsqrt(var + _EPS)
        xn = xn * lnw_ref[...] + lnb_ref[...]
        xn_b = xn.astype(bf16)

        # Channel-first projection slab [4H, TM]: rhs-transposed (NT) bf16 MXU
        # dot against the pre-transposed fused weight [4H, C]; f32 accumulation.
        # No XLU transpose anywhere in this kernel.
        y = lax.dot_general(wlr_ref[...], xn_b,
                            dimension_numbers=(((1,), (1,)), ((), ())),
                            preferred_element_type=jnp.float32)
        y = y + blr_ref[...]                                  # [4H, TM] + [4H, 1]

        mask = mask_ref[...]                                  # [1, TM]
        left = y[0 * H:1 * H, :] * mask * jax.nn.sigmoid(y[2 * H:3 * H, :])
        right = y[1 * H:2 * H, :] * mask * jax.nn.sigmoid(y[3 * H:4 * H, :])
        left_ref[...] = left.astype(bf16)                     # [H, TM] bf16
        right_ref[...] = right.astype(bf16)                   # [H, TM] bf16

        # Output gate stays row-major [TM, C] (consumed that way in stage 3).
        g = jnp.dot(xn_b, wg_ref[...],
                    preferred_element_type=jnp.float32) + bg_ref[...]
        gate_ref[...] = jax.nn.sigmoid(g).astype(bf16)        # [TM, C] bf16

    return kernel


# ---------------------------------------------------------------------------
# Kernel 2: triangle multiplication (HB channels x TI rows per grid step)
# ---------------------------------------------------------------------------
def _make_triangle_kernel(dimension_numbers):
    def kernel(a_ref, b_ref, o_ref):
        acc = lax.dot_general(a_ref[...], b_ref[...],
                              dimension_numbers=dimension_numbers,
                              preferred_element_type=jnp.float32)
        o_ref[...] = acc.astype(o_ref.dtype)                  # bf16 store
    return kernel


# ---------------------------------------------------------------------------
# Kernel 3: center LayerNorm (channel-first) + output projection + gating
# ---------------------------------------------------------------------------
def _output_kernel(tri_ref, gate_ref, lnw_ref, lnb_ref, wo_ref, bo_ref, out_ref):
    a = tri_ref[...].astype(jnp.float32)                      # [H, TM]
    mu = jnp.mean(a, axis=0, keepdims=True)                   # reduce over channels
    var = jnp.mean((a - mu) ** 2, axis=0, keepdims=True)
    an = (a - mu) * lax.rsqrt(var + _EPS)
    an = an * lnw_ref[...] + lnb_ref[...]                     # [H,TM] * [H,1]
    # Lhs-transposed contraction: [H,TM] x [H,C] -> [TM,C]; MXU absorbs the
    # transpose, stores stay lane-dense.
    out = lax.dot_general(an.astype(jnp.bfloat16), wo_ref[...],
                          dimension_numbers=(((0,), (0,)), ((), ())),
                          preferred_element_type=jnp.float32)
    out = out + bo_ref[...]
    out_ref[...] = out * gate_ref[...].astype(jnp.float32)    # [TM, C] f32


# ---------------------------------------------------------------------------
# Tile-size helpers (budgets chosen to fit v7x's 64 MiB VMEM)
# ---------------------------------------------------------------------------
def _pick_row_tile(m: int, target: int = 512) -> int:
    """Row tile for the [M, C] grids.  Prefers a 128-multiple divisor of m near
    `target`; if m has no such divisor, a partial last block is used (Pallas
    masks out-of-range reads/writes)."""
    if m <= target:
        return m
    t = target
    while t >= 128:
        if m % t == 0:
            return t
        t -= 128
    return target


def _pick_triangle_tiles(h: int, n: int, budget_bytes: int = 20 * 2 ** 20):
    """(HB channels, TI i-rows) per triangle step s.t. the double-buffered bf16
    A/B input blocks + bf16 output block stay within `budget_bytes`."""
    def fits(hb, ti):
        per_buf = 2 * hb * ti * n + 2 * hb * n * n + 2 * hb * ti * n  # A + B + O
        return 2 * per_buf <= budget_bytes                            # double-buffered

    for hb in (32, 16, 8, 4, 2, 1):
        if h % hb == 0 and fits(hb, n):
            return hb, n
    # Even one channel with full N x N blocks is too big: tile the i axis
    # (multiples of 128 keep both equations' block shapes lane/sublane aligned).
    ti = max(128, (n // 2 // 128) * 128)
    while ti >= 128:
        if fits(1, ti):
            return 1, ti
        ti -= 128
    # TODO(synk): for very large N (B block alone > budget) also tile j/k with a
    # VMEM f32 accumulator and an 'arbitrary' innermost reduction axis.
    return 1, 128


# ---------------------------------------------------------------------------
# Wrapper
# ---------------------------------------------------------------------------
def triangle_multiplication(pair_act, pair_mask, params, equation='ikc,jkc->ijc'):
    N, N2, C = pair_act.shape
    assert N == N2, "triangle multiplication expects square pair activations"
    H = params['w_left'].shape[1]
    M = N * N
    f32, bf16 = jnp.float32, jnp.bfloat16

    x2 = pair_act.reshape(M, C).astype(f32)
    mask_cf = pair_mask.reshape(1, M).astype(f32)   # channel-first mask row

    # Fused, pre-transposed projection weight [4H, C] (left|right|lgate|rgate),
    # bf16; transposing here (once, at trace time) lets the kernel use an
    # rhs-transposed MXU dot with zero in-kernel transposes.
    w_lr_t = jnp.concatenate(
        [params['w_left'], params['w_right'],
         params['w_lgate'], params['w_rgate']], axis=1).T.astype(bf16)     # [4H, C]
    b_lr = jnp.concatenate(
        [params['b_left'], params['b_right'],
         params['b_lgate'], params['b_rgate']]).reshape(4 * H, 1).astype(f32)
    w_gate = params['w_gate'].astype(bf16)                                  # [C, C]
    b_gate = params['b_gate'].reshape(1, C).astype(f32)

    TM = _pick_row_tile(M)
    grid_m = pl.cdiv(M, TM)

    # ---- stage 1: LayerNorm + fused channel-first projections / gates -----
    cost1 = pl.CostEstimate(
        flops=2 * M * C * (4 * H + C),
        transcendentals=M * (2 * H + C),
        bytes_accessed=(4 * M * C + 4 * M + 2 * C * (4 * H + C)
                        + 2 * M * 2 * H + 2 * M * C))

    left_cf, right_cf, gate2 = pl.pallas_call(
        _make_proj_gate_kernel(H),
        grid=(grid_m,),
        in_specs=[
            pl.BlockSpec((TM, C), lambda i: (i, 0)),        # pair_act row tile
            pl.BlockSpec((1, TM), lambda i: (0, i)),        # mask (channel-first)
            pl.BlockSpec((1, C), lambda i: (0, 0)),         # ln_in scale (resident)
            pl.BlockSpec((1, C), lambda i: (0, 0)),         # ln_in offset
            pl.BlockSpec((4 * H, C), lambda i: (0, 0)),     # fused proj weight bf16
            pl.BlockSpec((4 * H, 1), lambda i: (0, 0)),     # fused proj bias
            pl.BlockSpec((C, C), lambda i: (0, 0)),         # output-gate weight bf16
            pl.BlockSpec((1, C), lambda i: (0, 0)),         # output-gate bias
        ],
        out_specs=(
            pl.BlockSpec((H, TM), lambda i: (0, i)),        # left, channel-first bf16
            pl.BlockSpec((H, TM), lambda i: (0, i)),        # right, channel-first bf16
            pl.BlockSpec((TM, C), lambda i: (i, 0)),        # output gate bf16
        ),
        out_shape=(jax.ShapeDtypeStruct((H, M), bf16),
                   jax.ShapeDtypeStruct((H, M), bf16),
                   jax.ShapeDtypeStruct((M, C), bf16)),
        compiler_params=pltpu.CompilerParams(
            dimension_semantics=("parallel",), vmem_limit_bytes=_VMEM_LIMIT),
        cost_estimate=cost1,
    )(x2, mask_cf,
      params['ln_in_w'].reshape(1, C).astype(f32),
      params['ln_in_b'].reshape(1, C).astype(f32),
      w_lr_t, b_lr, w_gate, b_gate)

    # Channel-first [H, N, N] views — free reshapes, no HBM transpose passes.
    left3 = left_cf.reshape(H, N, N)      # [c, p, q]
    right3 = right_cf.reshape(H, N, N)    # [c, p, q]

    HB, TI = _pick_triangle_tiles(H, N)
    grid_h = pl.cdiv(H, HB)
    grid_i = pl.cdiv(N, TI)

    if equation == 'ikc,jkc->ijc':
        # tri[c, i, j] = sum_k left[c, i, k] * right[c, j, k]   (batched NT)
        a3, b3 = left3, right3
        dnums = (((2,), (2,)), ((0,), (0,)))
        a_spec = pl.BlockSpec((HB, TI, N), lambda h, it: (h, it, 0))
    elif equation == 'kjc,kic->ijc':
        # tri[c, i, j] = sum_k right[c, k, i] * left[c, k, j]   (batched TN)
        a3, b3 = right3, left3
        dnums = (((1,), (1,)), ((0,), (0,)))
        a_spec = pl.BlockSpec((HB, N, TI), lambda h, it: (h, 0, it))
    else:
        raise ValueError(f'Unknown equation: {equation}')

    # ---- stage 2: triangle multiplication ----------------------------------
    cost2 = pl.CostEstimate(
        flops=2 * H * N * N * N,
        transcendentals=0,
        bytes_accessed=2 * 2 * H * N * N + 2 * H * N * N)

    tri = pl.pallas_call(
        _make_triangle_kernel(dnums),
        grid=(grid_h, grid_i),
        in_specs=[a_spec,
                  pl.BlockSpec((HB, N, N), lambda h, it: (h, 0, 0))],
        out_specs=pl.BlockSpec((HB, TI, N), lambda h, it: (h, it, 0)),
        out_shape=jax.ShapeDtypeStruct((H, N, N), bf16),
        compiler_params=pltpu.CompilerParams(
            dimension_semantics=("parallel", "parallel"),
            vmem_limit_bytes=_VMEM_LIMIT),
        cost_estimate=cost2,
    )(a3, b3)

    tri_flat = tri.reshape(H, M)          # channel-first [c, i*N + j], free reshape

    # ---- stage 3: center LayerNorm + output projection + gating ------------
    cost3 = pl.CostEstimate(
        flops=2 * M * H * C,
        transcendentals=M,
        bytes_accessed=2 * M * H + 2 * M * C + 2 * H * C + 4 * M * C)

    out2 = pl.pallas_call(
        _output_kernel,
        grid=(grid_m,),
        in_specs=[
            pl.BlockSpec((H, TM), lambda i: (0, i)),   # triangle result bf16 (chan-first)
            pl.BlockSpec((TM, C), lambda i: (i, 0)),   # output gate bf16
            pl.BlockSpec((H, 1), lambda i: (0, 0)),    # ln_c scale (column vector)
            pl.BlockSpec((H, 1), lambda i: (0, 0)),    # ln_c offset
            pl.BlockSpec((H, C), lambda i: (0, 0)),    # w_out bf16 (resident)
            pl.BlockSpec((1, C), lambda i: (0, 0)),    # b_out
        ],
        out_specs=pl.BlockSpec((TM, C), lambda i: (i, 0)),
        out_shape=jax.ShapeDtypeStruct((M, C), f32),
        compiler_params=pltpu.CompilerParams(
            dimension_semantics=("parallel",), vmem_limit_bytes=_VMEM_LIMIT),
        cost_estimate=cost3,
    )(tri_flat, gate2,
      params['ln_c_w'].reshape(H, 1).astype(f32),
      params['ln_c_b'].reshape(H, 1).astype(f32),
      params['w_out'].astype(bf16),
      params['b_out'].reshape(1, C).astype(f32))

    return out2.reshape(N, N, C)


# ---------------------------------------------------------------------------
# Pure-JAX reference (mirrors the PyTorch forward) for validation
# ---------------------------------------------------------------------------
def reference(pair_act, pair_mask, params, equation='ikc,jkc->ijc'):
    mask = pair_mask[..., None]
    x = pair_act
    mu = x.mean(-1, keepdims=True)
    var = ((x - mu) ** 2).mean(-1, keepdims=True)
    xn = (x - mu) / jnp.sqrt(var + _EPS) * params['ln_in_w'] + params['ln_in_b']
    left = (xn @ params['w_left'] + params['b_left']) * mask
    right = (xn @ params['w_right'] + params['b_right']) * mask
    left = left * jax.nn.sigmoid(xn @ params['w_lgate'] + params['b_lgate'])
    right = right * jax.nn.sigmoid(xn @ params['w_rgate'] + params['b_rgate'])
    act = jnp.einsum(equation, left, right)
    mu = act.mean(-1, keepdims=True)
    var = ((act - mu) ** 2).mean(-1, keepdims=True)
    an = (act - mu) / jnp.sqrt(var + _EPS) * params['ln_c_w'] + params['ln_c_b']
    out = an @ params['w_out'] + params['b_out']
    gate = jax.nn.sigmoid(xn @ params['w_gate'] + params['b_gate'])
    return out * gate


def make_params(key, pair_dim, hidden):
    # Deterministic synthetic parameters (not AF2 init; synthetic kernel test).
    ks = jax.random.split(key, 16)
    def w(k, shape, scale=0.2):
        return scale * jax.random.normal(k, shape, jnp.float32)
    return {
        'ln_in_w': 1.0 + w(ks[0], (pair_dim,), 0.05),
        'ln_in_b': w(ks[1], (pair_dim,), 0.05),
        'w_left': w(ks[2], (pair_dim, hidden)),  'b_left': w(ks[3], (hidden,), 0.05),
        'w_right': w(ks[4], (pair_dim, hidden)), 'b_right': w(ks[5], (hidden,), 0.05),
        'w_lgate': w(ks[6], (pair_dim, hidden)), 'b_lgate': w(ks[7], (hidden,), 0.05),
        'w_rgate': w(ks[8], (pair_dim, hidden)), 'b_rgate': w(ks[9], (hidden,), 0.05),
        'ln_c_w': 1.0 + w(ks[10], (hidden,), 0.05),
        'ln_c_b': w(ks[11], (hidden,), 0.05),
        'w_out': w(ks[12], (hidden, pair_dim)), 'b_out': w(ks[13], (pair_dim,), 0.05),
        'w_gate': w(ks[14], (pair_dim, pair_dim)), 'b_gate': w(ks[15], (pair_dim,), 0.05),
    }


if __name__ == "__main__":
    # Small but tiling-realistic shapes (AF2 uses pair_dim = num_intermediate = 128):
    # exercises the row-tiled grids (M=4096, TM=512 -> 8 steps) and the 2-D
    # channel/row-blocked triangle grid.
    N, C, H = 64, 128, 128
    key = jax.random.PRNGKey(0)
    k_act, k_mask, k_par = jax.random.split(key, 3)

    pair_act = jax.random.normal(k_act, (N, N, C), jnp.float32)
    pair_mask = (jax.random.uniform(k_mask, (N, N)) > 0.1).astype(jnp.float32)
    params = make_params(k_par, C, H)

    equation = 'ikc,jkc->ijc'   # "outgoing" triangle multiplication
    fn = jax.jit(functools.partial(triangle_multiplication, equation=equation))
    out = jax.block_until_ready(fn(pair_act, pair_mask, params))

    ref = reference(pair_act, pair_mask, params, equation)
    out_np, ref_np = np.asarray(out), np.asarray(ref)

    # bf16 operands end-to-end (projections, triangle, gates, output projection,
    # f32 accumulation everywhere) vs the f32 reference: elementwise tolerance is
    # loosened accordingly, and a relative-Frobenius check guards overall
    # correctness (a transpose/equation bug would give O(1) relative error).
    np.testing.assert_allclose(out_np, ref_np, rtol=1e-1, atol=2e-1)
    rel = np.linalg.norm(out_np - ref_np) / np.linalg.norm(ref_np)
    assert rel < 2e-2, f"relative L2 error too high: {rel}"

    print("KERNEL_OK")
</pallas_src>

<mosaic_0001>
module attributes {stable_mosaic.version = 11 : i64} {
  func.func @kernel(%arg0: i32, %arg1: memref<512x128xf32, #tpu.memory_space<vmem>>, %arg2: memref<1x512xf32, #tpu.memory_space<vmem>>, %arg3: memref<1x128xf32, #tpu.memory_space<vmem>>, %arg4: memref<1x128xf32, #tpu.memory_space<vmem>>, %arg5: memref<512x128xbf16, #tpu.memory_space<vmem>>, %arg6: memref<512x1xf32, #tpu.memory_space<vmem>>, %arg7: memref<128x128xbf16, #tpu.memory_space<vmem>>, %arg8: memref<1x128xf32, #tpu.memory_space<vmem>>, %arg9: memref<128x512xbf16, #tpu.memory_space<vmem>>, %arg10: memref<128x512xbf16, #tpu.memory_space<vmem>>, %arg11: memref<512x128xbf16, #tpu.memory_space<vmem>>) attributes {dimension_semantics = [#tpu.dimension_semantics<parallel>], iteration_bounds = array<i64: 8>, scalar_prefetch = 0 : i64, scratch_operands = 0 : i64, tpu.core_type = #tpu.core_type<tc>, window_params = [{transform_indices = @transform_0, window_bounds = array<i64: 512, 128>}, {transform_indices = @transform_1, window_bounds = array<i64: 1, 512>}, {pipeline_mode = #tpu.pipeline_mode<synchronous>, transform_indices = @transform_2, window_bounds = array<i64: 1, 128>}, {pipeline_mode = #tpu.pipeline_mode<synchronous>, transform_indices = @transform_3, window_bounds = array<i64: 1, 128>}, {pipeline_mode = #tpu.pipeline_mode<synchronous>, transform_indices = @transform_4, window_bounds = array<i64: 512, 128>}, {pipeline_mode = #tpu.pipeline_mode<synchronous>, transform_indices = @transform_5, window_bounds = array<i64: 512, 1>}, {pipeline_mode = #tpu.pipeline_mode<synchronous>, transform_indices = @transform_6, window_bounds = array<i64: 128, 128>}, {pipeline_mode = #tpu.pipeline_mode<synchronous>, transform_indices = @transform_7, window_bounds = array<i64: 1, 128>}, {transform_indices = @transform_8, window_bounds = array<i64: 128, 512>}, {transform_indices = @transform_9, window_bounds = array<i64: 128, 512>}, {transform_indices = @transform_10, window_bounds = array<i64: 512, 128>}]} {
    %c0 = arith.constant 0 : index
    %c0_0 = arith.constant 0 : index
    %0 = vector.load %arg1[%c0, %c0_0] : memref<512x128xf32, #tpu.memory_space<vmem>>, vector<512x128xf32>
    %cst = arith.constant dense<0.000000e+00> : vector<512xf32>
    %1 = vector.multi_reduction <add>, %0, %cst [1] : vector<512x128xf32> to vector<512xf32>
    %2 = vector.shape_cast %1 : vector<512xf32> to vector<512x1xf32>
    %cst_1 = arith.constant 1.280000e+02 : f32
    %3 = vector.broadcast %cst_1 : f32 to vector<512x1xf32>
    %4 = arith.divf %2, %3 : vector<512x1xf32>
    %5 = vector.broadcast %4 : vector<512x1xf32> to vector<512x128xf32>
    %6 = arith.subf %0, %5 : vector<512x128xf32>
    %7 = arith.mulf %6, %6 : vector<512x128xf32>
    %cst_2 = arith.constant dense<0.000000e+00> : vector<512xf32>
    %8 = vector.multi_reduction <add>, %7, %cst_2 [1] : vector<512x128xf32> to vector<512xf32>
    %9 = vector.shape_cast %8 : vector<512xf32> to vector<512x1xf32>
    %cst_3 = arith.constant 1.280000e+02 : f32
    %10 = vector.broadcast %cst_3 : f32 to vector<512x1xf32>
    %11 = arith.divf %9, %10 : vector<512x1xf32>
    %12 = vector.broadcast %4 : vector<512x1xf32> to vector<512x128xf32>
    %13 = arith.subf %0, %12 : vector<512x128xf32>
    %cst_4 = arith.constant 9.99999974E-6 : f32
    %14 = vector.broadcast %cst_4 : f32 to vector<512x1xf32>
    %15 = arith.addf %11, %14 : vector<512x1xf32>
    %16 = math.rsqrt %15 : vector<512x1xf32>
    %17 = vector.broadcast %16 : vector<512x1xf32> to vector<512x128xf32>
    %18 = arith.mulf %13, %17 : vector<512x128xf32>
    %c0_5 = arith.constant 0 : index
    %c0_6 = arith.constant 0 : index
    %19 = vector.load %arg3[%c0_5, %c0_6] : memref<1x128xf32, #tpu.memory_space<vmem>>, vector<1x128xf32>
    %20 = vector.broadcast %19 : vector<1x128xf32> to vector<512x128xf32>
    %21 = arith.mulf %18, %20 : vector<512x128xf32>
    %c0_7 = arith.constant 0 : index
    %c0_8 = arith.constant 0 : index
    %22 = vector.load %arg4[%c0_7, %c0_8] : memref<1x128xf32, #tpu.memory_space<vmem>>, vector<1x128xf32>
    %23 = vector.broadcast %22 : vector<1x128xf32> to vector<512x128xf32>
    %24 = arith.addf %21, %23 : vector<512x128xf32>
    %25 = arith.truncf %24 : vector<512x128xf32> to vector<512x128xbf16>
    %c0_9 = arith.constant 0 : index
    %c0_10 = arith.constant 0 : index
    %26 = vector.load %arg5[%c0_9, %c0_10] : memref<512x128xbf16, #tpu.memory_space<vmem>>, vector<512x128xbf16>
    %cst_11 = arith.constant dense<0.000000e+00> : vector<512x512xf32>
    %27 = tpu.matmul %26, %25, %cst_11 {dimension_numbers = #tpu.dot_dimension_numbers<[1], [1], [0], [0], [0, 0, 1, 0], [], []>} : vector<512x128xbf16>, vector<512x128xbf16>, vector<512x512xf32> -> vector<512x512xf32>
    %c0_12 = arith.constant 0 : index
    %c0_13 = arith.constant 0 : index
    %28 = vector.load %arg6[%c0_12, %c0_13] : memref<512x1xf32, #tpu.memory_space<vmem>>, vector<512x1xf32>
    %29 = vector.broadcast %28 : vector<512x1xf32> to vector<512x512xf32>
    %30 = arith.addf %27, %29 : vector<512x512xf32>
    %c0_14 = arith.constant 0 : index
    %c0_15 = arith.constant 0 : index
    %31 = vector.load %arg2[%c0_14, %c0_15] : memref<1x512xf32, #tpu.memory_space<vmem>>, vector<1x512xf32>
    %32 = vector.extract_strided_slice %30 {offsets = [0, 0], sizes = [128, 512], strides = [1, 1]} : vector<512x512xf32> to vector<128x512xf32>
    %33 = vector.broadcast %31 : vector<1x512xf32> to vector<128x512xf32>
    %34 = arith.mulf %32, %33 : vector<128x512xf32>
    %35 = vector.extract_strided_slice %30 {offsets = [256, 0], sizes = [128, 512], strides = [1, 1]} : vector<512x512xf32> to vector<128x512xf32>
    %36 = arith.negf %35 : vector<128x512xf32>
    %37 = math.exp %36 : vector<128x512xf32>
    %cst_16 = arith.constant 1.000000e+00 : f32
    %38 = vector.broadcast %cst_16 : f32 to vector<128x512xf32>
    %39 = arith.addf %38, %37 : vector<128x512xf32>
    %40 = arith.divf %38, %39 : vector<128x512xf32>
    %41 = arith.mulf %34, %40 : vector<128x512xf32>
    %42 = vector.extract_strided_slice %30 {offsets = [128, 0], sizes = [128, 512], strides = [1, 1]} : vector<512x512xf32> to vector<128x512xf32>
    %43 = vector.broadcast %31 : vector<1x512xf32> to vector<128x512xf32>
    %44 = arith.mulf %42, %43 : vector<128x512xf32>
    %45 = vector.extract_strided_slice %30 {offsets = [384, 0], sizes = [128, 512], strides = [1, 1]} : vector<512x512xf32> to vector<128x512xf32>
    %46 = arith.negf %45 : vector<128x512xf32>
    %47 = math.exp %46 : vector<128x512xf32>
    %cst_17 = arith.constant 1.000000e+00 : f32
    %48 = vector.broadcast %cst_17 : f32 to vector<128x512xf32>
    %49 = arith.addf %48, %47 : vector<128x512xf32>
    %50 = arith.divf %48, %49 : vector<128x512xf32>
    %51 = arith.mulf %44, %50 : vector<128x512xf32>
    %52 = arith.truncf %41 : vector<128x512xf32> to vector<128x512xbf16>
    %c0_18 = arith.constant 0 : index
    %c0_19 = arith.constant 0 : index
    %53 = vector.load %arg9[%c0_18, %c0_19] : memref<128x512xbf16, #tpu.memory_space<vmem>>, vector<128x512xbf16>
    tpu.vector_store %arg9[%c0_18, %c0_19], %52 {strides = array<i32>} : memref<128x512xbf16, #tpu.memory_space<vmem>>, vector<128x512xbf16>,
    %54 = arith.truncf %51 : vector<128x512xf32> to vector<128x512xbf16>
    %c0_20 = arith.constant 0 : index
    %c0_21 = arith.constant 0 : index
    %55 = vector.load %arg10[%c0_20, %c0_21] : memref<128x512xbf16, #tpu.memory_space<vmem>>, vector<128x512xbf16>
    tpu.vector_store %arg10[%c0_20, %c0_21], %54 {strides = array<i32>} : memref<128x512xbf16, #tpu.memory_space<vmem>>, vector<128x512xbf16>,
    %c0_22 = arith.constant 0 : index
    %c0_23 = arith.constant 0 : index
    %56 = vector.load %arg7[%c0_22, %c0_23] : memref<128x128xbf16, #tpu.memory_space<vmem>>, vector<128x128xbf16>
    %cst_24 = arith.constant dense<0.000000e+00> : vector<512x128xf32>
    %57 = tpu.matmul %25, %56, %cst_24 {dimension_numbers = #tpu.dot_dimension_numbers<[1], [0], [0], [1], [0, 0, 1, 1], [], []>} : vector<512x128xbf16>, vector<128x128xbf16>, vector<512x128xf32> -> vector<512x128xf32>
    %c0_25 = arith.constant 0 : index
    %c0_26 = arith.constant 0 : index
    %58 = vector.load %arg8[%c0_25, %c0_26] : memref<1x128xf32, #tpu.memory_space<vmem>>, vector<1x128xf32>
    %59 = vector.broadcast %58 : vector<1x128xf32> to vector<512x128xf32>
    %60 = arith.addf %57, %59 : vector<512x128xf32>
    %61 = arith.negf %60 : vector<512x128xf32>
    %62 = math.exp %61 : vector<512x128xf32>
    %cst_27 = arith.constant 1.000000e+00 : f32
    %63 = vector.broadcast %cst_27 : f32 to vector<512x128xf32>
    %64 = arith.addf %63, %62 : vector<512x128xf32>
    %65 = arith.divf %63, %64 : vector<512x128xf32>
    %66 = arith.truncf %65 : vector<512x128xf32> to vector<512x128xbf16>
    %c0_28 = arith.constant 0 : index
    %c0_29 = arith.constant 0 : index
    %67 = vector.load %arg11[%c0_28, %c0_29] : memref<512x128xbf16, #tpu.memory_space<vmem>>, vector<512x128xbf16>
    tpu.vector_store %arg11[%c0_28, %c0_29], %66 {strides = array<i32>} : memref<512x128xbf16, #tpu.memory_space<vmem>>, vector<512x128xbf16>,
    return
  }
  func.func @transform_0(%arg0: i32) -> (i32, i32) {
    %c0_i32 = arith.constant 0 : i32
    %c0_i32_0 = arith.constant 0 : i32
    return %arg0, %c0_i32 : i32, i32
  }
  func.func @transform_1(%arg0: i32) -> (i32, i32) {
    %c0_i32 = arith.constant 0 : i32
    %c0_i32_0 = arith.constant 0 : i32
    return %c0_i32, %arg0 : i32, i32
  }
  func.func @transform_2(%arg0: i32) -> (i32, i32) {
    %c0_i32 = arith.constant 0 : i32
    %c0_i32_0 = arith.constant 0 : i32
    %c0_i32_1 = arith.constant 0 : i32
    return %c0_i32, %c0_i32_0 : i32, i32
  }
  func.func @transform_3(%arg0: i32) -> (i32, i32) {
    %c0_i32 = arith.constant 0 : i32
    %c0_i32_0 = arith.constant 0 : i32
    %c0_i32_1 = arith.constant 0 : i32
    return %c0_i32, %c0_i32_0 : i32, i32
  }
  func.func @transform_4(%arg0: i32) -> (i32, i32) {
    %c0_i32 = arith.constant 0 : i32
    %c0_i32_0 = arith.constant 0 : i32
    %c0_i32_1 = arith.constant 0 : i32
    return %c0_i32, %c0_i32_0 : i32, i32
  }
  func.func @transform_5(%arg0: i32) -> (i32, i32) {
    %c0_i32 = arith.constant 0 : i32
    %c0_i32_0 = arith.constant 0 : i32
    %c0_i32_1 = arith.constant 0 : i32
    return %c0_i32, %c0_i32_0 : i32, i32
  }
  func.func @transform_6(%arg0: i32) -> (i32, i32) {
    %c0_i32 = arith.constant 0 : i32
    %c0_i32_0 = arith.constant 0 : i32
    %c0_i32_1 = arith.constant 0 : i32
    return %c0_i32, %c0_i32_0 : i32, i32
  }
  func.func @transform_7(%arg0: i32) -> (i32, i32) {
    %c0_i32 = arith.constant 0 : i32
    %c0_i32_0 = arith.constant 0 : i32
    %c0_i32_1 = arith.constant 0 : i32
    return %c0_i32, %c0_i32_0 : i32, i32
  }
  func.func @transform_8(%arg0: i32) -> (i32, i32) {
    %c0_i32 = arith.constant 0 : i32
    %c0_i32_0 = arith.constant 0 : i32
    return %c0_i32, %arg0 : i32, i32
  }
  func.func @transform_9(%arg0: i32) -> (i32, i32) {
    %c0_i32 = arith.constant 0 : i32
    %c0_i32_0 = arith.constant 0 : i32
    return %c0_i32, %arg0 : i32, i32
  }
  func.func @transform_10(%arg0: i32) -> (i32, i32) {
    %c0_i32 = arith.constant 0 : i32
    %c0_i32_0 = arith.constant 0 : i32
    return %arg0, %c0_i32 : i32, i32
  }
}

module attributes {stable_mosaic.version = 11 : i64} {
  func.func @kernel(%arg0: i32, %arg1: i32, %arg2: memref<32x64x64xbf16, #tpu.memory_space<vmem>>, %arg3: memref<32x64x64xbf16, #tpu.memory_space<vmem>>, %arg4: memref<32x64x64xbf16, #tpu.memory_space<vmem>>) attributes {dimension_semantics = [#tpu.dimension_semantics<parallel>, #tpu.dimension_semantics<parallel>], iteration_bounds = array<i64: 4, 1>, scalar_prefetch = 0 : i64, scratch_operands = 0 : i64, tpu.core_type = #tpu.core_type<tc>, window_params = [{transform_indices = @transform_0, window_bounds = array<i64: 32, 64, 64>}, {transform_indices = @transform_1, window_bounds = array<i64: 32, 64, 64>}, {transform_indices = @transform_2, window_bounds = array<i64: 32, 64, 64>}]} {
    %c0 = arith.constant 0 : index
    %c0_0 = arith.constant 0 : index
    %c0_1 = arith.constant 0 : index
    %0 = vector.load %arg2[%c0, %c0_0, %c0_1] : memref<32x64x64xbf16, #tpu.memory_space<vmem>>, vector<32x64x64xbf16>
    %c0_2 = arith.constant 0 : index
    %c0_3 = arith.constant 0 : index
    %c0_4 = arith.constant 0 : index
    %1 = vector.load %arg3[%c0_2, %c0_3, %c0_4] : memref<32x64x64xbf16, #tpu.memory_space<vmem>>, vector<32x64x64xbf16>
    %cst = arith.constant dense<0.000000e+00> : vector<32x64x64xf32>
    %2 = tpu.matmul %0, %1, %cst {dimension_numbers = #tpu.dot_dimension_numbers<[2], [2], [1], [1], [0, 0, 0, 1, 1, 1], [0], [0]>} : vector<32x64x64xbf16>, vector<32x64x64xbf16>, vector<32x64x64xf32> -> vector<32x64x64xf32>
    %3 = arith.truncf %2 : vector<32x64x64xf32> to vector<32x64x64xbf16>
    %c0_5 = arith.constant 0 : index
    %c0_6 = arith.constant 0 : index
    %c0_7 = arith.constant 0 : index
    %4 = vector.load %arg4[%c0_5, %c0_6, %c0_7] : memref<32x64x64xbf16, #tpu.memory_space<vmem>>, vector<32x64x64xbf16>
    tpu.vector_store %arg4[%c0_5, %c0_6, %c0_7], %3 {strides = array<i32>} : memref<32x64x64xbf16, #tpu.memory_space<vmem>>, vector<32x64x64xbf16>,
    return
  }
  func.func @transform_0(%arg0: i32, %arg1: i32) -> (i32, i32, i32) {
    %c0_i32 = arith.constant 0 : i32
    %c0_i32_0 = arith.constant 0 : i32
    return %arg0, %arg1, %c0_i32 : i32, i32, i32
  }
  func.func @transform_1(%arg0: i32, %arg1: i32) -> (i32, i32, i32) {
    %c0_i32 = arith.constant 0 : i32
    %c0_i32_0 = arith.constant 0 : i32
    %c0_i32_1 = arith.constant 0 : i32
    return %arg0, %c0_i32, %c0_i32_0 : i32, i32, i32
  }
  func.func @transform_2(%arg0: i32, %arg1: i32) -> (i32, i32, i32) {
    %c0_i32 = arith.constant 0 : i32
    %c0_i32_0 = arith.constant 0 : i32
    return %arg0, %arg1, %c0_i32 : i32, i32, i32
  }
}

module attributes {stable_mosaic.version = 11 : i64} {
  func.func @_output_kernel(%arg0: i32, %arg1: memref<128x512xbf16, #tpu.memory_space<vmem>>, %arg2: memref<512x128xbf16, #tpu.memory_space<vmem>>, %arg3: memref<128x1xf32, #tpu.memory_space<vmem>>, %arg4: memref<128x1xf32, #tpu.memory_space<vmem>>, %arg5: memref<128x128xbf16, #tpu.memory_space<vmem>>, %arg6: memref<1x128xf32, #tpu.memory_space<vmem>>, %arg7: memref<512x128xf32, #tpu.memory_space<vmem>>) attributes {dimension_semantics = [#tpu.dimension_semantics<parallel>], iteration_bounds = array<i64: 8>, scalar_prefetch = 0 : i64, scratch_operands = 0 : i64, tpu.core_type = #tpu.core_type<tc>, window_params = [{transform_indices = @transform_0, window_bounds = array<i64: 128, 512>}, {transform_indices = @transform_1, window_bounds = array<i64: 512, 128>}, {pipeline_mode = #tpu.pipeline_mode<synchronous>, transform_indices = @transform_2, window_bounds = array<i64: 128, 1>}, {pipeline_mode = #tpu.pipeline_mode<synchronous>, transform_indices = @transform_3, window_bounds = array<i64: 128, 1>}, {pipeline_mode = #tpu.pipeline_mode<synchronous>, transform_indices = @transform_4, window_bounds = array<i64: 128, 128>}, {pipeline_mode = #tpu.pipeline_mode<synchronous>, transform_indices = @transform_5, window_bounds = array<i64: 1, 128>}, {transform_indices = @transform_6, window_bounds = array<i64: 512, 128>}]} {
    %c0 = arith.constant 0 : index
    %c0_0 = arith.constant 0 : index
    %0 = vector.load %arg1[%c0, %c0_0] : memref<128x512xbf16, #tpu.memory_space<vmem>>, vector<128x512xbf16>
    %1 = arith.extf %0 : vector<128x512xbf16> to vector<128x512xf32>
    %cst = arith.constant dense<0.000000e+00> : vector<512xf32>
    %2 = vector.multi_reduction <add>, %1, %cst [0] : vector<128x512xf32> to vector<512xf32>
    %3 = vector.shape_cast %2 : vector<512xf32> to vector<1x512xf32>
    %cst_1 = arith.constant 1.280000e+02 : f32
    %4 = vector.broadcast %cst_1 : f32 to vector<1x512xf32>
    %5 = arith.divf %3, %4 : vector<1x512xf32>
    %6 = vector.broadcast %5 : vector<1x512xf32> to vector<128x512xf32>
    %7 = arith.subf %1, %6 : vector<128x512xf32>
    %8 = arith.mulf %7, %7 : vector<128x512xf32>
    %cst_2 = arith.constant dense<0.000000e+00> : vector<512xf32>
    %9 = vector.multi_reduction <add>, %8, %cst_2 [0] : vector<128x512xf32> to vector<512xf32>
    %10 = vector.shape_cast %9 : vector<512xf32> to vector<1x512xf32>
    %cst_3 = arith.constant 1.280000e+02 : f32
    %11 = vector.broadcast %cst_3 : f32 to vector<1x512xf32>
    %12 = arith.divf %10, %11 : vector<1x512xf32>
    %13 = vector.broadcast %5 : vector<1x512xf32> to vector<128x512xf32>
    %14 = arith.subf %1, %13 : vector<128x512xf32>
    %cst_4 = arith.constant 9.99999974E-6 : f32
    %15 = vector.broadcast %cst_4 : f32 to vector<1x512xf32>
    %16 = arith.addf %12, %15 : vector<1x512xf32>
    %17 = math.rsqrt %16 : vector<1x512xf32>
    %18 = vector.broadcast %17 : vector<1x512xf32> to vector<128x512xf32>
    %19 = arith.mulf %14, %18 : vector<128x512xf32>
    %c0_5 = arith.constant 0 : index
    %c0_6 = arith.constant 0 : index
    %20 = vector.load %arg3[%c0_5, %c0_6] : memref<128x1xf32, #tpu.memory_space<vmem>>, vector<128x1xf32>
    %21 = vector.broadcast %20 : vector<128x1xf32> to vector<128x512xf32>
    %22 = arith.mulf %19, %21 : vector<128x512xf32>
    %c0_7 = arith.constant 0 : index
    %c0_8 = arith.constant 0 : index
    %23 = vector.load %arg4[%c0_7, %c0_8] : memref<128x1xf32, #tpu.memory_space<vmem>>, vector<128x1xf32>
    %24 = vector.broadcast %23 : vector<128x1xf32> to vector<128x512xf32>
    %25 = arith.addf %22, %24 : vector<128x512xf32>
    %26 = arith.truncf %25 : vector<128x512xf32> to vector<128x512xbf16>
    %c0_9 = arith.constant 0 : index
    %c0_10 = arith.constant 0 : index
    %27 = vector.load %arg5[%c0_9, %c0_10] : memref<128x128xbf16, #tpu.memory_space<vmem>>, vector<128x128xbf16>
    %cst_11 = arith.constant dense<0.000000e+00> : vector<512x128xf32>
    %28 = tpu.matmul %26, %27, %cst_11 {dimension_numbers = #tpu.dot_dimension_numbers<[0], [0], [1], [1], [0, 1, 1, 1], [], []>} : vector<128x512xbf16>, vector<128x128xbf16>, vector<512x128xf32> -> vector<512x128xf32>
    %c0_12 = arith.constant 0 : index
    %c0_13 = arith.constant 0 : index
    %29 = vector.load %arg6[%c0_12, %c0_13] : memref<1x128xf32, #tpu.memory_space<vmem>>, vector<1x128xf32>
    %30 = vector.broadcast %29 : vector<1x128xf32> to vector<512x128xf32>
    %31 = arith.addf %28, %30 : vector<512x128xf32>
    %c0_14 = arith.constant 0 : index
    %c0_15 = arith.constant 0 : index
    %32 = vector.load %arg2[%c0_14, %c0_15] : memref<512x128xbf16, #tpu.memory_space<vmem>>, vector<512x128xbf16>
    %33 = arith.extf %32 : vector<512x128xbf16> to vector<512x128xf32>
    %34 = arith.mulf %31, %33 : vector<512x128xf32>
    %c0_16 = arith.constant 0 : index
    %c0_17 = arith.constant 0 : index
    %35 = vector.load %arg7[%c0_16, %c0_17] : memref<512x128xf32, #tpu.memory_space<vmem>>, vector<512x128xf32>
    tpu.vector_store %arg7[%c0_16, %c0_17], %34 {strides = array<i32>} : memref<512x128xf32, #tpu.memory_space<vmem>>, vector<512x128xf32>,
    return
  }
  func.func @transform_0(%arg0: i32) -> (i32, i32) {
    %c0_i32 = arith.constant 0 : i32
    %c0_i32_0 = arith.constant 0 : i32
    return %c0_i32, %arg0 : i32, i32
  }
  func.func @transform_1(%arg0: i32) -> (i32, i32) {
    %c0_i32 = arith.constant 0 : i32
    %c0_i32_0 = arith.constant 0 : i32
    return %arg0, %c0_i32 : i32, i32
  }
  func.func @transform_2(%arg0: i32) -> (i32, i32) {
    %c0_i32 = arith.constant 0 : i32
    %c0_i32_0 = arith.constant 0 : i32
    %c0_i32_1 = arith.constant 0 : i32
    return %c0_i32, %c0_i32_0 : i32, i32
  }
  func.func @transform_3(%arg0: i32) -> (i32, i32) {
    %c0_i32 = arith.constant 0 : i32
    %c0_i32_0 = arith.constant 0 : i32
    %c0_i32_1 = arith.constant 0 : i32
    return %c0_i32, %c0_i32_0 : i32, i32
  }
  func.func @transform_4(%arg0: i32) -> (i32, i32) {
    %c0_i32 = arith.constant 0 : i32
    %c0_i32_0 = arith.constant 0 : i32
    %c0_i32_1 = arith.constant 0 : i32
    return %c0_i32, %c0_i32_0 : i32, i32
  }
  func.func @transform_5(%arg0: i32) -> (i32, i32) {
    %c0_i32 = arith.constant 0 : i32
    %c0_i32_0 = arith.constant 0 : i32
    %c0_i32_1 = arith.constant 0 : i32
    return %c0_i32, %c0_i32_0 : i32, i32
  }
  func.func @transform_6(%arg0: i32) -> (i32, i32) {
    %c0_i32 = arith.constant 0 : i32
    %c0_i32_0 = arith.constant 0 : i32
    return %arg0, %c0_i32 : i32, i32
  }
}

</mosaic_0001>

<bundles_post_ra>
// kernel: triangle_multiplication.3
= control target key start
LH: loop header
LB: loop body
LE: loop exit
PB: predicated region body
PF: predicated region fallthrough
CT: control target
= control target key end

     0   :  { %16 = vsyncpa [#allocation3], 0  ;;  %s11046_s0 = inlined_call_operand.hbm [shape: f32[4096,128], index: 0, kind: input, shape index: {}]   ;;  %s11047_s1 = inlined_call_operand.vmem [shape: f32[1,4096], index: 1, kind: input, shape index: {}]   ;;  %s11048_s2 = inlined_call_operand.hbm [shape: f32[1,128], index: 2, kind: input, shape index: {}]   ;;  %s11049_s3 = inlined_call_operand.hbm [shape: f32[1,128], index: 3, kind: input, shape index: {}]   ;;  %s11050_s4 = inlined_call_operand.vmem [shape: bf16[512,128], index: 4, kind: input, shape index: {}]   ;;  %s11051_s5 = inlined_call_operand.vmem [shape: f32[512,1], index: 5, kind: input, shape index: {}]   ;;  %s11052_s6 = inlined_call_operand.vmem [shape: bf16[128,128], index: 6, kind: input, shape index: {}]   ;;  %s11053_s7 = inlined_call_operand.hbm [shape: f32[1,128], index: 7, kind: input, shape index: {}]   ;;  %s11054_s8 = inlined_call_operand.vmem [shape: bf16[128,4096], index: 8, kind: output, shape index: {0}]   ;;  %s11055_s9 = inlined_call_operand.vmem [shape: bf16[128,4096], index: 9, kind: output, shape index: {1}]   ;;  %s11056_s10 = inlined_call_operand.vmem [shape: bf16[4096,128], index: 10, kind: output, shape index: {2}]  }
   0x1   :  { %18 = vsyncpa [#allocation3 + $0x1], 0 }
   0x2   :  { %19 = vsyncpa [#allocation5], 0 }
   0x3   :  { %20 = vsyncpa [#allocation8], 0  ;;  %s7894_s13 = smov 0   ;;  %s7896_s14 = smov 0  }
   0x4   :  { %s7898_s15 = smov 0   ;;  %s7900_s16 = smov 0  }
   0x5 LB: > { %s7913_s17 = sadd.s32 4294967295, %s7830_s16   ;;  %p46_p0 = scmp.ne.s32.totalorder %s7822_s14, %s7818_s13  ;;  %s7830_s16 = sphi %s7900_s16, %s11617_s16   ;;  %s7826_s15 = sphi %s7898_s15, %s11616_s15   ;;  %s7822_s14 = sphi %s7896_s14, %s11615_s14   ;;  %s7818_s13 = sphi %s7894_s13, %s11614_s13  }
   0x6   : > { %p11057_p1 = scmp.eq.s32.totalorder %s7913_s17, 0  ;;  %p5643_p3 = scmp.ge.s32.totalorder %s7830_s16, 1 }
   0x7   : > { %p287_p4 = scmp.lt.s32.totalorder %s7830_s16, 9  ;;  %s7832_s20 = smov [#allocation4]  }
   0x8   : > { %p7922_p5 = por %p11057_p1, %p46_p0  ;;  %s300_s21 = sshll.u32 %s7832_s20, 4  ;;  %s301_s21 = int_to_ptr.vmem [resolvable:$true] %s300_s21 }
   0x9   : > { %p7926_p6 = pnand %p5643_p3, %p287_p4  ;;  %s7833_s23 = smov [#allocation6]  }
   0xa   : > { %s11208_s18 = scalar_select %p7922_p5, 1, 0 }
   0xb   : > { %s11209_s19 = scalar_select %p7926_p6, 1, 0 }
   0xc   : > { %p6664_p7 = pneg %p7926_p6  ;;  %s311_s24 = sshll.u32 %s7833_s23, 4  ;;  %s7938_s24 = int_to_ptr.vmem [resolvable:$true] %s311_s24 }
   0xd   : > { %s7834_s25 = smov [#allocation7]   ;;  %s7674_s29 = scalar_lea.hbm %s11048_s2, 16 }
   0xe   : > { %p7934_p8 = pnand %p6664_p7, %p11057_p1  ;;  %s331_s26 = sshll.u32 %s7834_s25, 4  ;;  %s7940_s26 = int_to_ptr.vmem [resolvable:$true] %s331_s26 }
   0xf   : > { %p7675_p9 = scmp.ne.s32.totalorder %s11048_s2, %s7674_s29  ;;  %p7681_p13 = scmp.lt.u32.totalorder %s7674_s29, %s11048_s2 }
  0x10   : > { %p7950_p10 = pneg %p7934_p8 }
  0x12   : > { %p7677_p11 = pnand %p7950_p10, %p7675_p9 }
  0x14   : > { %p7678_p12 = pneg %p7677_p11 }
  0x16   : > { %p7683_p0 = pnand %p7681_p13, %p7678_p12 }
  0x18   : > { %7686 = shalt.err (!%p7683_p0)
}
  0x19   : > { %s7687_s23 = scalar_lea.vmem %s301_s21, 16  ;;  %s7694_s25 = scalar_lea.vmem %s301_s21, 32 }
  0x1a   : > { %p7688_p3 = scmp.ne.s32.totalorder %s301_s21, %s7687_s23  ;;  %p7695_p1 = scmp.lt.s32.totalorder %s301_s21, %s301_s21 }
  0x1b   : > { %p7696_p2 = scmp.lt.s32.totalorder %s7694_s25, %s7687_s23 }
  0x1c   : > { %p7690_p4 = pnand %p7688_p3, %p7950_p10 }
  0x1d   : > { %p7697_p5 = por %p7696_p2, %p7695_p1 }
  0x1e   : > { %p7691_p7 = pneg %p7690_p4 }
  0x20   : > { %p7698_p6 = pnand %p7697_p5, %p7691_p7 }
  0x22   : > { %7701 = shalt.err (!%p7698_p6)
}
  0x23   : > { %6667 = dma.hbm_to_vmem [thread:$0]  (!%p7934_p8), %s11048_s2, 16, %s301_s21, [#allocation5]  }
  0x24   : > { %s7702_s11 = scalar_lea.hbm %s11049_s3, 16 }
  0x25   : > { %p7703_p9 = scmp.ne.s32.totalorder %s11049_s3, %s7702_s11  ;;  %p7709_p2 = scmp.lt.u32.totalorder %s7702_s11, %s11049_s3 }
  0x27   : > { %p7705_p11 = pnand %p7703_p9, %p7950_p10 }
  0x29   : > { %p7706_p1 = pneg %p7705_p11 }
  0x2b   : > { %p7711_p5 = pnand %p7709_p2, %p7706_p1 }
  0x2d   : > { %7714 = shalt.err (!%p7711_p5)
}
  0x2e   : > { %s7715_s21 = scalar_lea.vmem %s7938_s24, 16  ;;  %s7722_s27 = scalar_lea.vmem %s7938_s24, 32 }
  0x2f   : > { %p7716_p6 = scmp.ne.s32.totalorder %s7938_s24, %s7715_s21  ;;  %p7723_p0 = scmp.lt.s32.totalorder %s7938_s24, %s7938_s24 }
  0x30   : > { %p7724_p3 = scmp.lt.s32.totalorder %s7722_s27, %s7715_s21 }
  0x31   : > { %p7718_p12 = pnand %p7716_p6, %p7950_p10 }
  0x32   : > { %p7725_p4 = por %p7724_p3, %p7723_p0 }
  0x33   : > { %p7719_p13 = pneg %p7718_p12 }
  0x35   : > { %p7726_p7 = pnand %p7725_p4, %p7719_p13 }
  0x37   : > { %7729 = shalt.err (!%p7726_p7)
}
  0x38   : > { %6670 = dma.hbm_to_vmem [thread:$0]  (!%p7934_p8), %s11049_s3, 16, %s7938_s24, [#allocation5]  }
  0x39   : > { %s7730_s13 = scalar_lea.hbm %s11053_s7, 16 }
  0x3a   : > { %p7731_p9 = scmp.ne.s32.totalorder %s11053_s7, %s7730_s13  ;;  %p7737_p2 = scmp.lt.u32.totalorder %s7730_s13, %s11053_s7 }
  0x3c   : > { %p7733_p11 = pnand %p7731_p9, %p7950_p10 }
  0x3e   : > { %p7734_p1 = pneg %p7733_p11 }
  0x40   : > { %p7739_p5 = pnand %p7737_p2, %p7734_p1 }
  0x42   : > { %7742 = shalt.err (!%p7739_p5)
}
  0x43   : > { %s7743_s24 = scalar_lea.vmem %s7940_s26, 16  ;;  %s7750_s27 = scalar_lea.vmem %s7940_s26, 32 }
  0x44   : > { %p7744_p6 = scmp.ne.s32.totalorder %s7940_s26, %s7743_s24  ;;  %p7751_p0 = scmp.lt.s32.totalorder %s7940_s26, %s7940_s26 }
  0x45   : > { %p7752_p3 = scmp.lt.s32.totalorder %s7750_s27, %s7743_s24 }
  0x46   : > { %p7746_p12 = pnand %p7744_p6, %p7950_p10 }
  0x47   : > { %p7753_p4 = por %p7752_p3, %p7751_p0 }
  0x48   : > { %p7747_p13 = pneg %p7746_p12 }
  0x4a   : > { %p7754_p7 = pnand %p7753_p4, %p7747_p13 }
  0x4c   : > { %7757 = shalt.err (!%p7754_p7)
}
  0x4d   : > { %6673 = dma.hbm_to_vmem [thread:$0]  (!%p7934_p8), %s11053_s7, 16, %s7940_s26, [#allocation8]  }
  0x4e   : > { %s8015_s12 = sadd.s32 1, %s7830_s16   ;;  %s33_s30 = sadd.s32 1, %s7826_s15 }
  0x4f   : > { %s30_s22 = ssub.s32 %s7830_s16, %s8015_s12  ;;  %p40_p9 = scmp.ne.s32.totalorder %s7826_s15, %s7822_s14 }
  0x50   : > { %p31_p10 = scmp.eq.s32.totalorder %s30_s22, 0  ;;  %p41_p11 = scmp.eq.s32.totalorder %s7830_s16, 0 }
  0x51   : > { %p11212_p2 = scmp.eq.s32.totalorder %s7913_s17, 7  ;;  %p6681_p6 = scmp.lt.s32.totalorder %s7830_s16, 8 }
  0x52   : > { %s8024_s11 = scalar_select %p31_p10, %s7826_s15, %s33_s30  }
  0x53   : > { %p42_p1 = por %p41_p11, %p40_p9  ;;  %p8028_p5 = por %p11212_p2, %p40_p9 }
  0x54   : > { %s342_s20 = sand.u32 1, %s7826_s15   ;;  %s6032_s26 = sshll.u32 %s7830_s16, 13 }
  0x55   : > { %s5648_s23 = sshll.u32 %s342_s20, 9  ;;  %s8038_s24 = scalar_lea.hbm %s11046_s0, %s6032_s26 }
  0x56   : > { %s346_s27 = scalar_lea.vmem [#allocation2], %s5648_s23  ;;  %p8042_p8 = pnand %p6681_p6, %p42_p1 }
  0x57   : > { %s353_s28 = sshll.u32 %s346_s27, 4  ;;  %s8046_s16 = scalar_lea.sflag [#allocation3], %s342_s20  ;;  %s8040_s28 = int_to_ptr.vmem [resolvable:$true] %s353_s28 }
  0x58   : > { %s7758_s22 = scalar_lea.hbm %s8038_s24, 8192  ;;  %p7760_p13 = pneg %p8042_p8 }
  0x59   : > { %p7759_p12 = scmp.ne.s32.totalorder %s8038_s24, %s7758_s22  ;;  %s7763_s26 = scalar_lea.hbm %s11046_s0, 65536 }
  0x5a   : > { %p7764_p4 = scmp.lt.u32.totalorder %s8038_s24, %s11046_s0  ;;  %p7765_p7 = scmp.lt.u32.totalorder %s7763_s26, %s7758_s22 }
  0x5b   : > { %p7761_p0 = pnand %p7760_p13, %p7759_p12  ;;  %p7767_p9 = scmp.lt.u32.totalorder %s7758_s22, %s8038_s24 }
  0x5c   : > { %p7766_p10 = por %p7765_p7, %p7764_p4 }
  0x5d   : > { %p7762_p3 = pneg %p7761_p0 }
  0x5e   : > { %p7768_p11 = por %p7767_p9, %p7766_p10 }
  0x60   : > { %p7769_p1 = pnand %p7768_p11, %p7762_p3 }
  0x62   : > { %7772 = shalt.err (!%p7769_p1)
}
  0x63   : > { %s7773_s20 = scalar_lea.vmem %s8040_s28, 8192  ;;  %s7835_s27 = smov [#allocation2]  }
  0x64   : > { %p7774_p2 = scmp.ne.s32.totalorder %s8040_s28, %s7773_s20  ;;  %s7778_s30 = sshll.u32 %s7835_s27, 4  ;;  %s7779_s30 = int_to_ptr.vmem [resolvable:$false] %s7778_s30 }
  0x65   : > { %s7780_s23 = scalar_lea.vmem %s7779_s30, 16384  ;;  %p7781_p0 = scmp.lt.s32.totalorder %s8040_s28, %s7779_s30 }
  0x66   : > { %p7776_p6 = pnand %p7774_p2, %p7760_p13  ;;  %p7782_p4 = scmp.lt.s32.totalorder %s7780_s23, %s7773_s20 }
  0x68   : > { %p7777_p12 = pneg %p7776_p6  ;;  %p7783_p7 = por %p7782_p4, %p7781_p0 }
  0x6a   : > { %p7784_p10 = pnand %p7783_p7, %p7777_p12 }
  0x6c   : > { %7787 = shalt.err (!%p7784_p10)
}
  0x6d   : > { %s7836_s22 = smov 128   ;;  %s7837_s26 = smov 8  }
  0x6e   : > { %6677 = dma.hbm_to_vmem [thread:$0]  (!%p8042_p8), %s8038_s24, 8192, %s8040_s28, %s8046_s16, %s7836_s22, %s7836_s22, %s7837_s26  }
  0x6f   : > { %p11215_p13 = scmp.ne.s32.totalorder %s11209_s19, 0 }
  0x71   : > { %373 = sbr.rel (%p11215_p13) target bundleno = 1236 (0x4d4), region = 52 }
  0x78   : > { %s8077_s25 = sand.u32 1, %s7822_s14   ;;  %p11216_p3 = scmp.ne.s32.totalorder %s11208_s18, 0 }
  0x79   : > { %s5652_s21 = sshll.u32 %s8077_s25, 9  ;;  %s376_s20 = scalar_lea.sflag [#allocation3], %s8077_s25 }
  0x7a   : > { %s8081_s27 = scalar_lea.vmem [#allocation2], %s5652_s21 }
  0x7b   : > { %7805 = dma.done.wait (%p11216_p3), %s376_s20, 8192  }
  0x7c   : > { %7807 = vsyncadd (%p11216_p3), %s376_s20, 4294959104  ;;  %p11217_p8 = scmp.eq.s32.totalorder %s7913_s17, 0 }
  0x7e   : > { %7809 = dma.done.wait (%p11217_p8), [#allocation5], 32   ;;  %p11218_p9 = pmov %p11217_p8 }
  0x7f   : > { %p11219_p11 = pmov %p11217_p8 }
  0x80   : > { %7811 = vsyncadd (%p11218_p9), [#allocation5], 4294967264 }
  0x81   : > { %7813 = dma.done.wait (%p11219_p11), [#allocation8], 16   ;;  %p11220_p1 = pmov %p11217_p8 }
  0x82   : > { %v8096_v0 = vld [vmem:[%s8081_s27 + $0x80] sm:$0xff]  ;;  %v8104_v2 = vld [vmem:[%s8081_s27 + $0x88] sm:$0xff]  ;;  %v8112_v4 = vld [vmem:[%s8081_s27 + $0x90] sm:$0xff]  ;;  %s5658_s24 = sshll.u32 %s7913_s17, 2  ;;  %s5656_s23 = sshll.u32 %s8077_s25, 8 }
  0x83   : > { %7815 = vsyncadd (%p11220_p1), [#allocation8], 4294967280  ;;  %v8099_v1 = vld [vmem:[%s8081_s27] sm:$0xff]  ;;  %551 = vadd.xlane.f32.xlu0 %v8096_v0  ;;  %v8107_v3 = vld [vmem:[%s8081_s27 + $0x8] sm:$0xff]  ;;  %p9685_p2 = scmp.lt.s32.totalorder %s5658_s24, 31  ;;  %s9795_s22 = scalar_lea.vmem [#allocation10], %s5656_s23 }
  0x84   : > { %519 = vadd.xlane.f32.xlu1 %v8099_v1  ;;  %v8115_v5 = vld [vmem:[%s8081_s27 + $0x98] sm:$0xff]  ;;  %v8120_v6 = vld [vmem:[%s8081_s27 + $0x10] sm:$0xff]  ;;  %v8128_v8 = vld [vmem:[%s8081_s27 + $0xa0] sm:$0xff]  ;;  %s5659_s25 = sshll.u32 %s7913_s17, 6 }
  0x85   : > { %v8123_v7 = vld [vmem:[%s8081_s27 + $0x18] sm:$0xff]  ;;  %v8131_v9 = vld [vmem:[%s8081_s27 + $0xa8] sm:$0xff]  ;;  %v8136_v10 = vld [vmem:[%s8081_s27 + $0x20] sm:$0xff]  ;;  %s11619_s24 = smov (!%p9685_p2, %s5658_s24), 31  ;;  %p10192_p6 = scmp.lt.s32.totalorder %s5659_s25, 511 }
  0x86   : > { %v8139_v11 = vld [vmem:[%s8081_s27 + $0x28] sm:$0xff]  ;;  %v8142_v12 = vld [vmem:[%s8081_s27 + $0xb0] sm:$0xff]  ;;  %v8145_v13 = vld [vmem:[%s8081_s27 + $0xb8] sm:$0xff]  ;;  %s9728_s30 = scalar_lea.vmem %s11047_s1, %s11619_s24  ;;  %s10021_s24 = scalar_lea.vmem [#allocation9], %s5656_s23 }
  0x87   : > { %553 = vadd.xlane.f32.xlu0 %v8104_v2  ;;  %v8150_v14 = vld [vmem:[%s8081_s27 + $0x30] sm:$0xff]  ;;  %v8153_v15 = vld [vmem:[%s8081_s27 + $0x38] sm:$0xff]  ;;  %v8158_v16 = vld [vmem:[%s8081_s27 + $0xc0] sm:$0xff]  ;;  %s11621_s25 = smov (!%p10192_p6, %s5659_s25), 511 }
  0x88   : > { %521 = vadd.xlane.f32.xlu1 %v8107_v3  ;;  %v8161_v17 = vld [vmem:[%s8081_s27 + $0xc8] sm:$0xff]  ;;  %v8166_v18 = vld [vmem:[%s8081_s27 + $0x40] sm:$0xff]  ;;  %v8174_v20 = vld [vmem:[%s8081_s27 + $0xd0] sm:$0xff]  ;;  %s5660_s28 = sshll.u32 %s11621_s25, 2 }
  0x89   : > { %v8169_v19 = vld [vmem:[%s8081_s27 + $0x48] sm:$0xff]  ;;  %v8177_v21 = vld [vmem:[%s8081_s27 + $0xd8] sm:$0xff]  ;;  %v8182_v22 = vld [vmem:[%s8081_s27 + $0x50] sm:$0xff]  ;;  %s10223_s26 = scalar_lea.vmem %s11056_s10, %s5660_s28 }
  0x8a   : > { %v8185_v23 = vld [vmem:[%s8081_s27 + $0x58] sm:$0xff]  ;;  %v8190_v24 = vld [vmem:[%s8081_s27 + $0xe0] sm:$0xff]  ;;  %v8195_v25 = vld [vmem:[%s8081_s27 + $0xe8] sm:$0xff] }
  0x8b   : > { %555 = vadd.xlane.f32.xlu0 %v8112_v4  ;;  %v8200_v26 = vld [vmem:[%s8081_s27 + $0x60] sm:$0xff]  ;;  %v8203_v27 = vld [vmem:[%s8081_s27 + $0x68] sm:$0xff]  ;;  %v8208_v28 = vld [vmem:[%s8081_s27 + $0xf0] sm:$0xff] }
  0x8c   : > { %557 = vadd.xlane.f32.xlu1 %v8115_v5  ;;  %v8211_v29 = vld [vmem:[%s8081_s27 + $0xf8] sm:$0xff]  ;;  %v8216_v30 = vld [vmem:[%s8081_s27 + $0x70] sm:$0xff]  ;;  %v8224_v32 = vld [vmem:[%s8081_s27 + $0x180] sm:$0xff] }
  0x8d   : > { %v8219_v31 = vld [vmem:[%s8081_s27 + $0x78] sm:$0xff]  ;;  %v8227_v33 = vld [vmem:[%s8081_s27 + $0x188] sm:$0xff]  ;;  %v8232_v34 = vld [vmem:[%s8081_s27 + $0x100] sm:$0xff] }
  0x8e   : > { %v8235_v35 = vld [vmem:[%s8081_s27 + $0x108] sm:$0xff]  ;;  %v8240_v36 = vld [vmem:[%s8081_s27 + $0x190] sm:$0xff]  ;;  %v8243_v37 = vld [vmem:[%s8081_s27 + $0x198] sm:$0xff] }
  0x8f   : > { %523 = vadd.xlane.f32.xlu0 %v8120_v6  ;;  %v8248_v38 = vld [vmem:[%s8081_s27 + $0x110] sm:$0xff]  ;;  %v8251_v39 = vld [vmem:[%s8081_s27 + $0x118] sm:$0xff]  ;;  %v8256_v40 = vld [vmem:[%s8081_s27 + $0x1a0] sm:$0xff] }
  0x90   : > { %525 = vadd.xlane.f32.xlu1 %v8123_v7  ;;  %v8259_v41 = vld [vmem:[%s8081_s27 + $0x1a8] sm:$0xff]  ;;  %v8264_v42 = vld [vmem:[%s8081_s27 + $0x120] sm:$0xff]  ;;  %v8272_v44 = vld [vmem:[%s8081_s27 + $0x1b0] sm:$0xff] }
  0x91   : > { %v8267_v43 = vld [vmem:[%s8081_s27 + $0x128] sm:$0xff]  ;;  %v8275_v45 = vld [vmem:[%s8081_s27 + $0x1b8] sm:$0xff]  ;;  %v8280_v46 = vld [vmem:[%s8081_s27 + $0x130] sm:$0xff] }
  0x92   : > { %v8283_v47 = vld [vmem:[%s8081_s27 + $0x138] sm:$0xff]  ;;  %v8288_v48 = vld [vmem:[%s8081_s27 + $0x1c0] sm:$0xff]  ;;  %v8291_v49 = vld [vmem:[%s8081_s27 + $0x1c8] sm:$0xff] }
  0x93   : > { %559 = vadd.xlane.f32.xlu0 %v8128_v8  ;;  %v8296_v50 = vld [vmem:[%s8081_s27 + $0x140] sm:$0xff]  ;;  %v8299_v51 = vld [vmem:[%s8081_s27 + $0x148] sm:$0xff]  ;;  %v8304_v52 = vld [vmem:[%s8081_s27 + $0x1d0] sm:$0xff] }
  0x94   : > { %561 = vadd.xlane.f32.xlu1 %v8131_v9  ;;  %11221 = vst [vmem:[#allocation14_spill] sm:$0xff] %v8299_v51  ;;  %11222 = vst [vmem:[#allocation15_spill] sm:$0xff] %v8304_v52  ;;  %v8307_v53 = vld [vmem:[%s8081_s27 + $0x1d8] sm:$0xff]  ;;  %v8312_v54 = vld [vmem:[%s8081_s27 + $0x150] sm:$0xff] }
  0x95   : > { %11223 = vst [vmem:[#allocation16_spill] sm:$0xff] %v8307_v53  ;;  %11224 = vst [vmem:[#allocation17_spill] sm:$0xff] %v8312_v54  ;;  %v8315_v55 = vld [vmem:[%s8081_s27 + $0x158] sm:$0xff]  ;;  %v8320_v56 = vld [vmem:[%s8081_s27 + $0x1e0] sm:$0xff] }
  0x96   : > { %11225 = vst [vmem:[#allocation18_spill] sm:$0xff] %v8315_v55  ;;  %11226 = vst [vmem:[#allocation19_spill] sm:$0xff] %v8320_v56  ;;  %v8323_v57 = vld [vmem:[%s8081_s27 + $0x1e8] sm:$0xff]  ;;  %v8328_v58 = vld [vmem:[%s8081_s27 + $0x160] sm:$0xff] }
  0x97   : > { %527 = vadd.xlane.f32.xlu0 %v8136_v10  ;;  %11227 = vst [vmem:[#allocation20_spill] sm:$0xff] %v8323_v57  ;;  %v8331_v59 = vld [vmem:[%s8081_s27 + $0x168] sm:$0xff] }
  0x98   : > { %529 = vadd.xlane.f32.xlu1 %v8139_v11  ;;  %11228 = vst [vmem:[#allocation21_spill] sm:$0xff] %v8331_v59 }
  0x9b   : > { %563 = vadd.xlane.f32.xlu0 %v8142_v12 }
  0x9c   : > { %565 = vadd.xlane.f32.xlu1 %v8145_v13 }
  0x9f   : > { %531 = vadd.xlane.f32.xlu0 %v8150_v14 }
  0xa0   : > { %533 = vadd.xlane.f32.xlu1 %v8153_v15 }
  0xa3   : > { %567 = vadd.xlane.f32.xlu0 %v8158_v16 }
  0xa4   : > { %569 = vadd.xlane.f32.xlu1 %v8161_v17 }
  0xa7   : > { %535 = vadd.xlane.f32.xlu0 %v8166_v18 }
  0xa8   : > { %537 = vadd.xlane.f32.xlu1 %v8169_v19 }
  0xab   : > { %571 = vadd.xlane.f32.xlu0 %v8174_v20 }
  0xac   : > { %573 = vadd.xlane.f32.xlu1 %v8177_v21 }
  0xaf   : > { %539 = vadd.xlane.f32.xlu0 %v8182_v22 }
  0xb0   : > { %541 = vadd.xlane.f32.xlu1 %v8185_v23 }
  0xb3   : > { %575 = vadd.xlane.f32.xlu0 %v8190_v24 }
  0xb4   : > { %577 = vadd.xlane.f32.xlu1 %v8195_v25 }
  0xb7   : > { %543 = vadd.xlane.f32.xlu0 %v8200_v26 }
  0xb8   : > { %545 = vadd.xlane.f32.xlu1 %v8203_v27 }
  0xbb   : > { %579 = vadd.xlane.f32.xlu0 %v8208_v28 }
  0xbc   : > { %581 = vadd.xlane.f32.xlu1 %v8211_v29 }
  0xbf   : > { %547 = vadd.xlane.f32.xlu0 %v8216_v30 }
  0xc0   : > { %549 = vadd.xlane.f32.xlu1 %v8219_v31 }
  0xc3   : > { %615 = vadd.xlane.f32.xlu0 %v8224_v32 }
  0xc4   : > { %617 = vadd.xlane.f32.xlu1 %v8227_v33 }
  0xc7   : > { %583 = vadd.xlane.f32.xlu0 %v8232_v34 }
  0xc8   : > { %585 = vadd.xlane.f32.xlu1 %v8235_v35 }
  0xcb   : > { %619 = vadd.xlane.f32.xlu0 %v8240_v36 }
  0xcc   : > { %621 = vadd.xlane.f32.xlu1 %v8243_v37 }
  0xcf   : > { %587 = vadd.xlane.f32.xlu0 %v8248_v38 }
  0xd0   : > { %589 = vadd.xlane.f32.xlu1 %v8251_v39 }
  0xd3   : > { %623 = vadd.xlane.f32.xlu0 %v8256_v40 }
  0xd4   : > { %625 = vadd.xlane.f32.xlu1 %v8259_v41 }
  0xd7   : > { %591 = vadd.xlane.f32.xlu0 %v8264_v42 }
  0xd8   : > { %593 = vadd.xlane.f32.xlu1 %v8267_v43 }
  0xdb   : > { %627 = vadd.xlane.f32.xlu0 %v8272_v44 }
  0xdc   : > { %629 = vadd.xlane.f32.xlu1 %v8275_v45 }
  0xdf   : > { %595 = vadd.xlane.f32.xlu0 %v8280_v46 }
  0xe0   : > { %597 = vadd.xlane.f32.xlu1 %v8283_v47 }
  0xe3   : > { %631 = vadd.xlane.f32.xlu0 %v8288_v48 }
  0xe4   : > { %633 = vadd.xlane.f32.xlu1 %v8291_v49 }
  0xe7   : > { %599 = vadd.xlane.f32.xlu0 %v8296_v50 }
  0xe8   : > { %601 = vadd.xlane.f32.xlu1 %v8299_v51 }
  0xeb   : > { %635 = vadd.xlane.f32.xlu0 %v8304_v52 }
  0xec   : > { %637 = vadd.xlane.f32.xlu1 %v8307_v53 }
  0xef   : > { %603 = vadd.xlane.f32.xlu0 %v8312_v54 }
  0xf0   : > { %605 = vadd.xlane.f32.xlu1 %v8315_v55 }
  0xf3   : > { %639 = vadd.xlane.f32.xlu0 %v8320_v56 }
  0xf4   : > { %641 = vadd.xlane.f32.xlu1 %v8323_v57 }
  0xf7   : > { %607 = vadd.xlane.f32.xlu0 %v8328_v58 }
  0xf8   : > { %609 = vadd.xlane.f32.xlu1 %v8331_v59 }
 0x110   : > { %v552_v60 = vpop.xlane.xlu0 %551 }
 0x111   : > { %v520_v61 = vpop.xlane.xlu1 %519  ;;  %v664_v62 = vmul.f32 0.0078125, %v552_v60 }
 0x112   : > { %v648_v63 = vmul.f32 0.0078125, %v520_v61 }
 0x113   : > { %v8336_v55 = vsub.f32 %v8096_v0, %v664_v62 }
 0x114   : > { %v8339_v54 = vsub.f32 %v8099_v1, %v648_v63  ;;  %v554_v56 = vpop.xlane.xlu0 %553 }
 0x115   : > { %v522_v57 = vpop.xlane.xlu1 %521  ;;  %v665_v53 = vmul.f32 0.0078125, %v554_v56  ;;  %v792_v51 = vmul.f32 %v8336_v55, %v8336_v55 }
 0x116   : > { %11229 = vst [vmem:[#allocation22_spill] sm:$0xff] %v8339_v54  ;;  %v649_v52 = vmul.f32 0.0078125, %v522_v57  ;;  %v776_v60 = vmul.f32 %v8339_v54, %v8339_v54 }
 0x117   : > { %872 = vadd.xlane.f32.xlu0 %v792_v51  ;;  %v8344_v59 = vsub.f32 %v8104_v2, %v665_v53 }
 0x118   : > { %v8349_v0 = vsub.f32 %v8107_v3, %v649_v52  ;;  %v556_v61 = vpop.xlane.xlu0 %555 }
 0x119   : > { %v558_v1 = vpop.xlane.xlu1 %557  ;;  %v666_v62 = vmul.f32 0.0078125, %v556_v61  ;;  %v793_v56 = vmul.f32 %v8344_v59, %v8344_v59 }
 0x11a   : > { %v667_v63 = vmul.f32 0.0078125, %v558_v1  ;;  %v777_v2 = vmul.f32 %v8349_v0, %v8349_v0 }
 0x11b   : > { %874 = vadd.xlane.f32.xlu1 %v793_v56  ;;  %840 = vadd.xlane.f32.xlu0 %v776_v60  ;;  %v8354_v51 = vsub.f32 %v8112_v4, %v666_v62 }
 0x11c   : > { %v8359_v53 = vsub.f32 %v8115_v5, %v667_v63  ;;  %v524_v3 = vpop.xlane.xlu0 %523 }
 0x11d   : > { %v526_v52 = vpop.xlane.xlu1 %525  ;;  %v650_v57 = vmul.f32 0.0078125, %v524_v3  ;;  %v794_v61 = vmul.f32 %v8354_v51, %v8354_v51 }
 0x11e   : > { %v651_v54 = vmul.f32 0.0078125, %v526_v52  ;;  %v795_v4 = vmul.f32 %v8359_v53, %v8359_v53 }
 0x11f   : > { %876 = vadd.xlane.f32.xlu0 %v794_v61  ;;  %842 = vadd.xlane.f32.xlu1 %v777_v2  ;;  %v8364_v60 = vsub.f32 %v8120_v6, %v650_v57 }
 0x120   : > { %v8369_v1 = vsub.f32 %v8123_v7, %v651_v54  ;;  %v560_v5 = vpop.xlane.xlu0 %559 }
 0x121   : > { %v562_v62 = vpop.xlane.xlu1 %561  ;;  %v668_v56 = vmul.f32 0.0078125, %v560_v5  ;;  %v778_v63 = vmul.f32 %v8364_v60, %v8364_v60 }
 0x122   : > { %v669_v3 = vmul.f32 0.0078125, %v562_v62  ;;  %v779_v6 = vmul.f32 %v8369_v1, %v8369_v1 }
 0x123   : > { %844 = vadd.xlane.f32.xlu0 %v778_v63  ;;  %878 = vadd.xlane.f32.xlu1 %v795_v4  ;;  %v8374_v2 = vsub.f32 %v8128_v8, %v668_v56 }
 0x124   : > { %v8379_v52 = vsub.f32 %v8131_v9, %v669_v3  ;;  %v528_v7 = vpop.xlane.xlu0 %527 }
 0x125   : > { %v530_v54 = vpop.xlane.xlu1 %529  ;;  %v652_v57 = vmul.f32 0.0078125, %v528_v7  ;;  %v796_v61 = vmul.f32 %v8374_v2, %v8374_v2 }
 0x126   : > { %v653_v5 = vmul.f32 0.0078125, %v530_v54  ;;  %v797_v8 = vmul.f32 %v8379_v52, %v8379_v52 }
 0x127   : > { %880 = vadd.xlane.f32.xlu0 %v796_v61  ;;  %846 = vadd.xlane.f32.xlu1 %v779_v6  ;;  %v8384_v4 = vsub.f32 %v8136_v10, %v652_v57 }
 0x128   : > { %v8389_v62 = vsub.f32 %v8139_v11, %v653_v5  ;;  %v564_v9 = vpop.xlane.xlu0 %563 }
 0x129   : > { %v566_v56 = vpop.xlane.xlu1 %565  ;;  %v670_v63 = vmul.f32 0.0078125, %v564_v9  ;;  %v780_v3 = vmul.f32 %v8384_v4, %v8384_v4 }
 0x12a   : > { %v671_v7 = vmul.f32 0.0078125, %v566_v56  ;;  %v781_v10 = vmul.f32 %v8389_v62, %v8389_v62 }
 0x12b   : > { %848 = vadd.xlane.f32.xlu0 %v780_v3  ;;  %882 = vadd.xlane.f32.xlu1 %v797_v8  ;;  %v8394_v6 = vsub.f32 %v8142_v12, %v670_v63 }
 0x12c   : > { %v8399_v54 = vsub.f32 %v8145_v13, %v671_v7  ;;  %v532_v11 = vpop.xlane.xlu0 %531 }
 0x12d   : > { %v534_v57 = vpop.xlane.xlu1 %533  ;;  %v654_v61 = vmul.f32 0.0078125, %v532_v11  ;;  %v798_v5 = vmul.f32 %v8394_v6, %v8394_v6 }
 0x12e   : > { %v655_v9 = vmul.f32 0.0078125, %v534_v57  ;;  %v799_v12 = vmul.f32 %v8399_v54, %v8399_v54 }
 0x12f   : > { %884 = vadd.xlane.f32.xlu0 %v798_v5  ;;  %850 = vadd.xlane.f32.xlu1 %v781_v10  ;;  %v8404_v8 = vsub.f32 %v8150_v14, %v654_v61 }
 0x130   : > { %v8409_v56 = vsub.f32 %v8153_v15, %v655_v9  ;;  %v568_v13 = vpop.xlane.xlu0 %567 }
 0x131   : > { %v570_v63 = vpop.xlane.xlu1 %569  ;;  %v672_v3 = vmul.f32 0.0078125, %v568_v13  ;;  %v782_v7 = vmul.f32 %v8404_v8, %v8404_v8 }
 0x132   : > { %v673_v11 = vmul.f32 0.0078125, %v570_v63  ;;  %v783_v14 = vmul.f32 %v8409_v56, %v8409_v56 }
 0x133   : > { %852 = vadd.xlane.f32.xlu0 %v782_v7  ;;  %886 = vadd.xlane.f32.xlu1 %v799_v12  ;;  %v8414_v10 = vsub.f32 %v8158_v16, %v672_v3 }
 0x134   : > { %v8419_v57 = vsub.f32 %v8161_v17, %v673_v11  ;;  %v536_v15 = vpop.xlane.xlu0 %535 }
 0x135   : > { %v538_v61 = vpop.xlane.xlu1 %537  ;;  %v656_v5 = vmul.f32 0.0078125, %v536_v15  ;;  %v800_v9 = vmul.f32 %v8414_v10, %v8414_v10 }
 0x136   : > { %v657_v13 = vmul.f32 0.0078125, %v538_v61  ;;  %v801_v16 = vmul.f32 %v8419_v57, %v8419_v57 }
 0x137   : > { %888 = vadd.xlane.f32.xlu0 %v800_v9  ;;  %854 = vadd.xlane.f32.xlu1 %v783_v14  ;;  %v8424_v12 = vsub.f32 %v8166_v18, %v656_v5 }
 0x138   : > { %v8429_v63 = vsub.f32 %v8169_v19, %v657_v13  ;;  %v572_v17 = vpop.xlane.xlu0 %571 }
 0x139   : > { %v574_v3 = vpop.xlane.xlu1 %573  ;;  %v674_v7 = vmul.f32 0.0078125, %v572_v17  ;;  %v784_v11 = vmul.f32 %v8424_v12, %v8424_v12 }
 0x13a   : > { %11230 = vst [vmem:[#allocation23_spill] sm:$0xff] %v8429_v63  ;;  %v675_v15 = vmul.f32 0.0078125, %v574_v3  ;;  %v785_v18 = vmul.f32 %v8429_v63, %v8429_v63 }
 0x13b   : > { %856 = vadd.xlane.f32.xlu0 %v784_v11  ;;  %890 = vadd.xlane.f32.xlu1 %v801_v16  ;;  %v8434_v14 = vsub.f32 %v8174_v20, %v674_v7 }
 0x13c   : > { %v8439_v61 = vsub.f32 %v8177_v21, %v675_v15  ;;  %v540_v19 = vpop.xlane.xlu0 %539 }
 0x13d   : > { %11231 = vst [vmem:[#allocation24_spill] sm:$0xff] %v8434_v14  ;;  %v542_v5 = vpop.xlane.xlu1 %541  ;;  %v658_v9 = vmul.f32 0.0078125, %v540_v19  ;;  %v802_v13 = vmul.f32 %v8434_v14, %v8434_v14 }
 0x13e   : > { %11232 = vst [vmem:[#allocation25_spill] sm:$0xff] %v8439_v61  ;;  %v659_v17 = vmul.f32 0.0078125, %v542_v5  ;;  %v803_v20 = vmul.f32 %v8439_v61, %v8439_v61 }
 0x13f   : > { %892 = vadd.xlane.f32.xlu0 %v802_v13  ;;  %858 = vadd.xlane.f32.xlu1 %v785_v18  ;;  %v8444_v16 = vsub.f32 %v8182_v22, %v658_v9  ;;  %v8456_v18 = vld [vmem:[%s8081_s27 + $0x1f0] sm:$0xff] }
 0x140   : > { %v8449_v3 = vsub.f32 %v8185_v23, %v659_v17  ;;  %v576_v21 = vpop.xlane.xlu0 %575  ;;  %v8463_v17 = vld [vmem:[%s8081_s27 + $0x170] sm:$0xff] }
 0x141   : > { %11233 = vst [vmem:[#allocation26_spill] sm:$0xff] %v8444_v16  ;;  %v578_v7 = vpop.xlane.xlu1 %577  ;;  %v786_v11 = vmul.f32 %v8444_v16, %v8444_v16  ;;  %v676_v22 = vmul.f32 0.0078125, %v576_v21 }
 0x142   : > { %11234 = vst [vmem:[#allocation27_spill] sm:$0xff] %v8449_v3  ;;  %v787_v15 = vmul.f32 %v8449_v3, %v8449_v3  ;;  %v677_v9 = vmul.f32 0.0078125, %v578_v7 }
 0x143   : > { %860 = vadd.xlane.f32.xlu0 %v786_v11  ;;  %894 = vadd.xlane.f32.xlu1 %v803_v20  ;;  %v8460_v13 = vsub.f32 %v8190_v24, %v676_v22  ;;  %v8466_v20 = vld [vmem:[%s8081_s27 + $0x1f8] sm:$0xff] }
 0x144   : > { %v544_v19 = vpop.xlane.xlu0 %543  ;;  %11236 = vst [vmem:[#allocation29_spill] sm:$0xff] %v8466_v20  ;;  %v8469_v21 = vsub.f32 %v8195_v25, %v677_v9  ;;  %v8479_v22 = vld [vmem:[%s8081_s27 + $0x178] sm:$0xff] }
 0x145   : > { %v546_v5 = vpop.xlane.xlu1 %545  ;;  %v660_v23 = vmul.f32 0.0078125, %v544_v19  ;;  %11235 = vst [vmem:[#allocation28_spill] sm:$0xff] %v8460_v13  ;;  %v804_v7 = vmul.f32 %v8460_v13, %v8460_v13 }
 0x146   : > { %v661_v19 = vmul.f32 0.0078125, %v546_v5  ;;  %v805_v25 = vmul.f32 %v8469_v21, %v8469_v21 }
 0x147   : > { %643 = vadd.xlane.f32.xlu0 %v8456_v18  ;;  %862 = vadd.xlane.f32.xlu1 %v787_v15  ;;  %v8476_v24 = vsub.f32 %v8200_v26, %v660_v23 }
 0x148   : > { %v580_v11 = vpop.xlane.xlu0 %579  ;;  %v8490_v26 = vsub.f32 %v8203_v27, %v661_v19 }
 0x149   : > { %v582_v3 = vpop.xlane.xlu1 %581  ;;  %v678_v15 = vmul.f32 0.0078125, %v580_v11  ;;  %v788_v14 = vmul.f32 %v8476_v24, %v8476_v24 }
 0x14a   : > { %v679_v9 = vmul.f32 0.0078125, %v582_v3  ;;  %11237 = vst [vmem:[#allocation30_spill] sm:$0xff] %v8490_v26 }
 0x14b   : > { %611 = vadd.xlane.f32.xlu0 %v8463_v17  ;;  %645 = vadd.xlane.f32.xlu1 %v8466_v20  ;;  %v8487_v5 = vsub.f32 %v8208_v28, %v678_v15 }
 0x14c   : > { %v548_v61 = vpop.xlane.xlu0 %547  ;;  %v8493_v20 = vsub.f32 %v8211_v29, %v679_v9 }
 0x14d   : > { %v550_v16 = vpop.xlane.xlu1 %549  ;;  %v662_v13 = vmul.f32 0.0078125, %v548_v61  ;;  %v806_v3 = vmul.f32 %v8487_v5, %v8487_v5  ;;  %v789_v61 = vmul.f32 %v8490_v26, %v8490_v26 }
 0x14e   : > { %v663_v63 = vmul.f32 0.0078125, %v550_v16  ;;  %v807_v16 = vmul.f32 %v8493_v20, %v8493_v20 }
 0x14f   : > { %896 = vadd.xlane.f32.xlu0 %v804_v7  ;;  %613 = vadd.xlane.f32.xlu1 %v8479_v22  ;;  %v8500_v28 = vsub.f32 %v8216_v30, %v662_v13 }
 0x150   : > { %v616_v23 = vpop.xlane.xlu0 %615  ;;  %v8505_v29 = vsub.f32 %v8219_v31, %v663_v63 }
 0x151   : > { %v618_v11 = vpop.xlane.xlu1 %617  ;;  %v696_v7 = vmul.f32 0.0078125, %v616_v23 }
 0x152   : > { %v791_v23 = vmul.f32 %v8505_v29, %v8505_v29 }
 0x153   : > { %864 = vadd.xlane.f32.xlu0 %v788_v14  ;;  %898 = vadd.xlane.f32.xlu1 %v805_v25  ;;  %v790_v14 = vmul.f32 %v8500_v28, %v8500_v28  ;;  %v697_v25 = vmul.f32 0.0078125, %v618_v11  ;;  %v8510_v9 = vsub.f32 %v8224_v32, %v696_v7 }
 0x154   : > { %v584_v27 = vpop.xlane.xlu0 %583 }
 0x155   : > { %v586_v15 = vpop.xlane.xlu1 %585  ;;  %v680_v19 = vmul.f32 0.0078125, %v584_v27  ;;  %v824_v63 = vmul.f32 %v8510_v9, %v8510_v9  ;;  %v8520_v11 = vsub.f32 %v8227_v33, %v697_v25 }
 0x156   : > { %v681_v26 = vmul.f32 0.0078125, %v586_v15 }
 0x157   : > { %900 = vadd.xlane.f32.xlu0 %v806_v3  ;;  %866 = vadd.xlane.f32.xlu1 %v789_v61  ;;  %v8515_v31 = vsub.f32 %v8232_v34, %v680_v19 }
 0x158   : > { %v620_v30 = vpop.xlane.xlu0 %619  ;;  %v8523_v7 = vsub.f32 %v8235_v35, %v681_v26 }
 0x159   : > { %v622_v13 = vpop.xlane.xlu1 %621  ;;  %v698_v3 = vmul.f32 0.0078125, %v620_v30  ;;  %v808_v34 = vmul.f32 %v8515_v31, %v8515_v31 }
 0x15a   : > { %v699_v27 = vmul.f32 0.0078125, %v622_v13  ;;  %v809_v35 = vmul.f32 %v8523_v7, %v8523_v7 }
 0x15b   : > { %868 = vadd.xlane.f32.xlu0 %v790_v14  ;;  %902 = vadd.xlane.f32.xlu1 %v807_v16  ;;  %v8526_v15 = vsub.f32 %v8240_v36, %v698_v3  ;;  %v825_v16 = vmul.f32 %v8520_v11, %v8520_v11 }
 0x15c   : > { %v588_v32 = vpop.xlane.xlu0 %587  ;;  %v8533_v25 = vsub.f32 %v8243_v37, %v699_v27 }
 0x15d   : > { %v590_v61 = vpop.xlane.xlu1 %589  ;;  %v682_v14 = vmul.f32 0.0078125, %v588_v32  ;;  %v826_v26 = vmul.f32 %v8526_v15, %v8526_v15 }
 0x15e   : > { %v683_v13 = vmul.f32 0.0078125, %v590_v61  ;;  %v827_v3 = vmul.f32 %v8533_v25, %v8533_v25 }
 0x15f   : > { %936 = vadd.xlane.f32.xlu0 %v824_v63  ;;  %870 = vadd.xlane.f32.xlu1 %v791_v23  ;;  %v8538_v36 = vsub.f32 %v8248_v38, %v682_v14 }
 0x160   : > { %v624_v33 = vpop.xlane.xlu0 %623  ;;  %v8548_v27 = vsub.f32 %v8251_v39, %v683_v13 }
 0x161   : > { %v626_v19 = vpop.xlane.xlu1 %625  ;;  %v700_v30 = vmul.f32 0.0078125, %v624_v33  ;;  %v810_v38 = vmul.f32 %v8538_v36, %v8538_v36 }
 0x162   : > { %v701_v37 = vmul.f32 0.0078125, %v626_v19  ;;  %v811_v39 = vmul.f32 %v8548_v27, %v8548_v27 }
 0x163   : > { %904 = vadd.xlane.f32.xlu0 %v808_v34  ;;  %938 = vadd.xlane.f32.xlu1 %v825_v16  ;;  %v8545_v32 = vsub.f32 %v8256_v40, %v700_v30 }
 0x164   : > { %v592_v23 = vpop.xlane.xlu0 %591  ;;  %v8553_v14 = vsub.f32 %v8259_v41, %v701_v37 }
 0x165   : > { %v594_v63 = vpop.xlane.xlu1 %593  ;;  %v684_v34 = vmul.f32 0.0078125, %v592_v23  ;;  %v828_v40 = vmul.f32 %v8545_v32, %v8545_v32 }
 0x166   : > { %v685_v33 = vmul.f32 0.0078125, %v594_v63  ;;  %v829_v41 = vmul.f32 %v8553_v14, %v8553_v14 }
 0x167   : > { %940 = vadd.xlane.f32.xlu0 %v826_v26  ;;  %906 = vadd.xlane.f32.xlu1 %v809_v35  ;;  %v8556_v19 = vsub.f32 %v8264_v42, %v684_v34 }
 0x168   : > { %v628_v16 = vpop.xlane.xlu0 %627  ;;  %v8563_v13 = vsub.f32 %v8267_v43, %v685_v33 }
 0x169   : > { %v630_v61 = vpop.xlane.xlu1 %629  ;;  %v702_v35 = vmul.f32 0.0078125, %v628_v16  ;;  %v812_v23 = vmul.f32 %v8556_v19, %v8556_v19 }
 0x16a   : > { %v813_v34 = vmul.f32 %v8563_v13, %v8563_v13 }
 0x16b   : > { %908 = vadd.xlane.f32.xlu0 %v810_v38  ;;  %942 = vadd.xlane.f32.xlu1 %v827_v3  ;;  %v8568_v42 = vsub.f32 %v8272_v44, %v702_v35  ;;  %v703_v3 = vmul.f32 0.0078125, %v630_v61 }
 0x16c   : > { %v596_v26 = vpop.xlane.xlu0 %595 }
 0x16d   : > { %v598_v30 = vpop.xlane.xlu1 %597  ;;  %v686_v63 = vmul.f32 0.0078125, %v596_v26  ;;  %v8578_v33 = vsub.f32 %v8275_v45, %v703_v3  ;;  %v830_v44 = vmul.f32 %v8568_v42, %v8568_v42 }
 0x16e   : > { %v687_v43 = vmul.f32 0.0078125, %v598_v30 }
 0x16f   : > { %944 = vadd.xlane.f32.xlu0 %v828_v40  ;;  %910 = vadd.xlane.f32.xlu1 %v811_v39  ;;  %v8575_v16 = vsub.f32 %v8280_v46, %v686_v63  ;;  %11239 = vst [vmem:[#allocation32_spill] sm:$0xff] %v8578_v33  ;;  %v831_v45 = vmul.f32 %v8578_v33, %v8578_v33 }
 0x170   : > { %v632_v37 = vpop.xlane.xlu0 %631  ;;  %v8583_v35 = vsub.f32 %v8283_v47, %v687_v43 }
 0x171   : > { %v634_v38 = vpop.xlane.xlu1 %633  ;;  %11238 = vst [vmem:[#allocation31_spill] sm:$0xff] %v8575_v16  ;;  %v704_v40 = vmul.f32 0.0078125, %v632_v37  ;;  %v814_v46 = vmul.f32 %v8575_v16, %v8575_v16 }
 0x172   : > { %11240 = vst [vmem:[#allocation33_spill] sm:$0xff] %v8583_v35  ;;  %v705_v26 = vmul.f32 0.0078125, %v634_v38  ;;  %v815_v47 = vmul.f32 %v8583_v35, %v8583_v35 }
 0x173   : > { %912 = vadd.xlane.f32.xlu0 %v812_v23  ;;  %946 = vadd.xlane.f32.xlu1 %v829_v41  ;;  %v8586_v30 = vsub.f32 %v8288_v48, %v704_v40 }
 0x174   : > { %v600_v39 = vpop.xlane.xlu0 %599  ;;  %v8593_v3 = vsub.f32 %v8291_v49, %v705_v26 }
 0x175   : > { %v602_v61 = vpop.xlane.xlu1 %601  ;;  %11241 = vst [vmem:[#allocation34_spill] sm:$0xff] %v8586_v30  ;;  %v688_v41 = vmul.f32 0.0078125, %v600_v39  ;;  %v832_v37 = vmul.f32 %v8586_v30, %v8586_v30  ;;  %v11244_v39 = vld [vmem:[#allocation15_spill] sm:$0xff] }
 0x176   : > { %11242 = vst [vmem:[#allocation35_spill] sm:$0xff] %v8593_v3  ;;  %v833_v40 = vmul.f32 %v8593_v3, %v8593_v3 }
 0x177   : > { %948 = vadd.xlane.f32.xlu0 %v830_v44  ;;  %914 = vadd.xlane.f32.xlu1 %v813_v34  ;;  %v8598_v48 = vsub.f32 %v8296_v50, %v688_v41  ;;  %v689_v34 = vmul.f32 0.0078125, %v602_v61  ;;  %v11248_v61 = vld [vmem:[#allocation16_spill] sm:$0xff] }
 0x178   : > { %v636_v23 = vpop.xlane.xlu0 %635 }
 0x179   : > { %v638_v63 = vpop.xlane.xlu1 %637  ;;  %11243 = vst [vmem:[#allocation36_spill] sm:$0xff] %v8598_v48  ;;  %v706_v38 = vmul.f32 0.0078125, %v636_v23  ;;  %v816_v50 = vmul.f32 %v8598_v48, %v8598_v48 }
 0x17a   : > { %v707_v49 = vmul.f32 0.0078125, %v638_v63  ;;  %v11250_v63 = vld [vmem:[#allocation17_spill] sm:$0xff] }
 0x17b   : > { %916 = vadd.xlane.f32.xlu0 %v814_v46  ;;  %950 = vadd.xlane.f32.xlu1 %v831_v45  ;;  %v8605_v26 = vsub.f32 %v11244_v39, %v706_v38  ;;  %v11246_v46 = vld [vmem:[#allocation14_spill] sm:$0xff] }
 0x17c   : > { %v604_v43 = vpop.xlane.xlu0 %603  ;;  %v8608_v45 = vsub.f32 %v11246_v46, %v689_v34  ;;  %v8613_v30 = vsub.f32 %v11248_v61, %v707_v49 }
 0x17d   : > { %v606_v44 = vpop.xlane.xlu1 %605  ;;  %11245 = vst [vmem:[#allocation15_spill] sm:$0xff] %v8605_v26  ;;  %v690_v41 = vmul.f32 0.0078125, %v604_v43  ;;  %v11252_v43 = vld [vmem:[#allocation18_spill] sm:$0xff] }
 0x17e   : > { %11247 = vst [vmem:[#allocation14_spill] sm:$0xff] %v8608_v45  ;;  %11249 = vst [vmem:[#allocation16_spill] sm:$0xff] %v8613_v30  ;;  %v691_v35 = vmul.f32 0.0078125, %v606_v44  ;;  %v817_v38 = vmul.f32 %v8608_v45, %v8608_v45  ;;  %v835_v44 = vmul.f32 %v8613_v30, %v8613_v30 }
 0x17f   : > { %952 = vadd.xlane.f32.xlu0 %v832_v37  ;;  %918 = vadd.xlane.f32.xlu1 %v815_v47  ;;  %v8616_v47 = vsub.f32 %v11250_v63, %v690_v41  ;;  %v834_v37 = vmul.f32 %v8605_v26, %v8605_v26 }
 0x180   : > { %v640_v23 = vpop.xlane.xlu0 %639  ;;  %v8623_v46 = vsub.f32 %v11252_v43, %v691_v35  ;;  %v8637_v35 = vld [vmem:[%s11050_s4] sm:$0xff]  }
 0x181   : > { %v642_v33 = vpop.xlane.xlu1 %641  ;;  %11251 = vst [vmem:[#allocation17_spill] sm:$0xff] %v8616_v47  ;;  %v708_v34 = vmul.f32 0.0078125, %v640_v23  ;;  %v8650_v43 = vld [vmem:[%s11050_s4 + $0xc0] sm:$0xff]   ;;  %6370 = vmatprep.mubr.bf16.mxu0 %v8637_v35 }
 0x182   : > { %11253 = vst [vmem:[#allocation18_spill] sm:$0xff] %v8623_v46  ;;  %v709_v61 = vmul.f32 0.0078125, %v642_v33  ;;  %v819_v23 = vmul.f32 %v8623_v46, %v8623_v46  ;;  %6418 = vmatprep.mubr.bf16.mxu1 %v8650_v43 }
 0x183   : > { %920 = vadd.xlane.f32.xlu0 %v816_v50  ;;  %954 = vadd.xlane.f32.xlu1 %v833_v40  ;;  %v11254_v40 = vld [vmem:[#allocation19_spill] sm:$0xff]  ;;  %v818_v50 = vmul.f32 %v8616_v47, %v8616_v47 }
 0x184   : > { %v608_v39 = vpop.xlane.xlu0 %607  ;;  %v8628_v49 = vsub.f32 %v11254_v40, %v708_v34 }
 0x185   : > { %v692_v41 = vmul.f32 0.0078125, %v608_v39  ;;  %v610_v63 = vpop.xlane.xlu1 %609 }
 0x186   : > { %11255 = vst [vmem:[#allocation19_spill] sm:$0xff] %v8628_v49  ;;  %v836_v33 = vmul.f32 %v8628_v49, %v8628_v49  ;;  %v693_v39 = vmul.f32 0.0078125, %v610_v63 }
 0x187   : > { %956 = vadd.xlane.f32.xlu0 %v834_v37  ;;  %922 = vadd.xlane.f32.xlu1 %v817_v38  ;;  %v8640_v37 = vsub.f32 %v8328_v58, %v692_v41  ;;  %v11257_v38 = vld [vmem:[#allocation20_spill] sm:$0xff]  ;;  %v11259_v58 = vld [vmem:[#allocation21_spill] sm:$0xff] }
 0x188   : > { %v8643_v34 = vsub.f32 %v11257_v38, %v709_v61 }
 0x189   : > { %11256 = vst [vmem:[#allocation37_spill] sm:$0xff] %v8640_v37  ;;  %v820_v40 = vmul.f32 %v8640_v37, %v8640_v37 }
 0x18a   : > { %11258 = vst [vmem:[#allocation20_spill] sm:$0xff] %v8643_v34 }
 0x18b   : > { %924 = vadd.xlane.f32.xlu0 %v818_v50  ;;  %958 = vadd.xlane.f32.xlu1 %v835_v44  ;;  %v8655_v44 = vsub.f32 %v11259_v58, %v693_v39  ;;  %v837_v50 = vmul.f32 %v8643_v34, %v8643_v34 }
 0x18d   : > { %11260 = vst [vmem:[#allocation21_spill] sm:$0xff] %v8655_v44  ;;  %v821_v41 = vmul.f32 %v8655_v44, %v8655_v44 }
 0x18f   : > { %960 = vadd.xlane.f32.xlu0 %v836_v33  ;;  %926 = vadd.xlane.f32.xlu1 %v819_v23 }
 0x193   : > { %928 = vadd.xlane.f32.xlu0 %v820_v40  ;;  %962 = vadd.xlane.f32.xlu1 %v837_v50 }
 0x197   : > { %930 = vadd.xlane.f32.xlu1 %v821_v41 }
 0x1a4   : > { %v873_v61 = vpop.xlane.xlu0 %872 }
 0x1a5   : > { %v984_v63 = vmul.f32 0.0078125, %v873_v61 }
 0x1a7   : > { %v1048_v38 = vadd.f32 1e-05, %v984_v63 }
 0x1a8   : > { %v841_v33 = vpop.xlane.xlu0 %840  ;;  %v875_v23 = vpop.xlane.xlu1 %874 }
 0x1a9   : > { %6765 = vrsqrt.f32 %v1048_v38  ;;  %v968_v39 = vmul.f32 0.0078125, %v841_v33  ;;  %v985_v58 = vmul.f32 0.0078125, %v875_v23 }
 0x1ab   : > { %v1032_v49 = vadd.f32 1e-05, %v968_v39  ;;  %v1049_v46 = vadd.f32 1e-05, %v985_v58 }
 0x1ac   : > { %v877_v37 = vpop.xlane.xlu0 %876  ;;  %v843_v30 = vpop.xlane.xlu1 %842 }
 0x1ad   : > { %6767 = vrsqrt.f32 %v1032_v49  ;;  %v986_v34 = vmul.f32 0.0078125, %v877_v37  ;;  %v969_v40 = vmul.f32 0.0078125, %v843_v30  ;;  %v8664_v30 = vld [vmem:[#allocation4] ss:$0 sm:$0xff] }
 0x1ae   : > { %6769 = vrsqrt.f32 %v1049_v46 }
 0x1af   : > { %v1050_v50 = vadd.f32 1e-05, %v986_v34  ;;  %v1033_v47 = vadd.f32 1e-05, %v969_v40 }
 0x1b0   : > { %v845_v44 = vpop.xlane.xlu0 %844  ;;  %v879_v41 = vpop.xlane.xlu1 %878 }
 0x1b1   : > { %6771 = vrsqrt.f32 %v1050_v50  ;;  %v970_v61 = vmul.f32 0.0078125, %v845_v44  ;;  %v987_v63 = vmul.f32 0.0078125, %v879_v41  ;;  %v7838_v50 = vmov 0  }
 0x1b2   : > { %6773 = vrsqrt.f32 %v1033_v47  ;;  %6724 = vset.pattern.permute.xlu1 %v7838_v50  ;;  %6723 = vset.pattern.permute.xlu0 %v7838_v50 }
 0x1b3   : > { %v6766_v45 = vpop.eup %6765  ;;  %v1034_v38 = vadd.f32 1e-05, %v970_v61  ;;  %v1051_v33 = vadd.f32 1e-05, %v987_v63 }
 0x1b4   : > { %v881_v23 = vpop.xlane.xlu0 %880  ;;  %v847_v39 = vpop.xlane.xlu1 %846  ;;  %v1176_v58 = vmul.f32 %v6766_v45, %v8336_v55 }
 0x1b5   : > { %6775 = vrsqrt.f32 %v1034_v38  ;;  %v988_v49 = vmul.f32 0.0078125, %v881_v23  ;;  %v971_v37 = vmul.f32 0.0078125, %v847_v39  ;;  %v8668_v38 = vld [vmem:[#allocation6] ss:$0 sm:$0xff] }
 0x1b6   : > { %6777 = vrsqrt.f32 %v1051_v33  ;;  %v1247_v61 = vmul.f32 %v8664_v30, %v1176_v58  ;;  %v11261_v33 = vld [vmem:[#allocation22_spill] sm:$0xff] }
 0x1b7   : > { %v6768_v46 = vpop.eup %6767  ;;  %v1052_v34 = vadd.f32 1e-05, %v988_v49  ;;  %v1035_v40 = vadd.f32 1e-05, %v971_v37 }
 0x1b8   : > { %v6770_v47 = vpop.eup %6769  ;;  %v849_v44 = vpop.xlane.xlu0 %848  ;;  %v1160_v23 = vmul.f32 %v6768_v46, %v11261_v33  ;;  %v1318_v58 = vadd.f32 %v8668_v38, %v1247_v61 }
 0x1b9   : > { %v883_v41 = vpop.xlane.xlu1 %882  ;;  %6779 = vrsqrt.f32 %v1052_v34  ;;  %v972_v63 = vmul.f32 0.0078125, %v849_v44  ;;  %v1177_v45 = vmul.f32 %v6770_v47, %v8344_v59 }
 0x1ba   : > { %v989_v55 = vmul.f32 0.0078125, %v883_v41  ;;  %6781 = vrsqrt.f32 %v1035_v40  ;;  %v1231_v40 = vmul.f32 %v8664_v30, %v1160_v23 }
 0x1bb   : > { %v6772_v39 = vpop.eup %6771  ;;  %v1036_v49 = vadd.f32 1e-05, %v972_v63  ;;  %v1248_v50 = vmul.f32 %v8664_v30, %v1177_v45 }
 0x1bc   : > { %v1053_v37 = vadd.f32 1e-05, %v989_v55  ;;  %v6774_v26 = vpop.eup %6773  ;;  %v885_v3 = vpop.xlane.xlu0 %884  ;;  %v1178_v34 = vmul.f32 %v6772_v39, %v8354_v51  ;;  %v1302_v23 = vadd.f32 %v8668_v38, %v1231_v40 }
 0x1bd   : > { %v851_v48 = vpop.xlane.xlu1 %850  ;;  %6783 = vrsqrt.f32 %v1036_v49  ;;  %v990_v44 = vmul.f32 0.0078125, %v885_v3  ;;  %v1319_v47 = vadd.f32 %v8668_v38, %v1248_v50  ;;  %v1161_v46 = vmul.f32 %v6774_v26, %v8349_v0 }
 0x1be   : > { %v973_v59 = vmul.f32 0.0078125, %v851_v48  ;;  %6785 = vrsqrt.f32 %v1053_v37  ;;  %v1249_v3 = vmul.f32 %v8664_v30, %v1178_v34 }
 0x1bf   : > { %v6776_v41 = vpop.eup %6775  ;;  %v1054_v63 = vadd.f32 1e-05, %v990_v44  ;;  %v8677_v45 = vpack.c.bf16 %v1319_v47, %v1318_v58  ;;  %v1232_v51 = vmul.f32 %v8664_v30, %v1161_v46 }
 0x1c0   : > { %v1037_v55 = vadd.f32 1e-05, %v973_v59  ;;  %v6778_v33 = vpop.eup %6777  ;;  %v853_v16 = vpop.xlane.xlu0 %852  ;;  %v1162_v49 = vmul.f32 %v6776_v41, %v8364_v60  ;;  %v1320_v46 = vadd.f32 %v8668_v38, %v1249_v3 }
 0x1c1   : > { %v887_v61 = vpop.xlane.xlu1 %886  ;;  %6787 = vrsqrt.f32 %v1054_v63  ;;  %v974_v48 = vmul.f32 0.0078125, %v853_v16  ;;  %6354 = vmatprep.subr.bf16.mxu0 %v8677_v45  ;;  %6634 = vmatprep.subr.bf16.mxu1 %v8677_v45  ;;  %v1179_v26 = vmul.f32 %v6778_v33, %v8359_v53  ;;  %v1303_v39 = vadd.f32 %v8668_v38, %v1232_v51 }
 0x1c2   : > { %v991_v0 = vmul.f32 0.0078125, %v887_v61  ;;  %6789 = vrsqrt.f32 %v1037_v55  ;;  %v1233_v41 = vmul.f32 %v8664_v30, %v1162_v49 }
 0x1c3   : > { %v6780_v37 = vpop.eup %6779  ;;  %v1038_v50 = vadd.f32 1e-05, %v974_v48  ;;  %v1250_v34 = vmul.f32 %v8664_v30, %v1179_v26  ;;  %v8688_v59 = vpack.c.bf16 %v1303_v39, %v1302_v23 }
 0x1c4   : > { %v1055_v58 = vadd.f32 1e-05, %v991_v0  ;;  %v6782_v16 = vpop.eup %6781  ;;  %v889_v44 = vpop.xlane.xlu0 %888  ;;  %v1180_v53 = vmul.f32 %v6780_v37, %v8374_v2  ;;  %v1304_v37 = vadd.f32 %v8668_v38, %v1233_v41 }
 0x1c5   : > { %v855_v47 = vpop.xlane.xlu1 %854  ;;  %6791 = vrsqrt.f32 %v1038_v50  ;;  %v992_v40 = vmul.f32 0.0078125, %v889_v44  ;;  %v1321_v55 = vadd.f32 %v8668_v38, %v1250_v34  ;;  %6355 = vmatpush3.bf16.xpose.msra.mxu0 %v8688_v59  ;;  %6642 = vmatpush3.bf16.xpose.msra.mxu1 %v8688_v59  ;;  %v1163_v60 = vmul.f32 %v6782_v16, %v8369_v1 }
 0x1c6   : > { %v975_v63 = vmul.f32 0.0078125, %v855_v47  ;;  %6793 = vrsqrt.f32 %v1055_v58  ;;  %v1251_v23 = vmul.f32 %v8664_v30, %v1180_v53 }
 0x1c7   : > { %v6784_v33 = vpop.eup %6783  ;;  %v1056_v61 = vadd.f32 1e-05, %v992_v40  ;;  %v8697_v3 = vpack.c.bf16 %v1321_v55, %v1320_v46  ;;  %v1234_v26 = vmul.f32 %v8664_v30, %v1163_v60 }
 0x1c8   : > { %v1039_v51 = vadd.f32 1e-05, %v975_v63  ;;  %v6786_v2 = vpop.eup %6785  ;;  %v857_v48 = vpop.xlane.xlu0 %856  ;;  %v1164_v58 = vmul.f32 %v6784_v33, %v8384_v4  ;;  %v1322_v55 = vadd.f32 %v8668_v38, %v1251_v23 }
 0x1c9   : > { %v891_v0 = vpop.xlane.xlu1 %890  ;;  %6795 = vrsqrt.f32 %v1056_v61  ;;  %v976_v39 = vmul.f32 0.0078125, %v857_v48  ;;  %6356 = vmatprep.subr.bf16.mxu0 %v8697_v3  ;;  %6635 = vmatprep.subr.bf16.mxu1 %v8697_v3  ;;  %v1181_v49 = vmul.f32 %v6786_v2, %v8379_v52  ;;  %v1305_v50 = vadd.f32 %v8668_v38, %v1234_v26 }
 0x1ca   : > { %v993_v1 = vmul.f32 0.0078125, %v891_v0  ;;  %6797 = vrsqrt.f32 %v1039_v51  ;;  %v1235_v33 = vmul.f32 %v8664_v30, %v1164_v58 }
 0x1cb   : > { %v6788_v34 = vpop.eup %6787  ;;  %v1040_v16 = vadd.f32 1e-05, %v976_v39  ;;  %v1252_v47 = vmul.f32 %v8664_v30, %v1181_v49  ;;  %v8708_v40 = vpack.c.bf16 %v1305_v50, %v1304_v37 }
 0x1cc   : > { %v1057_v44 = vadd.f32 1e-05, %v993_v1  ;;  %v6790_v46 = vpop.eup %6789  ;;  %v893_v53 = vpop.xlane.xlu0 %892  ;;  %v1182_v52 = vmul.f32 %v6788_v34, %v8394_v6  ;;  %v1306_v50 = vadd.f32 %v8668_v38, %v1235_v33 }
 0x1cd   : > { %v859_v63 = vpop.xlane.xlu1 %858  ;;  %6799 = vrsqrt.f32 %v1040_v16  ;;  %v994_v60 = vmul.f32 0.0078125, %v893_v53  ;;  %v1323_v61 = vadd.f32 %v8668_v38, %v1252_v47  ;;  %6357 = vmatpush3.bf16.xpose.msra.mxu0 %v8708_v40  ;;  %6643 = vmatpush3.bf16.xpose.msra.mxu1 %v8708_v40  ;;  %v1165_v4 = vmul.f32 %v6790_v46, %v8389_v62 }
 0x1ce   : > { %v977_v41 = vmul.f32 0.0078125, %v859_v63  ;;  %6801 = vrsqrt.f32 %v1057_v44  ;;  %v1253_v1 = vmul.f32 %v8664_v30, %v1182_v52 }
 0x1cf   : > { %v6792_v51 = vpop.eup %6791  ;;  %v1058_v2 = vadd.f32 1e-05, %v994_v60  ;;  %v8717_v0 = vpack.c.bf16 %v1323_v61, %v1322_v55  ;;  %v1236_v39 = vmul.f32 %v8664_v30, %v1165_v4 }
 0x1d0   : > { %v1041_v48 = vadd.f32 1e-05, %v977_v41  ;;  %v6794_v6 = vpop.eup %6793  ;;  %v861_v26 = vpop.xlane.xlu0 %860  ;;  %v1166_v34 = vmul.f32 %v6792_v51, %v8404_v8  ;;  %v1324_v60 = vadd.f32 %v8668_v38, %v1253_v1 }
 0x1d1   : > { %v895_v23 = vpop.xlane.xlu1 %894  ;;  %6803 = vrsqrt.f32 %v1058_v2  ;;  %v978_v49 = vmul.f32 0.0078125, %v861_v26  ;;  %6358 = vmatprep.subr.bf16.mxu0 %v8717_v0  ;;  %6636 = vmatprep.subr.bf16.mxu1 %v8717_v0  ;;  %v1183_v37 = vmul.f32 %v6794_v6, %v8399_v54  ;;  %v1307_v58 = vadd.f32 %v8668_v38, %v1236_v39 }
 0x1d2   : > { %v995_v62 = vmul.f32 0.0078125, %v895_v23  ;;  %6805 = vrsqrt.f32 %v1041_v48  ;;  %v1237_v33 = vmul.f32 %v8664_v30, %v1166_v34 }
 0x1d3   : > { %v6796_v16 = vpop.eup %6795  ;;  %v1042_v44 = vadd.f32 1e-05, %v978_v49  ;;  %v1254_v46 = vmul.f32 %v8664_v30, %v1183_v37  ;;  %v8728_v55 = vpack.c.bf16 %v1307_v58, %v1306_v50 }
 0x1d4   : > { %v1059_v47 = vadd.f32 1e-05, %v995_v62  ;;  %v6798_v53 = vpop.eup %6797  ;;  %v644_v63 = vpop.xlane.xlu0 %643  ;;  %v1184_v54 = vmul.f32 %v6796_v16, %v8414_v10  ;;  %v1308_v37 = vadd.f32 %v8668_v38, %v1237_v33 }
 0x1d5   : > { %v863_v52 = vpop.xlane.xlu1 %862  ;;  %6807 = vrsqrt.f32 %v1042_v44  ;;  %v710_v41 = vmul.f32 0.0078125, %v644_v63  ;;  %v1325_v4 = vadd.f32 %v8668_v38, %v1254_v46  ;;  %6359 = vmatpush3.bf16.xpose.msra.mxu0 %v8728_v55  ;;  %6644 = vmatpush3.bf16.xpose.msra.mxu1 %v8728_v55  ;;  %v1167_v8 = vmul.f32 %v6798_v53, %v8409_v56 }
 0x1d6   : > { %v979_v61 = vmul.f32 0.0078125, %v863_v52  ;;  %6809 = vrsqrt.f32 %v1059_v47  ;;  %v1255_v1 = vmul.f32 %v8664_v30, %v1184_v54 }
 0x1d7   : > { %v6800_v51 = vpop.eup %6799  ;;  %v8738_v2 = vsub.f32 %v8456_v18, %v710_v41  ;;  %v8740_v10 = vpack.c.bf16 %v1325_v4, %v1324_v60  ;;  %v1238_v39 = vmul.f32 %v8664_v30, %v1167_v8  ;;  %v11263_v8 = vld [vmem:[#allocation23_spill] sm:$0xff] }
 0x1d8   : > { %v1043_v48 = vadd.f32 1e-05, %v979_v61  ;;  %v6802_v6 = vpop.eup %6801  ;;  %v612_v26 = vpop.xlane.xlu0 %611  ;;  %v1168_v49 = vmul.f32 %v6800_v51, %v8424_v12  ;;  %v11262_v12 = vld [vmem:[#allocation29_spill] sm:$0xff]  ;;  %v1326_v60 = vadd.f32 %v8668_v38, %v1255_v1  ;;  %v11264_v51 = vld [vmem:[#allocation24_spill] sm:$0xff] }
 0x1d9   : > { %v646_v23 = vpop.xlane.xlu1 %645  ;;  %v694_v56 = vmul.f32 0.0078125, %v612_v26  ;;  %6360 = vmatprep.subr.bf16.mxu0 %v8740_v10  ;;  %6637 = vmatprep.subr.bf16.mxu1 %v8740_v10  ;;  %v838_v62 = vmul.f32 %v8738_v2, %v8738_v2  ;;  %v1309_v50 = vadd.f32 %v8668_v38, %v1238_v39  ;;  %v1185_v58 = vmul.f32 %v6802_v6, %v8419_v57 }
 0x1da   : > { %6811 = vrsqrt.f32 %v1043_v48  ;;  %v711_v18 = vmul.f32 0.0078125, %v646_v23  ;;  %v1239_v54 = vmul.f32 %v8664_v30, %v1168_v49 }
 0x1db   : > { %v6804_v34 = vpop.eup %6803  ;;  %v8753_v16 = vsub.f32 %v8463_v17, %v694_v56  ;;  %964 = vadd.xlane.f32.xlu0 %v838_v62  ;;  %v8758_v53 = vpack.c.bf16 %v1309_v50, %v1308_v37  ;;  %v1256_v52 = vmul.f32 %v8664_v30, %v1185_v58  ;;  %v11265_v37 = vld [vmem:[#allocation26_spill] sm:$0xff] }
 0x1dc   : > { %v8756_v44 = vsub.f32 %v11262_v12, %v711_v18  ;;  %v6806_v47 = vpop.eup %6805  ;;  %v897_v46 = vpop.xlane.xlu0 %896  ;;  %v1186_v48 = vmul.f32 %v6804_v34, %v11264_v51  ;;  %v1310_v62 = vadd.f32 %v8668_v38, %v1239_v54 }
 0x1dd   : > { %v614_v63 = vpop.xlane.xlu1 %613  ;;  %v996_v57 = vmul.f32 0.0078125, %v897_v46  ;;  %v822_v17 = vmul.f32 %v8753_v16, %v8753_v16  ;;  %6361 = vmatpush3.bf16.xpose.msra.mxu0 %v8758_v53  ;;  %6645 = vmatpush3.bf16.xpose.msra.mxu1 %v8758_v53  ;;  %v1327_v4 = vadd.f32 %v8668_v38, %v1256_v52  ;;  %v1169_v33 = vmul.f32 %v6806_v47, %v11263_v8  ;;  %v11266_v47 = vld [vmem:[#allocation25_spill] sm:$0xff] }
 0x1de   : > { %v695_v41 = vmul.f32 0.0078125, %v614_v63  ;;  %v839_v61 = vmul.f32 %v8756_v44, %v8756_v44  ;;  %v1257_v63 = vmul.f32 %v8664_v30, %v1186_v48 }
 0x1df   : > { %v6808_v6 = vpop.eup %6807  ;;  %v1060_v26 = vadd.f32 1e-05, %v996_v57  ;;  %932 = vadd.xlane.f32.xlu0 %v822_v17  ;;  %v8775_v49 = vpack.c.bf16 %v1327_v4, %v1326_v60  ;;  %v1240_v18 = vmul.f32 %v8664_v30, %v1169_v33  ;;  %v11267_v4 = vld [vmem:[#allocation27_spill] sm:$0xff] }
 0x1e0   : > { %v8773_v23 = vsub.f32 %v8479_v22, %v695_v41  ;;  %966 = vadd.xlane.f32.xlu1 %v839_v61  ;;  %v6810_v39 = vpop.eup %6809  ;;  %v865_v1 = vpop.xlane.xlu0 %864  ;;  %v1170_v50 = vmul.f32 %v6808_v6, %v11265_v37  ;;  %v1328_v48 = vadd.f32 %v8668_v38, %v1257_v63 }
 0x1e1   : > { %v899_v56 = vpop.xlane.xlu1 %898  ;;  %6813 = vrsqrt.f32 %v1060_v26  ;;  %v980_v58 = vmul.f32 0.0078125, %v865_v1  ;;  %6362 = vmatprep.subr.bf16.mxu0 %v8775_v49  ;;  %6638 = vmatprep.subr.bf16.mxu1 %v8775_v49  ;;  %v1311_v12 = vadd.f32 %v8668_v38, %v1240_v18  ;;  %v1187_v46 = vmul.f32 %v6810_v39, %v11266_v47 }
 0x1e2   : > { %v997_v34 = vmul.f32 0.0078125, %v899_v56  ;;  %v823_v22 = vmul.f32 %v8773_v23, %v8773_v23  ;;  %v1241_v33 = vmul.f32 %v8664_v30, %v1170_v50 }
 0x1e3   : > { %v1044_v60 = vadd.f32 1e-05, %v980_v58  ;;  %v8787_v41 = vpack.c.bf16 %v1311_v12, %v1310_v62  ;;  %v1258_v61 = vmul.f32 %v8664_v30, %v1187_v46 }
 0x1e4   : > { %v6812_v52 = vpop.eup %6811  ;;  %v1061_v54 = vadd.f32 1e-05, %v997_v34  ;;  %934 = vadd.xlane.f32.xlu1 %v823_v22  ;;  %v901_v57 = vpop.xlane.xlu0 %900  ;;  %v1312_v50 = vadd.f32 %v8668_v38, %v1241_v33 }
 0x1e5   : > { %v867_v17 = vpop.xlane.xlu1 %866  ;;  %v1171_v8 = vmul.f32 %v6812_v52, %v11267_v4  ;;  %6815 = vrsqrt.f32 %v1044_v60  ;;  %v998_v51 = vmul.f32 0.0078125, %v901_v57  ;;  %6363 = vmatpush3.bf16.xpose.msra.mxu0 %v8787_v41  ;;  %6646 = vmatpush3.bf16.xpose.msra.mxu1 %v8787_v41  ;;  %v1329_v26 = vadd.f32 %v8668_v38, %v1258_v61 }
 0x1e6   : > { %v981_v6 = vmul.f32 0.0078125, %v867_v17  ;;  %6817 = vrsqrt.f32 %v1061_v54  ;;  %v11268_v54 = vld [vmem:[#allocation28_spill] sm:$0xff] }
 0x1e7   : > { %v1242_v39 = vmul.f32 %v8664_v30, %v1171_v8  ;;  %v1062_v1 = vadd.f32 1e-05, %v998_v51  ;;  %v8797_v62 = vpack.c.bf16 %v1329_v26, %v1328_v48 }
 0x1e8   : > { %v1045_v56 = vadd.f32 1e-05, %v981_v6  ;;  %v869_v18 = vpop.xlane.xlu0 %868 }
 0x1e9   : > { %v903_v37 = vpop.xlane.xlu1 %902  ;;  %v1313_v58 = vadd.f32 %v8668_v38, %v1242_v39  ;;  %6819 = vrsqrt.f32 %v1062_v1  ;;  %v982_v34 = vmul.f32 0.0078125, %v869_v18  ;;  %6364 = vmatprep.subr.bf16.mxu0 %v8797_v62  ;;  %6639 = vmatprep.subr.bf16.mxu1 %v8797_v62  ;;  %v1463_v18 = vld [vmem:[%s11051_s5 + $0x8] sm:$0xff] }
 0x1ea   : > { %v999_v22 = vmul.f32 0.0078125, %v903_v37  ;;  %6821 = vrsqrt.f32 %v1045_v56 }
 0x1eb   : > { %v8803_v12 = vpack.c.bf16 %v1313_v58, %v1312_v50  ;;  %v6814_v47 = vpop.eup %6813  ;;  %v1046_v46 = vadd.f32 1e-05, %v982_v34  ;;  %v1462_v50 = vld [vmem:[%s11051_s5] sm:$0xff] }
 0x1ec   : > { %v1063_v63 = vadd.f32 1e-05, %v999_v22  ;;  %v937_v52 = vpop.xlane.xlu0 %936  ;;  %v1188_v57 = vmul.f32 %v6814_v47, %v11268_v54 }
 0x1ed   : > { %v871_v60 = vpop.xlane.xlu1 %870  ;;  %6823 = vrsqrt.f32 %v1046_v46  ;;  %v1016_v17 = vmul.f32 0.0078125, %v937_v52  ;;  %6365 = vmatpush3.bf16.xpose.msra.mxu0 %v8803_v12  ;;  %6647 = vmatpush3.bf16.xpose.msra.mxu1 %v8803_v12 }
 0x1ee   : > { %v983_v61 = vmul.f32 0.0078125, %v871_v60  ;;  %6825 = vrsqrt.f32 %v1063_v63  ;;  %v1259_v26 = vmul.f32 %v8664_v30, %v1188_v57 }
 0x1ef   : > { %v6816_v4 = vpop.eup %6815  ;;  %v1080_v8 = vadd.f32 1e-05, %v1016_v17  ;;  %v1464_v17 = vld [vmem:[%s11051_s5 + $0x10] sm:$0xff] }
 0x1f0   : > { %v1047_v33 = vadd.f32 1e-05, %v983_v61  ;;  %v6818_v51 = vpop.eup %6817  ;;  %v905_v6 = vpop.xlane.xlu0 %904  ;;  %v1172_v37 = vmul.f32 %v6816_v4, %v8476_v24  ;;  %v11269_v61 = vld [vmem:[#allocation30_spill] sm:$0xff] }
 0x1f1   : > { %v939_v48 = vpop.xlane.xlu1 %938  ;;  %6827 = vrsqrt.f32 %v1080_v8  ;;  %v1000_v39 = vmul.f32 0.0078125, %v905_v6  ;;  %v1189_v56 = vmul.f32 %v6818_v51, %v8469_v21  ;;  %v1330_v21 = vadd.f32 %v8668_v38, %v1259_v26 }
 0x1f2   : > { %v1017_v1 = vmul.f32 0.0078125, %v939_v48  ;;  %6829 = vrsqrt.f32 %v1047_v33  ;;  %v1243_v8 = vmul.f32 %v8664_v30, %v1172_v37  ;;  %v1471_v48 = vld [vmem:[%s11051_s5 + $0x48] sm:$0xff] }
 0x1f3   : > { %v6820_v58 = vpop.eup %6819  ;;  %v1064_v34 = vadd.f32 1e-05, %v1000_v39  ;;  %v1260_v47 = vmul.f32 %v8664_v30, %v1189_v56 }
 0x1f4   : > { %v1081_v22 = vadd.f32 1e-05, %v1017_v1  ;;  %v6822_v46 = vpop.eup %6821  ;;  %v941_v63 = vpop.xlane.xlu0 %940  ;;  %v1190_v60 = vmul.f32 %v6820_v58, %v8487_v5 }
 0x1f5   : > { %v907_v52 = vpop.xlane.xlu1 %906  ;;  %1533 = vperm.xlu1 %6724, %v1463_v18   ;;  %6831 = vrsqrt.f32 %v1064_v34  ;;  %v1018_v54 = vmul.f32 0.0078125, %v941_v63  ;;  %v1331_v57 = vadd.f32 %v8668_v38, %v1260_v47  ;;  %1528 = vperm.xlu0 %6723, %v1462_v50   ;;  %v1173_v4 = vmul.f32 %v6822_v46, %v11269_v61  ;;  %v1465_v34 = vld [vmem:[%s11051_s5 + $0x18] sm:$0xff] }
 0x1f6   : > { %v1001_v24 = vmul.f32 0.0078125, %v907_v52  ;;  %6833 = vrsqrt.f32 %v1081_v22  ;;  %v1261_v18 = vmul.f32 %v8664_v30, %v1190_v60  ;;  %v1314_v22 = vadd.f32 %v8668_v38, %v1243_v8 }
 0x1f7   : > { %v6824_v33 = vpop.eup %6823  ;;  %v1082_v51 = vadd.f32 1e-05, %v1018_v54  ;;  %v8826_v5 = vpack.c.bf16 %v1331_v57, %v1330_v21  ;;  %v1244_v56 = vmul.f32 %v8664_v30, %v1173_v4 }
 0x1f8   : > { %v1065_v6 = vadd.f32 1e-05, %v1001_v24  ;;  %v6826_v26 = vpop.eup %6825  ;;  %v909_v39 = vpop.xlane.xlu0 %908  ;;  %v1174_v46 = vmul.f32 %v6824_v33, %v8500_v28  ;;  %v1473_v28 = vld [vmem:[%s11051_s5 + $0x58] sm:$0xff] }
 0x1f9   : > { %v943_v1 = vpop.xlane.xlu1 %942  ;;  %1538 = vperm.xlu1 %6724, %v1464_v17   ;;  %6835 = vrsqrt.f32 %v1082_v51  ;;  %v1002_v50 = vmul.f32 0.0078125, %v909_v39  ;;  %6366 = vmatprep.subr.bf16.mxu0 %v8826_v5  ;;  %v1191_v58 = vmul.f32 %v6826_v26, %v8493_v20  ;;  %v1315_v47 = vadd.f32 %v8668_v38, %v1244_v56  ;;  %v1466_v51 = vld [vmem:[%s11051_s5 + $0x20] sm:$0xff] }
 0x1fa   : > { %6640 = vmatprep.subr.bf16.mxu1 %v8826_v5  ;;  %v1019_v37 = vmul.f32 0.0078125, %v943_v1  ;;  %6837 = vrsqrt.f32 %v1065_v6  ;;  %1573 = vperm.xlu0 %6723, %v1471_v48   ;;  %v1332_v17 = vadd.f32 %v8668_v38, %v1261_v18  ;;  %v1245_v6 = vmul.f32 %v8664_v30, %v1174_v46  ;;  %v1467_v46 = vld [vmem:[%s11051_s5 + $0x28] sm:$0xff] }
 0x1fb   : > { %v6828_v63 = vpop.eup %6827  ;;  %v1066_v52 = vadd.f32 1e-05, %v1002_v50  ;;  %v1262_v60 = vmul.f32 %v8664_v30, %v1191_v58  ;;  %v8843_v20 = vpack.c.bf16 %v1315_v47, %v1314_v22 }
 0x1fc   : > { %v1083_v21 = vadd.f32 1e-05, %v1019_v37  ;;  %v6830_v54 = vpop.eup %6829  ;;  %v945_v24 = vpop.xlane.xlu0 %944  ;;  %v1208_v61 = vmul.f32 %v6828_v63, %v8510_v9 }
 0x1fd   : > { %v911_v57 = vpop.xlane.xlu1 %910  ;;  %1543 = vperm.xlu1 %6724, %v1465_v34   ;;  %6839 = vrsqrt.f32 %v1066_v52  ;;  %v1020_v4 = vmul.f32 0.0078125, %v945_v24  ;;  %v1333_v33 = vadd.f32 %v8668_v38, %v1262_v60  ;;  %6367 = vmatpush3.bf16.xpose.msra.mxu0 %v8843_v20  ;;  %v1175_v9 = vmul.f32 %v6830_v54, %v8505_v29  ;;  %v1475_v29 = vld [vmem:[%s11051_s5 + $0x68] sm:$0xff] }
 0x1fe   : > { %v1003_v8 = vmul.f32 0.0078125, %v911_v57  ;;  %6841 = vrsqrt.f32 %v1083_v21  ;;  %6648 = vmatpush3.bf16.xpose.msra.mxu1 %v8843_v20  ;;  %1583 = vperm.xlu0 %6723, %v1473_v28   ;;  %v1279_v58 = vmul.f32 %v8664_v30, %v1208_v61  ;;  %v1316_v52 = vadd.f32 %v8668_v38, %v1245_v6  ;;  %v1468_v6 = vld [vmem:[%s11051_s5 + $0x30] sm:$0xff] }
 0x1ff   : > { %v6832_v48 = vpop.eup %6831  ;;  %v1084_v26 = vadd.f32 1e-05, %v1020_v4  ;;  %v8858_v1 = vpack.c.bf16 %v1333_v33, %v1332_v17  ;;  %v1246_v37 = vmul.f32 %v8664_v30, %v1175_v9 }
 0x200   : > { %v1067_v39 = vadd.f32 1e-05, %v1003_v8  ;;  %v6834_v56 = vpop.eup %6833  ;;  %v913_v18 = vpop.xlane.xlu0 %912  ;;  %v1192_v63 = vmul.f32 %v6832_v48, %v8515_v31  ;;  %v1350_v4 = vadd.f32 %v8668_v38, %v1279_v58  ;;  %v1477_v8 = vld [vmem:[%s11051_s5 + $0x78] sm:$0xff] }
 0x201   : > { %v947_v50 = vpop.xlane.xlu1 %946  ;;  %1548 = vperm.xlu1 %6724, %v1466_v51   ;;  %6843 = vrsqrt.f32 %v1084_v26  ;;  %v1004_v34 = vmul.f32 0.0078125, %v913_v18  ;;  %6368 = vmatprep.subr.bf16.mxu0 %v8858_v1  ;;  %v1209_v47 = vmul.f32 %v6834_v56, %v8520_v11  ;;  %v1317_v21 = vadd.f32 %v8668_v38, %v1246_v37  ;;  %v8878_v11 = vld [vmem:[%s11052_s6] sm:$0xff]  }
 0x202   : > { %6641 = vmatprep.subr.bf16.mxu1 %v8858_v1  ;;  %v1021_v22 = vmul.f32 0.0078125, %v947_v50  ;;  %6845 = vrsqrt.f32 %v1067_v39  ;;  %1593 = vperm.xlu0 %6723, %v1475_v29   ;;  %v1263_v26 = vmul.f32 %v8664_v30, %v1192_v63 }
 0x203   : > { %v6836_v60 = vpop.eup %6835  ;;  %v1068_v54 = vadd.f32 1e-05, %v1004_v34  ;;  %v1280_v57 = vmul.f32 %v8664_v30, %v1209_v47  ;;  %v8880_v28 = vpack.c.bf16 %v1317_v21, %v1316_v52 }
 0x204   : > { %v1085_v24 = vadd.f32 1e-05, %v1021_v22  ;;  %v6838_v17 = vpop.eup %6837  ;;  %v949_v61 = vpop.xlane.xlu0 %948  ;;  %v1210_v39 = vmul.f32 %v6836_v60, %v8526_v15  ;;  %v1334_v52 = vadd.f32 %v8668_v38, %v1263_v26  ;;  %v1470_v26 = vld [vmem:[%s11051_s5 + $0x40] sm:$0xff] }
 0x205   : > { %v915_v31 = vpop.xlane.xlu1 %914  ;;  %1553 = vperm.xlu1 %6724, %v1467_v46   ;;  %6847 = vrsqrt.f32 %v1068_v54  ;;  %v1022_v33 = vmul.f32 0.0078125, %v949_v61  ;;  %v1351_v9 = vadd.f32 %v8668_v38, %v1280_v57  ;;  %6369 = vmatpush3.bf16.xpose.msra.mxu0 %v8880_v28  ;;  %v1193_v48 = vmul.f32 %v6838_v17, %v8523_v7  ;;  %v1479_v7 = vld [vmem:[%s11051_s5 + $0x88] sm:$0xff] }
 0x206   : > { %v1005_v51 = vmul.f32 0.0078125, %v915_v31  ;;  %6849 = vrsqrt.f32 %v1085_v24  ;;  %6649 = vmatpush3.bf16.xpose.msra.mxu1 %v8880_v28  ;;  %6554 = vmatprep.subr.bf16.mxu0 %v8878_v11  ;;  %v1281_v60 = vmul.f32 %v8664_v30, %v1210_v39  ;;  %v8914_v54 = vld [vmem:[%s11050_s4 + $0x8] sm:$0xff]   ;;  %v1481_v39 = vld [vmem:[%s11051_s5 + $0x98] sm:$0xff] }
 0x207   : > { %v6840_v56 = vpop.eup %6839  ;;  %v1086_v18 = vadd.f32 1e-05, %v1022_v33  ;;  %v8895_v37 = vpack.c.bf16 %v1351_v9, %v1350_v4  ;;  %1603 = vperm.xlu0 %6723, %v1477_v8   ;;  %v1264_v47 = vmul.f32 %v8664_v30, %v1193_v48  ;;  %v8920_v61 = vld [vmem:[%s11050_s4 + $0xc8] sm:$0xff]  }
 0x208   : > { %v1069_v50 = vadd.f32 1e-05, %v1005_v51  ;;  %v6842_v58 = vpop.eup %6841  ;;  %v1194_v29 = vmul.f32 %v6840_v56, %v8538_v36  ;;  %v917_v34 = vpop.xlane.xlu0 %916  ;;  %v1469_v36 = vld [vmem:[%s11051_s5 + $0x38] sm:$0xff]  ;;  %v6742_v56 = vld [vmem:[%s11052_s6 + $0x8] sm:$0xff]  }
 0x209   : > { %v951_v22 = vpop.xlane.xlu1 %950  ;;  %1558 = vperm.xlu1 %6724, %v1468_v6   ;;  %6851 = vrsqrt.f32 %v1086_v18  ;;  %v1006_v15 = vmul.f32 0.0078125, %v917_v34  ;;  %6434 = vmatprep.subr.bf16.mxu1 %v8895_v37  ;;  %v1211_v63 = vmul.f32 %v6842_v58, %v8533_v25  ;;  %v1335_v21 = vadd.f32 %v8668_v38, %v1264_v47 }
 0x20a   : > { %v1023_v46 = vmul.f32 0.0078125, %v951_v22  ;;  %6853 = vrsqrt.f32 %v1069_v50  ;;  %v1265_v51 = vmul.f32 %v8664_v30, %v1194_v29 }
 0x20b   : > { %v6844_v24 = vpop.eup %6843  ;;  %v1070_v57 = vadd.f32 1e-05, %v1006_v15  ;;  %v1282_v25 = vmul.f32 %v8664_v30, %v1211_v63  ;;  %1613 = vperm.xlu0 %6723, %v1479_v7   ;;  %v8922_v8 = vpack.c.bf16 %v1335_v21, %v1334_v52 }
 0x20c   : > { %v1087_v17 = vadd.f32 1e-05, %v1023_v46  ;;  %v6846_v31 = vpop.eup %6845  ;;  %v953_v4 = vpop.xlane.xlu0 %952  ;;  %6371 = vmatmul.mubr.bf16.vlgmr.msra.gmra.mrb[0].mxu0 %v8637_v35  ;;  %v1336_v46 = vadd.f32 %v8668_v38, %v1265_v51 }
 0x20d   : > { %v919_v33 = vpop.xlane.xlu1 %918  ;;  %1563 = vperm.xlu1 %6724, %v1469_v36   ;;  %v1195_v9 = vmul.f32 %v6846_v31, %v8548_v27  ;;  %6855 = vrsqrt.f32 %v1070_v57  ;;  %v1024_v6 = vmul.f32 0.0078125, %v953_v4  ;;  %6419 = vmatmul.mubr.bf16.vlgmr.msra.gmra.mrb[0].mxu1 %v8650_v43  ;;  %v1352_v27 = vadd.f32 %v8668_v38, %v1281_v60  ;;  %v8962_v60 = vld [vmem:[%s11050_s4 + $0x10] sm:$0xff]  }
 0x20e   : > { %v1007_v48 = vmul.f32 0.0078125, %v919_v33  ;;  %6857 = vrsqrt.f32 %v1087_v17  ;;  %6435 = vmatpush3.bf16.xpose.msra.mxu1 %v8922_v8  ;;  %v1353_v35 = vadd.f32 %v8668_v38, %v1282_v25  ;;  %6372 = vmatprep.mubr.bf16.mxu0 %v8914_v54  ;;  %v1212_v43 = vmul.f32 %v6844_v24, %v8545_v32  ;;  %v8969_v31 = vld [vmem:[%s11050_s4 + $0xd0] sm:$0xff]  }
 0x20f   : > { %v6848_v18 = vpop.eup %6847  ;;  %v1088_v50 = vadd.f32 1e-05, %v1024_v6  ;;  %v1266_v29 = vmul.f32 %v8664_v30, %v1195_v9  ;;  %6555 = vmatpush3.bf16.msra.mxu0 %v8878_v11  ;;  %6420 = vmatprep.mubr.bf16.mxu1 %v8920_v61  ;;  %v1472_v11 = vld [vmem:[%s11051_s5 + $0x50] sm:$0xff] }
 0x210   : > { %v1071_v58 = vadd.f32 1e-05, %v1007_v48  ;;  %v6850_v34 = vpop.eup %6849  ;;  %v1196_v22 = vmul.f32 %v6848_v18, %v8556_v19  ;;  %v921_v47 = vpop.xlane.xlu0 %920  ;;  %v8946_v7 = vpack.c.bf16 %v1353_v35, %v1352_v27  ;;  %1623 = vperm.xlu0 %6723, %v1481_v39   ;;  %6556 = vmatprep.subr.bf16.mxu0 %v6742_v56  ;;  %v1483_v19 = vld [vmem:[%s11051_s5 + $0xa8] sm:$0xff]  ;;  %v1283_v21 = vmul.f32 %v8664_v30, %v1212_v43  ;;  %v1485_v27 = vld [vmem:[%s11051_s5 + $0xb8] sm:$0xff] }
 0x211   : > { %v955_v15 = vpop.xlane.xlu1 %954  ;;  %1568 = vperm.xlu1 %6724, %v1470_v26   ;;  %6859 = vrsqrt.f32 %v1088_v50  ;;  %v1008_v32 = vmul.f32 0.0078125, %v921_v47  ;;  %v1337_v36 = vadd.f32 %v8668_v38, %v1266_v29  ;;  %v1213_v52 = vmul.f32 %v6850_v34, %v8553_v14  ;;  %v6749_v14 = vld [vmem:[%s11052_s6 + $0x10] sm:$0xff]  }
 0x212   : > { %v1025_v63 = vmul.f32 0.0078125, %v955_v15  ;;  %6861 = vrsqrt.f32 %v1071_v58  ;;  %6436 = vmatprep.subr.bf16.mxu1 %v8946_v7  ;;  %v1267_v6 = vmul.f32 %v8664_v30, %v1196_v22  ;;  %v11270_v34 = vld [vmem:[#allocation31_spill] sm:$0xff] }
 0x213   : > { %v6852_v24 = vpop.eup %6851  ;;  %v1072_v57 = vadd.f32 1e-05, %v1008_v32  ;;  %v8964_v25 = vpack.c.bf16 %v1337_v36, %v1336_v46  ;;  %6557 = vmatpush3.bf16.msra.mxu0 %v6742_v56  ;;  %v1284_v9 = vmul.f32 %v8664_v30, %v1213_v52  ;;  %v1474_v56 = vld [vmem:[%s11051_s5 + $0x60] sm:$0xff]  ;;  %v1487_v52 = vld [vmem:[%s11051_s5 + $0xc8] sm:$0xff] }
 0x214   : > { %v1089_v17 = vadd.f32 1e-05, %v1025_v63  ;;  %v6854_v4 = vpop.eup %6853  ;;  %v957_v33 = vpop.xlane.xlu0 %956  ;;  %1633 = vperm.xlu0 %6723, %v1483_v19   ;;  %6373 = vmatmul.mubr.bf16.gmra.mrb[4].mxu0 %v8914_v54  ;;  %v1214_v43 = vmul.f32 %v6852_v24, %v8568_v42  ;;  %v1338_v32 = vadd.f32 %v8668_v38, %v1267_v6  ;;  %v6754_v42 = vld [vmem:[%s11052_s6 + $0x18] sm:$0xff]   ;;  %v1476_v19 = vld [vmem:[%s11051_s5 + $0x70] sm:$0xff] }
 0x215   : > { %v923_v51 = vpop.xlane.xlu1 %922  ;;  %1578 = vperm.xlu1 %6724, %v1472_v11   ;;  %v1197_v48 = vmul.f32 %v6854_v4, %v8563_v13  ;;  %6863 = vrsqrt.f32 %v1072_v57  ;;  %v1026_v26 = vmul.f32 0.0078125, %v957_v33  ;;  %6421 = vmatmul.mubr.bf16.gmra.mrb[4].mxu1 %v8920_v61  ;;  %v1354_v13 = vadd.f32 %v8668_v38, %v1283_v21  ;;  %v11271_v21 = vld [vmem:[#allocation32_spill] sm:$0xff] }
 0x216   : > { %v1009_v39 = vmul.f32 0.0078125, %v923_v51  ;;  %6865 = vrsqrt.f32 %v1089_v17  ;;  %6437 = vmatpush3.bf16.xpose.msra.mxu1 %v8964_v25  ;;  %v1355_v35 = vadd.f32 %v8668_v38, %v1284_v9  ;;  %6374 = vmatprep.mubr.bf16.mxu0 %v8962_v60  ;;  %v1285_v57 = vmul.f32 %v8664_v30, %v1214_v43  ;;  %v1478_v43 = vld [vmem:[%s11051_s5 + $0x80] sm:$0xff] }
 0x217   : > { %v6856_v61 = vpop.eup %6855  ;;  %v1090_v18 = vadd.f32 1e-05, %v1026_v26  ;;  %v1268_v58 = vmul.f32 %v8664_v30, %v1197_v48  ;;  %6422 = vmatprep.mubr.bf16.mxu1 %v8969_v31  ;;  %6558 = vmatprep.subr.bf16.mxu0 %v6749_v14  ;;  %v9021_v30 = vld [vmem:[#allocation4] ss:$0 sm:$0xff] }
 0x218   : > { %v1073_v50 = vadd.f32 1e-05, %v1009_v39  ;;  %v6858_v29 = vpop.eup %6857  ;;  %v1198_v22 = vmul.f32 %v6856_v61, %v11270_v34  ;;  %v925_v47 = vpop.xlane.xlu0 %924  ;;  %v8993_v15 = vpack.c.bf16 %v1355_v35, %v1354_v13  ;;  %1643 = vperm.xlu0 %6723, %v1485_v27   ;;  %6559 = vmatpush3.bf16.msra.mxu0 %v6749_v14  ;;  %v9019_v14 = vld [vmem:[%s11050_s4 + $0xd8] sm:$0xff]  }
 0x219   : > { %v959_v46 = vpop.xlane.xlu1 %958  ;;  %1588 = vperm.xlu1 %6724, %v1474_v56   ;;  %6867 = vrsqrt.f32 %v1090_v18  ;;  %v1010_v63 = vmul.f32 0.0078125, %v925_v47  ;;  %v1339_v11 = vadd.f32 %v8668_v38, %v1268_v58  ;;  %v1215_v24 = vmul.f32 %v6858_v29, %v11271_v21  ;;  %v9012_v38 = vld [vmem:[%s11050_s4 + $0x18] sm:$0xff]   ;;  %6560 = vmatprep.subr.bf16.mxu0 %v6754_v42  ;;  %v9035_v18 = vld [vmem:[#allocation6] ss:$0 sm:$0xff] }
 0x21a   : > { %v1027_v36 = vmul.f32 0.0078125, %v959_v46  ;;  %6869 = vrsqrt.f32 %v1073_v50  ;;  %6438 = vmatprep.subr.bf16.mxu1 %v8993_v15  ;;  %v1269_v39 = vmul.f32 %v9021_v30, %v1198_v22  ;;  %v11272_v56 = vld [vmem:[#allocation33_spill] sm:$0xff]  ;;  %v1356_v50 = vadd.f32 %v9035_v18, %v1285_v57 }
 0x21b   : > { %v6860_v17 = vpop.eup %6859  ;;  %v1074_v4 = vadd.f32 1e-05, %v1010_v63  ;;  %v9014_v51 = vpack.c.bf16 %v1339_v11, %v1338_v32  ;;  %v1286_v26 = vmul.f32 %v9021_v30, %v1215_v24  ;;  %v1489_v61 = vld [vmem:[%s11051_s5 + $0xd8] sm:$0xff] }
 0x21c   : > { %v1091_v33 = vadd.f32 1e-05, %v1027_v36  ;;  %v6862_v9 = vpop.eup %6861  ;;  %v961_v6 = vpop.xlane.xlu0 %960  ;;  %1653 = vperm.xlu0 %6723, %v1487_v52   ;;  %6375 = vmatmul.mubr.bf16.gmra.mrb[8].mxu0 %v8962_v60  ;;  %v11274_v63 = vld [vmem:[#allocation36_spill] sm:$0xff]  ;;  %v1340_v21 = vadd.f32 %v9035_v18, %v1269_v39 }
 0x21d   : > { %v927_v48 = vpop.xlane.xlu1 %926  ;;  %1598 = vperm.xlu1 %6724, %v1476_v19   ;;  %v1199_v27 = vmul.f32 %v6862_v9, %v11272_v56  ;;  %6871 = vrsqrt.f32 %v1074_v4  ;;  %v1028_v13 = vmul.f32 0.0078125, %v961_v6  ;;  %6423 = vmatmul.mubr.bf16.gmra.mrb[8].mxu1 %v8969_v31  ;;  %v1357_v58 = vadd.f32 %v9035_v18, %v1286_v26  ;;  %v11273_v31 = vld [vmem:[#allocation34_spill] sm:$0xff] }
 0x21e   : > { %v1011_v35 = vmul.f32 0.0078125, %v927_v48  ;;  %6873 = vrsqrt.f32 %v1091_v33  ;;  %6439 = vmatpush3.bf16.xpose.msra.mxu1 %v9014_v51  ;;  %6376 = vmatprep.mubr.bf16.mxu0 %v9012_v38  ;;  %v1216_v29 = vmul.f32 %v6860_v17, %v11273_v31  ;;  %v1491_v4 = vld [vmem:[%s11051_s5 + $0xe8] sm:$0xff]  ;;  %v9060_v48 = vld [vmem:[%s11050_s4 + $0x20] sm:$0xff]  }
 0x21f   : > { %v6864_v34 = vpop.eup %6863  ;;  %v1092_v22 = vadd.f32 1e-05, %v1028_v13  ;;  %v1270_v46 = vmul.f32 %v9021_v30, %v1199_v27  ;;  %6424 = vmatprep.mubr.bf16.mxu1 %v9019_v14  ;;  %6561 = vmatpush3.bf16.msra.mxu0 %v6754_v42  ;;  %v9044_v19 = vpack.c.bf16 %v1357_v58, %v1356_v50  ;;  %v1480_v42 = vld [vmem:[%s11051_s5 + $0x90] sm:$0xff]  ;;  %v6744_v13 = vld [vmem:[%s11050_s4 + $0xe0] sm:$0xff]  }
 0x220   : > { %v1075_v47 = vadd.f32 1e-05, %v1011_v35  ;;  %v6866_v32 = vpop.eup %6865  ;;  %v1200_v36 = vmul.f32 %v6864_v34, %v11274_v63  ;;  %v929_v11 = vpop.xlane.xlu0 %928  ;;  %1663 = vperm.xlu0 %6723, %v1489_v61   ;;  %v11275_v33 = vld [vmem:[#allocation35_spill] sm:$0xff]  ;;  %v1287_v6 = vmul.f32 %v9021_v30, %v1216_v29  ;;  %v11277_v31 = vld [vmem:[#allocation14_spill] sm:$0xff] }
 0x221   : > { %v963_v52 = vpop.xlane.xlu1 %962  ;;  %1608 = vperm.xlu1 %6724, %v1478_v43   ;;  %6875 = vrsqrt.f32 %v1092_v22  ;;  %v1012_v24 = vmul.f32 0.0078125, %v929_v11  ;;  %v1341_v17 = vadd.f32 %v9035_v18, %v1270_v46  ;;  %6440 = vmatprep.subr.bf16.mxu1 %v9044_v19  ;;  %v1217_v9 = vmul.f32 %v6866_v32, %v11275_v33  ;;  %v11276_v50 = vld [vmem:[#allocation15_spill] sm:$0xff]  ;;  %v1493_v46 = vld [vmem:[%s11051_s5 + $0xf8] sm:$0xff] }
 0x222   : > { %v1029_v57 = vmul.f32 0.0078125, %v963_v52  ;;  %6877 = vrsqrt.f32 %v1075_v47  ;;  %v1271_v22 = vmul.f32 %v9021_v30, %v1200_v36  ;;  %v1482_v47 = vld [vmem:[%s11051_s5 + $0xa0] sm:$0xff]  ;;  %v1358_v32 = vadd.f32 %v9035_v18, %v1287_v6  ;;  %v11279_v33 = vld [vmem:[#allocation16_spill] sm:$0xff] }
 0x223   : > { %v6868_v26 = vpop.eup %6867  ;;  %v1076_v39 = vadd.f32 1e-05, %v1012_v24  ;;  %v9062_v27 = vpack.c.bf16 %v1341_v17, %v1340_v21  ;;  %v1288_v61 = vmul.f32 %v9021_v30, %v1217_v9  ;;  %v11278_v21 = vld [vmem:[#allocation17_spill] sm:$0xff]  ;;  %v1484_v6 = vld [vmem:[%s11051_s5 + $0xb0] sm:$0xff] }
 0x224   : > { %v1093_v56 = vadd.f32 1e-05, %v1029_v57  ;;  %v6870_v35 = vpop.eup %6869  ;;  %v1218_v58 = vmul.f32 %v6868_v26, %v11276_v50  ;;  %1673 = vperm.xlu0 %6723, %v1491_v4   ;;  %6377 = vmatmul.mubr.bf16.gmra.mrb[12].mxu0 %v9012_v38  ;;  %v1495_v26 = vld [vmem:[%s11051_s5 + $0x108] sm:$0xff] }
 0x225   : > { %v931_v43 = vpop.xlane.xlu1 %930  ;;  %1618 = vperm.xlu1 %6724, %v1480_v42   ;;  %v1201_v29 = vmul.f32 %v6870_v35, %v11277_v31  ;;  %6879 = vrsqrt.f32 %v1076_v39  ;;  %6425 = vmatmul.mubr.bf16.gmra.mrb[12].mxu1 %v9019_v14  ;;  %v1359_v63 = vadd.f32 %v9035_v18, %v1288_v61  ;;  %v1342_v42 = vadd.f32 %v9035_v18, %v1271_v22  ;;  %v9101_v39 = vld [vmem:[%s11050_s4 + $0x28] sm:$0xff]  }
 0x226   : > { %v1013_v34 = vmul.f32 0.0078125, %v931_v43  ;;  %6881 = vrsqrt.f32 %v1093_v56  ;;  %6441 = vmatpush3.bf16.xpose.msra.mxu1 %v9062_v27  ;;  %6378 = vmatprep.mubr.bf16.mxu0 %v9060_v48  ;;  %v1289_v17 = vmul.f32 %v9021_v30, %v1218_v58  ;;  %v6746_v61 = vld [vmem:[%s11050_s4 + $0xe8] sm:$0xff]  }
 0x227   : > { %v6872_v36 = vpop.eup %6871  ;;  %v1272_v14 = vmul.f32 %v9021_v30, %v1201_v29  ;;  %6426 = vmatprep.mubr.bf16.mxu1 %v6744_v13  ;;  %v9085_v57 = vpack.c.bf16 %v1359_v63, %v1358_v32  ;;  %v11280_v29 = vld [vmem:[#allocation18_spill] sm:$0xff]  ;;  %v1497_v63 = vld [vmem:[%s11051_s5 + $0x118] sm:$0xff] }
 0x228   : > { %v1077_v11 = vadd.f32 1e-05, %v1013_v34  ;;  %v6874_v52 = vpop.eup %6873  ;;  %v1202_v24 = vmul.f32 %v6872_v36, %v11278_v21  ;;  %1683 = vperm.xlu0 %6723, %v1493_v46   ;;  %v1360_v58 = vadd.f32 %v9035_v18, %v1289_v17  ;;  %v1486_v32 = vld [vmem:[%s11051_s5 + $0xc0] sm:$0xff] }
 0x229   : > { %1628 = vperm.xlu1 %6724, %v1482_v47   ;;  %v1343_v4 = vadd.f32 %v9035_v18, %v1272_v14  ;;  %v1219_v9 = vmul.f32 %v6874_v52, %v11279_v33  ;;  %6442 = vmatprep.subr.bf16.mxu1 %v9085_v57  ;;  %v11281_v47 = vld [vmem:[#allocation19_spill] sm:$0xff]  ;;  %v11282_v21 = vld [vmem:[#allocation37_spill] sm:$0xff] }
 0x22a   : > { %6883 = vrsqrt.f32 %v1077_v11  ;;  %v1273_v31 = vmul.f32 %v9021_v30, %v1202_v24 }
 0x22b   : > { %v6876_v56 = vpop.eup %6875  ;;  %v9103_v35 = vpack.c.bf16 %v1343_v4, %v1342_v42  ;;  %v1290_v43 = vmul.f32 %v9021_v30, %v1219_v9  ;;  %v11283_v4 = vld [vmem:[#allocation20_spill] sm:$0xff] }
 0x22c   : > { %v6878_v50 = vpop.eup %6877  ;;  %1693 = vperm.xlu0 %6723, %v1495_v26   ;;  %6379 = vmatmul.mubr.bf16.gmra.mrb[16].mxu0 %v9060_v48  ;;  %v1220_v46 = vmul.f32 %v6876_v56, %v11281_v47  ;;  %v1344_v17 = vadd.f32 %v9035_v18, %v1273_v31  ;;  %v1499_v26 = vld [vmem:[%s11051_s5 + $0x128] sm:$0xff]  ;;  %v9144_v56 = vld [vmem:[%s11050_s4 + $0x30] sm:$0xff]  }
 0x22d   : > { %1638 = vperm.xlu1 %6724, %v1484_v6   ;;  %v1203_v34 = vmul.f32 %v6878_v50, %v11280_v29  ;;  %v1361_v22 = vadd.f32 %v9035_v18, %v1290_v43  ;;  %6427 = vmatmul.mubr.bf16.gmra.mrb[16].mxu1 %v6744_v13  ;;  %v6758_v13 = vld [vmem:[%s11052_s6 + $0x20] sm:$0xff]   ;;  %v1488_v6 = vld [vmem:[%s11051_s5 + $0xd0] sm:$0xff] }
 0x22e   : > { %6443 = vmatpush3.bf16.xpose.msra.mxu1 %v9103_v35  ;;  %6380 = vmatprep.mubr.bf16.mxu0 %v9101_v39  ;;  %v1291_v9 = vmul.f32 %v9021_v30, %v1220_v46  ;;  %v6748_v31 = vld [vmem:[%s11050_s4 + $0xf0] sm:$0xff]   ;;  %v11284_v29 = vld [vmem:[#allocation21_spill] sm:$0xff] }
 0x22f   : > { %v6880_v36 = vpop.eup %6879  ;;  %v9123_v11 = vpack.c.bf16 %v1361_v22, %v1360_v58  ;;  %v1274_v14 = vmul.f32 %v9021_v30, %v1203_v34  ;;  %6428 = vmatprep.mubr.bf16.mxu1 %v6746_v61  ;;  %6562 = vmatprep.subr.bf16.mxu0 %v6758_v13 }
 0x230   : > { %v6882_v52 = vpop.eup %6881  ;;  %v1204_v24 = vmul.f32 %v6880_v36, %v11282_v21  ;;  %1703 = vperm.xlu0 %6723, %v1497_v63   ;;  %6563 = vmatpush3.bf16.msra.mxu0 %v6758_v13  ;;  %v1362_v47 = vadd.f32 %v9035_v18, %v1291_v9  ;;  %v1501_v63 = vld [vmem:[%s11051_s5 + $0x138] sm:$0xff]  ;;  %v1503_v21 = vld [vmem:[%s11051_s5 + $0x148] sm:$0xff] }
 0x231   : > { %1648 = vperm.xlu1 %6724, %v1486_v32   ;;  %6444 = vmatprep.subr.bf16.mxu1 %v9123_v11  ;;  %v1345_v42 = vadd.f32 %v9035_v18, %v1274_v14  ;;  %v1221_v33 = vmul.f32 %v6882_v52, %v11283_v4  ;;  %v1490_v32 = vld [vmem:[%s11051_s5 + $0xe0] sm:$0xff]  ;;  %v1492_v52 = vld [vmem:[%s11051_s5 + $0xf0] sm:$0xff]  ;;  %v6761_v9 = vld [vmem:[%s11052_s6 + $0x28] sm:$0xff]  }
 0x232   : > { %v1275_v22 = vmul.f32 %v9021_v30, %v1204_v24  ;;  %v1494_v4 = vld [vmem:[%s11051_s5 + $0x100] sm:$0xff]  ;;  %6564 = vmatprep.subr.bf16.mxu0 %v6761_v9 }
 0x233   : > { %v9146_v50 = vpack.c.bf16 %v1345_v42, %v1344_v17  ;;  %v1292_v58 = vmul.f32 %v9021_v30, %v1221_v33  ;;  %v9182_v17 = vld [vmem:[%s11050_s4 + $0x38] sm:$0xff]  }
 0x234   : > { %v6884_v43 = vpop.eup %6883  ;;  %1713 = vperm.xlu0 %6723, %v1499_v26   ;;  %6381 = vmatmul.mubr.bf16.gmra.mrb[20].mxu0 %v9101_v39  ;;  %v1346_v13 = vadd.f32 %v9035_v18, %v1275_v22  ;;  %v6751_v42 = vld [vmem:[%s11050_s4 + $0xf8] sm:$0xff]   ;;  %v1507_v26 = vld [vmem:[%s11051_s5 + $0x168] sm:$0xff] }
 0x235   : > { %v1205_v34 = vmul.f32 %v6884_v43, %v11284_v29  ;;  %1658 = vperm.xlu1 %6724, %v1488_v6   ;;  %v1363_v46 = vadd.f32 %v9035_v18, %v1292_v58  ;;  %6429 = vmatmul.mubr.bf16.gmra.mrb[20].mxu1 %v6746_v61  ;;  %v1505_v33 = vld [vmem:[%s11051_s5 + $0x158] sm:$0xff]  ;;  %v1496_v6 = vld [vmem:[%s11051_s5 + $0x110] sm:$0xff]  ;;  %v9208_v43 = vld [vmem:[%s11050_s4 + $0x40] sm:$0xff]  }
 0x236   : > { %6445 = vmatpush3.bf16.xpose.msra.mxu1 %v9146_v50  ;;  %6382 = vmatprep.mubr.bf16.mxu0 %v9144_v56  ;;  %v6763_v58 = vld [vmem:[%s11052_s6 + $0x30] sm:$0xff]   ;;  %v1509_v29 = vld [vmem:[%s11051_s5 + $0x178] sm:$0xff] }
 0x237   : > { %v1276_v36 = vmul.f32 %v9021_v30, %v1205_v34  ;;  %v9166_v14 = vpack.c.bf16 %v1363_v46, %v1362_v47  ;;  %6430 = vmatprep.mubr.bf16.mxu1 %v6748_v31  ;;  %6565 = vmatpush3.bf16.msra.mxu0 %v6761_v9  ;;  %v9224_v34 = vld [vmem:[%s11050_s4] sm:$0xff]   ;;  %v6764_v22 = vld [vmem:[%s11052_s6 + $0x38] sm:$0xff]   ;;  %v1500_v47 = vld [vmem:[%s11051_s5 + $0x130] sm:$0xff] }
 0x238   : > { %1723 = vperm.xlu0 %6723, %v1501_v63   ;;  %6566 = vmatprep.subr.bf16.mxu0 %v6763_v58  ;;  %v1511_v46 = vld [vmem:[%s11051_s5 + $0x188] sm:$0xff]  ;;  %v1502_v63 = vld [vmem:[%s11051_s5 + $0x140] sm:$0xff]  ;;  %v9277_v9 = vld [vmem:[%s11050_s4 + $0x58] sm:$0xff]  }
 0x239   : > { %v1347_v61 = vadd.f32 %v9035_v18, %v1276_v36  ;;  %1668 = vperm.xlu1 %6724, %v1490_v32   ;;  %6446 = vmatprep.subr.bf16.mxu1 %v9166_v14  ;;  %v9239_v32 = vld [vmem:[%s11050_s4 + $0x48] sm:$0xff]   ;;  %v1513_v36 = vld [vmem:[%s11051_s5 + $0x198] sm:$0xff] }
 0x23b   : > { %v9177_v24 = vpack.c.bf16 %v1347_v61, %v1346_v13  ;;  %6567 = vmatpush3.bf16.msra.mxu0 %v6763_v58  ;;  %v1504_v13 = vld [vmem:[%s11051_s5 + $0x150] sm:$0xff]  ;;  %v1515_v61 = vld [vmem:[%s11051_s5 + $0x1a8] sm:$0xff] }
 0x23c   : > { %1733 = vperm.xlu0 %6723, %v1503_v21   ;;  %6383 = vmatmul.mubr.bf16.gmra.mrb[24].mxu0 %v9144_v56  ;;  %v1506_v21 = vld [vmem:[%s11051_s5 + $0x160] sm:$0xff]  ;;  %v1512_v58 = vld [vmem:[%s11051_s5 + $0x190] sm:$0xff] }
 0x23d   : > { %1678 = vperm.xlu1 %6724, %v1492_v52   ;;  %6431 = vmatmul.mubr.bf16.gmra.mrb[24].mxu1 %v6748_v31  ;;  %v1498_v31 = vld [vmem:[%s11051_s5 + $0x120] sm:$0xff]  ;;  %v9258_v52 = vld [vmem:[%s11050_s4 + $0x50] sm:$0xff]  }
 0x23e   : > { %6447 = vmatpush3.bf16.xpose.msra.mxu1 %v9177_v24  ;;  %6384 = vmatprep.mubr.bf16.mxu0 %v9182_v17 }
 0x23f   : > { %6432 = vmatprep.mubr.bf16.mxu1 %v6751_v42  ;;  %6568 = vmatprep.subr.bf16.mxu0 %v6764_v22 }
 0x240   : > { %1743 = vperm.xlu0 %6723, %v1505_v33   ;;  %6569 = vmatpush3.bf16.msra.mxu0 %v6764_v22  ;;  %v1519_v33 = vld [vmem:[%s11051_s5 + $0x1c8] sm:$0xff]  ;;  %v1514_v22 = vld [vmem:[%s11051_s5 + $0x1a0] sm:$0xff] }
 0x241   : > { %1688 = vperm.xlu1 %6724, %v1494_v4   ;;  %v1508_v4 = vld [vmem:[%s11051_s5 + $0x170] sm:$0xff] }
 0x244   : > { %1753 = vperm.xlu0 %6723, %v1507_v26   ;;  %6385 = vmatmul.mubr.bf16.gmra.mrb[28].mxu0 %v9182_v17  ;;  %v1521_v26 = vld [vmem:[%s11051_s5 + $0x1d8] sm:$0xff] }
 0x245   : > { %1698 = vperm.xlu1 %6724, %v1496_v6   ;;  %6433 = vmatmul.mubr.bf16.gmra.mrb[28].mxu1 %v6751_v42  ;;  %v1517_v42 = vld [vmem:[%s11051_s5 + $0x1b8] sm:$0xff]  ;;  %v1510_v6 = vld [vmem:[%s11051_s5 + $0x180] sm:$0xff] }
 0x246   : > { %6386 = vmatprep.mubr.bf16.mxu0 %v9208_v43  ;;  %6450 = vmatprep.mubr.bf16.mxu1 %v9224_v34 }
 0x248   : > { %1763 = vperm.xlu0 %6723, %v1509_v29   ;;  %v9296_v29 = vld [vmem:[%s11050_s4 + $0x60] sm:$0xff]  }
 0x249   : > { %1708 = vperm.xlu1 %6724, %v1498_v31   ;;  %v1523_v31 = vld [vmem:[%s11051_s5 + $0x1e8] sm:$0xff] }
 0x24c   : > { %1773 = vperm.xlu0 %6723, %v1511_v46   ;;  %6387 = vmatmul.mubr.bf16.gmra.mrb[32].mxu0 %v9208_v43 }
 0x24d   : > { %1718 = vperm.xlu1 %6724, %v1500_v47   ;;  %6388 = vmatprep.mubr.bf16.mxu0 %v9239_v32  ;;  %v1525_v47 = vld [vmem:[%s11051_s5 + $0x1f8] sm:$0xff] }
 0x250   : > { %1783 = vperm.xlu0 %6723, %v1513_v36   ;;  %v1516_v36 = vld [vmem:[%s11051_s5 + $0x1b0] sm:$0xff] }
 0x251   : > { %1728 = vperm.xlu1 %6724, %v1502_v63  }
 0x254   : > { %1793 = vperm.xlu0 %6723, %v1515_v61   ;;  %6389 = vmatmul.mubr.bf16.gmra.mrb[36].mxu0 %v9239_v32 }
 0x255   : > { %1738 = vperm.xlu1 %6724, %v1504_v13   ;;  %6390 = vmatprep.mubr.bf16.mxu0 %v9258_v52  ;;  %v9312_v13 = vld [vmem:[%s11050_s4 + $0x68] sm:$0xff]  }
 0x258   : > { %1803 = vperm.xlu0 %6723, %v1517_v42  }
 0x259   : > { %1748 = vperm.xlu1 %6724, %v1506_v21  }
 0x25c   : > { %1813 = vperm.xlu0 %6723, %v1519_v33   ;;  %6391 = vmatmul.mubr.bf16.gmra.mrb[40].mxu0 %v9258_v52 }
 0x25d   : > { %1758 = vperm.xlu1 %6724, %v1508_v4   ;;  %6392 = vmatprep.mubr.bf16.mxu0 %v9277_v9 }
 0x260   : > { %1823 = vperm.xlu0 %6723, %v1521_v26  }
 0x261   : > { %1768 = vperm.xlu1 %6724, %v1510_v6   ;;  %v1518_v6 = vld [vmem:[%s11051_s5 + $0x1c0] sm:$0xff] }
 0x264   : > { %1833 = vperm.xlu0 %6723, %v1523_v31   ;;  %6393 = vmatmul.mubr.bf16.gmra.mrb[44].mxu0 %v9277_v9 }
 0x265   : > { %1778 = vperm.xlu1 %6724, %v1512_v58   ;;  %6394 = vmatprep.mubr.bf16.mxu0 %v9296_v29 }
 0x268   : > { %v965_v46 = vpop.xlane.xlu0 %964  ;;  %1843 = vperm.xlu0 %6723, %v1525_v47   ;;  %v1520_v47 = vld [vmem:[%s11051_s5 + $0x1d0] sm:$0xff] }
 0x269   : > { %1788 = vperm.xlu1 %6724, %v1514_v22   ;;  %v1030_v63 = vmul.f32 0.0078125, %v965_v46  ;;  %v9325_v46 = vld [vmem:[%s11050_s4 + $0x70] sm:$0xff]  }
 0x26b   : > { %v1094_v61 = vadd.f32 1e-05, %v1030_v63 }
 0x26c   : > { %v933_v21 = vpop.xlane.xlu0 %932  ;;  %6395 = vmatmul.mubr.bf16.gmra.mrb[48].mxu0 %v9296_v29 }
 0x26d   : > { %v967_v42 = vpop.xlane.xlu1 %966  ;;  %1798 = vperm.xlu1 %6724, %v1516_v36   ;;  %6885 = vrsqrt.f32 %v1094_v61  ;;  %v1014_v4 = vmul.f32 0.0078125, %v933_v21  ;;  %6396 = vmatprep.mubr.bf16.mxu0 %v9312_v13  ;;  %v1522_v21 = vld [vmem:[%s11051_s5 + $0x1e0] sm:$0xff] }
 0x26e   : > { %v1031_v33 = vmul.f32 0.0078125, %v967_v42 }
 0x26f   : > { %v1078_v26 = vadd.f32 1e-05, %v1014_v4 }
 0x270   : > { %v1095_v58 = vadd.f32 1e-05, %v1031_v33 }
 0x271   : > { %v935_v31 = vpop.xlane.xlu1 %934  ;;  %1808 = vperm.xlu1 %6724, %v1518_v6   ;;  %6887 = vrsqrt.f32 %v1078_v26  ;;  %v1524_v26 = vld [vmem:[%s11051_s5 + $0x1f0] sm:$0xff] }
 0x272   : > { %v1015_v22 = vmul.f32 0.0078125, %v935_v31  ;;  %6889 = vrsqrt.f32 %v1095_v58  ;;  %v9347_v58 = vld [vmem:[%s11050_s4 + $0x78] sm:$0xff]  }
 0x274   : > { %v1079_v63 = vadd.f32 1e-05, %v1015_v22  ;;  %v9329_v61 = vpop.permute.xlu0 %1528  ;;  %6397 = vmatmul.mubr.bf16.gmra.mrb[52].mxu0 %v9312_v13 }
 0x275   : > { %v9327_v36 = vpop.permute.xlu1 %1533  ;;  %1818 = vperm.xlu1 %6724, %v1520_v47   ;;  %11286 = vst [vmem:[#allocation29_spill] sm:$0xff] %v9329_v61  ;;  %6398 = vmatprep.mubr.bf16.mxu0 %v9325_v46 }
 0x276   : > { %11285 = vst [vmem:[#allocation22_spill] sm:$0xff] %v9327_v36  ;;  %6891 = vrsqrt.f32 %v1079_v63 }
 0x277   : > { %v6886_v42 = vpop.eup %6885 }
 0x278   : > { %v1222_v33 = vmul.f32 %v6886_v42, %v8738_v2 }
 0x279   : > { %v9336_v4 = vpop.permute.xlu1 %1538  ;;  %1828 = vperm.xlu1 %6724, %v1522_v21   ;;  %v9339_v6 = vpop.permute.xlu0 %1573 }
 0x27a   : > { %11287 = vst [vmem:[#allocation23_spill] sm:$0xff] %v9336_v4  ;;  %11288 = vst [vmem:[#allocation24_spill] sm:$0xff] %v9339_v6  ;;  %v1293_v21 = vmul.f32 %v9021_v30, %v1222_v33  ;;  %v9369_v33 = vld [vmem:[%s11050_s4 + $0x80] sm:$0xff]  }
 0x27b   : > { %v6888_v31 = vpop.eup %6887 }
 0x27c   : > { %v6890_v22 = vpop.eup %6889  ;;  %v1206_v47 = vmul.f32 %v6888_v31, %v8753_v16  ;;  %6399 = vmatmul.mubr.bf16.gmra.mrb[56].mxu0 %v9325_v46 }
 0x27d   : > { %v9350_v63 = vpop.permute.xlu1 %1543  ;;  %1838 = vperm.xlu1 %6724, %v1524_v26   ;;  %v1223_v2 = vmul.f32 %v6890_v22, %v8756_v44  ;;  %6400 = vmatprep.mubr.bf16.mxu0 %v9347_v58  ;;  %v9357_v4 = vpop.permute.xlu0 %1583  ;;  %v1364_v26 = vadd.f32 %v9035_v18, %v1293_v21 }
 0x27e   : > { %11289 = vst [vmem:[#allocation26_spill] sm:$0xff] %v9350_v63  ;;  %11290 = vst [vmem:[#allocation25_spill] sm:$0xff] %v9357_v4  ;;  %v1277_v16 = vmul.f32 %v9021_v30, %v1206_v47 }
 0x27f   : > { %v1294_v6 = vmul.f32 %v9021_v30, %v1223_v2 }
 0x280   : > { %v6892_v42 = vpop.eup %6891  ;;  %v1348_v2 = vadd.f32 %v9035_v18, %v1277_v16 }
 0x281   : > { %v1207_v36 = vmul.f32 %v6892_v42, %v8773_v23  ;;  %v9361_v31 = vpop.permute.xlu1 %1548  ;;  %v1365_v63 = vadd.f32 %v9035_v18, %v1294_v6  ;;  %v9379_v6 = vpop.permute.xlu0 %1593 }
 0x282   : > { %11291 = vst [vmem:[#allocation27_spill] sm:$0xff] %v9361_v31  ;;  %11294 = vst [vmem:[#allocation31_spill] sm:$0xff] %v9379_v6 }
 0x283   : > { %v1278_v44 = vmul.f32 %v9021_v30, %v1207_v36  ;;  %v9371_v22 = vpack.c.bf16 %v1365_v63, %v1364_v26  ;;  %v9407_v26 = vld [vmem:[%s11050_s4 + $0x90] sm:$0xff]  }
 0x284   : > { %6401 = vmatmul.mubr.bf16.gmra.mrb[60].mxu0 %v9347_v58 }
 0x285   : > { %11292 = vst [vmem:[#allocation28_spill] sm:$0xff] %v9371_v22  ;;  %v1349_v23 = vadd.f32 %v9035_v18, %v1278_v44  ;;  %v9375_v47 = vpop.permute.xlu1 %1553  ;;  %6448 = vmatprep.subr.bf16.mxu1 %v9371_v22  ;;  %6402 = vmatprep.mubr.bf16.mxu0 %v9369_v33  ;;  %v9390_v18 = vld [vmem:[%s11050_s4 + $0x88] sm:$0xff]  }
 0x286   : > { %11293 = vst [vmem:[#allocation30_spill] sm:$0xff] %v9375_v47  ;;  %v9392_v63 = vpop.permute.xlu0 %1603  ;;  %v9469_v47 = vld [vmem:[%s11050_s4 + $0xb0] sm:$0xff]  }
 0x287   : > { %v9381_v30 = vpack.c.bf16 %v1349_v23, %v1348_v2  ;;  %11296 = vst [vmem:[#allocation33_spill] sm:$0xff] %v9392_v63  ;;  %v9422_v23 = vld [vmem:[%s11050_s4 + $0x98] sm:$0xff]  }
 0x289   : > { %6449 = vmatpush3.bf16.xpose.msra.mxu1 %v9381_v30  ;;  %v9385_v36 = vpop.permute.xlu1 %1558 }
 0x28a   : > { %11295 = vst [vmem:[#allocation32_spill] sm:$0xff] %v9385_v36  ;;  %v9402_v16 = vpop.permute.xlu0 %1613 }
 0x28b   : > { %11299 = vst [vmem:[#allocation35_spill] sm:$0xff] %v9402_v16 }
 0x28c   : > { %6403 = vmatmul.mubr.bf16.gmra.mrb[64].mxu0 %v9369_v33 }
 0x28d   : > { %v9394_v21 = vpop.permute.xlu1 %1563  ;;  %6404 = vmatprep.mubr.bf16.mxu0 %v9390_v18 }
 0x28e   : > { %11297 = vst [vmem:[#allocation34_spill] sm:$0xff] %v9394_v21 }
 0x290   : > { %6451 = vmatmul.mubr.bf16.vlgmr.msra.gmra.mrb[32].mxu1 %v9224_v34  ;;  %v9414_v34 = vpop.permute.xlu0 %1623 }
 0x291   : > { %6452 = vmatprep.mubr.bf16.mxu1 %v8914_v54  ;;  %v9400_v42 = vpop.permute.xlu1 %1568  ;;  %11301 = vst [vmem:[#allocation14_spill] sm:$0xff] %v9414_v34 }
 0x292   : > { %11298 = vst [vmem:[#allocation36_spill] sm:$0xff] %v9400_v42  ;;  %v9454_v42 = vld [vmem:[%s11050_s4 + $0xa8] sm:$0xff]  }
 0x294   : > { %6405 = vmatmul.mubr.bf16.gmra.mrb[68].mxu0 %v9390_v18  ;;  %v9427_v6 = vpop.permute.xlu0 %1633 }
 0x295   : > { %v9409_v44 = vpop.permute.xlu1 %1578  ;;  %6406 = vmatprep.mubr.bf16.mxu0 %v9407_v26  ;;  %11304 = vst [vmem:[#allocation18_spill] sm:$0xff] %v9427_v6 }
 0x296   : > { %11300 = vst [vmem:[#allocation15_spill] sm:$0xff] %v9409_v44 }
 0x298   : > { %6453 = vmatmul.mubr.bf16.gmra.mrb[36].mxu1 %v8914_v54  ;;  %v9439_v4 = vpop.permute.xlu0 %1643 }
 0x299   : > { %6454 = vmatprep.mubr.bf16.mxu1 %v8962_v60  ;;  %v9417_v2 = vpop.permute.xlu1 %1588  ;;  %11306 = vst [vmem:[#allocation37_spill] sm:$0xff] %v9439_v4 }
 0x29a   : > { %11302 = vst [vmem:[#allocation17_spill] sm:$0xff] %v9417_v2  ;;  %v9437_v2 = vld [vmem:[%s11050_s4 + $0xa0] sm:$0xff]  }
 0x29c   : > { %6407 = vmatmul.mubr.bf16.gmra.mrb[72].mxu0 %v9407_v26  ;;  %v9449_v44 = vpop.permute.xlu0 %1653 }
 0x29d   : > { %v9424_v63 = vpop.permute.xlu1 %1598  ;;  %6408 = vmatprep.mubr.bf16.mxu0 %v9422_v23  ;;  %11309 = vst [vmem:[#allocation38_spill] sm:$0xff] %v9449_v44 }
 0x29e   : > { %11303 = vst [vmem:[#allocation16_spill] sm:$0xff] %v9424_v63 }
 0x2a0   : > { %6455 = vmatmul.mubr.bf16.gmra.mrb[40].mxu1 %v8962_v60 }
 0x2a1   : > { %6456 = vmatprep.mubr.bf16.mxu1 %v9012_v38  ;;  %v9432_v54 = vpop.permute.xlu1 %1608 }
 0x2a2   : > { %11305 = vst [vmem:[#allocation19_spill] sm:$0xff] %v9432_v54 }
 0x2a4   : > { %6409 = vmatmul.mubr.bf16.gmra.mrb[76].mxu0 %v9422_v23 }
 0x2a5   : > { %v9441_v63 = vpop.permute.xlu1 %1618  ;;  %6410 = vmatprep.mubr.bf16.mxu0 %v9437_v2 }
 0x2a6   : > { %11307 = vst [vmem:[#allocation20_spill] sm:$0xff] %v9441_v63 }
 0x2a8   : > { %6457 = vmatmul.mubr.bf16.gmra.mrb[44].mxu1 %v9012_v38  ;;  %v9461_v38 = vpop.permute.xlu0 %1663 }
 0x2a9   : > { %6458 = vmatprep.mubr.bf16.mxu1 %v9060_v48  ;;  %v9447_v60 = vpop.permute.xlu1 %1628  ;;  %11311 = vst [vmem:[#allocation40_spill] sm:$0xff] %v9461_v38  ;;  %v9484_v38 = vld [vmem:[%s11050_s4 + $0xb8] sm:$0xff]  }
 0x2aa   : > { %11308 = vst [vmem:[#allocation21_spill] sm:$0xff] %v9447_v60 }
 0x2ac   : > { %6411 = vmatmul.mubr.bf16.gmra.mrb[80].mxu0 %v9437_v2  ;;  %v9474_v61 = vpop.permute.xlu0 %1673 }
 0x2ad   : > { %v9456_v21 = vpop.permute.xlu1 %1638  ;;  %6412 = vmatprep.mubr.bf16.mxu0 %v9454_v42  ;;  %11314 = vst [vmem:[#allocation43_spill] sm:$0xff] %v9474_v61 }
 0x2ae   : > { %11310 = vst [vmem:[#allocation39_spill] sm:$0xff] %v9456_v21 }
 0x2b0   : > { %6459 = vmatmul.mubr.bf16.gmra.mrb[48].mxu1 %v9060_v48  ;;  %v9486_v22 = vpop.permute.xlu0 %1683 }
 0x2b1   : > { %6460 = vmatprep.mubr.bf16.mxu1 %v9101_v39  ;;  %v9464_v36 = vpop.permute.xlu1 %1648  ;;  %11316 = vst [vmem:[#allocation45_spill] sm:$0xff] %v9486_v22 }
 0x2b2   : > { %11312 = vst [vmem:[#allocation41_spill] sm:$0xff] %v9464_v36 }
 0x2b4   : > { %6413 = vmatmul.mubr.bf16.gmra.mrb[84].mxu0 %v9454_v42 }
 0x2b5   : > { %v9471_v31 = vpop.permute.xlu1 %1658  ;;  %6414 = vmatprep.mubr.bf16.mxu0 %v9469_v47 }
 0x2b6   : > { %11313 = vst [vmem:[#allocation42_spill] sm:$0xff] %v9471_v31 }
 0x2b8   : > { %6461 = vmatmul.mubr.bf16.gmra.mrb[52].mxu1 %v9101_v39  ;;  %v9494_v39 = vpop.permute.xlu0 %1693 }
 0x2b9   : > { %6462 = vmatprep.mubr.bf16.mxu1 %v9144_v56  ;;  %v9479_v48 = vpop.permute.xlu1 %1668  ;;  %11318 = vst [vmem:[#allocation47_spill] sm:$0xff] %v9494_v39 }
 0x2ba   : > { %11315 = vst [vmem:[#allocation44_spill] sm:$0xff] %v9479_v48 }
 0x2bc   : > { %6415 = vmatmul.mubr.bf16.gmra.mrb[88].mxu0 %v9469_v47  ;;  %v9501_v22 = vpop.permute.xlu0 %1703 }
 0x2bd   : > { %v9488_v31 = vpop.permute.xlu1 %1678  ;;  %6416 = vmatprep.mubr.bf16.mxu0 %v9484_v38  ;;  %11320 = vst [vmem:[#allocation49_spill] sm:$0xff] %v9501_v22 }
 0x2be   : > { %11317 = vst [vmem:[#allocation46_spill] sm:$0xff] %v9488_v31 }
 0x2c0   : > { %6463 = vmatmul.mubr.bf16.gmra.mrb[56].mxu1 %v9144_v56  ;;  %v9507_v56 = vpop.permute.xlu0 %1713 }
 0x2c1   : > { %6464 = vmatprep.mubr.bf16.mxu1 %v9182_v17  ;;  %v9496_v61 = vpop.permute.xlu1 %1688  ;;  %11322 = vst [vmem:[#allocation51_spill] sm:$0xff] %v9507_v56 }
 0x2c2   : > { %11319 = vst [vmem:[#allocation48_spill] sm:$0xff] %v9496_v61 }
 0x2c4   : > { %6417 = vmatmul.mubr.bf16.gmra.mrb[92].mxu0 %v9484_v38 }
 0x2c5   : > { %6570 = vmatprep.mubr.bf16.mxu0 %v8688_v59  ;;  %v9503_v31 = vpop.permute.xlu1 %1698  ;;  %v9514_v59 = vpop.permute.xlu0 %1723 }
 0x2c6   : > { %11321 = vst [vmem:[#allocation50_spill] sm:$0xff] %v9503_v31  ;;  %11324 = vst [vmem:[#allocation53_spill] sm:$0xff] %v9514_v59 }
 0x2c8   : > { %6465 = vmatmul.mubr.bf16.gmra.mrb[60].mxu1 %v9182_v17 }
 0x2c9   : > { %6466 = vmatprep.mubr.bf16.mxu1 %v9208_v43  ;;  %v9509_v48 = vpop.permute.xlu1 %1708 }
 0x2ca   : > { %11323 = vst [vmem:[#allocation52_spill] sm:$0xff] %v9509_v48 }
 0x2cc   : > { %6571 = vmatmul.mubr.bf16.vlgmr.msra.gmra.mrb[96].mxu0 %v8708_v40  ;;  %v9522_v40 = vpop.permute.xlu0 %1733 }
 0x2cd   : > { %6574 = vmatprep.mubr.bf16.mxu0 %v8728_v55  ;;  %v9516_v17 = vpop.permute.xlu1 %1718  ;;  %11326 = vst [vmem:[#allocation55_spill] sm:$0xff] %v9522_v40 }
 0x2ce   : > { %11325 = vst [vmem:[#allocation54_spill] sm:$0xff] %v9516_v17 }
 0x2d0   : > { %6467 = vmatmul.mubr.bf16.gmra.mrb[64].mxu1 %v9208_v43  ;;  %v9529_v55 = vpop.permute.xlu0 %1743 }
 0x2d1   : > { %6468 = vmatprep.mubr.bf16.mxu1 %v9239_v32  ;;  %v9524_v56 = vpop.permute.xlu1 %1728  ;;  %11328 = vst [vmem:[#allocation57_spill] sm:$0xff] %v9529_v55 }
 0x2d2   : > { %11327 = vst [vmem:[#allocation56_spill] sm:$0xff] %v9524_v56 }
 0x2d4   : > { %6575 = vmatmul.mubr.bf16.gmra.mrb[100].mxu0 %v8758_v53 }
 0x2d5   : > { %6578 = vmatprep.mubr.bf16.mxu0 %v8787_v41  ;;  %v9531_v43 = vpop.permute.xlu1 %1738 }
 0x2d6   : > { %11329 = vst [vmem:[#allocation58_spill] sm:$0xff] %v9531_v43 }
 0x2d8   : > { %6469 = vmatmul.mubr.bf16.gmra.mrb[68].mxu1 %v9239_v32 }
 0x2d9   : > { %6470 = vmatprep.mubr.bf16.mxu1 %v9258_v52  ;;  %v9547_v55 = vpop.permute.xlu1 %1748 }
 0x2da   : > { %11335 = vst [vmem:[#allocation64_spill] sm:$0xff] %v9547_v55 }
 0x2dc   : > { %6579 = vmatmul.mubr.bf16.gmra.mrb[104].mxu0 %v8803_v12 }
 0x2dd   : > { %6582 = vmatprep.mubr.bf16.mxu0 %v8843_v20 }
 0x2df   : > { %v9534_v53 = vpop.f32.mrb[0].mxu0 }
 0x2e0   : > { %6471 = vmatmul.mubr.bf16.gmra.mrb[72].mxu1 %v9258_v52  ;;  %11330 = vst [vmem:[#allocation59_spill] sm:$0xff] %v9534_v53  ;;  %v2312_v41 = vpop.f32.mrb[0].mxu1  ;;  %v9536_v32 = vpop.f32.mrb[1].mxu0 }
 0x2e1   : > { %6472 = vmatprep.mubr.bf16.mxu1 %v9277_v9  ;;  %11331 = vst [vmem:[#allocation60_spill] sm:$0xff] %v9536_v32  ;;  %v2314_v40 = vpop.f32.mrb[1].mxu1  ;;  %v9538_v59 = vpop.f32.mrb[2].mxu0 }
 0x2e2   : > { %11332 = vst [vmem:[#allocation61_spill] sm:$0xff] %v9538_v59  ;;  %v2316_v56 = vpop.f32.mrb[2].mxu1  ;;  %v9540_v12 = vpop.f32.mrb[3].mxu0 }
 0x2e3   : > { %11333 = vst [vmem:[#allocation62_spill] sm:$0xff] %v9540_v12  ;;  %v2318_v20 = vpop.f32.mrb[3].mxu1  ;;  %v9545_v52 = vpop.permute.xlu0 %1753 }
 0x2e4   : > { %6583 = vmatmul.mubr.bf16.gmra.mrb[108].mxu0 %v8880_v28  ;;  %11334 = vst [vmem:[#allocation63_spill] sm:$0xff] %v9545_v52  ;;  %v9563_v52 = vpop.permute.xlu1 %1758 }
 0x2e5   : > { %6586 = vmatprep.mubr.bf16.mxu0 %v8677_v45  ;;  %11341 = vst [vmem:[#allocation70_spill] sm:$0xff] %v9563_v52 }
 0x2e7   : > { %v9550_v43 = vpop.f32.mrb[4].mxu0 }
 0x2e8   : > { %6473 = vmatmul.mubr.bf16.gmra.mrb[76].mxu1 %v9277_v9  ;;  %11336 = vst [vmem:[#allocation65_spill] sm:$0xff] %v9550_v43  ;;  %v2322_v17 = vpop.f32.mrb[4].mxu1  ;;  %v9552_v59 = vpop.f32.mrb[5].mxu0 }
 0x2e9   : > { %6474 = vmatprep.mubr.bf16.mxu1 %v9296_v29  ;;  %11337 = vst [vmem:[#allocation66_spill] sm:$0xff] %v9552_v59  ;;  %v2324_v32 = vpop.f32.mrb[5].mxu1  ;;  %v9554_v12 = vpop.f32.mrb[6].mxu0 }
 0x2ea   : > { %11338 = vst [vmem:[#allocation67_spill] sm:$0xff] %v9554_v12  ;;  %v2326_v53 = vpop.f32.mrb[6].mxu1  ;;  %v9556_v28 = vpop.f32.mrb[7].mxu0 }
 0x2eb   : > { %11339 = vst [vmem:[#allocation68_spill] sm:$0xff] %v9556_v28  ;;  %v2328_v45 = vpop.f32.mrb[7].mxu1  ;;  %v9561_v9 = vpop.permute.xlu0 %1763 }
 0x2ec   : > { %6587 = vmatmul.mubr.bf16.gmra.mrb[112].mxu0 %v8697_v3  ;;  %11340 = vst [vmem:[#allocation69_spill] sm:$0xff] %v9561_v9  ;;  %v9583_v52 = vpop.permute.xlu1 %1768 }
 0x2ed   : > { %6590 = vmatprep.mubr.bf16.mxu0 %v8717_v0  ;;  %11347 = vst [vmem:[#allocation76_spill] sm:$0xff] %v9583_v52 }
 0x2ef   : > { %v9566_v55 = vpop.f32.mrb[8].mxu0  ;;  %v9580_v9 = vpop.permute.xlu0 %1773 }
 0x2f0   : > { %6475 = vmatmul.mubr.bf16.gmra.mrb[80].mxu1 %v9296_v29  ;;  %11342 = vst [vmem:[#allocation71_spill] sm:$0xff] %v9566_v55  ;;  %v9568_v59 = vpop.f32.mrb[8].mxu1  ;;  %v9570_v12 = vpop.f32.mrb[9].mxu0  ;;  %11346 = vst [vmem:[#allocation75_spill] sm:$0xff] %v9580_v9 }
 0x2f1   : > { %6476 = vmatprep.mubr.bf16.mxu1 %v9312_v13  ;;  %11343 = vst [vmem:[#allocation72_spill] sm:$0xff] %v9570_v12  ;;  %v9572_v28 = vpop.f32.mrb[9].mxu1  ;;  %v9574_v43 = vpop.f32.mrb[10].mxu0 }
 0x2f2   : > { %11344 = vst [vmem:[#allocation73_spill] sm:$0xff] %v9574_v43  ;;  %v2336_v3 = vpop.f32.mrb[10].mxu1  ;;  %v9576_v0 = vpop.f32.mrb[11].mxu0  ;;  %v2317_v43 = vadd.f32 %v2316_v56, %v9580_v9 }
 0x2f3   : > { %11345 = vst [vmem:[#allocation74_spill] sm:$0xff] %v9576_v0  ;;  %v2338_v29 = vpop.f32.mrb[11].mxu1  ;;  %v9606_v56 = vpop.permute.xlu0 %1783 }
 0x2f4   : > { %6591 = vmatmul.mubr.bf16.gmra.mrb[116].mxu0 %v8740_v10  ;;  %v2319_v10 = vadd.f32 %v2318_v20, %v9580_v9  ;;  %v5763_v39 = vmul.f32 -1.442695, %v2317_v43  ;;  %11352 = vst [vmem:[#allocation81_spill] sm:$0xff] %v9606_v56  ;;  %v2315_v20 = vadd.f32 %v2314_v40, %v9583_v52  ;;  %v9611_v9 = vpop.permute.xlu1 %1778 }
 0x2f5   : > { %6594 = vmatprep.mubr.bf16.mxu0 %v8775_v49  ;;  %11353 = vst [vmem:[#allocation82_spill] sm:$0xff] %v9611_v9 }
 0x2f6   : > { %6893 = vpow2.f32 %v5763_v39  ;;  %v5760_v40 = vmul.f32 -1.442695, %v2315_v20 }
 0x2f7   : > { %v9586_v12 = vpop.f32.mrb[12].mxu0  ;;  %v9634_v61 = vpop.permute.xlu0 %1793 }
 0x2f8   : > { %6477 = vmatmul.mubr.bf16.gmra.mrb[84].mxu1 %v9312_v13  ;;  %11348 = vst [vmem:[#allocation77_spill] sm:$0xff] %v9586_v12  ;;  %v9588_v55 = vpop.f32.mrb[12].mxu1  ;;  %v9591_v0 = vpop.f32.mrb[13].mxu0  ;;  %v2313_v12 = vadd.f32 %v2312_v41, %v9583_v52  ;;  %v2327_v41 = vadd.f32 %v2326_v53, %v9606_v56  ;;  %11357 = vst [vmem:[#allocation86_spill] sm:$0xff] %v9634_v61  ;;  %v2337_v20 = vadd.f32 %v2336_v3, %v9634_v61 }
 0x2f9   : > { %6478 = vmatprep.mubr.bf16.mxu1 %v9325_v46  ;;  %11349 = vst [vmem:[#allocation78_spill] sm:$0xff] %v9591_v0  ;;  %v9593_v48 = vpop.f32.mrb[13].mxu1  ;;  %v9596_v49 = vpop.f32.mrb[14].mxu0  ;;  %v5764_v0 = vmul.f32 -1.442695, %v2319_v10 }
 0x2fa   : > { %11350 = vst [vmem:[#allocation79_spill] sm:$0xff] %v9596_v49  ;;  %v9598_v22 = vpop.f32.mrb[14].mxu1  ;;  %v9600_v13 = vpop.f32.mrb[15].mxu0  ;;  %v5771_v39 = vmul.f32 -1.442695, %v2327_v41  ;;  %v2339_v41 = vadd.f32 %v2338_v29, %v9634_v61 }
 0x2fb   : > { %11351 = vst [vmem:[#allocation80_spill] sm:$0xff] %v9600_v13  ;;  %v9602_v31 = vpop.f32.mrb[15].mxu1  ;;  %v5759_v13 = vmul.f32 -1.442695, %v2313_v12  ;;  %6895 = vpow2.f32 %v5764_v0 }
 0x2fc   : > { %6595 = vmatmul.mubr.bf16.gmra.mrb[120].mxu0 %v8797_v62  ;;  %v5780_v61 = vmul.f32 -1.442695, %v2339_v41 }
 0x2fd   : > { %6598 = vmatprep.mubr.bf16.mxu0 %v8826_v5  ;;  %6897 = vpow2.f32 %v5759_v13 }
 0x2fe   : > { %6899 = vpow2.f32 %v5760_v40 }
 0x2ff   : > { %v9614_v49 = vpop.f32.mrb[16].mxu0  ;;  %6901 = vpow2.f32 %v5771_v39 }
 0x300   : > { %6479 = vmatmul.mubr.bf16.gmra.mrb[88].mxu1 %v9325_v46  ;;  %11354 = vst [vmem:[#allocation83_spill] sm:$0xff] %v9614_v49  ;;  %v9617_v62 = vpop.f32.mrb[16].mxu1  ;;  %v9619_v43 = vpop.f32.mrb[17].mxu0  ;;  %v2329_v46 = vadd.f32 %v2328_v45, %v9606_v56  ;;  %v2323_v49 = vadd.f32 %v2322_v17, %v9611_v9 }
 0x301   : > { %6480 = vmatprep.mubr.bf16.mxu1 %v9347_v58  ;;  %11355 = vst [vmem:[#allocation84_spill] sm:$0xff] %v9619_v43  ;;  %v9621_v5 = vpop.f32.mrb[17].mxu1  ;;  %v9623_v10 = vpop.f32.mrb[18].mxu0  ;;  %v2325_v43 = vadd.f32 %v2324_v32, %v9611_v9 }
 0x302   : > { %v9626_v52 = vpop.f32.mrb[18].mxu1  ;;  %v9628_v12 = vpop.f32.mrb[19].mxu0  ;;  %v5772_v45 = vmul.f32 -1.442695, %v2329_v46  ;;  %v5767_v0 = vmul.f32 -1.442695, %v2323_v49 }
 0x303   : > { %11356 = vst [vmem:[#allocation85_spill] sm:$0xff] %v9628_v12  ;;  %v9631_v53 = vpop.f32.mrb[19].mxu1  ;;  %v9640_v17 = vpop.permute.xlu1 %1788  ;;  %v5768_v13 = vmul.f32 -1.442695, %v2325_v43  ;;  %v5779_v43 = vmul.f32 -1.442695, %v2337_v20 }
 0x304   : > { %6599 = vmatmul.mubr.bf16.gmra.mrb[124].mxu0 %v8858_v1  ;;  %11358 = vst [vmem:[#allocation87_spill] sm:$0xff] %v9640_v17  ;;  %6903 = vpow2.f32 %v5772_v45  ;;  %v6894_v49 = vpop.eup %6893  ;;  %v2333_v56 = vadd.f32 %v9568_v59, %v9640_v17  ;;  %v9663_v45 = vpop.permute.xlu0 %1803 }
 0x305   : > { %6602 = vmatprep.mubr.bf16.mxu0 %v8922_v8  ;;  %6905 = vpow2.f32 %v5767_v0  ;;  %v6896_v29 = vpop.eup %6895  ;;  %11363 = vst [vmem:[#allocation92_spill] sm:$0xff] %v9663_v45  ;;  %v2335_v0 = vadd.f32 %v9572_v28, %v9640_v17 }
 0x306   : > { %6907 = vpow2.f32 %v5768_v13  ;;  %v3539_v20 = vadd.f32 1.0, %v6896_v29  ;;  %v5775_v41 = vmul.f32 -1.442695, %v2333_v56 }
 0x307   : > { %v9643_v32 = vpop.f32.mrb[20].mxu0  ;;  %v6898_v9 = vpop.eup %6897  ;;  %6909 = vpow2.f32 %v5779_v43 }
 0x308   : > { %6481 = vmatmul.mubr.bf16.gmra.mrb[92].mxu1 %v9347_v58  ;;  %11359 = vst [vmem:[#allocation88_spill] sm:$0xff] %v9643_v32  ;;  %v9646_v1 = vpop.f32.mrb[20].mxu1  ;;  %v9648_v8 = vpop.f32.mrb[21].mxu0  ;;  %6911 = vpow2.f32 %v5780_v61  ;;  %v3534_v28 = vadd.f32 1.0, %v6898_v9  ;;  %v5776_v61 = vmul.f32 -1.442695, %v2335_v0 }
 0x309   : > { %6482 = vmatprep.mubr.bf16.mxu1 %v9369_v33  ;;  %11360 = vst [vmem:[#allocation89_spill] sm:$0xff] %v9648_v8  ;;  %v9650_v40 = vpop.f32.mrb[21].mxu1  ;;  %v9652_v58 = vpop.f32.mrb[22].mxu0  ;;  %v2746_v8 = vlaneseq }
 0x30a   : > { %11361 = vst [vmem:[#allocation90_spill] sm:$0xff] %v9652_v58  ;;  %v9654_v3 = vpop.f32.mrb[22].mxu1  ;;  %v9656_v46 = vpop.f32.mrb[23].mxu0  ;;  %v3538_v58 = vadd.f32 1.0, %v6894_v49 }
 0x30b   : > { %11362 = vst [vmem:[#allocation91_spill] sm:$0xff] %v9656_v46  ;;  %v9658_v39 = vpop.f32.mrb[23].mxu1  ;;  %v9670_v13 = vpop.permute.xlu1 %1798 }
 0x30c   : > { %6603 = vmatmul.mubr.bf16.gmra.mrb[128].mxu0 %v8964_v25  ;;  %11364 = vst [vmem:[#allocation93_spill] sm:$0xff] %v9670_v13  ;;  %v6900_v59 = vpop.eup %6899  ;;  %6913 = vrcp.f32 %v3538_v58 }
 0x30d   : > { %6606 = vmatprep.mubr.bf16.mxu0 %v9014_v51  ;;  %v2347_v51 = vadd.f32 %v9598_v22, %v9663_v45  ;;  %v6902_v43 = vpop.eup %6901  ;;  %v2349_v22 = vadd.f32 %v9602_v31, %v9663_v45  ;;  %6915 = vrcp.f32 %v3539_v20  ;;  %v3535_v56 = vadd.f32 1.0, %v6900_v59 }
 0x30e   : > { %v6904_v46 = vpop.eup %6903  ;;  %6917 = vpow2.f32 %v5775_v41  ;;  %v3546_v0 = vadd.f32 1.0, %v6902_v43  ;;  %v2343_v59 = vadd.f32 %v9588_v55, %v9670_v13 }
 0x30f   : > { %v9673_v25 = vpop.f32.mrb[24].mxu0  ;;  %v5787_v58 = vmul.f32 -1.442695, %v2347_v51  ;;  %v6906_v32 = vpop.eup %6905  ;;  %6919 = vrcp.f32 %v3534_v28  ;;  %v5788_v20 = vmul.f32 -1.442695, %v2349_v22  ;;  %v3547_v41 = vadd.f32 1.0, %v6904_v46 }
 0x310   : > { %6483 = vmatmul.mubr.bf16.gmra.mrb[96].mxu1 %v9369_v33  ;;  %11365 = vst [vmem:[#allocation94_spill] sm:$0xff] %v9673_v25  ;;  %v9677_v49 = vpop.f32.mrb[24].mxu1  ;;  %v9679_v33 = vpop.f32.mrb[25].mxu0  ;;  %6921 = vpow2.f32 %v5776_v61  ;;  %v3542_v43 = vadd.f32 1.0, %v6906_v32  ;;  %v5783_v32 = vmul.f32 -1.442695, %v2343_v59 }
 0x311   : > { %6484 = vmatprep.mubr.bf16.mxu1 %v9390_v18  ;;  %11366 = vst [vmem:[#allocation95_spill] sm:$0xff] %v9679_v33  ;;  %v9681_v17 = vpop.f32.mrb[25].mxu1  ;;  %v9689_v29 = vpop.f32.mrb[26].mxu0  ;;  %6923 = vrcp.f32 %v3535_v56 }
 0x312   : > { %11368 = vst [vmem:[#allocation96_spill] sm:$0xff] %v9689_v29  ;;  %v9693_v9 = vpop.f32.mrb[26].mxu1  ;;  %v9695_v33 = vpop.f32.mrb[27].mxu0  ;;  %6925 = vpow2.f32 %v5787_v58 }
 0x313   : > { %11369 = vst [vmem:[#allocation97_spill] sm:$0xff] %v9695_v33  ;;  %v9697_v25 = vpop.f32.mrb[27].mxu1  ;;  %v6908_v31 = vpop.eup %6907  ;;  %6927 = vrcp.f32 %v3546_v0 }
 0x314   : > { %6607 = vmatmul.mubr.bf16.gmra.mrb[132].mxu0 %v9062_v27  ;;  %v2345_v27 = vadd.f32 %v9593_v48, %v9670_v13  ;;  %v9710_v51 = vpop.permute.xlu0 %1813  ;;  %v9712_v28 = vpop.permute.xlu1 %1808  ;;  %v3543_v46 = vadd.f32 1.0, %v6908_v31  ;;  %6929 = vpow2.f32 %v5788_v20 }
 0x315   : > { %6610 = vmatprep.mubr.bf16.mxu0 %v9103_v35  ;;  %11370 = vst [vmem:[#allocation98_spill] sm:$0xff] %v9710_v51  ;;  %11371 = vst [vmem:[#allocation99_spill] sm:$0xff] %v9712_v28  ;;  %v9714_v35 = vshrl.u32 %v2746_v8, 7  ;;  %v2357_v58 = vadd.f32 %v9626_v52, %v9710_v51  ;;  %6931 = vrcp.f32 %v3547_v41  ;;  %v2353_v13 = vadd.f32 %v9617_v62, %v9712_v28  ;;  %v2744_v41 = vld [vmem:[%s9728_s30] sm:$0xf] }
 0x316   : > { %v5784_v45 = vmul.f32 -1.442695, %v2345_v27  ;;  %6933 = vrcp.f32 %v3542_v43  ;;  %v2355_v52 = vadd.f32 %v9621_v5, %v9712_v28  ;;  %v2359_v43 = vadd.f32 %v9631_v53, %v9710_v51 }
 0x317   : > { %11372 = vst [vmem:[#allocation100_spill] sm:$0xff] %v9714_v35  ;;  %v9717_v61 = vpop.f32.mrb[28].mxu0  ;;  %6935 = vrcp.f32 %v3543_v46  ;;  %v5795_v33 = vmul.f32 -1.442695, %v2357_v58  ;;  %v5791_v5 = vmul.f32 -1.442695, %v2353_v13 }
 0x318   : > { %6485 = vmatmul.mubr.bf16.gmra.mrb[100].mxu1 %v9390_v18  ;;  %11373 = vst [vmem:[#allocation101_spill] sm:$0xff] %v9717_v61  ;;  %v9719_v55 = vpop.f32.mrb[28].mxu1  ;;  %v6910_v18 = vpop.eup %6909  ;;  %6937 = vpow2.f32 %v5783_v32  ;;  %v5796_v51 = vmul.f32 -1.442695, %v2359_v43 }
 0x319   : > { %6486 = vmatprep.mubr.bf16.mxu1 %v9407_v26  ;;  %v9721_v22 = vpop.f32.mrb[29].mxu0  ;;  %v9723_v48 = vpop.f32.mrb[29].mxu1  ;;  %v3554_v20 = vadd.f32 1.0, %v6910_v18  ;;  %6939 = vpow2.f32 %v5784_v45 }
 0x31a   : > { %11374 = vst [vmem:[#allocation102_spill] sm:$0xff] %v9721_v22  ;;  %v6912_v56 = vpop.eup %6911  ;;  %v9730_v8 = vpop.f32.mrb[30].mxu0 }
 0x31b   : > { %11375 = vst [vmem:[#allocation103_spill] sm:$0xff] %v9730_v8  ;;  %v9734_v0 = vpop.f32.mrb[30].mxu1  ;;  %v9736_v31 = vpop.f32.mrb[31].mxu0  ;;  %v2748_v8 = vsub.s32 0, %v9714_v35  ;;  %v3555_v62 = vadd.f32 1.0, %v6912_v56  ;;  %6941 = vrcp.f32 %v3554_v20 }
 0x31c   : > { %11376 = vst [vmem:[#allocation104_spill] sm:$0xff] %v9736_v31  ;;  %v9740_v22 = vpop.f32.mrb[31].mxu1  ;;  %v9742_v61 = vpop.eup %6913  ;;  %v2752_v31 = vsub.s32 1, %v9714_v35  ;;  %6611 = vmatmul.mubr.bf16.gmra.mrb[136].mxu0 %v9146_v50 }
 0x31d   : > { %v9747_v59 = vpop.eup %6915  ;;  %6614 = vmatprep.mubr.bf16.mxu0 %v9177_v24  ;;  %v9756_v28 = vpop.permute.xlu0 %1823  ;;  %v9758_v29 = vrot.slane %v2744_v41, %v2748_v8  ;;  %v5792_v24 = vmul.f32 -1.442695, %v2355_v52  ;;  %6943 = vrcp.f32 %v3555_v62 }
 0x31e   : > { %v6918_v27 = vpop.eup %6917  ;;  %11377 = vst [vmem:[#allocation105_spill] sm:$0xff] %v9756_v28  ;;  %v9761_v56 = vrot.slane %v2744_v41, %v2752_v31  ;;  %v9764_v45 = vpop.permute.xlu1 %1818  ;;  %6945 = vpow2.f32 %v5795_v33  ;;  %v2367_v20 = vadd.f32 %v9654_v3, %v9756_v28 }
 0x31f   : > { %v6920_v18 = vpop.eup %6919  ;;  %v2152_v50 = vpop.f32.mrb[32].mxu0  ;;  %v3550_v53 = vadd.f32 1.0, %v6918_v27  ;;  %11378 = vst [vmem:[#allocation106_spill] sm:$0xff] %v9764_v45  ;;  %6947 = vpow2.f32 %v5791_v5  ;;  %v2363_v33 = vadd.f32 %v9646_v1, %v9764_v45  ;;  %v2365_v5 = vadd.f32 %v9650_v40, %v9764_v45  ;;  %v11419_v45 = vld [vmem:[#allocation55_spill] sm:$0xff] }
 0x320   : > { %6487 = vmatmul.mubr.bf16.gmra.mrb[104].mxu1 %v9407_v26  ;;  %v6922_v35 = vpop.eup %6921  ;;  %v2153_v32 = vadd.f32 %v2152_v50, %v9432_v54  ;;  %v2154_v26 = vpop.f32.mrb[33].mxu0  ;;  %6949 = vpow2.f32 %v5792_v24 }
 0x321   : > { %6488 = vmatprep.mubr.bf16.mxu1 %v9422_v23  ;;  %v6924_v46 = vpop.eup %6923  ;;  %v2155_v8 = vadd.f32 %v2154_v26, %v9432_v54  ;;  %v2156_v58 = vpop.f32.mrb[34].mxu0  ;;  %v3551_v31 = vadd.f32 1.0, %v6922_v35  ;;  %6951 = vrcp.f32 %v3550_v53 }
 0x322   : > { %v6926_v13 = vpop.eup %6925  ;;  %v3278_v41 = vmul.f32 %v9758_v29, %v2153_v32  ;;  %v2157_v62 = vadd.f32 %v2156_v58, %v9402_v16  ;;  %v2158_v27 = vpop.f32.mrb[35].mxu0  ;;  %6953 = vpow2.f32 %v5796_v51 }
 0x323   : > { %v9769_v52 = vpop.eup %6927  ;;  %v3279_v12 = vmul.f32 %v9761_v56, %v2155_v8  ;;  %v2159_v26 = vadd.f32 %v2158_v27, %v9402_v16  ;;  %v3562_v32 = vadd.f32 1.0, %v6926_v13  ;;  %v5803_v27 = vmul.f32 -1.442695, %v2367_v20 }
 0x324   : > { %v6930_v50 = vpop.eup %6929  ;;  %6615 = vmatmul.mubr.bf16.gmra.mrb[140].mxu0 %v9381_v30  ;;  %v3726_v35 = vmul.f32 %v6920_v18, %v3278_v41  ;;  %v3282_v43 = vmul.f32 %v9758_v29, %v2157_v62  ;;  %6955 = vrcp.f32 %v3551_v31  ;;  %v2369_v31 = vadd.f32 %v9658_v39, %v9756_v28 }
 0x325   : > { %v9778_v3 = vpop.eup %6931  ;;  %6618 = vmatprep.mubr.bf16.mxu0 %v8895_v37  ;;  %v3727_v8 = vmul.f32 %v6924_v46, %v3279_v12  ;;  %v3283_v24 = vmul.f32 %v9761_v56, %v2159_v26  ;;  %v3563_v18 = vadd.f32 1.0, %v6930_v50  ;;  %v5799_v12 = vmul.f32 -1.442695, %v2363_v33 }
 0x326   : > { %v6934_v58 = vpop.eup %6933  ;;  %v3730_v30 = vmul.f32 %v9742_v61, %v3282_v43  ;;  %6957 = vrcp.f32 %v3562_v32  ;;  %v9805_v32 = vpop.permute.xlu0 %1833 }
 0x327   : > { %v6936_v1 = vpop.eup %6935  ;;  %v6065_v40 = vpack.c.bf16 %v3727_v8, %v3726_v35  ;;  %v3731_v37 = vmul.f32 %v9747_v59, %v3283_v24  ;;  %v2162_v53 = vpop.f32.mrb[36].mxu0  ;;  %6959 = vpow2.f32 %v5803_v27  ;;  %11379 = vst [vmem:[#allocation107_spill] sm:$0xff] %v9805_v32 }
 0x328   : > { %6489 = vmatmul.mubr.bf16.gmra.mrb[108].mxu1 %v9422_v23  ;;  %v6938_v13 = vpop.eup %6937  ;;  %v2163_v20 = vadd.f32 %v2162_v53, %v9441_v63  ;;  %v2164_v41 = vpop.f32.mrb[37].mxu0  ;;  %v5800_v23 = vmul.f32 -1.442695, %v2365_v5  ;;  %6961 = vrcp.f32 %v3563_v18 }
 0x329   : > { %6490 = vmatprep.mubr.bf16.mxu1 %v9437_v2  ;;  %v6940_v46 = vpop.eup %6939  ;;  %4206 = vst [vmem:[%s9795_s22] sm:$0xff] %v6065_v40  ;;  %v6067_v51 = vpack.c.bf16 %v3731_v37, %v3730_v30  ;;  %v2165_v61 = vadd.f32 %v2164_v41, %v9441_v63  ;;  %v2166_v59 = vpop.f32.mrb[38].mxu0  ;;  %v3558_v26 = vadd.f32 1.0, %v6938_v13  ;;  %6963 = vpow2.f32 %v5799_v12 }
 0x32a   : > { %v9791_v62 = vpop.eup %6941  ;;  %v3286_v33 = vmul.f32 %v9758_v29, %v2163_v20  ;;  %v2167_v35 = vadd.f32 %v2166_v59, %v9414_v34  ;;  %v2168_v43 = vpop.f32.mrb[39].mxu0  ;;  %v3559_v30 = vadd.f32 1.0, %v6940_v46  ;;  %6965 = vpow2.f32 %v5800_v23 }
 0x32b   : > { %v9801_v50 = vpop.eup %6943  ;;  %4208 = vst [vmem:[%s9795_s22 + $0x10] sm:$0xff] %v6067_v51  ;;  %v3287_v8 = vmul.f32 %v9761_v56, %v2165_v61  ;;  %v2169_v24 = vadd.f32 %v2168_v43, %v9414_v34  ;;  %v9810_v27 = vpop.permute.xlu1 %1828  ;;  %v5804_v20 = vmul.f32 -1.442695, %v2369_v31  ;;  %v2377_v12 = vadd.f32 %v9693_v9, %v9805_v32 }
 0x32c   : > { %v6946_v5 = vpop.eup %6945  ;;  %11380 = vst [vmem:[#allocation108_spill] sm:$0xff] %v9810_v27  ;;  %6619 = vmatmul.mubr.bf16.gmra.mrb[144].mxu0 %v8946_v7  ;;  %v3734_v18 = vmul.f32 %v6934_v58, %v3286_v33  ;;  %v3290_v13 = vmul.f32 %v9758_v29, %v2167_v35  ;;  %6967 = vrcp.f32 %v3558_v26  ;;  %v2373_v58 = vadd.f32 %v9677_v49, %v9810_v27 }
 0x32d   : > { %v6948_v39 = vpop.eup %6947  ;;  %6622 = vmatprep.mubr.bf16.mxu0 %v8993_v15  ;;  %v3735_v37 = vmul.f32 %v6936_v1, %v3287_v8  ;;  %v3291_v53 = vmul.f32 %v9761_v56, %v2169_v24  ;;  %v3570_v46 = vadd.f32 1.0, %v6946_v5  ;;  %v2375_v9 = vadd.f32 %v9681_v17, %v9810_v27 }
 0x32e   : > { %v6950_v40 = vpop.eup %6949  ;;  %v3738_v7 = vmul.f32 %v9769_v52, %v3290_v13  ;;  %v3566_v23 = vadd.f32 1.0, %v6948_v39  ;;  %6969 = vrcp.f32 %v3559_v30  ;;  %v2379_v49 = vadd.f32 %v9697_v25, %v9805_v32 }
 0x32f   : > { %v6952_v41 = vpop.eup %6951  ;;  %v6069_v15 = vpack.c.bf16 %v3735_v37, %v3734_v18  ;;  %v3739_v1 = vmul.f32 %v9778_v3, %v3291_v53  ;;  %v2172_v51 = vpop.f32.mrb[40].mxu0  ;;  %v3567_v61 = vadd.f32 1.0, %v6950_v40  ;;  %6971 = vpow2.f32 %v5804_v20 }
 0x330   : > { %6491 = vmatmul.mubr.bf16.gmra.mrb[112].mxu1 %v9437_v2  ;;  %v6954_v2 = vpop.eup %6953  ;;  %v2173_v52 = vadd.f32 %v2172_v51, %v9447_v60  ;;  %v2174_v59 = vpop.f32.mrb[41].mxu0  ;;  %v5811_v35 = vmul.f32 -1.442695, %v2377_v12  ;;  %6973 = vrcp.f32 %v3570_v46  ;;  %v5807_v24 = vmul.f32 -1.442695, %v2373_v58 }
 0x331   : > { %6492 = vmatprep.mubr.bf16.mxu1 %v9454_v42  ;;  %v6956_v31 = vpop.eup %6955  ;;  %4210 = vst [vmem:[%s9795_s22 + $0x20] sm:$0xff] %v6069_v15  ;;  %v6071_v26 = vpack.c.bf16 %v3739_v1, %v3738_v7  ;;  %v2175_v3 = vadd.f32 %v2174_v59, %v9447_v60  ;;  %v2176_v33 = vpop.f32.mrb[42].mxu0  ;;  %6975 = vrcp.f32 %v3566_v23  ;;  %v5808_v18 = vmul.f32 -1.442695, %v2375_v9 }
 0x332   : > { %v9831_v43 = vpop.eup %6957  ;;  %v3294_v17 = vmul.f32 %v9758_v29, %v2173_v52  ;;  %v2177_v5 = vadd.f32 %v2176_v33, %v9427_v6  ;;  %v2178_v8 = vpop.f32.mrb[43].mxu0  ;;  %6977 = vrcp.f32 %v3567_v61  ;;  %v5812_v20 = vmul.f32 -1.442695, %v2379_v49 }
 0x333   : > { %v6960_v39 = vpop.eup %6959  ;;  %4212 = vst [vmem:[%s9795_s22 + $0x30] sm:$0xff] %v6071_v26  ;;  %v3295_v25 = vmul.f32 %v9761_v56, %v2175_v3  ;;  %v2179_v30 = vadd.f32 %v2178_v8, %v9427_v6  ;;  %v9838_v13 = vpop.permute.xlu1 %1838  ;;  %v3571_v7 = vadd.f32 1.0, %v6954_v2  ;;  %6979 = vpow2.f32 %v5811_v35 }
 0x334   : > { %11381 = vst [vmem:[#allocation109_spill] sm:$0xff] %v9838_v13  ;;  %v9840_v40 = vpop.eup %6961  ;;  %6623 = vmatmul.mubr.bf16.gmra.mrb[148].mxu0 %v9044_v19  ;;  %v3742_v37 = vmul.f32 %v6952_v41, %v3294_v17  ;;  %v3298_v53 = vmul.f32 %v9758_v29, %v2177_v5  ;;  %v9846_v15 = vpop.permute.xlu0 %1843  ;;  %v3578_v41 = vadd.f32 1.0, %v6960_v39  ;;  %6981 = vpow2.f32 %v5807_v24 }
 0x335   : > { %v6964_v12 = vpop.eup %6963  ;;  %6626 = vmatprep.mubr.bf16.mxu0 %v9085_v57  ;;  %v3743_v46 = vmul.f32 %v6956_v31, %v3295_v25  ;;  %v3299_v58 = vmul.f32 %v9761_v56, %v2179_v30  ;;  %11382 = vst [vmem:[#allocation110_spill] sm:$0xff] %v9846_v15  ;;  %v2383_v23 = vadd.f32 %v9719_v55, %v9838_v13  ;;  %6983 = vpow2.f32 %v5808_v18 }
 0x336   : > { %v6966_v1 = vpop.eup %6965  ;;  %v3746_v19 = vmul.f32 %v9791_v62, %v3298_v53  ;;  %v2385_v2 = vadd.f32 %v9723_v48, %v9838_v13  ;;  %v3574_v52 = vadd.f32 1.0, %v6964_v12  ;;  %6985 = vpow2.f32 %v5812_v20 }
 0x337   : > { %v6073_v57 = vpack.c.bf16 %v3743_v46, %v3742_v37  ;;  %v3747_v51 = vmul.f32 %v9801_v50, %v3299_v58  ;;  %v2182_v9 = vpop.f32.mrb[44].mxu0  ;;  %v6968_v61 = vpop.eup %6967  ;;  %v2387_v55 = vadd.f32 %v9734_v0, %v9846_v15  ;;  %v3575_v50 = vadd.f32 1.0, %v6966_v1 }
 0x338   : > { %6493 = vmatmul.mubr.bf16.gmra.mrb[116].mxu1 %v9454_v42  ;;  %v2183_v42 = vadd.f32 %v2182_v9, %v9456_v21  ;;  %v2184_v62 = vpop.f32.mrb[45].mxu0  ;;  %v2389_v26 = vadd.f32 %v9740_v22, %v9846_v15  ;;  %v6970_v48 = vpop.eup %6969  ;;  %6987 = vrcp.f32 %v3571_v7  ;;  %v5815_v17 = vmul.f32 -1.442695, %v2383_v23 }
 0x339   : > { %6494 = vmatprep.mubr.bf16.mxu1 %v9469_v47  ;;  %4214 = vst [vmem:[%s9795_s22 + $0x40] sm:$0xff] %v6073_v57  ;;  %v6075_v59 = vpack.c.bf16 %v3747_v51, %v3746_v19  ;;  %v2185_v49 = vadd.f32 %v2184_v62, %v9456_v21  ;;  %v2186_v31 = vpop.f32.mrb[46].mxu0  ;;  %v6972_v5 = vpop.eup %6971  ;;  %6989 = vrcp.f32 %v3578_v41  ;;  %v5816_v24 = vmul.f32 -1.442695, %v2385_v2 }
 0x33a   : > { %v3302_v3 = vmul.f32 %v9758_v29, %v2183_v42  ;;  %v2187_v33 = vadd.f32 %v2186_v31, %v9439_v4  ;;  %v2188_v35 = vpop.f32.mrb[47].mxu0  ;;  %v6974_v39 = vpop.eup %6973  ;;  %6991 = vrcp.f32 %v3574_v52  ;;  %v5819_v30 = vmul.f32 -1.442695, %v2387_v55 }
 0x33b   : > { %4216 = vst [vmem:[%s9795_s22 + $0x50] sm:$0xff] %v6075_v59  ;;  %v3303_v0 = vmul.f32 %v9761_v56, %v2185_v49  ;;  %v2189_v8 = vadd.f32 %v2188_v35, %v9439_v4  ;;  %v6976_v18 = vpop.eup %6975  ;;  %6993 = vrcp.f32 %v3575_v50  ;;  %v5820_v20 = vmul.f32 -1.442695, %v2389_v26  ;;  %v11383_v59 = vld [vmem:[#allocation28_spill] sm:$0xff]  ;;  %v11412_v4 = vld [vmem:[#allocation67_spill] sm:$0xff] }
 0x33c   : > { %6627 = vmatmul.mubr.bf16.gmra.mrb[152].mxu0 %v9123_v11  ;;  %v3750_v22 = vmul.f32 %v6968_v61, %v3302_v3  ;;  %v3306_v25 = vmul.f32 %v9758_v29, %v2187_v33  ;;  %v6978_v12 = vpop.eup %6977  ;;  %v3579_v7 = vadd.f32 1.0, %v6972_v5  ;;  %6995 = vpow2.f32 %v5815_v17 }
 0x33d   : > { %6630 = vmatprep.mubr.bf16.mxu0 %v9166_v14  ;;  %v3751_v37 = vmul.f32 %v6970_v48, %v3303_v0  ;;  %v3307_v53 = vmul.f32 %v9761_v56, %v2189_v8  ;;  %v6980_v46 = vpop.eup %6979  ;;  %6997 = vpow2.f32 %v5816_v24  ;;  %v7664_v8 = vld [vmem:[%s11050_s4 + $0xc0] sm:$0xff]  }
 0x33e   : > { %v3754_v11 = vmul.f32 %v9831_v43, %v3306_v25  ;;  %v6982_v19 = vpop.eup %6981  ;;  %6999 = vpow2.f32 %v5819_v30  ;;  %v3586_v33 = vadd.f32 1.0, %v6980_v46  ;;  %v11385_v46 = vld [vmem:[#allocation40_spill] sm:$0xff] }
 0x33f   : > { %v6077_v58 = vpack.c.bf16 %v3751_v37, %v3750_v22  ;;  %v3755_v1 = vmul.f32 %v9840_v40, %v3307_v53  ;;  %v2192_v14 = vpop.f32.mrb[48].mxu0  ;;  %v6984_v57 = vpop.eup %6983  ;;  %7001 = vpow2.f32 %v5820_v20  ;;  %v3582_v52 = vadd.f32 1.0, %v6982_v19 }
 0x340   : > { %6495 = vmatmul.mubr.bf16.gmra.mrb[120].mxu1 %v9469_v47  ;;  %v2193_v41 = vadd.f32 %v2192_v14, %v9464_v36  ;;  %v2194_v23 = vpop.f32.mrb[49].mxu0  ;;  %v6986_v9 = vpop.eup %6985  ;;  %7003 = vrcp.f32 %v3579_v7  ;;  %v3583_v31 = vadd.f32 1.0, %v6984_v57 }
 0x341   : > { %6496 = vmatprep.mubr.bf16.mxu1 %v9484_v38  ;;  %4218 = vst [vmem:[%s9795_s22 + $0x60] sm:$0xff] %v6077_v58  ;;  %v6079_v47 = vpack.c.bf16 %v3755_v1, %v3754_v11  ;;  %v2195_v43 = vadd.f32 %v2194_v23, %v9464_v36  ;;  %v2196_v51 = vpop.f32.mrb[50].mxu0  ;;  %v3587_v5 = vadd.f32 1.0, %v6986_v9  ;;  %7005 = vrcp.f32 %v3582_v52 }
 0x342   : > { %v3310_v2 = vmul.f32 %v9758_v29, %v2193_v41  ;;  %v2197_v40 = vadd.f32 %v2196_v51, %v9449_v44  ;;  %v2198_v61 = vpop.f32.mrb[51].mxu0  ;;  %v6988_v55 = vpop.eup %6987  ;;  %7007 = vrcp.f32 %v3583_v31 }
 0x343   : > { %4220 = vst [vmem:[%s9795_s22 + $0x70] sm:$0xff] %v6079_v47  ;;  %v3311_v42 = vmul.f32 %v9761_v56, %v2195_v43  ;;  %v2199_v62 = vadd.f32 %v2198_v61, %v9449_v44  ;;  %v6990_v26 = vpop.eup %6989  ;;  %7009 = vrcp.f32 %v3586_v33 }
 0x344   : > { %6631 = vmatmul.mubr.bf16.gmra.mrb[156].mxu0 %v11383_v59  ;;  %v3758_v49 = vmul.f32 %v6976_v18, %v3310_v2  ;;  %v3314_v50 = vmul.f32 %v9758_v29, %v2197_v40  ;;  %v6992_v35 = vpop.eup %6991  ;;  %v11384_v18 = vld [vmem:[#allocation42_spill] sm:$0xff]  ;;  %7011 = vrcp.f32 %v3587_v5  ;;  %v11387_v5 = vld [vmem:[#allocation43_spill] sm:$0xff] }
 0x345   : > { %v3759_v48 = vmul.f32 %v6978_v12, %v3311_v42  ;;  %v3315_v3 = vmul.f32 %v9761_v56, %v2199_v62  ;;  %v6994_v0 = vpop.eup %6993  ;;  %v7665_v59 = vld [vmem:[%s11050_s4 + $0xc8] sm:$0xff]  }
 0x346   : > { %v3762_v17 = vmul.f32 %v6974_v39, %v3314_v50  ;;  %v6996_v30 = vpop.eup %6995 }
 0x347   : > { %v6081_v24 = vpack.c.bf16 %v3759_v48, %v3758_v49  ;;  %v3763_v22 = vmul.f32 %v6988_v55, %v3315_v3  ;;  %v2202_v25 = vpop.f32.mrb[52].mxu0  ;;  %v6998_v20 = vpop.eup %6997  ;;  %v3590_v23 = vadd.f32 1.0, %v6996_v30  ;;  %v11386_v49 = vld [vmem:[#allocation44_spill] sm:$0xff] }
 0x348   : > { %6497 = vmatmul.mubr.bf16.gmra.mrb[124].mxu1 %v9484_v38  ;;  %v2203_v37 = vadd.f32 %v2202_v25, %v11384_v18  ;;  %v2204_v53 = vpop.f32.mrb[53].mxu0  ;;  %v7000_v7 = vpop.eup %6999  ;;  %v3591_v51 = vadd.f32 1.0, %v6998_v20 }
 0x349   : > { %6498 = vmatprep.mubr.bf16.mxu1 %v7664_v8  ;;  %4222 = vst [vmem:[%s9795_s22 + $0x80] sm:$0xff] %v6081_v24  ;;  %v6083_v38 = vpack.c.bf16 %v3763_v22, %v3762_v17  ;;  %v2205_v39 = vadd.f32 %v2204_v53, %v11384_v18  ;;  %v2206_v12 = vpop.f32.mrb[54].mxu0  ;;  %v7002_v14 = vpop.eup %7001  ;;  %v3594_v40 = vadd.f32 1.0, %v7000_v7  ;;  %7013 = vrcp.f32 %v3590_v23 }
 0x34a   : > { %v3318_v11 = vmul.f32 %v9758_v29, %v2203_v37  ;;  %v2207_v58 = vadd.f32 %v2206_v12, %v11385_v46  ;;  %v2208_v1 = vpop.f32.mrb[55].mxu0  ;;  %v7004_v57 = vpop.eup %7003  ;;  %v3595_v42 = vadd.f32 1.0, %v7002_v14  ;;  %7015 = vrcp.f32 %v3591_v51 }
 0x34b   : > { %4224 = vst [vmem:[%s9795_s22 + $0x90] sm:$0xff] %v6083_v38  ;;  %v3319_v19 = vmul.f32 %v9761_v56, %v2205_v39  ;;  %v2209_v41 = vadd.f32 %v2208_v1, %v11385_v46  ;;  %v7006_v48 = vpop.eup %7005  ;;  %7017 = vrcp.f32 %v3594_v40  ;;  %v11388_v1 = vld [vmem:[#allocation46_spill] sm:$0xff] }
 0x34c   : > { %v3766_v47 = vmul.f32 %v6992_v35, %v3318_v11  ;;  %v3322_v43 = vmul.f32 %v9758_v29, %v2207_v58  ;;  %v7008_v35 = vpop.eup %7007  ;;  %7019 = vrcp.f32 %v3595_v42  ;;  %v7666_v58 = vld [vmem:[%s11050_s4 + $0xd0] sm:$0xff]  }
 0x34d   : > { %v3767_v9 = vmul.f32 %v6994_v0, %v3319_v19  ;;  %v3323_v2 = vmul.f32 %v9761_v56, %v2209_v41  ;;  %v7010_v24 = vpop.eup %7009 }
 0x34e   : > { %v3770_v61 = vmul.f32 %v6990_v26, %v3322_v43  ;;  %v7012_v30 = vpop.eup %7011 }
 0x34f   : > { %v6085_v62 = vpack.c.bf16 %v3767_v9, %v3766_v47  ;;  %v3771_v52 = vmul.f32 %v7004_v57, %v3323_v2  ;;  %v2212_v55 = vpop.f32.mrb[56].mxu0  ;;  %v11389_v9 = vld [vmem:[#allocation45_spill] sm:$0xff] }
 0x350   : > { %6499 = vmatmul.mubr.bf16.gmra.mrb[128].mxu1 %v7664_v8  ;;  %v2213_v50 = vadd.f32 %v2212_v55, %v11386_v49  ;;  %v2214_v31 = vpop.f32.mrb[57].mxu0 }
 0x351   : > { %6500 = vmatprep.mubr.bf16.mxu1 %v7665_v59  ;;  %4226 = vst [vmem:[%s9795_s22 + $0xa0] sm:$0xff] %v6085_v62  ;;  %v6087_v3 = vpack.c.bf16 %v3771_v52, %v3770_v61  ;;  %v2215_v26 = vadd.f32 %v2214_v31, %v11386_v49  ;;  %v2216_v33 = vpop.f32.mrb[58].mxu0 }
 0x352   : > { %v3326_v17 = vmul.f32 %v9758_v29, %v2213_v50  ;;  %v2217_v0 = vadd.f32 %v2216_v33, %v11387_v5  ;;  %v2218_v8 = vpop.f32.mrb[59].mxu0 }
 0x353   : > { %4228 = vst [vmem:[%s9795_s22 + $0xb0] sm:$0xff] %v6087_v3  ;;  %v3327_v22 = vmul.f32 %v9761_v56, %v2215_v26  ;;  %v2219_v25 = vadd.f32 %v2218_v8, %v11387_v5  ;;  %v7014_v41 = vpop.eup %7013 }
 0x354   : > { %v3774_v37 = vmul.f32 %v7006_v48, %v3326_v17  ;;  %v3330_v53 = vmul.f32 %v9758_v29, %v2217_v0  ;;  %v7016_v43 = vpop.eup %7015  ;;  %v11390_v17 = vld [vmem:[#allocation48_spill] sm:$0xff] }
 0x355   : > { %v3775_v20 = vmul.f32 %v7008_v35, %v3327_v22  ;;  %v3331_v38 = vmul.f32 %v9761_v56, %v2219_v25  ;;  %v7018_v61 = vpop.eup %7017  ;;  %v7667_v35 = vld [vmem:[%s11050_s4 + $0xd8] sm:$0xff]  }
 0x356   : > { %v3778_v39 = vmul.f32 %v7010_v24, %v3330_v53  ;;  %v7020_v52 = vpop.eup %7019  ;;  %v11391_v53 = vld [vmem:[#allocation47_spill] sm:$0xff] }
 0x357   : > { %v6089_v12 = vpack.c.bf16 %v3775_v20, %v3774_v37  ;;  %v3779_v7 = vmul.f32 %v7012_v30, %v3331_v38  ;;  %v2222_v11 = vpop.f32.mrb[60].mxu0 }
 0x358   : > { %6501 = vmatmul.mubr.bf16.gmra.mrb[132].mxu1 %v7665_v59  ;;  %v2223_v14 = vadd.f32 %v2222_v11, %v11388_v1  ;;  %v2224_v19 = vpop.f32.mrb[61].mxu0 }
 0x359   : > { %6502 = vmatprep.mubr.bf16.mxu1 %v7666_v58  ;;  %4230 = vst [vmem:[%s9795_s22 + $0xc0] sm:$0xff] %v6089_v12  ;;  %v6091_v23 = vpack.c.bf16 %v3779_v7, %v3778_v39  ;;  %v2225_v57 = vadd.f32 %v2224_v19, %v11388_v1  ;;  %v2226_v47 = vpop.f32.mrb[62].mxu0 }
 0x35a   : > { %v3334_v51 = vmul.f32 %v9758_v29, %v2223_v14  ;;  %v2227_v2 = vadd.f32 %v2226_v47, %v11389_v9  ;;  %v2228_v40 = vpop.f32.mrb[63].mxu0 }
 0x35b   : > { %4232 = vst [vmem:[%s9795_s22 + $0xd0] sm:$0xff] %v6091_v23  ;;  %v3335_v42 = vmul.f32 %v9761_v56, %v2225_v57  ;;  %v2229_v62 = vadd.f32 %v2228_v40, %v11389_v9  ;;  %v7668_v23 = vld [vmem:[%s11050_s4 + $0xe0] sm:$0xff]  }
 0x35c   : > { %v3782_v55 = vmul.f32 %v7014_v41, %v3334_v51  ;;  %v3338_v59 = vmul.f32 %v9758_v29, %v2227_v2  ;;  %v11392_v57 = vld [vmem:[#allocation50_spill] sm:$0xff] }
 0x35d   : > { %v3783_v50 = vmul.f32 %v7016_v43, %v3335_v42  ;;  %v3339_v31 = vmul.f32 %v9761_v56, %v2229_v62  ;;  %v11393_v42 = vld [vmem:[#allocation49_spill] sm:$0xff] }
 0x35e   : > { %v3786_v48 = vmul.f32 %v7018_v61, %v3338_v59 }
 0x35f   : > { %v6093_v3 = vpack.c.bf16 %v3783_v50, %v3782_v55  ;;  %v3787_v26 = vmul.f32 %v7020_v52, %v3339_v31  ;;  %v2232_v33 = vpop.f32.mrb[64].mxu0 }
 0x360   : > { %6503 = vmatmul.mubr.bf16.gmra.mrb[136].mxu1 %v7666_v58  ;;  %v2233_v0 = vadd.f32 %v2232_v33, %v11390_v17  ;;  %v2234_v8 = vpop.f32.mrb[65].mxu0 }
 0x361   : > { %6504 = vmatprep.mubr.bf16.mxu1 %v7667_v35  ;;  %4234 = vst [vmem:[%s9795_s22 + $0xe0] sm:$0xff] %v6093_v3  ;;  %v6095_v24 = vpack.c.bf16 %v3787_v26, %v3786_v48  ;;  %v2235_v22 = vadd.f32 %v2234_v8, %v11390_v17  ;;  %v2236_v25 = vpop.f32.mrb[66].mxu0 }
 0x362   : > { %v5695_v37 = vmul.f32 -1.442695, %v2233_v0  ;;  %v2237_v20 = vadd.f32 %v2236_v25, %v11391_v53  ;;  %v2238_v38 = vpop.f32.mrb[67].mxu0 }
 0x363   : > { %v9933_v30 = vpop.f32.mrb[32].mxu1  ;;  %4236 = vst [vmem:[%s9795_s22 + $0xf0] sm:$0xff] %v6095_v24  ;;  %v5696_v12 = vmul.f32 -1.442695, %v2235_v22  ;;  %v2239_v7 = vadd.f32 %v2238_v38, %v11391_v53  ;;  %v7669_v24 = vld [vmem:[%s11050_s4 + $0xe8] sm:$0xff]  }
 0x364   : > { %v9936_v39 = vpop.f32.mrb[33].mxu1  ;;  %7021 = vpow2.f32 %v5695_v37  ;;  %v5699_v58 = vmul.f32 -1.442695, %v2237_v20  ;;  %v11394_v37 = vld [vmem:[#allocation52_spill] sm:$0xff] }
 0x365   : > { %v9940_v11 = vpop.f32.mrb[34].mxu1  ;;  %7023 = vpow2.f32 %v5696_v12  ;;  %v5700_v19 = vmul.f32 -1.442695, %v2239_v7  ;;  %v11395_v7 = vld [vmem:[#allocation29_spill] sm:$0xff] }
 0x366   : > { %v9942_v14 = vpop.f32.mrb[35].mxu1  ;;  %7025 = vpow2.f32 %v5699_v58  ;;  %v11396_v58 = vld [vmem:[#allocation59_spill] sm:$0xff] }
 0x367   : > { %7027 = vpow2.f32 %v5700_v19  ;;  %v2242_v41 = vpop.f32.mrb[68].mxu0  ;;  %v2073_v19 = vadd.f32 %v11396_v58, %v11395_v7 }
 0x368   : > { %6505 = vmatmul.mubr.bf16.gmra.mrb[140].mxu1 %v7667_v35  ;;  %v2243_v47 = vadd.f32 %v2242_v41, %v11392_v57  ;;  %v2244_v43 = vpop.f32.mrb[69].mxu0 }
 0x369   : > { %6506 = vmatprep.mubr.bf16.mxu1 %v7668_v23  ;;  %v2245_v51 = vadd.f32 %v2244_v43, %v11392_v57  ;;  %v2246_v2 = vpop.f32.mrb[70].mxu0 }
 0x36a   : > { %v5703_v61 = vmul.f32 -1.442695, %v2243_v47  ;;  %v2247_v62 = vadd.f32 %v2246_v2, %v11393_v42  ;;  %v2248_v52 = vpop.f32.mrb[71].mxu0 }
 0x36b   : > { %v9949_v40 = vpop.f32.mrb[36].mxu1  ;;  %v5704_v59 = vmul.f32 -1.442695, %v2245_v51  ;;  %v2249_v50 = vadd.f32 %v2248_v52, %v11393_v42 }
 0x36c   : > { %v9952_v55 = vpop.f32.mrb[37].mxu1  ;;  %7029 = vpow2.f32 %v5703_v61  ;;  %v5707_v48 = vmul.f32 -1.442695, %v2247_v62  ;;  %v11397_v61 = vld [vmem:[#allocation51_spill] sm:$0xff] }
 0x36d   : > { %v9955_v31 = vpop.f32.mrb[38].mxu1  ;;  %7031 = vpow2.f32 %v5704_v59  ;;  %v5708_v26 = vmul.f32 -1.442695, %v2249_v50  ;;  %v11398_v50 = vld [vmem:[#allocation60_spill] sm:$0xff] }
 0x36e   : > { %v9957_v3 = vpop.f32.mrb[39].mxu1  ;;  %v7022_v33 = vpop.eup %7021  ;;  %7033 = vpow2.f32 %v5707_v48  ;;  %v2075_v48 = vadd.f32 %v11398_v50, %v11395_v7  ;;  %v11402_v50 = vld [vmem:[#allocation23_spill] sm:$0xff] }
 0x36f   : > { %v7024_v35 = vpop.eup %7023  ;;  %v3022_v0 = vadd.f32 1.0, %v7022_v33  ;;  %7035 = vpow2.f32 %v5708_v26  ;;  %v2252_v8 = vpop.f32.mrb[72].mxu0 }
 0x370   : > { %6507 = vmatmul.mubr.bf16.gmra.mrb[144].mxu1 %v7668_v23  ;;  %v7026_v22 = vpop.eup %7025  ;;  %v3023_v25 = vadd.f32 1.0, %v7024_v35  ;;  %v2253_v20 = vadd.f32 %v2252_v8, %v11394_v37  ;;  %v2254_v38 = vpop.f32.mrb[73].mxu0 }
 0x371   : > { %6508 = vmatprep.mubr.bf16.mxu1 %v7669_v24  ;;  %v7028_v12 = vpop.eup %7027  ;;  %7037 = vrcp.f32 %v3022_v0  ;;  %v3026_v41 = vadd.f32 1.0, %v7026_v22  ;;  %v2255_v23 = vadd.f32 %v2254_v38, %v11394_v37  ;;  %v2256_v47 = vpop.f32.mrb[74].mxu0  ;;  %v11399_v38 = vld [vmem:[#allocation22_spill] sm:$0xff] }
 0x372   : > { %7039 = vrcp.f32 %v3023_v25  ;;  %v3027_v51 = vadd.f32 1.0, %v7028_v12  ;;  %v5711_v2 = vmul.f32 -1.442695, %v2253_v20  ;;  %v2257_v62 = vadd.f32 %v2256_v47, %v11397_v61  ;;  %v2258_v52 = vpop.f32.mrb[75].mxu0  ;;  %v11400_v12 = vld [vmem:[#allocation61_spill] sm:$0xff]  ;;  %v11401_v47 = vld [vmem:[#allocation62_spill] sm:$0xff] }
 0x373   : > { %v9966_v43 = vpop.f32.mrb[40].mxu1  ;;  %7041 = vrcp.f32 %v3026_v41  ;;  %v5712_v26 = vmul.f32 -1.442695, %v2255_v23  ;;  %v2259_v33 = vadd.f32 %v2258_v52, %v11397_v61  ;;  %v2766_v20 = vmul.f32 %v9758_v29, %v2073_v19 }
 0x374   : > { %v9969_v59 = vpop.f32.mrb[41].mxu1  ;;  %7043 = vrcp.f32 %v3027_v51  ;;  %v5715_v0 = vmul.f32 -1.442695, %v2257_v62  ;;  %v2077_v58 = vadd.f32 %v11400_v12, %v11399_v38  ;;  %v2767_v23 = vmul.f32 %v9761_v56, %v2075_v48 }
 0x375   : > { %v9974_v35 = vpop.f32.mrb[42].mxu1  ;;  %7045 = vpow2.f32 %v5711_v2  ;;  %v5716_v22 = vmul.f32 -1.442695, %v2259_v33  ;;  %v2079_v52 = vadd.f32 %v11401_v47, %v11399_v38  ;;  %v7670_v2 = vld [vmem:[%s11050_s4 + $0xf0] sm:$0xff]   ;;  %v11403_v33 = vld [vmem:[#allocation65_spill] sm:$0xff]  ;;  %v11405_v47 = vld [vmem:[#allocation66_spill] sm:$0xff] }
 0x376   : > { %v9976_v8 = vpop.f32.mrb[43].mxu1  ;;  %v7030_v25 = vpop.eup %7029  ;;  %7047 = vpow2.f32 %v5712_v26  ;;  %v2083_v12 = vadd.f32 %v11403_v33, %v11402_v50  ;;  %v11407_v33 = vld [vmem:[#allocation53_spill] sm:$0xff]  ;;  %v2770_v13 = vmul.f32 %v9758_v29, %v2077_v58 }
 0x377   : > { %v7032_v41 = vpop.eup %7031  ;;  %v3030_v51 = vadd.f32 1.0, %v7030_v25  ;;  %7049 = vpow2.f32 %v5715_v0  ;;  %v2262_v62 = vpop.f32.mrb[76].mxu0  ;;  %v2085_v25 = vadd.f32 %v11405_v47, %v11402_v50  ;;  %v2771_v36 = vmul.f32 %v9761_v56, %v2079_v52 }
 0x378   : > { %6509 = vmatmul.mubr.bf16.gmra.mrb[148].mxu1 %v7669_v24  ;;  %v7034_v19 = vpop.eup %7033  ;;  %v3031_v26 = vadd.f32 1.0, %v7032_v41  ;;  %7051 = vpow2.f32 %v5716_v22  ;;  %v11404_v24 = vld [vmem:[#allocation54_spill] sm:$0xff]  ;;  %v2264_v48 = vpop.f32.mrb[77].mxu0  ;;  %v2774_v32 = vmul.f32 %v9758_v29, %v2083_v12 }
 0x379   : > { %6510 = vmatprep.mubr.bf16.mxu1 %v7670_v2  ;;  %v2263_v9 = vadd.f32 %v2262_v62, %v11404_v24  ;;  %v7036_v1 = vpop.eup %7035  ;;  %7053 = vrcp.f32 %v3030_v51  ;;  %v3034_v0 = vadd.f32 1.0, %v7034_v19  ;;  %v2265_v5 = vadd.f32 %v2264_v48, %v11404_v24  ;;  %v2266_v49 = vpop.f32.mrb[78].mxu0 }
 0x37a   : > { %7055 = vrcp.f32 %v3031_v26  ;;  %v3035_v18 = vadd.f32 1.0, %v7036_v1  ;;  %v2267_v41 = vadd.f32 %v2266_v49, %v11407_v33  ;;  %v2268_v22 = vpop.f32.mrb[79].mxu0 }
 0x37b   : > { %v9993_v46 = vpop.f32.mrb[44].mxu1  ;;  %v5719_v44 = vmul.f32 -1.442695, %v2263_v9  ;;  %v7038_v62 = vpop.eup %7037  ;;  %7057 = vrcp.f32 %v3034_v0  ;;  %v5720_v47 = vmul.f32 -1.442695, %v2265_v5  ;;  %v2269_v51 = vadd.f32 %v2268_v22, %v11407_v33  ;;  %v11411_v22 = vld [vmem:[#allocation26_spill] sm:$0xff] }
 0x37c   : > { %11406 = vst [vmem:[#allocation28_spill] sm:$0xff] %v9993_v46  ;;  %v9996_v15 = vpop.f32.mrb[45].mxu1  ;;  %v7040_v48 = vpop.eup %7039  ;;  %v3214_v26 = vmul.f32 %v7038_v62, %v2766_v20  ;;  %7059 = vrcp.f32 %v3035_v18  ;;  %v5723_v1 = vmul.f32 -1.442695, %v2267_v41  ;;  %v2775_v5 = vmul.f32 %v9761_v56, %v2085_v25  ;;  %v11413_v18 = vld [vmem:[#allocation68_spill] sm:$0xff]  ;;  %v11414_v25 = vld [vmem:[#allocation27_spill] sm:$0xff] }
 0x37d   : > { %11408 = vst [vmem:[#allocation48_spill] sm:$0xff] %v9996_v15  ;;  %v10000_v19 = vpop.f32.mrb[46].mxu1  ;;  %v7042_v49 = vpop.eup %7041  ;;  %v3215_v27 = vmul.f32 %v7040_v48, %v2767_v23  ;;  %7061 = vpow2.f32 %v5719_v44  ;;  %v5724_v58 = vmul.f32 -1.442695, %v2269_v51  ;;  %v2087_v21 = vadd.f32 %v11412_v4, %v11411_v22  ;;  %v7671_v44 = vld [vmem:[%s11050_s4 + $0xf8] sm:$0xff]   ;;  %v11415_v4 = vld [vmem:[#allocation71_spill] sm:$0xff] }
 0x37e   : > { %11409 = vst [vmem:[#allocation47_spill] sm:$0xff] %v10000_v19  ;;  %v10003_v9 = vpop.f32.mrb[47].mxu1  ;;  %v7044_v0 = vpop.eup %7043  ;;  %v3218_v28 = vmul.f32 %v7042_v49, %v2770_v13  ;;  %7063 = vpow2.f32 %v5720_v47  ;;  %v2089_v52 = vadd.f32 %v11413_v18, %v11411_v22  ;;  %v2093_v13 = vadd.f32 %v11415_v4, %v11414_v25 }
 0x37f   : > { %11410 = vst [vmem:[#allocation50_spill] sm:$0xff] %v10003_v9  ;;  %v7046_v20 = vpop.eup %7045  ;;  %v6033_v41 = vpack.c.bf16 %v3215_v27, %v3214_v26  ;;  %v3219_v62 = vmul.f32 %v7044_v0, %v2771_v36  ;;  %7065 = vpow2.f32 %v5723_v1  ;;  %v2272_v23 = vpop.f32.mrb[80].mxu0  ;;  %v11417_v27 = vld [vmem:[#allocation72_spill] sm:$0xff]  ;;  %v2778_v63 = vmul.f32 %v9758_v29, %v2087_v21 }
 0x380   : > { %6511 = vmatmul.mubr.bf16.gmra.mrb[152].mxu1 %v7670_v2  ;;  %v7048_v12 = vpop.eup %7047  ;;  %v3038_v47 = vadd.f32 1.0, %v7046_v20  ;;  %7067 = vpow2.f32 %v5724_v58  ;;  %v11416_v2 = vld [vmem:[#allocation56_spill] sm:$0xff]  ;;  %v2274_v48 = vpop.f32.mrb[81].mxu0  ;;  %v2095_v36 = vadd.f32 %v11417_v27, %v11414_v25  ;;  %v2779_v16 = vmul.f32 %v9761_v56, %v2089_v52 }
 0x381   : > { %6512 = vmatprep.mubr.bf16.mxu1 %v7671_v44  ;;  %v2273_v51 = vadd.f32 %v2272_v23, %v11416_v2  ;;  %v7050_v49 = vpop.eup %7049  ;;  %3982 = vst [vmem:[%s10021_s24] sm:$0xff] %v6033_v41  ;;  %v6035_v26 = vpack.c.bf16 %v3219_v62, %v3218_v28  ;;  %v3039_v1 = vadd.f32 1.0, %v7048_v12  ;;  %v2275_v0 = vadd.f32 %v2274_v48, %v11416_v2  ;;  %v2276_v18 = vpop.f32.mrb[82].mxu0  ;;  %v11442_v9 = vld [vmem:[#allocation84_spill] sm:$0xff] }
 0x382   : > { %v7052_v58 = vpop.eup %7051  ;;  %7069 = vrcp.f32 %v3038_v47  ;;  %v3042_v23 = vadd.f32 1.0, %v7050_v49  ;;  %v2277_v6 = vadd.f32 %v2276_v18, %v11419_v45  ;;  %v2278_v27 = vpop.f32.mrb[83].mxu0 }
 0x383   : > { %v10025_v20 = vpop.f32.mrb[48].mxu1  ;;  %v5727_v4 = vmul.f32 -1.442695, %v2273_v51  ;;  %v7054_v34 = vpop.eup %7053  ;;  %3984 = vst [vmem:[%s10021_s24 + $0x10] sm:$0xff] %v6035_v26  ;;  %7071 = vrcp.f32 %v3039_v1  ;;  %v3043_v41 = vadd.f32 1.0, %v7052_v58  ;;  %v2279_v62 = vadd.f32 %v2278_v27, %v11419_v45  ;;  %v11423_v58 = vld [vmem:[#allocation30_spill] sm:$0xff] }
 0x384   : > { %11418 = vst [vmem:[#allocation49_spill] sm:$0xff] %v10025_v20  ;;  %v10028_v60 = vpop.f32.mrb[49].mxu1  ;;  %v5728_v28 = vmul.f32 -1.442695, %v2275_v0  ;;  %v7056_v48 = vpop.eup %7055  ;;  %v3222_v47 = vmul.f32 %v7054_v34, %v2774_v32  ;;  %7073 = vrcp.f32 %v3042_v23  ;;  %v5731_v51 = vmul.f32 -1.442695, %v2277_v6 }
 0x385   : > { %11420 = vst [vmem:[#allocation52_spill] sm:$0xff] %v10028_v60  ;;  %v10032_v12 = vpop.f32.mrb[50].mxu1  ;;  %v7058_v18 = vpop.eup %7057  ;;  %v3223_v54 = vmul.f32 %v7056_v48, %v2775_v5  ;;  %7075 = vrcp.f32 %v3043_v41  ;;  %v5732_v26 = vmul.f32 -1.442695, %v2279_v62  ;;  %v2782_v0 = vmul.f32 %v9758_v29, %v2093_v13  ;;  %v11424_v27 = vld [vmem:[#allocation73_spill] sm:$0xff]  ;;  %v11425_v23 = vld [vmem:[#allocation74_spill] sm:$0xff] }
 0x386   : > { %11421 = vst [vmem:[#allocation29_spill] sm:$0xff] %v10032_v12  ;;  %v10035_v49 = vpop.f32.mrb[51].mxu1  ;;  %v7060_v1 = vpop.eup %7059  ;;  %v2097_v12 = vadd.f32 %v11424_v27, %v11423_v58  ;;  %v3226_v60 = vmul.f32 %v7058_v18, %v2778_v63  ;;  %7077 = vpow2.f32 %v5727_v4  ;;  %v2783_v6 = vmul.f32 %v9761_v56, %v2095_v36  ;;  %v11426_v62 = vld [vmem:[#allocation32_spill] sm:$0xff]  ;;  %v11427_v13 = vld [vmem:[#allocation77_spill] sm:$0xff] }
 0x387   : > { %11422 = vst [vmem:[#allocation59_spill] sm:$0xff] %v10035_v49  ;;  %v7062_v21 = vpop.eup %7061  ;;  %v6037_v34 = vpack.c.bf16 %v3223_v54, %v3222_v47  ;;  %v3227_v32 = vmul.f32 %v7060_v1, %v2779_v16  ;;  %7079 = vpow2.f32 %v5728_v28  ;;  %v2282_v52 = vpop.f32.mrb[84].mxu0  ;;  %v2099_v41 = vadd.f32 %v11425_v23, %v11423_v58  ;;  %v11428_v54 = vld [vmem:[#allocation58_spill] sm:$0xff] }
 0x388   : > { %6513 = vmatmul.mubr.bf16.gmra.mrb[156].mxu1 %v7671_v44  ;;  %v7064_v5 = vpop.eup %7063  ;;  %v2103_v48 = vadd.f32 %v11427_v13, %v11426_v62  ;;  %v3046_v49 = vadd.f32 1.0, %v7062_v21  ;;  %7081 = vpow2.f32 %v5731_v51  ;;  %v2284_v63 = vpop.f32.mrb[85].mxu0  ;;  %v2283_v16 = vadd.f32 %v2282_v52, %v11428_v54  ;;  %v11430_v1 = vld [vmem:[#allocation78_spill] sm:$0xff] }
 0x389   : > { %v7066_v4 = vpop.eup %7065  ;;  %3986 = vst [vmem:[%s10021_s24 + $0x20] sm:$0xff] %v6037_v34  ;;  %v6039_v44 = vpack.c.bf16 %v3227_v32, %v3226_v60  ;;  %v3047_v18 = vadd.f32 1.0, %v7064_v5  ;;  %7083 = vpow2.f32 %v5732_v26  ;;  %v2286_v36 = vpop.f32.mrb[86].mxu0  ;;  %v2105_v27 = vadd.f32 %v11430_v1, %v11426_v62  ;;  %v11432_v34 = vld [vmem:[#allocation57_spill] sm:$0xff] }
 0x38a   : > { %v7068_v47 = vpop.eup %7067  ;;  %7085 = vrcp.f32 %v3046_v49  ;;  %v3050_v23 = vadd.f32 1.0, %v7066_v4  ;;  %v2285_v51 = vadd.f32 %v2284_v63, %v11428_v54  ;;  %v2288_v21 = vpop.f32.mrb[87].mxu0  ;;  %v5735_v26 = vmul.f32 -1.442695, %v2283_v16  ;;  %v11440_v54 = vld [vmem:[#allocation64_spill] sm:$0xff] }
 0x38b   : > { %v10048_v28 = vpop.f32.mrb[52].mxu1  ;;  %3988 = vst [vmem:[%s10021_s24 + $0x30] sm:$0xff] %v6039_v44  ;;  %7087 = vrcp.f32 %v3047_v18  ;;  %v3051_v60 = vadd.f32 1.0, %v7068_v47  ;;  %v2287_v32 = vadd.f32 %v2286_v36, %v11432_v34  ;;  %v2289_v49 = vadd.f32 %v2288_v21, %v11432_v34 }
 0x38c   : > { %11429 = vst [vmem:[#allocation51_spill] sm:$0xff] %v10048_v28  ;;  %v10053_v13 = vpop.f32.mrb[53].mxu1  ;;  %v7070_v5 = vpop.eup %7069  ;;  %v2786_v28 = vmul.f32 %v9758_v29, %v2097_v12  ;;  %7089 = vrcp.f32 %v3050_v23  ;;  %v5736_v1 = vmul.f32 -1.442695, %v2285_v51  ;;  %v2790_v36 = vmul.f32 %v9758_v29, %v2103_v48  ;;  %v11435_v23 = vld [vmem:[#allocation34_spill] sm:$0xff]  ;;  %v11436_v51 = vld [vmem:[#allocation79_spill] sm:$0xff] }
 0x38d   : > { %11431 = vst [vmem:[#allocation60_spill] sm:$0xff] %v10053_v13  ;;  %v10057_v52 = vpop.f32.mrb[54].mxu1  ;;  %v7072_v63 = vpop.eup %7071  ;;  %v2787_v13 = vmul.f32 %v9761_v56, %v2099_v41  ;;  %v3230_v44 = vmul.f32 %v7070_v5, %v2782_v0  ;;  %7091 = vrcp.f32 %v3051_v60  ;;  %v5739_v18 = vmul.f32 -1.442695, %v2287_v32  ;;  %v11437_v0 = vld [vmem:[#allocation80_spill] sm:$0xff] }
 0x38e   : > { %11433 = vst [vmem:[#allocation22_spill] sm:$0xff] %v10057_v52  ;;  %v10061_v4 = vpop.f32.mrb[55].mxu1  ;;  %v7074_v16 = vpop.eup %7073  ;;  %v3231_v47 = vmul.f32 %v7072_v63, %v2783_v6  ;;  %7093 = vpow2.f32 %v5735_v26  ;;  %v5740_v52 = vmul.f32 -1.442695, %v2289_v49  ;;  %v2791_v12 = vmul.f32 %v9761_v56, %v2105_v27  ;;  %v11438_v26 = vld [vmem:[#allocation36_spill] sm:$0xff]  ;;  %v11439_v49 = vld [vmem:[#allocation83_spill] sm:$0xff] }
 0x38f   : > { %11434 = vst [vmem:[#allocation61_spill] sm:$0xff] %v10061_v4  ;;  %v7076_v20 = vpop.eup %7075  ;;  %v2107_v21 = vadd.f32 %v11436_v51, %v11435_v23  ;;  %v3234_v34 = vmul.f32 %v7074_v16, %v2786_v28  ;;  %7095 = vpow2.f32 %v5736_v1  ;;  %v2292_v4 = vpop.f32.mrb[88].mxu0  ;;  %v2109_v60 = vadd.f32 %v11437_v0, %v11435_v23 }
 0x390   : > { %v7078_v41 = vpop.eup %7077  ;;  %v6041_v32 = vpack.c.bf16 %v3231_v47, %v3230_v44  ;;  %v3235_v5 = vmul.f32 %v7076_v20, %v2787_v13  ;;  %7097 = vpow2.f32 %v5739_v18  ;;  %v2294_v6 = vpop.f32.mrb[89].mxu0  ;;  %v2113_v63 = vadd.f32 %v11439_v49, %v11438_v26  ;;  %v11444_v49 = vld [vmem:[#allocation63_spill] sm:$0xff] }
 0x391   : > { %v7080_v48 = vpop.eup %7079  ;;  %v3054_v27 = vadd.f32 1.0, %v7078_v41  ;;  %7099 = vpow2.f32 %v5740_v52  ;;  %v2293_v51 = vadd.f32 %v2292_v4, %v11440_v54  ;;  %v2296_v28 = vpop.f32.mrb[90].mxu0  ;;  %v2115_v0 = vadd.f32 %v11442_v9, %v11438_v26 }
 0x392   : > { %v7082_v16 = vpop.eup %7081  ;;  %3990 = vst [vmem:[%s10021_s24 + $0x40] sm:$0xff] %v6041_v32  ;;  %v6043_v20 = vpack.c.bf16 %v3235_v5, %v3234_v34  ;;  %v3055_v13 = vadd.f32 1.0, %v7080_v48  ;;  %v2295_v44 = vadd.f32 %v2294_v6, %v11440_v54  ;;  %v2298_v18 = vpop.f32.mrb[91].mxu0  ;;  %v2297_v19 = vadd.f32 %v2296_v28, %v11444_v49 }
 0x393   : > { %v10073_v1 = vpop.f32.mrb[56].mxu1  ;;  %v7084_v41 = vpop.eup %7083  ;;  %7101 = vrcp.f32 %v3054_v27  ;;  %v3058_v52 = vadd.f32 1.0, %v7082_v16  ;;  %v5743_v4 = vmul.f32 -1.442695, %v2293_v51  ;;  %v2299_v34 = vadd.f32 %v2298_v18, %v11444_v49 }
 0x394   : > { %11441 = vst [vmem:[#allocation62_spill] sm:$0xff] %v10073_v1  ;;  %v10079_v47 = vpop.f32.mrb[57].mxu1  ;;  %v7086_v23 = vpop.eup %7085  ;;  %3992 = vst [vmem:[%s10021_s24 + $0x50] sm:$0xff] %v6043_v20  ;;  %7103 = vrcp.f32 %v3055_v13  ;;  %v3059_v9 = vadd.f32 1.0, %v7084_v41  ;;  %v5744_v32 = vmul.f32 -1.442695, %v2295_v44  ;;  %v2794_v48 = vmul.f32 %v9758_v29, %v2107_v21 }
 0x395   : > { %11443 = vst [vmem:[#allocation23_spill] sm:$0xff] %v10079_v47  ;;  %v10082_v1 = vpop.f32.mrb[58].mxu1  ;;  %v7088_v6 = vpop.eup %7087  ;;  %v3238_v47 = vmul.f32 %v7086_v23, %v2790_v36  ;;  %7105 = vrcp.f32 %v3058_v52  ;;  %v5747_v27 = vmul.f32 -1.442695, %v2297_v19  ;;  %v2795_v28 = vmul.f32 %v9761_v56, %v2109_v60  ;;  %v11447_v44 = vld [vmem:[#allocation24_spill] sm:$0xff]  ;;  %v11448_v52 = vld [vmem:[#allocation85_spill] sm:$0xff] }
 0x396   : > { %11445 = vst [vmem:[#allocation65_spill] sm:$0xff] %v10082_v1  ;;  %v10086_v5 = vpop.f32.mrb[59].mxu1  ;;  %v7090_v51 = vpop.eup %7089  ;;  %v3239_v16 = vmul.f32 %v7088_v6, %v2791_v12  ;;  %7107 = vrcp.f32 %v3059_v9  ;;  %v5748_v1 = vmul.f32 -1.442695, %v2299_v34  ;;  %v2798_v13 = vmul.f32 %v9758_v29, %v2113_v63  ;;  %v11449_v34 = vld [vmem:[#allocation15_spill] sm:$0xff]  ;;  %v11450_v63 = vld [vmem:[#allocation88_spill] sm:$0xff] }
 0x397   : > { %11446 = vst [vmem:[#allocation54_spill] sm:$0xff] %v10086_v5  ;;  %v7092_v20 = vpop.eup %7091  ;;  %v2117_v18 = vadd.f32 %v9623_v10, %v11447_v44  ;;  %v3242_v41 = vmul.f32 %v7090_v51, %v2794_v48  ;;  %7109 = vpow2.f32 %v5743_v4  ;;  %v2302_v5 = vpop.f32.mrb[92].mxu0  ;;  %v2799_v36 = vmul.f32 %v9761_v56, %v2115_v0 }
 0x398   : > { %v7094_v21 = vpop.eup %7093  ;;  %v6045_v19 = vpack.c.bf16 %v3239_v16, %v3238_v47  ;;  %v3243_v23 = vmul.f32 %v7092_v20, %v2795_v28  ;;  %7111 = vpow2.f32 %v5744_v32  ;;  %v2304_v60 = vpop.f32.mrb[93].mxu0  ;;  %v2119_v9 = vadd.f32 %v11448_v52, %v11447_v44  ;;  %v11452_v32 = vld [vmem:[#allocation70_spill] sm:$0xff]  ;;  %v11454_v52 = vld [vmem:[#allocation89_spill] sm:$0xff]  ;;  %v11468_v44 = vld [vmem:[#allocation31_spill] sm:$0xff] }
 0x399   : > { %v7096_v12 = vpop.eup %7095  ;;  %v2123_v6 = vadd.f32 %v11450_v63, %v11449_v34  ;;  %v3062_v49 = vadd.f32 1.0, %v7094_v21  ;;  %7113 = vpow2.f32 %v5747_v27  ;;  %v2306_v10 = vpop.f32.mrb[94].mxu0  ;;  %v2303_v51 = vadd.f32 %v2302_v5, %v11452_v32 }
 0x39a   : > { %v7098_v48 = vpop.eup %7097  ;;  %3994 = vst [vmem:[%s10021_s24 + $0x60] sm:$0xff] %v6045_v19  ;;  %v6047_v0 = vpack.c.bf16 %v3243_v23, %v3242_v41  ;;  %v3063_v47 = vadd.f32 1.0, %v7096_v12  ;;  %7115 = vpow2.f32 %v5748_v1  ;;  %v2308_v28 = vpop.f32.mrb[95].mxu0  ;;  %v2125_v63 = vadd.f32 %v11454_v52, %v11449_v34  ;;  %v11456_v1 = vld [vmem:[#allocation69_spill] sm:$0xff] }
 0x39b   : > { %v10098_v4 = vpop.f32.mrb[60].mxu1  ;;  %v7100_v20 = vpop.eup %7099  ;;  %7117 = vrcp.f32 %v3062_v49  ;;  %v3066_v27 = vadd.f32 1.0, %v7098_v48  ;;  %v2305_v21 = vadd.f32 %v2304_v60, %v11452_v32  ;;  %v5751_v19 = vmul.f32 -1.442695, %v2303_v51  ;;  %v11458_v52 = vld [vmem:[#allocation25_spill] sm:$0xff]  ;;  %v11459_v60 = vld [vmem:[#allocation90_spill] sm:$0xff] }
 0x39c   : > { %11451 = vst [vmem:[#allocation66_spill] sm:$0xff] %v10098_v4  ;;  %v10102_v16 = vpop.f32.mrb[61].mxu1  ;;  %3996 = vst [vmem:[%s10021_s24 + $0x70] sm:$0xff] %v6047_v0  ;;  %7119 = vrcp.f32 %v3063_v47  ;;  %v3067_v41 = vadd.f32 1.0, %v7100_v20  ;;  %v2307_v23 = vadd.f32 %v2306_v10, %v11456_v1  ;;  %v2309_v49 = vadd.f32 %v2308_v28, %v11456_v1  ;;  %v10118_v34 = vld [vmem:[#allocation7] ss:$0 sm:$0xff] }
 0x39d   : > { %11453 = vst [vmem:[#allocation53_spill] sm:$0xff] %v10102_v16  ;;  %v10107_v54 = vpop.f32.mrb[62].mxu1  ;;  %v7102_v12 = vpop.eup %7101  ;;  %v2802_v16 = vmul.f32 %v9758_v29, %v2117_v18  ;;  %7121 = vrcp.f32 %v3066_v27  ;;  %v5752_v4 = vmul.f32 -1.442695, %v2305_v21  ;;  %v2127_v32 = vadd.f32 %v11459_v60, %v11458_v52  ;;  %v11463_v1 = vld [vmem:[#allocation17_spill] sm:$0xff] }
 0x39e   : > { %11455 = vst [vmem:[#allocation26_spill] sm:$0xff] %v10107_v54  ;;  %v10111_v5 = vpop.f32.mrb[63].mxu1  ;;  %v7104_v48 = vpop.eup %7103  ;;  %v3246_v54 = vmul.f32 %v7102_v12, %v2798_v13  ;;  %7123 = vrcp.f32 %v3067_v41  ;;  %v5755_v0 = vmul.f32 -1.442695, %v2307_v23  ;;  %v2803_v51 = vmul.f32 %v9761_v56, %v2119_v9  ;;  %v11460_v41 = vld [vmem:[#allocation91_spill] sm:$0xff] }
 0x39f   : > { %11457 = vst [vmem:[#allocation67_spill] sm:$0xff] %v10111_v5  ;;  %v7106_v47 = vpop.eup %7105  ;;  %v3247_v10 = vmul.f32 %v7104_v48, %v2799_v36  ;;  %7125 = vpow2.f32 %v5751_v19  ;;  %v5756_v20 = vmul.f32 -1.442695, %v2309_v49  ;;  %v6572_v5 = vpop.f32.mrb[96].mxu0  ;;  %v2806_v27 = vmul.f32 %v9758_v29, %v2123_v6 }
 0x3a0   : > { %v7108_v18 = vpop.eup %7107  ;;  %v2807_v28 = vmul.f32 %v9761_v56, %v2125_v63  ;;  %v3250_v21 = vmul.f32 %v7106_v47, %v2802_v16  ;;  %7127 = vpow2.f32 %v5752_v4  ;;  %v4343_v60 = vpop.f32.mrb[97].mxu0  ;;  %v2129_v23 = vadd.f32 %v11460_v41, %v11458_v52  ;;  %v11464_v41 = vld [vmem:[#allocation94_spill] sm:$0xff] }
 0x3a1   : > { %v7110_v13 = vpop.eup %7109  ;;  %v6049_v9 = vpack.c.bf16 %v3247_v10, %v3246_v54  ;;  %v3251_v36 = vmul.f32 %v7108_v18, %v2803_v51  ;;  %7129 = vpow2.f32 %v5755_v0  ;;  %v6573_v19 = vpop.f32.mrb[98].mxu0  ;;  %v2810_v48 = vmul.f32 %v9758_v29, %v2127_v32 }
 0x3a2   : > { %v7112_v49 = vpop.eup %7111  ;;  %v3070_v6 = vadd.f32 1.0, %v7110_v13  ;;  %7131 = vpow2.f32 %v5756_v20  ;;  %v4352_v16 = vadd.f32 %v6572_v5, %v10118_v34  ;;  %v4346_v4 = vpop.f32.mrb[99].mxu0  ;;  %v2133_v54 = vadd.f32 %v11464_v41, %v11463_v1 }
 0x3a3   : > { %v10124_v12 = vpop.f32.mrb[64].mxu1  ;;  %v7114_v47 = vpop.eup %7113  ;;  %3998 = vst [vmem:[%s10021_s24 + $0x80] sm:$0xff] %v6049_v9  ;;  %v6051_v0 = vpack.c.bf16 %v3251_v36, %v3250_v21  ;;  %v3071_v51 = vadd.f32 1.0, %v7112_v49  ;;  %v4344_v10 = vadd.f32 %v10118_v34, %v4343_v60  ;;  %v4355_v5 = vadd.f32 %v6573_v19, %v10118_v34  ;;  %v11467_v60 = vld [vmem:[#allocation95_spill] sm:$0xff] }
 0x3a4   : > { %11461 = vst [vmem:[#allocation68_spill] sm:$0xff] %v10124_v12  ;;  %v10128_v63 = vpop.f32.mrb[65].mxu1  ;;  %v7116_v32 = vpop.eup %7115  ;;  %7133 = vrcp.f32 %v3070_v6  ;;  %v3074_v20 = vadd.f32 1.0, %v7114_v47  ;;  %v5898_v13 = vmul.f32 -1.442695, %v4352_v16  ;;  %v4347_v21 = vadd.f32 %v10118_v34, %v4346_v4 }
 0x3a5   : > { %11462 = vst [vmem:[#allocation27_spill] sm:$0xff] %v10128_v63  ;;  %v10134_v18 = vpop.f32.mrb[66].mxu1  ;;  %v7118_v63 = vpop.eup %7117  ;;  %4000 = vst [vmem:[%s10021_s24 + $0x90] sm:$0xff] %v6051_v0  ;;  %7135 = vrcp.f32 %v3071_v51  ;;  %v3075_v52 = vadd.f32 1.0, %v7116_v32  ;;  %v5896_v41 = vmul.f32 -1.442695, %v4344_v10  ;;  %v2135_v36 = vadd.f32 %v11467_v60, %v11463_v1 }
 0x3a6   : > { %11465 = vst [vmem:[#allocation71_spill] sm:$0xff] %v10134_v18  ;;  %v10137_v12 = vpop.f32.mrb[67].mxu1  ;;  %v7120_v9 = vpop.eup %7119  ;;  %v3254_v49 = vmul.f32 %v7118_v63, %v2806_v27  ;;  %7137 = vrcp.f32 %v3074_v20  ;;  %v5899_v6 = vmul.f32 -1.442695, %v4355_v5  ;;  %v2811_v16 = vmul.f32 %v9761_v56, %v2129_v23  ;;  %v11469_v60 = vld [vmem:[#allocation96_spill] sm:$0xff] }
 0x3a7   : > { %11466 = vst [vmem:[#allocation56_spill] sm:$0xff] %v10137_v12  ;;  %v7122_v47 = vpop.eup %7121  ;;  %v3255_v19 = vmul.f32 %v7120_v9, %v2807_v28  ;;  %7139 = vrcp.f32 %v3075_v52  ;;  %v5897_v12 = vmul.f32 -1.442695, %v4347_v21  ;;  %v6576_v18 = vpop.f32.mrb[100].mxu0  ;;  %v2814_v51 = vmul.f32 %v9758_v29, %v2133_v54  ;;  %v11471_v21 = vld [vmem:[#allocation97_spill] sm:$0xff] }
 0x3a8   : > { %v7124_v0 = vpop.eup %7123  ;;  %v3258_v10 = vmul.f32 %v7122_v47, %v2810_v48  ;;  %7141 = vpow2.f32 %v5898_v13  ;;  %v4359_v4 = vpop.f32.mrb[101].mxu0  ;;  %v2137_v27 = vadd.f32 %v11469_v60, %v11468_v44  ;;  %v2815_v28 = vmul.f32 %v9761_v56, %v2135_v36  ;;  %v11474_v36 = vld [vmem:[#allocation16_spill] sm:$0xff]  ;;  %v11475_v60 = vld [vmem:[#allocation101_spill] sm:$0xff] }
 0x3a9   : > { %v7126_v32 = vpop.eup %7125  ;;  %v6053_v63 = vpack.c.bf16 %v3255_v19, %v3254_v49  ;;  %v3259_v20 = vmul.f32 %v7124_v0, %v2811_v16  ;;  %7143 = vpow2.f32 %v5896_v41  ;;  %v6577_v5 = vpop.f32.mrb[102].mxu0  ;;  %v2139_v54 = vadd.f32 %v11471_v21, %v11468_v44 }
 0x3aa   : > { %v7128_v52 = vpop.eup %7127  ;;  %v3078_v48 = vadd.f32 1.0, %v7126_v32  ;;  %7145 = vpow2.f32 %v5899_v6  ;;  %v4362_v13 = vpop.f32.mrb[103].mxu0  ;;  %v4368_v41 = vadd.f32 %v6576_v18, %v10118_v34  ;;  %v4360_v6 = vadd.f32 %v10118_v34, %v4359_v4 }
 0x3ab   : > { %v10147_v23 = vpop.f32.mrb[68].mxu1  ;;  %v7130_v47 = vpop.eup %7129  ;;  %4002 = vst [vmem:[%s10021_s24 + $0xa0] sm:$0xff] %v6053_v63  ;;  %v6055_v49 = vpack.c.bf16 %v3259_v20, %v3258_v10  ;;  %v3079_v16 = vadd.f32 1.0, %v7128_v52  ;;  %7147 = vpow2.f32 %v5897_v12  ;;  %v4371_v12 = vadd.f32 %v6577_v5, %v10118_v34 }
 0x3ac   : > { %11470 = vst [vmem:[#allocation72_spill] sm:$0xff] %v10147_v23  ;;  %v10152_v9 = vpop.f32.mrb[69].mxu1  ;;  %v7132_v0 = vpop.eup %7131  ;;  %v2143_v23 = vadd.f32 %v11475_v60, %v11474_v36  ;;  %7149 = vrcp.f32 %v3078_v48  ;;  %v3082_v32 = vadd.f32 1.0, %v7130_v47  ;;  %v5902_v10 = vmul.f32 -1.442695, %v4368_v41  ;;  %v11477_v48 = vld [vmem:[#allocation102_spill] sm:$0xff] }
 0x3ad   : > { %11472 = vst [vmem:[#allocation30_spill] sm:$0xff] %v10152_v9  ;;  %v10156_v19 = vpop.f32.mrb[70].mxu1  ;;  %4004 = vst [vmem:[%s10021_s24 + $0xb0] sm:$0xff] %v6055_v49  ;;  %7151 = vrcp.f32 %v3079_v16  ;;  %v3083_v63 = vadd.f32 1.0, %v7132_v0  ;;  %v2818_v18 = vmul.f32 %v9758_v29, %v2137_v27  ;;  %v5900_v52 = vmul.f32 -1.442695, %v4360_v6 }
 0x3ae   : > { %11473 = vst [vmem:[#allocation73_spill] sm:$0xff] %v10156_v19  ;;  %v10161_v21 = vpop.f32.mrb[71].mxu1  ;;  %v7134_v20 = vpop.eup %7133  ;;  %7153 = vrcp.f32 %v3082_v32  ;;  %v4363_v19 = vadd.f32 %v10118_v34, %v4362_v13  ;;  %v2145_v47 = vadd.f32 %v11477_v48, %v11474_v36  ;;  %v2819_v41 = vmul.f32 %v9761_v56, %v2139_v54 }
 0x3af   : > { %11476 = vst [vmem:[#allocation74_spill] sm:$0xff] %v10161_v21  ;;  %v7136_v60 = vpop.eup %7135  ;;  %v3262_v4 = vmul.f32 %v7134_v20, %v2814_v51  ;;  %7155 = vrcp.f32 %v3083_v63  ;;  %v5903_v21 = vmul.f32 -1.442695, %v4371_v12  ;;  %v6580_v49 = vpop.f32.mrb[104].mxu0  ;;  %v2822_v32 = vmul.f32 %v9758_v29, %v2143_v23  ;;  %v11479_v63 = vld [vmem:[#allocation33_spill] sm:$0xff]  ;;  %v11480_v12 = vld [vmem:[#allocation103_spill] sm:$0xff] }
 0x3b0   : > { %v7138_v16 = vpop.eup %7137  ;;  %v3263_v0 = vmul.f32 %v7136_v60, %v2815_v28  ;;  %7157 = vpow2.f32 %v5902_v10  ;;  %v5901_v5 = vmul.f32 -1.442695, %v4363_v19  ;;  %v4375_v9 = vpop.f32.mrb[105].mxu0  ;;  %v2147_v20 = vadd.f32 %v11480_v12, %v11479_v63 }
 0x3b1   : > { %v7140_v27 = vpop.eup %7139  ;;  %v3266_v13 = vmul.f32 %v7138_v16, %v2818_v18  ;;  %7159 = vpow2.f32 %v5900_v52  ;;  %v6581_v6 = vpop.f32.mrb[106].mxu0  ;;  %v2823_v60 = vmul.f32 %v9761_v56, %v2145_v47  ;;  %v4384_v18 = vadd.f32 %v6580_v49, %v10118_v34 }
 0x3b2   : > { %v7142_v51 = vpop.eup %7141  ;;  %v6057_v48 = vpack.c.bf16 %v3263_v0, %v3262_v4  ;;  %v3267_v54 = vmul.f32 %v7140_v27, %v2819_v41  ;;  %7161 = vpow2.f32 %v5903_v21  ;;  %v4378_v28 = vpop.f32.mrb[107].mxu0  ;;  %v11483_v4 = vld [vmem:[#allocation104_spill] sm:$0xff]  ;;  %v4376_v27 = vadd.f32 %v10118_v34, %v4375_v9 }
 0x3b3   : > { %v10171_v44 = vpop.f32.mrb[72].mxu1  ;;  %v7144_v10 = vpop.eup %7143  ;;  %v4792_v23 = vadd.f32 1.0, %v7142_v51  ;;  %7163 = vpow2.f32 %v5901_v5  ;;  %v2149_v41 = vadd.f32 %v11483_v4, %v11479_v63  ;;  %v5906_v51 = vmul.f32 -1.442695, %v4384_v18 }
 0x3b4   : > { %11478 = vst [vmem:[#allocation77_spill] sm:$0xff] %v10171_v44  ;;  %v10175_v19 = vpop.f32.mrb[73].mxu1  ;;  %v7146_v16 = vpop.eup %7145  ;;  %4006 = vst [vmem:[%s10021_s24 + $0xc0] sm:$0xff] %v6057_v48  ;;  %v6059_v21 = vpack.c.bf16 %v3267_v54, %v3266_v13  ;;  %v4790_v0 = vadd.f32 1.0, %v7144_v10  ;;  %v4387_v49 = vadd.f32 %v6581_v6, %v10118_v34  ;;  %v5904_v48 = vmul.f32 -1.442695, %v4376_v27 }
 0x3b5   : > { %11481 = vst [vmem:[#allocation78_spill] sm:$0xff] %v10175_v19  ;;  %v10180_v52 = vpop.f32.mrb[74].mxu1  ;;  %v7148_v47 = vpop.eup %7147  ;;  %7165 = vrcp.f32 %v4792_v23  ;;  %v4793_v5 = vadd.f32 1.0, %v7146_v16  ;;  %v4379_v9 = vadd.f32 %v10118_v34, %v4378_v28  ;;  %v2826_v10 = vmul.f32 %v9758_v29, %v2147_v20 }
 0x3b6   : > { %11482 = vst [vmem:[#allocation79_spill] sm:$0xff] %v10180_v52  ;;  %v10186_v12 = vpop.f32.mrb[75].mxu1  ;;  %v7150_v19 = vpop.eup %7149  ;;  %4008 = vst [vmem:[%s10021_s24 + $0xd0] sm:$0xff] %v6059_v21  ;;  %7167 = vrcp.f32 %v4790_v0  ;;  %v4791_v13 = vadd.f32 1.0, %v7148_v47  ;;  %v5907_v18 = vmul.f32 -1.442695, %v4387_v49  ;;  %v2827_v4 = vmul.f32 %v9761_v56, %v2149_v41 }
 0x3b7   : > { %11484 = vst [vmem:[#allocation80_spill] sm:$0xff] %v10186_v12  ;;  %v7152_v54 = vpop.eup %7151  ;;  %v3270_v23 = vmul.f32 %v7150_v19, %v2822_v32  ;;  %7169 = vrcp.f32 %v4793_v5  ;;  %v6584_v6 = vpop.f32.mrb[108].mxu0  ;;  %v5905_v0 = vmul.f32 -1.442695, %v4379_v9 }
 0x3b8   : > { %v7154_v16 = vpop.eup %7153  ;;  %v3271_v21 = vmul.f32 %v7152_v54, %v2823_v60  ;;  %7171 = vrcp.f32 %v4791_v13  ;;  %v4391_v12 = vpop.f32.mrb[109].mxu0  ;;  %v4400_v9 = vadd.f32 %v6584_v6, %v10118_v34 }
 0x3b9   : > { %v7156_v47 = vpop.eup %7155  ;;  %v3274_v27 = vmul.f32 %v7154_v16, %v2826_v10  ;;  %7173 = vpow2.f32 %v5906_v51  ;;  %v6585_v28 = vpop.f32.mrb[110].mxu0 }
 0x3ba   : > { %v7158_v29 = vpop.eup %7157  ;;  %v6061_v32 = vpack.c.bf16 %v3271_v21, %v3270_v23  ;;  %v3275_v20 = vmul.f32 %v7156_v47, %v2827_v4  ;;  %7175 = vpow2.f32 %v5904_v48  ;;  %v4394_v56 = vpop.f32.mrb[111].mxu0  ;;  %v4392_v23 = vadd.f32 %v10118_v34, %v4391_v12 }
 0x3bb   : > { %v10199_v52 = vpop.f32.mrb[76].mxu1  ;;  %v7160_v60 = vpop.eup %7159  ;;  %v4796_v41 = vadd.f32 1.0, %v7158_v29  ;;  %7177 = vpow2.f32 %v5907_v18  ;;  %v5910_v16 = vmul.f32 -1.442695, %v4400_v9  ;;  %v4403_v4 = vadd.f32 %v6585_v28, %v10118_v34 }
 0x3bc   : > { %11486 = vst [vmem:[#allocation83_spill] sm:$0xff] %v10199_v52  ;;  %v10207_v19 = vpop.f32.mrb[77].mxu1  ;;  %v7162_v51 = vpop.eup %7161  ;;  %4010 = vst [vmem:[%s10021_s24 + $0xe0] sm:$0xff] %v6061_v32  ;;  %v6063_v49 = vpack.c.bf16 %v3275_v20, %v3274_v27  ;;  %v4794_v13 = vadd.f32 1.0, %v7160_v60  ;;  %7179 = vpow2.f32 %v5905_v0  ;;  %v5908_v47 = vmul.f32 -1.442695, %v4392_v23 }
 0x3bd   : > { %11487 = vst [vmem:[#allocation84_spill] sm:$0xff] %v10207_v19  ;;  %v10209_v5 = vpop.f32.mrb[78].mxu1  ;;  %v7164_v48 = vpop.eup %7163  ;;  %7181 = vrcp.f32 %v4796_v41  ;;  %v4797_v10 = vadd.f32 1.0, %v7162_v51  ;;  %v4395_v0 = vadd.f32 %v10118_v34, %v4394_v56  ;;  %v5911_v29 = vmul.f32 -1.442695, %v4403_v4 }
 0x3be   : > { %11488 = vst [vmem:[#allocation85_spill] sm:$0xff] %v10209_v5  ;;  %v10213_v54 = vpop.f32.mrb[79].mxu1  ;;  %4012 = vst [vmem:[%s10021_s24 + $0xf0] sm:$0xff] %v6063_v49  ;;  %7183 = vrcp.f32 %v4794_v13  ;;  %v4795_v18 = vadd.f32 1.0, %v7164_v48 }
 0x3bf   : > { %11489 = vst [vmem:[#allocation88_spill] sm:$0xff] %v10213_v54  ;;  %v7166_v21 = vpop.eup %7165  ;;  %7185 = vrcp.f32 %v4797_v10  ;;  %v6588_v6 = vpop.f32.mrb[112].mxu0  ;;  %v5909_v12 = vmul.f32 -1.442695, %v4395_v0 }
 0x3c0   : > { %v7168_v27 = vpop.eup %7167  ;;  %7187 = vrcp.f32 %v4795_v18  ;;  %v4407_v32 = vpop.f32.mrb[113].mxu0  ;;  %v4416_v48 = vadd.f32 %v6588_v6, %v10118_v34 }
 0x3c1   : > { %v7170_v20 = vpop.eup %7169  ;;  %7189 = vpow2.f32 %v5910_v16  ;;  %v6589_v28 = vpop.f32.mrb[114].mxu0  ;;  %v4408_v16 = vadd.f32 %v10118_v34, %v4407_v32 }
 0x3c2   : > { %v7172_v41 = vpop.eup %7171  ;;  %v6171_v51 = vpack.c.bf16 %v7170_v20, %v7166_v21  ;;  %7191 = vpow2.f32 %v5908_v47  ;;  %v4410_v56 = vpop.f32.mrb[115].mxu0  ;;  %v4419_v4 = vadd.f32 %v6589_v28, %v10118_v34  ;;  %v5914_v20 = vmul.f32 -1.442695, %v4416_v48 }
 0x3c3   : > { %v10225_v60 = vpop.f32.mrb[80].mxu1  ;;  %v7174_v13 = vpop.eup %7173  ;;  %v6166_v9 = vpack.c.bf16 %v7172_v41, %v7168_v27  ;;  %7193 = vpow2.f32 %v5911_v29  ;;  %v4411_v27 = vadd.f32 %v10118_v34, %v4410_v56 }
 0x3c4   : > { %11490 = vst [vmem:[#allocation89_spill] sm:$0xff] %v10225_v60  ;;  %v10227_v49 = vpop.f32.mrb[81].mxu1  ;;  %v7176_v23 = vpop.eup %7175  ;;  %6323 = vst [vmem:[%s10223_s26 + $0x8] sm:$0xff] %v6171_v51   ;;  %v4800_v18 = vadd.f32 1.0, %v7174_v13  ;;  %7195 = vpow2.f32 %v5909_v12  ;;  %v5912_v13 = vmul.f32 -1.442695, %v4408_v16 }
 0x3c5   : > { %11491 = vst [vmem:[#allocation90_spill] sm:$0xff] %v10227_v49  ;;  %v10230_v10 = vpop.f32.mrb[82].mxu1  ;;  %v7178_v47 = vpop.eup %7177  ;;  %6167 = vst [vmem:[%s10223_s26] sm:$0xff] %v6166_v9   ;;  %v4798_v0 = vadd.f32 1.0, %v7176_v23  ;;  %v5915_v32 = vmul.f32 -1.442695, %v4419_v4 }
 0x3c6   : > { %11492 = vst [vmem:[#allocation91_spill] sm:$0xff] %v10230_v10  ;;  %v10235_v21 = vpop.f32.mrb[83].mxu1  ;;  %v7180_v29 = vpop.eup %7179  ;;  %7197 = vrcp.f32 %v4800_v18  ;;  %v4801_v6 = vadd.f32 1.0, %v7178_v47  ;;  %v5913_v9 = vmul.f32 -1.442695, %v4411_v27 }
 0x3c7   : > { %11493 = vst [vmem:[#allocation94_spill] sm:$0xff] %v10235_v21  ;;  %v7182_v41 = vpop.eup %7181  ;;  %7199 = vrcp.f32 %v4798_v0  ;;  %v4799_v51 = vadd.f32 1.0, %v7180_v29  ;;  %v6592_v12 = vpop.f32.mrb[116].mxu0 }
 0x3c8   : > { %v7184_v10 = vpop.eup %7183  ;;  %7201 = vrcp.f32 %v4801_v6  ;;  %v4423_v28 = vpop.f32.mrb[117].mxu0  ;;  %v4432_v48 = vadd.f32 %v6592_v12, %v10118_v34 }
 0x3c9   : > { %v7186_v49 = vpop.eup %7185  ;;  %7203 = vrcp.f32 %v4799_v51  ;;  %v6593_v23 = vpop.f32.mrb[118].mxu0  ;;  %v4424_v4 = vadd.f32 %v10118_v34, %v4423_v28 }
 0x3ca   : > { %v7188_v56 = vpop.eup %7187  ;;  %v6181_v18 = vpack.c.bf16 %v7186_v49, %v7182_v41  ;;  %7205 = vpow2.f32 %v5914_v20  ;;  %v4426_v47 = vpop.f32.mrb[119].mxu0  ;;  %v4435_v49 = vadd.f32 %v6593_v23, %v10118_v34  ;;  %v5918_v28 = vmul.f32 -1.442695, %v4432_v48 }
 0x3cb   : > { %v10239_v21 = vpop.f32.mrb[84].mxu1  ;;  %v7190_v0 = vpop.eup %7189  ;;  %v6176_v29 = vpack.c.bf16 %v7188_v56, %v7184_v10  ;;  %7207 = vpow2.f32 %v5912_v13 }
 0x3cc   : > { %11494 = vst [vmem:[#allocation95_spill] sm:$0xff] %v10239_v21  ;;  %v10242_v16 = vpop.f32.mrb[85].mxu1  ;;  %v7192_v27 = vpop.eup %7191  ;;  %6325 = vst [vmem:[%s10223_s26 + $0x18] sm:$0xff] %v6181_v18   ;;  %v4804_v51 = vadd.f32 1.0, %v7190_v0  ;;  %7209 = vpow2.f32 %v5915_v32  ;;  %v5919_v32 = vmul.f32 -1.442695, %v4435_v49 }
 0x3cd   : > { %11495 = vst [vmem:[#allocation96_spill] sm:$0xff] %v10242_v16  ;;  %v10245_v6 = vpop.f32.mrb[86].mxu1  ;;  %v7194_v41 = vpop.eup %7193  ;;  %6324 = vst [vmem:[%s10223_s26 + $0x10] sm:$0xff] %v6176_v29   ;;  %v4802_v12 = vadd.f32 1.0, %v7192_v27  ;;  %7211 = vpow2.f32 %v5913_v9  ;;  %v4427_v16 = vadd.f32 %v10118_v34, %v4426_v47 }
 0x3ce   : > { %11496 = vst [vmem:[#allocation97_spill] sm:$0xff] %v10245_v6  ;;  %v10249_v20 = vpop.f32.mrb[87].mxu1  ;;  %v7196_v10 = vpop.eup %7195  ;;  %7213 = vrcp.f32 %v4804_v51  ;;  %v4805_v13 = vadd.f32 1.0, %v7194_v41  ;;  %v5916_v6 = vmul.f32 -1.442695, %v4424_v4 }
 0x3cf   : > { %11497 = vst [vmem:[#allocation101_spill] sm:$0xff] %v10249_v20  ;;  %7215 = vrcp.f32 %v4802_v12  ;;  %v4803_v56 = vadd.f32 1.0, %v7196_v10  ;;  %v6596_v18 = vpop.f32.mrb[120].mxu0  ;;  %v5917_v20 = vmul.f32 -1.442695, %v4427_v16 }
 0x3d0   : > { %v7198_v0 = vpop.eup %7197  ;;  %7217 = vrcp.f32 %v4805_v13  ;;  %v4439_v23 = vpop.f32.mrb[121].mxu0  ;;  %v4448_v29 = vadd.f32 %v6596_v18, %v10118_v34 }
 0x3d1   : > { %v7200_v21 = vpop.eup %7199  ;;  %7219 = vrcp.f32 %v4803_v56  ;;  %v6597_v9 = vpop.f32.mrb[122].mxu0  ;;  %v4440_v12 = vadd.f32 %v10118_v34, %v4439_v23 }
 0x3d2   : > { %v7202_v47 = vpop.eup %7201  ;;  %7221 = vpow2.f32 %v5918_v28  ;;  %v4442_v48 = vpop.f32.mrb[123].mxu0  ;;  %v5922_v49 = vmul.f32 -1.442695, %v4448_v29  ;;  %v4451_v56 = vadd.f32 %v6597_v9, %v10118_v34 }
 0x3d3   : > { %v10254_v27 = vpop.f32.mrb[88].mxu1  ;;  %v7204_v4 = vpop.eup %7203  ;;  %v6191_v41 = vpack.c.bf16 %v7202_v47, %v7198_v0  ;;  %7223 = vpow2.f32 %v5916_v6  ;;  %v4443_v0 = vadd.f32 %v10118_v34, %v4442_v48 }
 0x3d4   : > { %11498 = vst [vmem:[#allocation102_spill] sm:$0xff] %v10254_v27  ;;  %v10256_v51 = vpop.f32.mrb[89].mxu1  ;;  %v7206_v16 = vpop.eup %7205  ;;  %v6186_v13 = vpack.c.bf16 %v7204_v4, %v7200_v21  ;;  %7225 = vpow2.f32 %v5919_v32  ;;  %v5923_v4 = vmul.f32 -1.442695, %v4451_v56 }
 0x3d5   : > { %11499 = vst [vmem:[#allocation103_spill] sm:$0xff] %v10256_v51  ;;  %v10259_v10 = vpop.f32.mrb[90].mxu1  ;;  %v7208_v28 = vpop.eup %7207  ;;  %6327 = vst [vmem:[%s10223_s26 + $0x28] sm:$0xff] %v6191_v41   ;;  %v4808_v27 = vadd.f32 1.0, %v7206_v16  ;;  %7227 = vpow2.f32 %v5917_v20  ;;  %v5921_v41 = vmul.f32 -1.442695, %v4443_v0 }
 0x3d6   : > { %11500 = vst [vmem:[#allocation104_spill] sm:$0xff] %v10259_v10  ;;  %v10262_v18 = vpop.f32.mrb[91].mxu1  ;;  %v7210_v47 = vpop.eup %7209  ;;  %6326 = vst [vmem:[%s10223_s26 + $0x20] sm:$0xff] %v6186_v13   ;;  %v4806_v6 = vadd.f32 1.0, %v7208_v28  ;;  %7229 = vpow2.f32 %v5922_v49  ;;  %v5920_v10 = vmul.f32 -1.442695, %v4440_v12 }
 0x3d7   : > { %11501 = vst [vmem:[#allocation111_spill] sm:$0xff] %v10262_v18  ;;  %v7212_v23 = vpop.eup %7211  ;;  %7231 = vrcp.f32 %v4808_v27  ;;  %v4809_v29 = vadd.f32 1.0, %v7210_v47  ;;  %v6600_v21 = vpop.f32.mrb[124].mxu0 }
 0x3d8   : > { %v7214_v32 = vpop.eup %7213  ;;  %7233 = vrcp.f32 %v4806_v6  ;;  %v4807_v9 = vadd.f32 1.0, %v7212_v23  ;;  %v4455_v18 = vpop.f32.mrb[125].mxu0  ;;  %v4464_v20 = vadd.f32 %v6600_v21, %v10118_v34 }
 0x3d9   : > { %v7216_v51 = vpop.eup %7215  ;;  %7235 = vrcp.f32 %v4809_v29  ;;  %v6601_v48 = vpop.f32.mrb[126].mxu0  ;;  %v4456_v23 = vadd.f32 %v10118_v34, %v4455_v18 }
 0x3da   : > { %v7218_v49 = vpop.eup %7217  ;;  %7237 = vrcp.f32 %v4807_v9  ;;  %v4458_v27 = vpop.f32.mrb[127].mxu0  ;;  %v5926_v56 = vmul.f32 -1.442695, %v4464_v20 }
 0x3db   : > { %v10268_v16 = vpop.f32.mrb[92].mxu1  ;;  %v7220_v12 = vpop.eup %7219  ;;  %v6201_v28 = vpack.c.bf16 %v7218_v49, %v7214_v32  ;;  %7239 = vpow2.f32 %v5920_v10  ;;  %v4459_v10 = vadd.f32 %v10118_v34, %v4458_v27 }
 0x3dc   : > { %11502 = vst [vmem:[#allocation112_spill] sm:$0xff] %v10268_v16  ;;  %v10270_v13 = vpop.f32.mrb[93].mxu1  ;;  %v7222_v6 = vpop.eup %7221  ;;  %v6196_v0 = vpack.c.bf16 %v7220_v12, %v7216_v51  ;;  %7241 = vpow2.f32 %v5923_v4  ;;  %v5924_v12 = vmul.f32 -1.442695, %v4456_v23 }
 0x3dd   : > { %11503 = vst [vmem:[#allocation113_spill] sm:$0xff] %v10270_v13  ;;  %v10272_v47 = vpop.f32.mrb[94].mxu1  ;;  %v7224_v21 = vpop.eup %7223  ;;  %6329 = vst [vmem:[%s10223_s26 + $0x38] sm:$0xff] %v6201_v28   ;;  %v4812_v9 = vadd.f32 1.0, %v7222_v6  ;;  %7243 = vpow2.f32 %v5921_v41  ;;  %v4467_v13 = vadd.f32 %v6601_v48, %v10118_v34  ;;  %v5925_v27 = vmul.f32 -1.442695, %v4459_v10 }
 0x3de   : > { %11504 = vst [vmem:[#allocation114_spill] sm:$0xff] %v10272_v47  ;;  %v10275_v29 = vpop.f32.mrb[95].mxu1  ;;  %v7226_v16 = vpop.eup %7225  ;;  %6328 = vst [vmem:[%s10223_s26 + $0x30] sm:$0xff] %v6196_v0   ;;  %v4810_v32 = vadd.f32 1.0, %v7224_v21  ;;  %7245 = vpow2.f32 %v5926_v56 }
 0x3df   : > { %11505 = vst [vmem:[#allocation115_spill] sm:$0xff] %v10275_v29  ;;  %v7228_v20 = vpop.eup %7227  ;;  %7247 = vrcp.f32 %v4812_v9  ;;  %v4813_v51 = vadd.f32 1.0, %v7226_v16  ;;  %v6604_v4 = vpop.f32.mrb[128].mxu0  ;;  %v5927_v29 = vmul.f32 -1.442695, %v4467_v13 }
 0x3e0   : > { %v7230_v49 = vpop.eup %7229  ;;  %7249 = vrcp.f32 %v4810_v32  ;;  %v4811_v18 = vadd.f32 1.0, %v7228_v20  ;;  %v4480_v28 = vadd.f32 %v6604_v4, %v10118_v34  ;;  %v4471_v6 = vpop.f32.mrb[129].mxu0 }
 0x3e1   : > { %v7232_v41 = vpop.eup %7231  ;;  %7251 = vrcp.f32 %v4813_v51  ;;  %v4816_v48 = vadd.f32 1.0, %v7230_v49  ;;  %v6605_v0 = vpop.f32.mrb[130].mxu0  ;;  %v4472_v51 = vadd.f32 %v10118_v34, %v4471_v6 }
 0x3e2   : > { %v7234_v56 = vpop.eup %7233  ;;  %7253 = vrcp.f32 %v4811_v18  ;;  %v4474_v47 = vpop.f32.mrb[131].mxu0  ;;  %v5930_v32 = vmul.f32 -1.442695, %v4480_v28  ;;  %v4483_v18 = vadd.f32 %v6605_v0, %v10118_v34 }
 0x3e3   : > { %v2585_v21 = vpop.f32.mrb[96].mxu1  ;;  %v7236_v9 = vpop.eup %7235  ;;  %7255 = vrcp.f32 %v4816_v48  ;;  %v4475_v48 = vadd.f32 %v10118_v34, %v4474_v47 }
 0x3e4   : > { %v2587_v16 = vpop.f32.mrb[97].mxu1  ;;  %v7238_v23 = vpop.eup %7237  ;;  %v6211_v4 = vpack.c.bf16 %v7236_v9, %v7232_v41  ;;  %7257 = vpow2.f32 %v5924_v12  ;;  %v2586_v12 = vadd.f32 %v2585_v21, %v11390_v17 }
 0x3e5   : > { %v2589_v20 = vpop.f32.mrb[98].mxu1  ;;  %v7240_v13 = vpop.eup %7239  ;;  %v6206_v60 = vpack.c.bf16 %v7238_v23, %v7234_v56  ;;  %7259 = vpow2.f32 %v5927_v29  ;;  %v5928_v56 = vmul.f32 -1.442695, %v4472_v51  ;;  %v2588_v29 = vadd.f32 %v2587_v16, %v11390_v17 }
 0x3e6   : > { %v2591_v49 = vpop.f32.mrb[99].mxu1  ;;  %v7242_v10 = vpop.eup %7241  ;;  %6331 = vst [vmem:[%s10223_s26 + $0x48] sm:$0xff] %v6211_v4   ;;  %v4814_v54 = vadd.f32 1.0, %v7240_v13  ;;  %7261 = vpow2.f32 %v5925_v27  ;;  %v5931_v27 = vmul.f32 -1.442695, %v4483_v18 }
 0x3e7   : > { %v7244_v28 = vpop.eup %7243  ;;  %6330 = vst [vmem:[%s10223_s26 + $0x40] sm:$0xff] %v6206_v60   ;;  %v4817_v5 = vadd.f32 1.0, %v7242_v10  ;;  %7263 = vpow2.f32 %v5930_v32  ;;  %v6608_v41 = vpop.f32.mrb[132].mxu0  ;;  %v5929_v32 = vmul.f32 -1.442695, %v4475_v48  ;;  %v2590_v48 = vadd.f32 %v2589_v20, %v11391_v53 }
 0x3e8   : > { %v7246_v6 = vpop.eup %7245  ;;  %7265 = vrcp.f32 %v4814_v54  ;;  %v4815_v9 = vadd.f32 1.0, %v7244_v28  ;;  %v4487_v0 = vpop.f32.mrb[133].mxu0  ;;  %v5697_v51 = vmul.f32 -1.442695, %v2586_v12  ;;  %v5698_v18 = vmul.f32 -1.442695, %v2588_v29 }
 0x3e9   : > { %v7248_v23 = vpop.eup %7247  ;;  %7267 = vrcp.f32 %v4817_v5  ;;  %v4820_v4 = vadd.f32 1.0, %v7246_v6  ;;  %v6609_v13 = vpop.f32.mrb[134].mxu0 }
 0x3ea   : > { %v7250_v60 = vpop.eup %7249  ;;  %7269 = vrcp.f32 %v4815_v9  ;;  %v4490_v10 = vpop.f32.mrb[135].mxu0  ;;  %v4499_v63 = vadd.f32 %v6609_v13, %v10118_v34 }
 0x3eb   : > { %v10289_v47 = vpop.f32.mrb[100].mxu1  ;;  %v7252_v54 = vpop.eup %7251  ;;  %7271 = vrcp.f32 %v4820_v4  ;;  %v2592_v4 = vadd.f32 %v2591_v49, %v11391_v53 }
 0x3ec   : > { %v10291_v21 = vpop.f32.mrb[101].mxu1  ;;  %v7254_v16 = vpop.eup %7253  ;;  %v6221_v5 = vpack.c.bf16 %v7252_v54, %v7248_v23  ;;  %7273 = vpow2.f32 %v5928_v56  ;;  %v4496_v23 = vadd.f32 %v6608_v41, %v10118_v34 }
 0x3ed   : > { %v10293_v17 = vpop.f32.mrb[102].mxu1  ;;  %v7256_v6 = vpop.eup %7255  ;;  %v6216_v19 = vpack.c.bf16 %v7254_v16, %v7250_v60  ;;  %7275 = vpow2.f32 %v5931_v27  ;;  %v4488_v27 = vadd.f32 %v10118_v34, %v4487_v0  ;;  %v5701_v16 = vmul.f32 -1.442695, %v2590_v48 }
 0x3ee   : > { %v10295_v28 = vpop.f32.mrb[103].mxu1  ;;  %v7258_v9 = vpop.eup %7257  ;;  %6333 = vst [vmem:[%s10223_s26 + $0x58] sm:$0xff] %v6221_v5   ;;  %7277 = vpow2.f32 %v5929_v32  ;;  %v2598_v13 = vadd.f32 %v10291_v21, %v11392_v57 }
 0x3ef   : > { %v7260_v12 = vpop.eup %7259  ;;  %6332 = vst [vmem:[%s10223_s26 + $0x50] sm:$0xff] %v6216_v19   ;;  %v4818_v52 = vadd.f32 1.0, %v7258_v9  ;;  %7279 = vpow2.f32 %v5697_v51  ;;  %v10302_v56 = vpop.f32.mrb[136].mxu0  ;;  %v5702_v51 = vmul.f32 -1.442695, %v2592_v4 }
 0x3f0   : > { %v7262_v29 = vpop.eup %7261  ;;  %v4821_v54 = vadd.f32 1.0, %v7260_v12  ;;  %7281 = vpow2.f32 %v5698_v18  ;;  %v10305_v60 = vpop.f32.mrb[137].mxu0  ;;  %v5934_v9 = vmul.f32 -1.442695, %v4496_v23  ;;  %v4491_v23 = vadd.f32 %v10118_v34, %v4490_v10  ;;  %v11506_v10 = vld [vmem:[#allocation100_spill] sm:$0xff] }
 0x3f1   : > { %v7264_v20 = vpop.eup %7263  ;;  %7283 = vrcp.f32 %v4818_v52  ;;  %v4819_v32 = vadd.f32 1.0, %v7262_v29  ;;  %v10307_v53 = vpop.f32.mrb[138].mxu0  ;;  %v5932_v29 = vmul.f32 -1.442695, %v4488_v27  ;;  %v5706_v15 = vmul.f32 -1.442695, %v2598_v13 }
 0x3f2   : > { %v7266_v49 = vpop.eup %7265  ;;  %7285 = vrcp.f32 %v4821_v54  ;;  %v4824_v41 = vadd.f32 1.0, %v7264_v20  ;;  %v10311_v5 = vpop.f32.mrb[139].mxu0 }
 0x3f3   : > { %v10309_v19 = vpop.f32.mrb[104].mxu1  ;;  %v7268_v0 = vpop.eup %7267  ;;  %7287 = vrcp.f32 %v4819_v32 }
 0x3f4   : > { %v10313_v18 = vpop.f32.mrb[105].mxu1  ;;  %v7270_v48 = vpop.eup %7269  ;;  %v6231_v12 = vpack.c.bf16 %v7268_v0, %v7256_v6  ;;  %7289 = vrcp.f32 %v4824_v41 }
 0x3f5   : > { %v10315_v52 = vpop.f32.mrb[106].mxu1  ;;  %v7272_v54 = vpop.eup %7271  ;;  %v6226_v20 = vpack.c.bf16 %v7270_v48, %v7266_v49  ;;  %7291 = vpow2.f32 %v5701_v16  ;;  %v2596_v49 = vadd.f32 %v10289_v47, %v11392_v57  ;;  %v2756_v48 = vsub.s32 2, %v11506_v10 }
 0x3f6   : > { %v10317_v44 = vpop.f32.mrb[107].mxu1  ;;  %v7274_v4 = vpop.eup %7273  ;;  %6335 = vst [vmem:[%s10223_s26 + $0x68] sm:$0xff] %v6231_v12   ;;  %7293 = vpow2.f32 %v5702_v51  ;;  %v5935_v12 = vmul.f32 -1.442695, %v4499_v63  ;;  %v5933_v57 = vmul.f32 -1.442695, %v4491_v23 }
 0x3f7   : > { %v7276_v36 = vpop.eup %7275  ;;  %6334 = vst [vmem:[%s10223_s26 + $0x60] sm:$0xff] %v6226_v20   ;;  %v4822_v32 = vadd.f32 1.0, %v7274_v4  ;;  %7295 = vpow2.f32 %v5934_v9  ;;  %v10323_v1 = vpop.f32.mrb[140].mxu0  ;;  %v2760_v4 = vsub.s32 3, %v11506_v10  ;;  %v5705_v26 = vmul.f32 -1.442695, %v2596_v49 }
 0x3f8   : > { %v7278_v6 = vpop.eup %7277  ;;  %v4825_v27 = vadd.f32 1.0, %v7276_v36  ;;  %7297 = vpow2.f32 %v5932_v29  ;;  %v10327_v16 = vpop.f32.mrb[141].mxu0 }
 0x3f9   : > { %v7280_v41 = vpop.eup %7279  ;;  %7299 = vrcp.f32 %v4822_v32  ;;  %v4823_v51 = vadd.f32 1.0, %v7278_v6  ;;  %v10331_v0 = vpop.f32.mrb[142].mxu0 }
 0x3fa   : > { %v7282_v34 = vpop.eup %7281  ;;  %7301 = vrcp.f32 %v4825_v27  ;;  %v3024_v36 = vadd.f32 1.0, %v7280_v41  ;;  %v10336_v29 = vpop.f32.mrb[143].mxu0 }
 0x3fb   : > { %v10333_v9 = vpop.f32.mrb[108].mxu1  ;;  %v7284_v20 = vpop.eup %7283  ;;  %7303 = vrcp.f32 %v4823_v51  ;;  %v3025_v32 = vadd.f32 1.0, %v7282_v34  ;;  %v2600_v51 = vadd.f32 %v10293_v17, %v11393_v42  ;;  %v7672_v34 = vld [vmem:[%s9728_s30] sm:$0xf]  ;;  %v10360_v17 = vld [vmem:[#allocation7] ss:$0 sm:$0xff] }
 0x3fc   : > { %v10338_v47 = vpop.f32.mrb[109].mxu1  ;;  %v7286_v6 = vpop.eup %7285  ;;  %7305 = vrcp.f32 %v3024_v36  ;;  %v10348_v10 = vrot.slane %v7672_v34, %v2756_v48  ;;  %v10350_v45 = vrot.slane %v7672_v34, %v2760_v4  ;;  %v2426_v36 = vadd.f32 %v9933_v30, %v11395_v7  ;;  %s6161_s30 = sshll.u32 (%p8028_p5), %s7913_s17, 4 }
 0x3fd   : > { %v10341_v21 = vpop.f32.mrb[110].mxu1  ;;  %v7288_v63 = vpop.eup %7287  ;;  %v6241_v41 = vpack.c.bf16 %v7286_v6, %v7272_v54  ;;  %7307 = vrcp.f32 %v3025_v32  ;;  %v2602_v54 = vadd.f32 %v10295_v28, %v11393_v42  ;;  %v4512_v48 = vadd.f32 %v10360_v17, %v10302_v56  ;;  %s10898_s27 = scalar_lea.vmem (%p8028_p5), %s11054_s8, %s6161_s30 }
 0x3fe   : > { %v10343_v27 = vpop.f32.mrb[111].mxu1  ;;  %v7290_v46 = vpop.eup %7289  ;;  %v6236_v62 = vpack.c.bf16 %v7288_v63, %v7284_v20  ;;  %7309 = vpow2.f32 %v5935_v12  ;;  %v2428_v42 = vadd.f32 %v9936_v39, %v11395_v7  ;;  %v4504_v32 = vadd.f32 %v10360_v17, %v10305_v60 }
 0x3ff   : > { %v7292_v23 = vpop.eup %7291  ;;  %6337 = vst [vmem:[%s10223_s26 + $0x78] sm:$0xff] %v6241_v41   ;;  %7311 = vpow2.f32 %v5933_v57  ;;  %v10355_v49 = vpop.f32.mrb[144].mxu0  ;;  %v5709_v6 = vmul.f32 -1.442695, %v2600_v51  ;;  %v4515_v56 = vadd.f32 %v10360_v17, %v10307_v53  ;;  %v5710_v7 = vmul.f32 -1.442695, %v2602_v54 }
 0x400   : > { %v7294_v13 = vpop.eup %7293  ;;  %6336 = vst [vmem:[%s10223_s26 + $0x70] sm:$0xff] %v6236_v62   ;;  %v3028_v12 = vadd.f32 1.0, %v7292_v23  ;;  %7313 = vpow2.f32 %v5705_v26  ;;  %v10364_v20 = vpop.f32.mrb[145].mxu0  ;;  %v5938_v34 = vmul.f32 -1.442695, %v4512_v48 }
 0x401   : > { %v7296_v4 = vpop.eup %7295  ;;  %v3029_v28 = vadd.f32 1.0, %v7294_v13  ;;  %7315 = vpow2.f32 %v5706_v15  ;;  %v10370_v30 = vpop.f32.mrb[146].mxu0  ;;  %v5939_v54 = vmul.f32 -1.442695, %v4515_v56 }
 0x402   : > { %v7298_v26 = vpop.eup %7297  ;;  %7317 = vrcp.f32 %v3028_v12  ;;  %v4828_v57 = vadd.f32 1.0, %v7296_v4  ;;  %v10376_v63 = vpop.f32.mrb[147].mxu0  ;;  %v2768_v12 = vmul.f32 %v10348_v10, %v2426_v36  ;;  %v5936_v4 = vmul.f32 -1.442695, %v4504_v32 }
 0x403   : > { %v10372_v62 = vpop.f32.mrb[112].mxu1  ;;  %v7300_v39 = vpop.eup %7299  ;;  %7319 = vrcp.f32 %v3029_v28  ;;  %v4826_v15 = vadd.f32 1.0, %v7298_v26  ;;  %v2769_v28 = vmul.f32 %v10350_v45, %v2428_v42  ;;  %v4507_v36 = vadd.f32 %v10360_v17, %v10311_v5 }
 0x404   : > { %v10378_v41 = vpop.f32.mrb[113].mxu1  ;;  %v7302_v23 = vpop.eup %7301  ;;  %7321 = vrcp.f32 %v4828_v57  ;;  %v2430_v57 = vadd.f32 %v9940_v11, %v11399_v38  ;;  %v2432_v32 = vadd.f32 %v9942_v14, %v11399_v38  ;;  %v2608_v5 = vadd.f32 %v10313_v18, %v11394_v37 }
 0x405   : > { %11507 = vst [vmem:[#allocation100_spill] sm:$0xff] %v10378_v41  ;;  %v10380_v60 = vpop.f32.mrb[114].mxu1  ;;  %v7304_v51 = vpop.eup %7303  ;;  %v6251_v53 = vpack.c.bf16 %v7302_v23, %v7290_v46  ;;  %7323 = vrcp.f32 %v4826_v15  ;;  %v5937_v18 = vmul.f32 -1.442695, %v4507_v36 }
 0x406   : > { %11508 = vst [vmem:[#allocation116_spill] sm:$0xff] %v10380_v60  ;;  %v10382_v13 = vpop.f32.mrb[115].mxu1  ;;  %v7306_v41 = vpop.eup %7305  ;;  %v6246_v26 = vpack.c.bf16 %v7304_v51, %v7300_v39  ;;  %7325 = vpow2.f32 %v5709_v6  ;;  %v2606_v6 = vadd.f32 %v10309_v19, %v11394_v37  ;;  %v2610_v19 = vadd.f32 %v10315_v52, %v11397_v61 }
 0x407   : > { %v7308_v60 = vpop.eup %7307  ;;  %6339 = vst [vmem:[%s10223_s26 + $0x88] sm:$0xff] %v6251_v53   ;;  %v3216_v48 = vmul.f32 %v7306_v41, %v2768_v12  ;;  %7327 = vpow2.f32 %v5710_v7  ;;  %v10391_v46 = vpop.f32.mrb[148].mxu0  ;;  %v2772_v12 = vmul.f32 %v10348_v10, %v2430_v57 }
 0x408   : > { %v7310_v15 = vpop.eup %7309  ;;  %6338 = vst [vmem:[%s10223_s26 + $0x80] sm:$0xff] %v6246_v26   ;;  %v3217_v42 = vmul.f32 %v7308_v60, %v2769_v28  ;;  %7329 = vpow2.f32 %v5938_v34  ;;  %v10398_v56 = vpop.f32.mrb[149].mxu0  ;;  %v2773_v28 = vmul.f32 %v10350_v45, %v2432_v32 }
 0x409   : > { %v7312_v11 = vpop.eup %7311  ;;  %v4829_v41 = vadd.f32 1.0, %v7310_v15  ;;  %7331 = vpow2.f32 %v5936_v4  ;;  %v10402_v39 = vpop.f32.mrb[150].mxu0 }
 0x40a   : > { %v7314_v14 = vpop.eup %7313  ;;  %v6034_v38 = vpack.c.bf16 %v3217_v42, %v3216_v48  ;;  %v4827_v60 = vadd.f32 1.0, %v7312_v11  ;;  %7333 = vpow2.f32 %v5939_v54  ;;  %v10408_v23 = vpop.f32.mrb[151].mxu0  ;;  %v5713_v54 = vmul.f32 -1.442695, %v2606_v6 }
 0x40b   : > { %v10404_v7 = vpop.f32.mrb[116].mxu1  ;;  %v7316_v51 = vpop.eup %7315  ;;  %7335 = vrcp.f32 %v4829_v41  ;;  %v3032_v37 = vadd.f32 1.0, %v7314_v14  ;;  %v5714_v42 = vmul.f32 -1.442695, %v2608_v5  ;;  %v5717_v41 = vmul.f32 -1.442695, %v2610_v19 }
 0x40c   : > { %v10410_v34 = vpop.f32.mrb[117].mxu1  ;;  %v7318_v4 = vpop.eup %7317  ;;  %3983 = vst [vmem:[%s10021_s24 + $0x8] sm:$0xff] %v6034_v38  ;;  %7337 = vrcp.f32 %v4827_v60  ;;  %v3033_v26 = vadd.f32 1.0, %v7316_v51  ;;  %v2612_v6 = vadd.f32 %v10317_v44, %v11397_v61  ;;  %v2436_v5 = vadd.f32 %v9949_v40, %v11402_v50 }
 0x40d   : > { %v10413_v53 = vpop.f32.mrb[118].mxu1  ;;  %v7320_v48 = vpop.eup %7319  ;;  %v3220_v15 = vmul.f32 %v7318_v4, %v2772_v12  ;;  %7339 = vrcp.f32 %v3032_v37  ;;  %v4528_v19 = vadd.f32 %v10360_v17, %v10323_v1  ;;  %v4520_v61 = vadd.f32 %v10360_v17, %v10327_v16 }
 0x40e   : > { %v10417_v52 = vpop.f32.mrb[119].mxu1  ;;  %v7322_v11 = vpop.eup %7321  ;;  %v3221_v57 = vmul.f32 %v7320_v48, %v2773_v28  ;;  %7341 = vrcp.f32 %v3033_v26  ;;  %v2438_v40 = vadd.f32 %v9952_v55, %v11402_v50  ;;  %v4531_v1 = vadd.f32 %v10360_v17, %v10331_v0 }
 0x40f   : > { %v7324_v36 = vpop.eup %7323  ;;  %7343 = vpow2.f32 %v5937_v18  ;;  %v10419_v14 = vpop.f32.mrb[152].mxu0  ;;  %v5942_v55 = vmul.f32 -1.442695, %v4528_v19  ;;  %v2440_v0 = vadd.f32 %v9955_v31, %v11411_v22 }
 0x410   : > { %v7326_v32 = vpop.eup %7325  ;;  %v6036_v38 = vpack.c.bf16 %v3221_v57, %v3220_v15  ;;  %7345 = vpow2.f32 %v5713_v54  ;;  %v10423_v60 = vpop.f32.mrb[153].mxu0  ;;  %v5718_v57 = vmul.f32 -1.442695, %v2612_v6 }
 0x411   : > { %v7328_v51 = vpop.eup %7327  ;;  %v3036_v12 = vadd.f32 1.0, %v7326_v32  ;;  %7347 = vpow2.f32 %v5714_v42  ;;  %v10429_v37 = vpop.f32.mrb[154].mxu0  ;;  %v2776_v32 = vmul.f32 %v10348_v10, %v2436_v5  ;;  %v5943_v5 = vmul.f32 -1.442695, %v4531_v1 }
 0x412   : > { %v7330_v18 = vpop.eup %7329  ;;  %3985 = vst [vmem:[%s10021_s24 + $0x18] sm:$0xff] %v6036_v38  ;;  %v3037_v4 = vadd.f32 1.0, %v7328_v51  ;;  %7349 = vpow2.f32 %v5717_v41  ;;  %v10434_v44 = vpop.f32.mrb[155].mxu0 }
 0x413   : > { %v10436_v28 = vpop.f32.mrb[120].mxu1  ;;  %v7332_v26 = vpop.eup %7331  ;;  %7351 = vrcp.f32 %v3036_v12  ;;  %v4832_v54 = vadd.f32 1.0, %v7330_v18  ;;  %v5940_v18 = vmul.f32 -1.442695, %v4520_v61  ;;  %v2442_v61 = vadd.f32 %v9957_v3, %v11411_v22 }
 0x414   : > { %v10442_v48 = vpop.f32.mrb[121].mxu1  ;;  %v7334_v15 = vpop.eup %7333  ;;  %7353 = vrcp.f32 %v3037_v4  ;;  %v4830_v42 = vadd.f32 1.0, %v7332_v26  ;;  %v2777_v4 = vmul.f32 %v10350_v45, %v2438_v40 }
 0x415   : > { %v10444_v16 = vpop.f32.mrb[122].mxu1  ;;  %v7336_v41 = vpop.eup %7335  ;;  %7355 = vrcp.f32 %v4832_v54  ;;  %v4833_v38 = vadd.f32 1.0, %v7334_v15 }
 0x416   : > { %v10447_v50 = vpop.f32.mrb[123].mxu1  ;;  %v7338_v51 = vpop.eup %7337  ;;  %v6261_v12 = vpack.c.bf16 %v7336_v41, %v7322_v11  ;;  %7357 = vrcp.f32 %v4830_v42  ;;  %v2780_v41 = vmul.f32 %v10348_v10, %v2440_v0 }
 0x417   : > { %11509 = vst [vmem:[#allocation117_spill] sm:$0xff] %v10447_v50  ;;  %v7340_v6 = vpop.eup %7339  ;;  %v6256_v26 = vpack.c.bf16 %v7338_v51, %v7324_v36  ;;  %7359 = vrcp.f32 %v4833_v38  ;;  %v10452_v54 = vpop.f32.mrb[156].mxu0  ;;  %v4523_v50 = vadd.f32 %v10360_v17, %v10336_v29  ;;  %v2616_v36 = vadd.f32 %v10333_v9, %v11404_v24 }
 0x418   : > { %v7342_v15 = vpop.eup %7341  ;;  %6341 = vst [vmem:[%s10223_s26 + $0x98] sm:$0xff] %v6261_v12   ;;  %v3224_v19 = vmul.f32 %v7340_v6, %v2776_v32  ;;  %7361 = vpow2.f32 %v5718_v57  ;;  %v10457_v31 = vpop.f32.mrb[157].mxu0  ;;  %v2618_v32 = vadd.f32 %v10338_v47, %v11404_v24  ;;  %v2620_v51 = vadd.f32 %v10341_v21, %v11407_v33 }
 0x419   : > { %v7344_v11 = vpop.eup %7343  ;;  %6340 = vst [vmem:[%s10223_s26 + $0x90] sm:$0xff] %v6256_v26   ;;  %v3225_v40 = vmul.f32 %v7342_v15, %v2777_v4  ;;  %7363 = vpow2.f32 %v5942_v55  ;;  %v10464_v1 = vpop.f32.mrb[158].mxu0  ;;  %v5941_v6 = vmul.f32 -1.442695, %v4523_v50  ;;  %v2622_v24 = vadd.f32 %v10343_v27, %v11407_v33 }
 0x41a   : > { %v7346_v57 = vpop.eup %7345  ;;  %v4831_v29 = vadd.f32 1.0, %v7344_v11  ;;  %7365 = vpow2.f32 %v5940_v18  ;;  %v10471_v38 = vpop.f32.mrb[159].mxu0  ;;  %v2781_v26 = vmul.f32 %v10350_v45, %v2442_v61  ;;  %v5721_v15 = vmul.f32 -1.442695, %v2616_v36 }
 0x41b   : > { %v10466_v42 = vpop.f32.mrb[124].mxu1  ;;  %v7348_v22 = vpop.eup %7347  ;;  %v6038_v55 = vpack.c.bf16 %v3225_v40, %v3224_v19  ;;  %v3040_v9 = vadd.f32 1.0, %v7346_v57  ;;  %7367 = vpow2.f32 %v5943_v5  ;;  %v5722_v11 = vmul.f32 -1.442695, %v2618_v32 }
 0x41c   : > { %v10473_v3 = vpop.f32.mrb[125].mxu1  ;;  %v7350_v0 = vpop.eup %7349  ;;  %7369 = vrcp.f32 %v4831_v29  ;;  %v3041_v18 = vadd.f32 1.0, %v7348_v22  ;;  %v5725_v50 = vmul.f32 -1.442695, %v2620_v51  ;;  %v5726_v33 = vmul.f32 -1.442695, %v2622_v24 }
 0x41d   : > { %v10477_v12 = vpop.f32.mrb[126].mxu1  ;;  %v7352_v4 = vpop.eup %7351  ;;  %3987 = vst [vmem:[%s10021_s24 + $0x28] sm:$0xff] %v6038_v55  ;;  %7371 = vrcp.f32 %v3040_v9  ;;  %v3044_v5 = vadd.f32 1.0, %v7350_v0  ;;  %v4544_v61 = vadd.f32 %v10360_v17, %v10355_v49  ;;  %v4536_v9 = vadd.f32 %v10360_v17, %v10364_v20 }
 0x41e   : > { %v10481_v47 = vpop.f32.mrb[127].mxu1  ;;  %v7354_v19 = vpop.eup %7353  ;;  %v3228_v21 = vmul.f32 %v7352_v4, %v2780_v41  ;;  %7373 = vrcp.f32 %v3041_v18  ;;  %v2446_v41 = vadd.f32 %v9966_v43, %v11414_v25  ;;  %v2448_v18 = vadd.f32 %v9969_v59, %v11414_v25 }
 0x41f   : > { %v7356_v40 = vpop.eup %7355  ;;  %v3229_v57 = vmul.f32 %v7354_v19, %v2781_v26  ;;  %7375 = vrcp.f32 %v3044_v5  ;;  %v2450_v4 = vadd.f32 %v9974_v35, %v11423_v58  ;;  %v4539_v26 = vadd.f32 %v10360_v17, %v10376_v63 }
 0x420   : > { %v7358_v29 = vpop.eup %7357  ;;  %7377 = vpow2.f32 %v5941_v6  ;;  %v4547_v6 = vadd.f32 %v10360_v17, %v10370_v30  ;;  %v2784_v30 = vmul.f32 %v10348_v10, %v2446_v41 }
 0x421   : > { %v7360_v27 = vpop.eup %7359  ;;  %v6040_v22 = vpack.c.bf16 %v3229_v57, %v3228_v21  ;;  %7379 = vpow2.f32 %v5721_v15  ;;  %v5946_v15 = vmul.f32 -1.442695, %v4544_v61 }
 0x422   : > { %v7362_v36 = vpop.eup %7361  ;;  %v6271_v32 = vpack.c.bf16 %v7360_v27, %v7356_v40  ;;  %7381 = vpow2.f32 %v5722_v11  ;;  %v5944_v11 = vmul.f32 -1.442695, %v4536_v9  ;;  %v2785_v40 = vmul.f32 %v10350_v45, %v2448_v18 }
 0x423   : > { %v10487_v55 = vpop.f32.mrb[128].mxu1  ;;  %v7364_v0 = vpop.eup %7363  ;;  %3989 = vst [vmem:[%s10021_s24 + $0x38] sm:$0xff] %v6040_v22  ;;  %v3045_v49 = vadd.f32 1.0, %v7362_v36  ;;  %7383 = vpow2.f32 %v5725_v50  ;;  %v5947_v50 = vmul.f32 -1.442695, %v4547_v6  ;;  %v2452_v9 = vadd.f32 %v9976_v8, %v11423_v58  ;;  %v11511_v8 = vld [vmem:[#allocation55_spill] sm:$0xff] }
 0x424   : > { %v10493_v51 = vpop.f32.mrb[129].mxu1  ;;  %v7366_v43 = vpop.eup %7365  ;;  %6343 = vst [vmem:[%s10223_s26 + $0xa8] sm:$0xff] %v6271_v32   ;;  %v4836_v20 = vadd.f32 1.0, %v7364_v0  ;;  %7385 = vpow2.f32 %v5726_v33  ;;  %v2788_v33 = vmul.f32 %v10348_v10, %v2450_v4  ;;  %v5945_v22 = vmul.f32 -1.442695, %v4539_v26  ;;  %v11510_v4 = vld [vmem:[#allocation100_spill] sm:$0xff] }
 0x425   : > { %v10500_v24 = vpop.f32.mrb[130].mxu1  ;;  %v7368_v59 = vpop.eup %7367  ;;  %7387 = vrcp.f32 %v3045_v49  ;;  %v4834_v25 = vadd.f32 1.0, %v7366_v43  ;;  %v11512_v58 = vld [vmem:[#allocation116_spill] sm:$0xff] }
 0x426   : > { %v10507_v5 = vpop.f32.mrb[131].mxu1  ;;  %v7370_v19 = vpop.eup %7369  ;;  %7389 = vrcp.f32 %v4836_v20  ;;  %v4837_v21 = vadd.f32 1.0, %v7368_v59  ;;  %v2628_v20 = vadd.f32 %v11510_v4, %v11416_v2 }
 0x427   : > { %v7372_v35 = vpop.eup %7371  ;;  %v6266_v57 = vpack.c.bf16 %v7370_v19, %v7358_v29  ;;  %7391 = vrcp.f32 %v4834_v25  ;;  %v2626_v29 = vadd.f32 %v10372_v62, %v11416_v2  ;;  %v2789_v2 = vmul.f32 %v10350_v45, %v2452_v9  ;;  %v11514_v9 = vld [vmem:[#allocation28_spill] sm:$0xff] }
 0x428   : > { %v7374_v63 = vpop.eup %7373  ;;  %v3232_v27 = vmul.f32 %v7372_v35, %v2784_v30  ;;  %7393 = vrcp.f32 %v4837_v21  ;;  %v2632_v21 = vadd.f32 %v10382_v13, %v11511_v8 }
 0x429   : > { %v7376_v61 = vpop.eup %7375  ;;  %6342 = vst [vmem:[%s10223_s26 + $0xa0] sm:$0xff] %v6266_v57   ;;  %v3233_v36 = vmul.f32 %v7374_v63, %v2785_v40  ;;  %7395 = vpow2.f32 %v5946_v15  ;;  %v2630_v15 = vadd.f32 %v11512_v58, %v11511_v8  ;;  %v5729_v40 = vmul.f32 -1.442695, %v2626_v29 }
 0x42a   : > { %v7378_v32 = vpop.eup %7377  ;;  %v3236_v0 = vmul.f32 %v7376_v61, %v2788_v33  ;;  %7397 = vpow2.f32 %v5944_v11  ;;  %v5730_v63 = vmul.f32 -1.442695, %v2628_v20  ;;  %v4560_v29 = vadd.f32 %v10360_v17, %v10391_v46 }
 0x42b   : > { %v10513_v41 = vpop.f32.mrb[132].mxu1  ;;  %v7380_v49 = vpop.eup %7379  ;;  %v6042_v6 = vpack.c.bf16 %v3233_v36, %v3232_v27  ;;  %v4835_v43 = vadd.f32 1.0, %v7378_v32  ;;  %7399 = vpow2.f32 %v5947_v50  ;;  %v5734_v36 = vmul.f32 -1.442695, %v2632_v21 }
 0x42c   : > { %v10519_v18 = vpop.f32.mrb[133].mxu1  ;;  %v7382_v59 = vpop.eup %7381  ;;  %v3048_v25 = vadd.f32 1.0, %v7380_v49  ;;  %7401 = vpow2.f32 %v5945_v22  ;;  %v5733_v22 = vmul.f32 -1.442695, %v2630_v15  ;;  %v11513_v49 = vld [vmem:[#allocation32_spill] sm:$0xff]  ;;  %v4552_v58 = vadd.f32 %v10360_v17, %v10398_v56 }
 0x42d   : > { %v10523_v26 = vpop.f32.mrb[134].mxu1  ;;  %v7384_v62 = vpop.eup %7383  ;;  %3991 = vst [vmem:[%s10021_s24 + $0x48] sm:$0xff] %v6042_v6  ;;  %7403 = vrcp.f32 %v4835_v43  ;;  %v3049_v30 = vadd.f32 1.0, %v7382_v59  ;;  %v2456_v6 = vadd.f32 %v11514_v9, %v11513_v49  ;;  %v11515_v59 = vld [vmem:[#allocation48_spill] sm:$0xff] }
 0x42e   : > { %v10527_v19 = vpop.f32.mrb[135].mxu1  ;;  %v7386_v11 = vpop.eup %7385  ;;  %7405 = vrcp.f32 %v3048_v25  ;;  %v3052_v35 = vadd.f32 1.0, %v7384_v62  ;;  %v2458_v25 = vadd.f32 %v11515_v59, %v11513_v49 }
 0x42f   : > { %v7388_v57 = vpop.eup %7387  ;;  %7407 = vrcp.f32 %v3049_v30  ;;  %v3053_v50 = vadd.f32 1.0, %v7386_v11  ;;  %v11517_v30 = vld [vmem:[#allocation47_spill] sm:$0xff]  ;;  %v4563_v11 = vadd.f32 %v10360_v17, %v10402_v39  ;;  %v2792_v49 = vmul.f32 %v10348_v10, %v2456_v6 }
 0x430   : > { %v7390_v33 = vpop.eup %7389  ;;  %v3237_v27 = vmul.f32 %v7388_v57, %v2789_v2  ;;  %7409 = vrcp.f32 %v3052_v35 }
 0x431   : > { %v7392_v61 = vpop.eup %7391  ;;  %7411 = vrcp.f32 %v3053_v50  ;;  %v4555_v50 = vadd.f32 %v10360_v17, %v10408_v23  ;;  %v5951_v23 = vmul.f32 -1.442695, %v4563_v11 }
 0x432   : > { %v7394_v13 = vpop.eup %7393  ;;  %v6044_v43 = vpack.c.bf16 %v3237_v27, %v3236_v0  ;;  %7413 = vpow2.f32 %v5729_v40  ;;  %v11516_v0 = vld [vmem:[#allocation34_spill] sm:$0xff]  ;;  %v5950_v27 = vmul.f32 -1.442695, %v4560_v29 }
 0x433   : > { %v10533_v32 = vpop.f32.mrb[136].mxu1  ;;  %v7396_v20 = vpop.eup %7395  ;;  %v6281_v8 = vpack.c.bf16 %v7394_v13, %v7390_v33  ;;  %7415 = vpow2.f32 %v5730_v63  ;;  %v2460_v21 = vadd.f32 %v11517_v30, %v11516_v0  ;;  %v11518_v40 = vld [vmem:[#allocation50_spill] sm:$0xff] }
 0x434   : > { %v10539_v4 = vpop.f32.mrb[137].mxu1  ;;  %v7398_v62 = vpop.eup %7397  ;;  %3993 = vst [vmem:[%s10021_s24 + $0x58] sm:$0xff] %v6044_v43  ;;  %v4840_v46 = vadd.f32 1.0, %v7396_v20  ;;  %7417 = vpow2.f32 %v5733_v22  ;;  %v2462_v57 = vadd.f32 %v11518_v40, %v11516_v0  ;;  %v11519_v22 = vld [vmem:[#allocation58_spill] sm:$0xff]  ;;  %v5948_v43 = vmul.f32 -1.442695, %v4552_v58 }
 0x435   : > { %v10545_v15 = vpop.f32.mrb[138].mxu1  ;;  %v7400_v35 = vpop.eup %7399  ;;  %6345 = vst [vmem:[%s10223_s26 + $0xb8] sm:$0xff] %v6281_v8   ;;  %v4838_v56 = vadd.f32 1.0, %v7398_v62  ;;  %7419 = vpow2.f32 %v5734_v36  ;;  %v2636_v13 = vadd.f32 %v10404_v7, %v11519_v22  ;;  %v2793_v36 = vmul.f32 %v10350_v45, %v2458_v25 }
 0x436   : > { %v10552_v2 = vpop.f32.mrb[139].mxu1  ;;  %v7402_v63 = vpop.eup %7401  ;;  %7421 = vrcp.f32 %v4840_v46  ;;  %v4841_v33 = vadd.f32 1.0, %v7400_v35  ;;  %v2796_v62 = vmul.f32 %v10348_v10, %v2460_v21  ;;  %v5949_v0 = vmul.f32 -1.442695, %v4555_v50 }
 0x437   : > { %v7404_v39 = vpop.eup %7403  ;;  %7423 = vrcp.f32 %v4838_v56  ;;  %v4839_v9 = vadd.f32 1.0, %v7402_v63  ;;  %v2797_v6 = vmul.f32 %v10350_v45, %v2462_v57  ;;  %v5737_v58 = vmul.f32 -1.442695, %v2636_v13  ;;  %v11520_v57 = vld [vmem:[#allocation57_spill] sm:$0xff] }
 0x438   : > { %v7406_v20 = vpop.eup %7405  ;;  %v6276_v59 = vpack.c.bf16 %v7404_v39, %v7392_v61  ;;  %7425 = vrcp.f32 %v4841_v33  ;;  %v2638_v21 = vadd.f32 %v10410_v34, %v11519_v22  ;;  %v2640_v63 = vadd.f32 %v10413_v53, %v11520_v57 }
 0x439   : > { %v7408_v8 = vpop.eup %7407  ;;  %v3240_v29 = vmul.f32 %v7406_v20, %v2792_v49  ;;  %7427 = vrcp.f32 %v4839_v9  ;;  %v2642_v39 = vadd.f32 %v10417_v52, %v11520_v57  ;;  %v4576_v9 = vadd.f32 %v10360_v17, %v10419_v14 }
 0x43a   : > { %v7410_v30 = vpop.eup %7409  ;;  %6344 = vst [vmem:[%s10223_s26 + $0xb0] sm:$0xff] %v6276_v59   ;;  %v3241_v46 = vmul.f32 %v7408_v8, %v2793_v36  ;;  %7429 = vpow2.f32 %v5950_v27  ;;  %v5738_v20 = vmul.f32 -1.442695, %v2638_v21 }
 0x43b   : > { %v10564_v7 = vpop.f32.mrb[140].mxu1  ;;  %v7412_v61 = vpop.eup %7411  ;;  %v3244_v25 = vmul.f32 %v7410_v30, %v2796_v62  ;;  %7431 = vpow2.f32 %v5948_v43  ;;  %v5742_v52 = vmul.f32 -1.442695, %v2642_v39  ;;  %v4579_v39 = vadd.f32 %v10360_v17, %v10429_v37 }
 0x43c   : > { %v10568_v35 = vpop.f32.mrb[141].mxu1  ;;  %v7414_v40 = vpop.eup %7413  ;;  %v6046_v56 = vpack.c.bf16 %v3241_v46, %v3240_v29  ;;  %v3245_v50 = vmul.f32 %v7412_v61, %v2797_v6  ;;  %7433 = vpow2.f32 %v5951_v23  ;;  %v5741_v23 = vmul.f32 -1.442695, %v2640_v63  ;;  %v11521_v61 = vld [vmem:[#allocation36_spill] sm:$0xff] }
 0x43d   : > { %v10572_v11 = vpop.f32.mrb[142].mxu1  ;;  %v7416_v27 = vpop.eup %7415  ;;  %v3056_v13 = vadd.f32 1.0, %v7414_v40  ;;  %7435 = vpow2.f32 %v5949_v0  ;;  %v5954_v0 = vmul.f32 -1.442695, %v4576_v9  ;;  %v11523_v63 = vld [vmem:[#allocation52_spill] sm:$0xff] }
 0x43e   : > { %v10576_v33 = vpop.f32.mrb[143].mxu1  ;;  %v7418_v49 = vpop.eup %7417  ;;  %3995 = vst [vmem:[%s10021_s24 + $0x68] sm:$0xff] %v6046_v56  ;;  %v6048_v34 = vpack.c.bf16 %v3245_v50, %v3244_v25  ;;  %v3057_v22 = vadd.f32 1.0, %v7416_v27  ;;  %7437 = vpow2.f32 %v5737_v58  ;;  %v11522_v25 = vld [vmem:[#allocation49_spill] sm:$0xff]  ;;  %v4568_v56 = vadd.f32 %v10360_v17, %v10423_v60 }
 0x43f   : > { %v7420_v43 = vpop.eup %7419  ;;  %7439 = vrcp.f32 %v3056_v13  ;;  %v3060_v53 = vadd.f32 1.0, %v7418_v49  ;;  %v2466_v21 = vadd.f32 %v11522_v25, %v11521_v61  ;;  %v2468_v27 = vadd.f32 %v11523_v63, %v11521_v61 }
 0x440   : > { %v7422_v36 = vpop.eup %7421  ;;  %3997 = vst [vmem:[%s10021_s24 + $0x78] sm:$0xff] %v6048_v34  ;;  %7441 = vrcp.f32 %v3057_v22  ;;  %v3061_v59 = vadd.f32 1.0, %v7420_v43  ;;  %v11524_v34 = vld [vmem:[#allocation24_spill] sm:$0xff]  ;;  %v11525_v22 = vld [vmem:[#allocation29_spill] sm:$0xff]  ;;  %v4571_v60 = vadd.f32 %v10360_v17, %v10434_v44 }
 0x441   : > { %v7424_v8 = vpop.eup %7423  ;;  %7443 = vrcp.f32 %v3060_v53  ;;  %v2470_v9 = vadd.f32 %v11525_v22, %v11524_v34 }
 0x442   : > { %v7426_v29 = vpop.eup %7425  ;;  %7445 = vrcp.f32 %v3061_v59 }
 0x443   : > { %v10584_v62 = vpop.f32.mrb[144].mxu1  ;;  %v7428_v14 = vpop.eup %7427  ;;  %v6291_v6 = vpack.c.bf16 %v7426_v29, %v7422_v36  ;;  %7447 = vpow2.f32 %v5738_v20  ;;  %v11526_v20 = vld [vmem:[#allocation59_spill] sm:$0xff] }
 0x444   : > { %v10586_v30 = vpop.f32.mrb[145].mxu1  ;;  %v7430_v58 = vpop.eup %7429  ;;  %v6286_v40 = vpack.c.bf16 %v7428_v14, %v7424_v8  ;;  %7449 = vpow2.f32 %v5741_v23  ;;  %v2472_v36 = vadd.f32 %v11526_v20, %v11524_v34  ;;  %v11527_v23 = vld [vmem:[#allocation64_spill] sm:$0xff]  ;;  %v5952_v14 = vmul.f32 -1.442695, %v4568_v56  ;;  %v11528_v20 = vld [vmem:[#allocation63_spill] sm:$0xff] }
 0x445   : > { %v10588_v46 = vpop.f32.mrb[146].mxu1  ;;  %v7432_v57 = vpop.eup %7431  ;;  %6347 = vst [vmem:[%s10223_s26 + $0xc8] sm:$0xff] %v6291_v6   ;;  %v4844_v13 = vadd.f32 1.0, %v7430_v58  ;;  %7451 = vpow2.f32 %v5742_v52  ;;  %v2646_v8 = vadd.f32 %v10436_v28, %v11527_v23  ;;  %v2800_v52 = vmul.f32 %v10348_v10, %v2466_v21 }
 0x446   : > { %v10594_v50 = vpop.f32.mrb[147].mxu1  ;;  %v7434_v49 = vpop.eup %7433  ;;  %6346 = vst [vmem:[%s10223_s26 + $0xc0] sm:$0xff] %v6286_v40   ;;  %v4842_v43 = vadd.f32 1.0, %v7432_v57  ;;  %7453 = vpow2.f32 %v5954_v0  ;;  %v2801_v0 = vmul.f32 %v10350_v45, %v2468_v27  ;;  %v5955_v58 = vmul.f32 -1.442695, %v4579_v39 }
 0x447   : > { %v7436_v53 = vpop.eup %7435  ;;  %7455 = vrcp.f32 %v4844_v13  ;;  %v4845_v59 = vadd.f32 1.0, %v7434_v49  ;;  %v2804_v40 = vmul.f32 %v10348_v10, %v2470_v9  ;;  %v5953_v28 = vmul.f32 -1.442695, %v4571_v60 }
 0x448   : > { %v7438_v37 = vpop.eup %7437  ;;  %7457 = vrcp.f32 %v4842_v43  ;;  %v4843_v29 = vadd.f32 1.0, %v7436_v53  ;;  %v2805_v13 = vmul.f32 %v10350_v45, %v2472_v36  ;;  %v5745_v49 = vmul.f32 -1.442695, %v2646_v8  ;;  %v11529_v8 = vld [vmem:[#allocation15_spill] sm:$0xff] }
 0x449   : > { %v7440_v6 = vpop.eup %7439  ;;  %7459 = vrcp.f32 %v4845_v59  ;;  %v3064_v44 = vadd.f32 1.0, %v7438_v37  ;;  %v2648_v22 = vadd.f32 %v10442_v48, %v11527_v23  ;;  %v2650_v36 = vadd.f32 %v10444_v16, %v11528_v20  ;;  %v11530_v37 = vld [vmem:[#allocation51_spill] sm:$0xff] }
 0x44a   : > { %v7442_v25 = vpop.eup %7441  ;;  %v3248_v57 = vmul.f32 %v7440_v6, %v2800_v52  ;;  %7461 = vrcp.f32 %v4843_v29  ;;  %v2476_v52 = vadd.f32 %v11530_v37, %v11529_v8 }
 0x44b   : > { %v10612_v61 = vpop.f32.mrb[148].mxu1  ;;  %v7444_v21 = vpop.eup %7443  ;;  %v3249_v56 = vmul.f32 %v7442_v25, %v2801_v0  ;;  %7463 = vrcp.f32 %v3064_v44  ;;  %v4592_v44 = vadd.f32 %v10360_v17, %v10452_v54  ;;  %v5746_v25 = vmul.f32 -1.442695, %v2648_v22 }
 0x44c   : > { %v10615_v63 = vpop.f32.mrb[149].mxu1  ;;  %v7446_v34 = vpop.eup %7445  ;;  %v3252_v39 = vmul.f32 %v7444_v21, %v2804_v40  ;;  %7465 = vpow2.f32 %v5952_v14  ;;  %v11531_v14 = vld [vmem:[#allocation117_spill] sm:$0xff]  ;;  %v4584_v40 = vadd.f32 %v10360_v17, %v10457_v31  ;;  %v5749_v21 = vmul.f32 -1.442695, %v2650_v36 }
 0x44d   : > { %v10618_v27 = vpop.f32.mrb[150].mxu1  ;;  %v7448_v43 = vpop.eup %7447  ;;  %v6050_v60 = vpack.c.bf16 %v3249_v56, %v3248_v57  ;;  %v3253_v53 = vmul.f32 %v7446_v34, %v2805_v13  ;;  %7467 = vpow2.f32 %v5955_v58  ;;  %v2652_v6 = vadd.f32 %v11531_v14, %v11528_v20 }
 0x44e   : > { %v10622_v9 = vpop.f32.mrb[151].mxu1  ;;  %v7450_v59 = vpop.eup %7449  ;;  %v3065_v29 = vadd.f32 1.0, %v7448_v43  ;;  %7469 = vpow2.f32 %v5953_v28  ;;  %v2808_v31 = vmul.f32 %v10348_v10, %v2476_v52  ;;  %v4595_v14 = vadd.f32 %v10360_v17, %v10464_v1 }
 0x44f   : > { %v7452_v48 = vpop.eup %7451  ;;  %3999 = vst [vmem:[%s10021_s24 + $0x88] sm:$0xff] %v6050_v60  ;;  %v6052_v23 = vpack.c.bf16 %v3253_v53, %v3252_v39  ;;  %v3068_v0 = vadd.f32 1.0, %v7450_v59  ;;  %7471 = vpow2.f32 %v5745_v49  ;;  %v5750_v49 = vmul.f32 -1.442695, %v2652_v6  ;;  %v11532_v59 = vld [vmem:[#allocation60_spill] sm:$0xff] }
 0x450   : > { %v7454_v58 = vpop.eup %7453  ;;  %7473 = vrcp.f32 %v3065_v29  ;;  %v3069_v16 = vadd.f32 1.0, %v7452_v48  ;;  %v5958_v39 = vmul.f32 -1.442695, %v4592_v44  ;;  %v5956_v53 = vmul.f32 -1.442695, %v4584_v40  ;;  %v11533_v48 = vld [vmem:[#allocation25_spill] sm:$0xff] }
 0x451   : > { %v7456_v57 = vpop.eup %7455  ;;  %4001 = vst [vmem:[%s10021_s24 + $0x98] sm:$0xff] %v6052_v23  ;;  %7475 = vrcp.f32 %v3068_v0  ;;  %v4848_v28 = vadd.f32 1.0, %v7454_v58  ;;  %v2478_v37 = vadd.f32 %v11532_v59, %v11529_v8  ;;  %v11534_v23 = vld [vmem:[#allocation22_spill] sm:$0xff]  ;;  %v4587_v44 = vadd.f32 %v10360_v17, %v10471_v38 }
 0x452   : > { %v7458_v56 = vpop.eup %7457  ;;  %7477 = vrcp.f32 %v3069_v16  ;;  %v2480_v0 = vadd.f32 %v11534_v23, %v11533_v48  ;;  %v11535_v16 = vld [vmem:[#allocation61_spill] sm:$0xff]  ;;  %v11536_v40 = vld [vmem:[#allocation70_spill] sm:$0xff]  ;;  %v5959_v38 = vmul.f32 -1.442695, %v4595_v14 }
 0x453   : > { %v10636_v13 = vpop.f32.mrb[152].mxu1  ;;  %v7460_v54 = vpop.eup %7459  ;;  %7479 = vrcp.f32 %v4848_v28  ;;  %v2656_v1 = vadd.f32 %v10466_v42, %v11536_v40  ;;  %v5957_v42 = vmul.f32 -1.442695, %v4587_v44 }
 0x454   : > { %v10638_v34 = vpop.f32.mrb[153].mxu1  ;;  %v7462_v43 = vpop.eup %7461  ;;  %v6301_v60 = vpack.c.bf16 %v7460_v54, %v7456_v57  ;;  %7481 = vpow2.f32 %v5746_v25  ;;  %v2482_v25 = vadd.f32 %v11535_v16, %v11533_v48  ;;  %v11537_v16 = vld [vmem:[#allocation69_spill] sm:$0xff] }
 0x455   : > { %v10640_v22 = vpop.f32.mrb[154].mxu1  ;;  %v7464_v36 = vpop.eup %7463  ;;  %v6296_v29 = vpack.c.bf16 %v7462_v43, %v7458_v56  ;;  %7483 = vpow2.f32 %v5749_v21  ;;  %v2658_v21 = vadd.f32 %v10473_v3, %v11536_v40  ;;  %v5753_v59 = vmul.f32 -1.442695, %v2656_v1 }
 0x456   : > { %v10643_v20 = vpop.f32.mrb[155].mxu1  ;;  %v7466_v6 = vpop.eup %7465  ;;  %6349 = vst [vmem:[%s10223_s26 + $0xd8] sm:$0xff] %v6301_v60   ;;  %v3256_v52 = vmul.f32 %v7464_v36, %v2808_v31  ;;  %7485 = vpow2.f32 %v5750_v49  ;;  %v2809_v49 = vmul.f32 %v10350_v45, %v2478_v37  ;;  %v2813_v36 = vmul.f32 %v10350_v45, %v2482_v25 }
 0x457   : > { %v7468_v58 = vpop.eup %7467  ;;  %6348 = vst [vmem:[%s10223_s26 + $0xd0] sm:$0xff] %v6296_v29   ;;  %v4846_v8 = vadd.f32 1.0, %v7466_v6  ;;  %7487 = vpow2.f32 %v5958_v39  ;;  %v2812_v39 = vmul.f32 %v10348_v10, %v2480_v0  ;;  %v5754_v6 = vmul.f32 -1.442695, %v2658_v21 }
 0x458   : > { %v7470_v57 = vpop.eup %7469  ;;  %v4849_v28 = vadd.f32 1.0, %v7468_v58  ;;  %7489 = vpow2.f32 %v5956_v53  ;;  %v2660_v25 = vadd.f32 %v10477_v12, %v11537_v16 }
 0x459   : > { %v7472_v56 = vpop.eup %7471  ;;  %7491 = vrcp.f32 %v4846_v8  ;;  %v4847_v17 = vadd.f32 1.0, %v7470_v57  ;;  %v2662_v57 = vadd.f32 %v10481_v47, %v11537_v16 }
 0x45a   : > { %v7474_v43 = vpop.eup %7473  ;;  %7493 = vrcp.f32 %v4849_v28  ;;  %v3072_v31 = vadd.f32 1.0, %v7472_v56 }
 0x45b   : > { %v10662_v54 = vpop.f32.mrb[156].mxu1  ;;  %v7476_v53 = vpop.eup %7475  ;;  %v3257_v3 = vmul.f32 %v7474_v43, %v2809_v49  ;;  %7495 = vrcp.f32 %v4847_v17  ;;  %v11539_v17 = vld [vmem:[#allocation17_spill] sm:$0xff] }
 0x45c   : > { %v10665_v60 = vpop.f32.mrb[157].mxu1  ;;  %v7478_v29 = vpop.eup %7477  ;;  %v3260_v14 = vmul.f32 %v7476_v53, %v2812_v39  ;;  %7497 = vrcp.f32 %v3072_v31 }
 0x45d   : > { %v10668_v37 = vpop.f32.mrb[158].mxu1  ;;  %v7480_v23 = vpop.eup %7479  ;;  %v6054_v0 = vpack.c.bf16 %v3257_v3, %v3256_v52  ;;  %v3261_v44 = vmul.f32 %v7478_v29, %v2813_v36  ;;  %7499 = vpow2.f32 %v5959_v38  ;;  %v11538_v52 = vld [vmem:[#allocation76_spill] sm:$0xff]  ;;  %v11540_v38 = vld [vmem:[#allocation62_spill] sm:$0xff]  ;;  %v5757_v36 = vmul.f32 -1.442695, %v2660_v25 }
 0x45e   : > { %v10670_v48 = vpop.f32.mrb[159].mxu1  ;;  %v7482_v58 = vpop.eup %7481  ;;  %7501 = vpow2.f32 %v5957_v42  ;;  %v2666_v56 = vadd.f32 %v10487_v55, %v11538_v52  ;;  %v2486_v43 = vadd.f32 %v11540_v38, %v11539_v17  ;;  %v2668_v39 = vadd.f32 %v10493_v51, %v11538_v52  ;;  %v11541_v42 = vld [vmem:[#allocation23_spill] sm:$0xff]  ;;  %v11543_v55 = vld [vmem:[#allocation65_spill] sm:$0xff] }
 0x45f   : > { %v7484_v8 = vpop.eup %7483  ;;  %4003 = vst [vmem:[%s10021_s24 + $0xa8] sm:$0xff] %v6054_v0  ;;  %v6056_v40 = vpack.c.bf16 %v3261_v44, %v3260_v14  ;;  %v3073_v1 = vadd.f32 1.0, %v7482_v58  ;;  %7503 = vpow2.f32 %v5753_v59  ;;  %v2488_v47 = vadd.f32 %v11541_v42, %v11539_v17  ;;  %v11542_v59 = vld [vmem:[#allocation31_spill] sm:$0xff]  ;;  %v11545_v17 = vld [vmem:[#allocation54_spill] sm:$0xff] }
 0x460   : > { %v7486_v28 = vpop.eup %7485  ;;  %v3076_v21 = vadd.f32 1.0, %v7484_v8  ;;  %7505 = vpow2.f32 %v5754_v6  ;;  %v2490_v29 = vadd.f32 %v11543_v55, %v11542_v59  ;;  %v5758_v6 = vmul.f32 -1.442695, %v2662_v57  ;;  %v11548_v42 = vld [vmem:[#allocation66_spill] sm:$0xff] }
 0x461   : > { %v7488_v49 = vpop.eup %7487  ;;  %4005 = vst [vmem:[%s10021_s24 + $0xb8] sm:$0xff] %v6056_v40  ;;  %7507 = vrcp.f32 %v3073_v1  ;;  %v3077_v12 = vadd.f32 1.0, %v7486_v28  ;;  %v5761_v44 = vmul.f32 -1.442695, %v2666_v56  ;;  %v2816_v51 = vmul.f32 %v10348_v10, %v2486_v43  ;;  %v11544_v28 = vld [vmem:[#allocation75_spill] sm:$0xff] }
 0x462   : > { %v7490_v31 = vpop.eup %7489  ;;  %7509 = vrcp.f32 %v3076_v21  ;;  %v4852_v53 = vadd.f32 1.0, %v7488_v49  ;;  %v5762_v8 = vmul.f32 -1.442695, %v2668_v39  ;;  %v2817_v25 = vmul.f32 %v10350_v45, %v2488_v47 }
 0x463   : > { %v7492_v3 = vpop.eup %7491  ;;  %7511 = vrcp.f32 %v3077_v12  ;;  %v4850_v14 = vadd.f32 1.0, %v7490_v31  ;;  %v2670_v21 = vadd.f32 %v10500_v24, %v11544_v28  ;;  %v2820_v52 = vmul.f32 %v10348_v10, %v2490_v29  ;;  %v11546_v12 = vld [vmem:[#allocation82_spill] sm:$0xff]  ;;  %v11547_v31 = vld [vmem:[#allocation16_spill] sm:$0xff] }
 0x464   : > { %v7494_v0 = vpop.eup %7493  ;;  %7513 = vrcp.f32 %v4852_v53  ;;  %v2492_v38 = vadd.f32 %v11545_v17, %v11542_v59  ;;  %v2676_v39 = vadd.f32 %v10513_v41, %v11546_v12  ;;  %v2496_v47 = vadd.f32 %v11548_v42, %v11547_v31  ;;  %v11549_v59 = vld [vmem:[#allocation81_spill] sm:$0xff] }
 0x465   : > { %v7496_v58 = vpop.eup %7495  ;;  %v6311_v16 = vpack.c.bf16 %v7494_v0, %v7480_v23  ;;  %7515 = vrcp.f32 %v4850_v14  ;;  %v2672_v23 = vadd.f32 %v10507_v5, %v11544_v28  ;;  %v5765_v55 = vmul.f32 -1.442695, %v2670_v21 }
 0x466   : > { %v7498_v40 = vpop.eup %7497  ;;  %v6306_v1 = vpack.c.bf16 %v7496_v58, %v7492_v3  ;;  %7517 = vpow2.f32 %v5757_v36  ;;  %v2678_v36 = vadd.f32 %v10519_v18, %v11546_v12  ;;  %v2680_v29 = vadd.f32 %v10523_v26, %v11549_v59 }
 0x467   : > { %v7500_v57 = vpop.eup %7499  ;;  %6351 = vst [vmem:[%s10223_s26 + $0xe8] sm:$0xff] %v6311_v16   ;;  %v3264_v56 = vmul.f32 %v7498_v40, %v2816_v51  ;;  %7519 = vpow2.f32 %v5758_v6  ;;  %v11550_v6 = vld [vmem:[#allocation53_spill] sm:$0xff]  ;;  %v2821_v51 = vmul.f32 %v10350_v45, %v2492_v38  ;;  %v5769_v18 = vmul.f32 -1.442695, %v2676_v39  ;;  %v11552_v38 = vld [vmem:[#allocation26_spill] sm:$0xff] }
 0x468   : > { %v7502_v49 = vpop.eup %7501  ;;  %6350 = vst [vmem:[%s10223_s26 + $0xe0] sm:$0xff] %v6306_v1   ;;  %v4853_v43 = vadd.f32 1.0, %v7500_v57  ;;  %7521 = vpow2.f32 %v5761_v44  ;;  %v2498_v41 = vadd.f32 %v11550_v6, %v11547_v31  ;;  %v5766_v44 = vmul.f32 -1.442695, %v2672_v23  ;;  %v11554_v31 = vld [vmem:[#allocation87_spill] sm:$0xff]  ;;  %v11558_v6 = vld [vmem:[#allocation86_spill] sm:$0xff] }
 0x469   : > { %v7504_v24 = vpop.eup %7503  ;;  %v4851_v53 = vadd.f32 1.0, %v7502_v49  ;;  %7523 = vpow2.f32 %v5762_v8  ;;  %v2824_v40 = vmul.f32 %v10348_v10, %v2496_v47  ;;  %v5770_v26 = vmul.f32 -1.442695, %v2678_v36  ;;  %v11556_v36 = vld [vmem:[#allocation68_spill] sm:$0xff] }
 0x46a   : > { %v7506_v5 = vpop.eup %7505  ;;  %7525 = vrcp.f32 %v4853_v43  ;;  %v3080_v3 = vadd.f32 1.0, %v7504_v24  ;;  %v5773_v49 = vmul.f32 -1.442695, %v2680_v29  ;;  %v2825_v23 = vmul.f32 %v10350_v45, %v2498_v41  ;;  %v11551_v43 = vld [vmem:[#allocation33_spill] sm:$0xff] }
 0x46b   : > { %v7508_v14 = vpop.eup %7507  ;;  %7527 = vrcp.f32 %v4851_v53  ;;  %v3081_v0 = vadd.f32 1.0, %v7506_v5  ;;  %v2682_v12 = vadd.f32 %v10527_v19, %v11549_v59  ;;  %v2686_v42 = vadd.f32 %v10533_v32, %v11554_v31  ;;  %v11555_v53 = vld [vmem:[#allocation19_spill] sm:$0xff] }
 0x46c   : > { %v7510_v58 = vpop.eup %7509  ;;  %v3265_v16 = vmul.f32 %v7508_v14, %v2817_v25  ;;  %7529 = vrcp.f32 %v3080_v3  ;;  %v2500_v25 = vadd.f32 %v11552_v38, %v11551_v43  ;;  %v2506_v5 = vadd.f32 %v11556_v36, %v11555_v53  ;;  %v11557_v59 = vld [vmem:[#allocation27_spill] sm:$0xff]  ;;  %v11563_v36 = vld [vmem:[#allocation72_spill] sm:$0xff] }
 0x46d   : > { %v7512_v8 = vpop.eup %7511  ;;  %v3268_v1 = vmul.f32 %v7510_v58, %v2820_v52  ;;  %7531 = vrcp.f32 %v3081_v0  ;;  %v11553_v52 = vld [vmem:[#allocation67_spill] sm:$0xff]  ;;  %v2508_v29 = vadd.f32 %v11557_v59, %v11555_v53  ;;  %v2690_v41 = vadd.f32 %v10545_v15, %v11558_v6  ;;  %v11562_v53 = vld [vmem:[#allocation20_spill] sm:$0xff] }
 0x46e   : > { %v7514_v28 = vpop.eup %7513  ;;  %v6058_v21 = vpack.c.bf16 %v3265_v16, %v3264_v56  ;;  %v3269_v57 = vmul.f32 %v7512_v8, %v2821_v51  ;;  %7533 = vpow2.f32 %v5765_v55  ;;  %v2502_v24 = vadd.f32 %v11553_v52, %v11551_v43  ;;  %v11559_v0 = vld [vmem:[#allocation35_spill] sm:$0xff] }
 0x46f   : > { %v7516_v17 = vpop.eup %7515  ;;  %7535 = vpow2.f32 %v5766_v44  ;;  %v2688_v55 = vadd.f32 %v10539_v4, %v11554_v31  ;;  %v11560_v44 = vld [vmem:[#allocation71_spill] sm:$0xff]  ;;  %v5774_v16 = vmul.f32 -1.442695, %v2682_v12  ;;  %v2828_v4 = vmul.f32 %v10348_v10, %v2500_v25 }
 0x470   : > { %v7518_v39 = vpop.eup %7517  ;;  %4007 = vst [vmem:[%s10021_s24 + $0xc8] sm:$0xff] %v6058_v21  ;;  %v6060_v56 = vpack.c.bf16 %v3269_v57, %v3268_v1  ;;  %7537 = vpow2.f32 %v5769_v18  ;;  %v2510_v58 = vadd.f32 %v11560_v44, %v11559_v0  ;;  %v5777_v1 = vmul.f32 -1.442695, %v2686_v42 }
 0x471   : > { %v7520_v47 = vpop.eup %7519  ;;  %v3084_v3 = vadd.f32 1.0, %v7518_v39  ;;  %7539 = vpow2.f32 %v5770_v26  ;;  %v2829_v21 = vmul.f32 %v10350_v45, %v2502_v24  ;;  %v5778_v15 = vmul.f32 -1.442695, %v2688_v55  ;;  %v11564_v55 = vld [vmem:[#allocation93_spill] sm:$0xff] }
 0x472   : > { %v7522_v19 = vpop.eup %7521  ;;  %4009 = vst [vmem:[%s10021_s24 + $0xd8] sm:$0xff] %v6060_v56  ;;  %v3085_v14 = vadd.f32 1.0, %v7520_v47  ;;  %7541 = vpow2.f32 %v5773_v49  ;;  %v3280_v43 = vmul.f32 %v10348_v10, %v2506_v5  ;;  %v5781_v12 = vmul.f32 -1.442695, %v2690_v41 }
 0x473   : > { %v7524_v32 = vpop.eup %7523  ;;  %7543 = vrcp.f32 %v3084_v3  ;;  %v3536_v51 = vadd.f32 1.0, %v7522_v19  ;;  %v3281_v25 = vmul.f32 %v10350_v45, %v2508_v29  ;;  %v10737_v52 = vmul.f32 %v10348_v10, %v2510_v58 }
 0x474   : > { %v7526_v18 = vpop.eup %7525  ;;  %7545 = vrcp.f32 %v3085_v14  ;;  %v3537_v8 = vadd.f32 1.0, %v7524_v32  ;;  %v2516_v5 = vadd.f32 %v11563_v36, %v11562_v53  ;;  %v11566_v32 = vld [vmem:[#allocation92_spill] sm:$0xff]  ;;  %v11570_v36 = vld [vmem:[#allocation99_spill] sm:$0xff] }
 0x475   : > { %v7528_v26 = vpop.eup %7527  ;;  %v6321_v57 = vpack.c.bf16 %v7526_v18, %v7514_v28  ;;  %7547 = vrcp.f32 %v3536_v51  ;;  %v11561_v28 = vld [vmem:[#allocation56_spill] sm:$0xff] }
 0x476   : > { %v7530_v49 = vpop.eup %7529  ;;  %v6316_v38 = vpack.c.bf16 %v7528_v26, %v7516_v17  ;;  %7549 = vrcp.f32 %v3537_v8  ;;  %v2512_v31 = vadd.f32 %v11561_v28, %v11559_v0  ;;  %v2692_v17 = vadd.f32 %v10552_v2, %v11558_v6  ;;  %v11565_v2 = vld [vmem:[#allocation30_spill] sm:$0xff] }
 0x477   : > { %v7532_v39 = vpop.eup %7531  ;;  %6353 = vst [vmem:[%s10223_s26 + $0xf8] sm:$0xff] %v6321_v57   ;;  %v3272_v56 = vmul.f32 %v7530_v49, %v2824_v40  ;;  %7551 = vpow2.f32 %v5774_v16  ;;  %v2696_v40 = vadd.f32 %v10564_v7, %v11564_v55  ;;  %v2518_v6 = vadd.f32 %v11565_v2, %v11562_v53  ;;  %v11567_v26 = vld [vmem:[#allocation14_spill] sm:$0xff]  ;;  %v11568_v57 = vld [vmem:[#allocation73_spill] sm:$0xff] }
 0x478   : > { %v7534_v24 = vpop.eup %7533  ;;  %6352 = vst [vmem:[%s10223_s26 + $0xf0] sm:$0xff] %v6316_v38   ;;  %v3273_v42 = vmul.f32 %v7532_v39, %v2825_v23  ;;  %7553 = vpow2.f32 %v5777_v1  ;;  %v2698_v23 = vadd.f32 %v10568_v35, %v11564_v55  ;;  %v2700_v0 = vadd.f32 %v10572_v11, %v11566_v32  ;;  %v11569_v28 = vld [vmem:[#allocation74_spill] sm:$0xff] }
 0x479   : > { %v7536_v47 = vpop.eup %7535  ;;  %v3540_v3 = vadd.f32 1.0, %v7534_v24  ;;  %7555 = vpow2.f32 %v5778_v15  ;;  %v3285_v58 = vmul.f32 %v10350_v45, %v2512_v31  ;;  %v5782_v51 = vmul.f32 -1.442695, %v2692_v17 }
 0x47a   : > { %v7538_v19 = vpop.eup %7537  ;;  %v6062_v59 = vpack.c.bf16 %v3273_v42, %v3272_v56  ;;  %v3541_v29 = vadd.f32 1.0, %v7536_v47  ;;  %7557 = vpow2.f32 %v5781_v12  ;;  %v3288_v18 = vmul.f32 %v10348_v10, %v2516_v5 }
 0x47b   : > { %v7540_v14 = vpop.eup %7539  ;;  %7559 = vrcp.f32 %v3540_v3  ;;  %v3544_v41 = vadd.f32 1.0, %v7538_v19  ;;  %v5785_v8 = vmul.f32 -1.442695, %v2696_v40  ;;  %v2520_v15 = vadd.f32 %v11568_v57, %v11567_v26  ;;  %v11575_v57 = vld [vmem:[#allocation18_spill] sm:$0xff] }
 0x47c   : > { %v7542_v44 = vpop.eup %7541  ;;  %4011 = vst [vmem:[%s10021_s24 + $0xe8] sm:$0xff] %v6062_v59  ;;  %7561 = vrcp.f32 %v3541_v29  ;;  %v3545_v7 = vadd.f32 1.0, %v7540_v14  ;;  %v5786_v11 = vmul.f32 -1.442695, %v2698_v23  ;;  %v3289_v12 = vmul.f32 %v10350_v45, %v2518_v6  ;;  %v11571_v59 = vld [vmem:[#allocation98_spill] sm:$0xff] }
 0x47d   : > { %v7544_v16 = vpop.eup %7543  ;;  %7563 = vrcp.f32 %v3544_v41  ;;  %v3548_v35 = vadd.f32 1.0, %v7542_v44  ;;  %v5789_v56 = vmul.f32 -1.442695, %v2700_v0  ;;  %v2522_v31 = vadd.f32 %v11569_v28, %v11567_v26  ;;  %v11572_v0 = vld [vmem:[#allocation21_spill] sm:$0xff] }
 0x47e   : > { %v7546_v1 = vpop.eup %7545  ;;  %v3276_v49 = vmul.f32 %v7544_v16, %v2828_v4  ;;  %7565 = vrcp.f32 %v3545_v7  ;;  %v2702_v17 = vadd.f32 %v10576_v33, %v11566_v32  ;;  %v2706_v5 = vadd.f32 %v10584_v62, %v11570_v36  ;;  %v11573_v44 = vld [vmem:[#allocation77_spill] sm:$0xff] }
 0x47f   : > { %v7548_v38 = vpop.eup %7547  ;;  %v3277_v39 = vmul.f32 %v7546_v1, %v2829_v21  ;;  %7567 = vrcp.f32 %v3548_v35  ;;  %v3292_v3 = vmul.f32 %v10348_v10, %v2520_v15  ;;  %v2712_v14 = vadd.f32 %v10594_v50, %v11571_v59  ;;  %v11574_v35 = vld [vmem:[#allocation78_spill] sm:$0xff]  ;;  %v11576_v15 = vld [vmem:[#allocation79_spill] sm:$0xff] }
 0x480   : > { %v7550_v24 = vpop.eup %7549  ;;  %v3728_v42 = vmul.f32 %v7548_v38, %v3280_v43  ;;  %7569 = vpow2.f32 %v5782_v51  ;;  %v2708_v43 = vadd.f32 %v10586_v30, %v11570_v36  ;;  %v5790_v23 = vmul.f32 -1.442695, %v2702_v17 }
 0x481   : > { %v7552_v47 = vpop.eup %7551  ;;  %v6064_v4 = vpack.c.bf16 %v3277_v39, %v3276_v49  ;;  %v3729_v53 = vmul.f32 %v7550_v24, %v3281_v25  ;;  %7571 = vpow2.f32 %v5785_v8  ;;  %v2710_v25 = vadd.f32 %v10588_v46, %v11571_v59  ;;  %v11577_v24 = vld [vmem:[#allocation106_spill] sm:$0xff] }
 0x482   : > { %v7554_v21 = vpop.eup %7553  ;;  %v3549_v55 = vadd.f32 1.0, %v7552_v47  ;;  %7573 = vpow2.f32 %v5786_v11  ;;  %v3293_v6 = vmul.f32 %v10350_v45, %v2522_v31  ;;  %v5793_v41 = vmul.f32 -1.442695, %v2706_v5 }
 0x483   : > { %v7556_v40 = vpop.eup %7555  ;;  %4013 = vst [vmem:[%s10021_s24 + $0xf8] sm:$0xff] %v6064_v4  ;;  %v6066_v19 = vpack.c.bf16 %v3729_v53, %v3728_v42  ;;  %v3552_v33 = vadd.f32 1.0, %v7554_v21  ;;  %7575 = vpow2.f32 %v5789_v56  ;;  %v2526_v7 = vadd.f32 %v11573_v44, %v11572_v0  ;;  %v11582_v44 = vld [vmem:[#allocation84_spill] sm:$0xff] }
 0x484   : > { %v7558_v29 = vpop.eup %7557  ;;  %7577 = vrcp.f32 %v3549_v55  ;;  %v3553_v62 = vadd.f32 1.0, %v7556_v40  ;;  %v5794_v51 = vmul.f32 -1.442695, %v2708_v43  ;;  %v2528_v8 = vadd.f32 %v11574_v35, %v11572_v0  ;;  %v11583_v35 = vld [vmem:[#allocation37_spill] sm:$0xff] }
 0x485   : > { %v7560_v2 = vpop.eup %7559  ;;  %4207 = vst [vmem:[%s9795_s22 + $0x8] sm:$0xff] %v6066_v19  ;;  %7579 = vrcp.f32 %v3552_v33  ;;  %v3556_v30 = vadd.f32 1.0, %v7558_v29  ;;  %v5797_v1 = vmul.f32 -1.442695, %v2710_v25  ;;  %v2530_v49 = vadd.f32 %v11576_v15, %v11575_v57 }
 0x486   : > { %v7562_v32 = vpop.eup %7561  ;;  %v3732_v46 = vmul.f32 %v7560_v2, %v10737_v52  ;;  %7581 = vrcp.f32 %v3553_v62  ;;  %v5798_v38 = vmul.f32 -1.442695, %v2712_v14  ;;  %v2716_v28 = vadd.f32 %v10612_v61, %v11577_v24  ;;  %v11580_v14 = vld [vmem:[#allocation39_spill] sm:$0xff] }
 0x487   : > { %v7564_v16 = vpop.eup %7563  ;;  %v3733_v50 = vmul.f32 %v7562_v32, %v3285_v58  ;;  %7583 = vrcp.f32 %v3556_v30  ;;  %v11578_v58 = vld [vmem:[#allocation80_spill] sm:$0xff]  ;;  %v2718_v47 = vadd.f32 %v10615_v63, %v11577_v24  ;;  %v3296_v61 = vmul.f32 %v10348_v10, %v2526_v7  ;;  %v11581_v2 = vld [vmem:[#allocation83_spill] sm:$0xff] }
 0x488   : > { %v7566_v26 = vpop.eup %7565  ;;  %v3736_v11 = vmul.f32 %v7564_v16, %v3288_v18  ;;  %7585 = vpow2.f32 %v5790_v23  ;;  %v2532_v42 = vadd.f32 %v11578_v58, %v11575_v57  ;;  %v3297_v43 = vmul.f32 %v10350_v45, %v2528_v8  ;;  %v11587_v24 = vld [vmem:[#allocation107_spill] sm:$0xff] }
 0x489   : > { %v7568_v39 = vpop.eup %7567  ;;  %v6068_v56 = vpack.c.bf16 %v3733_v50, %v3732_v46  ;;  %v3737_v52 = vmul.f32 %v7566_v26, %v3289_v12  ;;  %7587 = vpow2.f32 %v5793_v41  ;;  %v11579_v12 = vld [vmem:[#allocation105_spill] sm:$0xff]  ;;  %v5801_v40 = vmul.f32 -1.442695, %v2716_v28 }
 0x48a   : > { %v7570_v31 = vpop.eup %7569  ;;  %v3740_v17 = vmul.f32 %v7568_v39, %v3292_v3  ;;  %7589 = vpow2.f32 %v5794_v51  ;;  %v2720_v36 = vadd.f32 %v10618_v27, %v11579_v12  ;;  %v2722_v3 = vadd.f32 %v10622_v9, %v11579_v12  ;;  %v11586_v39 = vld [vmem:[#allocation88_spill] sm:$0xff] }
 0x48b   : > { %v7572_v18 = vpop.eup %7571  ;;  %4209 = vst [vmem:[%s9795_s22 + $0x18] sm:$0xff] %v6068_v56  ;;  %v6070_v4 = vpack.c.bf16 %v3737_v52, %v3736_v11  ;;  %v3557_v53 = vadd.f32 1.0, %v7570_v31  ;;  %7591 = vpow2.f32 %v5797_v1  ;;  %v3300_v33 = vmul.f32 %v10348_v10, %v2530_v49  ;;  %v11585_v1 = vld [vmem:[#allocation108_spill] sm:$0xff] }
 0x48c   : > { %v7574_v5 = vpop.eup %7573  ;;  %v3560_v21 = vadd.f32 1.0, %v7572_v18  ;;  %7593 = vpow2.f32 %v5798_v38  ;;  %v5802_v59 = vmul.f32 -1.442695, %v2718_v47  ;;  %v3301_v29 = vmul.f32 %v10350_v45, %v2532_v42 }
 0x48d   : > { %v7576_v55 = vpop.eup %7575  ;;  %4211 = vst [vmem:[%s9795_s22 + $0x28] sm:$0xff] %v6070_v4  ;;  %7595 = vrcp.f32 %v3557_v53  ;;  %v3561_v63 = vadd.f32 1.0, %v7574_v5  ;;  %v5805_v23 = vmul.f32 -1.442695, %v2720_v36  ;;  %v2536_v30 = vadd.f32 %v11581_v2, %v11580_v14 }
 0x48e   : > { %v7578_v19 = vpop.eup %7577  ;;  %7597 = vrcp.f32 %v3560_v21  ;;  %v3564_v27 = vadd.f32 1.0, %v7576_v55  ;;  %v5806_v32 = vmul.f32 -1.442695, %v2722_v3  ;;  %v2538_v7 = vadd.f32 %v11582_v44, %v11580_v14  ;;  %v11589_v55 = vld [vmem:[#allocation89_spill] sm:$0xff] }
 0x48f   : > { %v7580_v25 = vpop.eup %7579  ;;  %v3741_v62 = vmul.f32 %v7578_v19, %v3293_v6  ;;  %7599 = vrcp.f32 %v3561_v63  ;;  %v11584_v6 = vld [vmem:[#allocation85_spill] sm:$0xff]  ;;  %v2726_v26 = vadd.f32 %v10636_v13, %v11585_v1  ;;  %v2728_v11 = vadd.f32 %v10638_v34, %v11585_v1 }
 0x490   : > { %v7582_v9 = vpop.eup %7581  ;;  %v3744_v41 = vmul.f32 %v7580_v25, %v3296_v61  ;;  %7601 = vrcp.f32 %v3564_v27  ;;  %v2540_v8 = vadd.f32 %v11584_v6, %v11583_v35  ;;  %v2542_v56 = vadd.f32 %v11586_v39, %v11583_v35 }
 0x491   : > { %v7584_v0 = vpop.eup %7583  ;;  %v6072_v46 = vpack.c.bf16 %v3741_v62, %v3740_v17  ;;  %v3745_v51 = vmul.f32 %v7582_v9, %v3297_v43  ;;  %7603 = vpow2.f32 %v5801_v40  ;;  %v2730_v28 = vadd.f32 %v10640_v22, %v11587_v24 }
 0x492   : > { %v7586_v16 = vpop.eup %7585  ;;  %v3748_v50 = vmul.f32 %v7584_v0, %v3300_v33  ;;  %7605 = vpow2.f32 %v5802_v59  ;;  %v3304_v13 = vmul.f32 %v10348_v10, %v2536_v30  ;;  %v2732_v42 = vadd.f32 %v10643_v20, %v11587_v24  ;;  %v11588_v20 = vld [vmem:[#allocation41_spill] sm:$0xff] }
 0x493   : > { %v7588_v57 = vpop.eup %7587  ;;  %4213 = vst [vmem:[%s9795_s22 + $0x38] sm:$0xff] %v6072_v46  ;;  %v6074_v15 = vpack.c.bf16 %v3745_v51, %v3744_v41  ;;  %v3565_v49 = vadd.f32 1.0, %v7586_v16  ;;  %7607 = vpow2.f32 %v5805_v23  ;;  %v3305_v34 = vmul.f32 %v10350_v45, %v2538_v7  ;;  %v11590_v59 = vld [vmem:[#allocation109_spill] sm:$0xff]  ;;  %v11594_v7 = vld [vmem:[#allocation91_spill] sm:$0xff] }
 0x494   : > { %v7590_v38 = vpop.eup %7589  ;;  %v3568_v52 = vadd.f32 1.0, %v7588_v57  ;;  %7609 = vpow2.f32 %v5806_v32  ;;  %v5809_v18 = vmul.f32 -1.442695, %v2726_v26  ;;  %v3308_v53 = vmul.f32 %v10348_v10, %v2540_v8  ;;  %v11592_v32 = vld [vmem:[#allocation110_spill] sm:$0xff] }
 0x495   : > { %v7592_v31 = vpop.eup %7591  ;;  %4215 = vst [vmem:[%s9795_s22 + $0x48] sm:$0xff] %v6074_v15  ;;  %7611 = vrcp.f32 %v3565_v49  ;;  %v3569_v58 = vadd.f32 1.0, %v7590_v38  ;;  %v5810_v12 = vmul.f32 -1.442695, %v2728_v11  ;;  %v3309_v5 = vmul.f32 %v10350_v45, %v2542_v56 }
 0x496   : > { %v7594_v17 = vpop.eup %7593  ;;  %7613 = vrcp.f32 %v3568_v52  ;;  %v3572_v47 = vadd.f32 1.0, %v7592_v31  ;;  %v5813_v21 = vmul.f32 -1.442695, %v2730_v28  ;;  %v2546_v43 = vadd.f32 %v11589_v55, %v11588_v20  ;;  %v11601_v55 = vld [vmem:[#allocation101_spill] sm:$0xff] }
 0x497   : > { %v7596_v4 = vpop.eup %7595  ;;  %7615 = vrcp.f32 %v3569_v58  ;;  %v3573_v22 = vadd.f32 1.0, %v7594_v17  ;;  %v5814_v40 = vmul.f32 -1.442695, %v2732_v42  ;;  %v2736_v25 = vadd.f32 %v10662_v54, %v11590_v59  ;;  %v11593_v54 = vld [vmem:[#allocation38_spill] sm:$0xff]  ;;  %v11597_v17 = vld [vmem:[#allocation95_spill] sm:$0xff] }
 0x498   : > { %v7598_v36 = vpop.eup %7597  ;;  %v3749_v61 = vmul.f32 %v7596_v4, %v3301_v29  ;;  %7617 = vrcp.f32 %v3572_v47  ;;  %v11591_v29 = vld [vmem:[#allocation90_spill] sm:$0xff]  ;;  %v2738_v14 = vadd.f32 %v10665_v60, %v11590_v59  ;;  %v2740_v0 = vadd.f32 %v10668_v37, %v11592_v32  ;;  %v11598_v4 = vld [vmem:[#allocation96_spill] sm:$0xff] }
 0x499   : > { %v7600_v3 = vpop.eup %7599  ;;  %v3752_v63 = vmul.f32 %v7598_v36, %v3304_v13  ;;  %7619 = vrcp.f32 %v3573_v22  ;;  %v2548_v23 = vadd.f32 %v11591_v29, %v11588_v20  ;;  %v2550_v46 = vadd.f32 %v11594_v7, %v11593_v54  ;;  %v11595_v60 = vld [vmem:[#allocation94_spill] sm:$0xff] }
 0x49a   : > { %v7602_v19 = vpop.eup %7601  ;;  %v6076_v33 = vpack.c.bf16 %v3749_v61, %v3748_v50  ;;  %v3753_v27 = vmul.f32 %v7600_v3, %v3305_v34  ;;  %7621 = vpow2.f32 %v5809_v18  ;;  %v2742_v16 = vadd.f32 %v10670_v48, %v11592_v32  ;;  %v11596_v42 = vld [vmem:[#allocation42_spill] sm:$0xff]  ;;  %v11600_v61 = vld [vmem:[#allocation97_spill] sm:$0xff] }
 0x49b   : > { %v7604_v62 = vpop.eup %7603  ;;  %v3756_v9 = vmul.f32 %v7602_v19, %v3308_v53  ;;  %7623 = vpow2.f32 %v5810_v12  ;;  %v2552_v6 = vadd.f32 %v11595_v60, %v11593_v54  ;;  %v5817_v50 = vmul.f32 -1.442695, %v2736_v25  ;;  %v11603_v54 = vld [vmem:[#allocation102_spill] sm:$0xff] }
 0x49c   : > { %v7606_v2 = vpop.eup %7605  ;;  %4217 = vst [vmem:[%s9795_s22 + $0x58] sm:$0xff] %v6076_v33  ;;  %v6078_v30 = vpack.c.bf16 %v3753_v27, %v3752_v63  ;;  %v3576_v41 = vadd.f32 1.0, %v7604_v62  ;;  %7625 = vpow2.f32 %v5813_v21  ;;  %v3312_v37 = vmul.f32 %v10348_v10, %v2546_v43 }
 0x49d   : > { %v7608_v44 = vpop.eup %7607  ;;  %v3577_v51 = vadd.f32 1.0, %v7606_v2  ;;  %7627 = vpow2.f32 %v5814_v40  ;;  %v5818_v57 = vmul.f32 -1.442695, %v2738_v14  ;;  %v3313_v49 = vmul.f32 %v10350_v45, %v2548_v23 }
 0x49e   : > { %v7610_v35 = vpop.eup %7609  ;;  %4219 = vst [vmem:[%s9795_s22 + $0x68] sm:$0xff] %v6078_v30  ;;  %7629 = vrcp.f32 %v3576_v41  ;;  %v3580_v8 = vadd.f32 1.0, %v7608_v44  ;;  %v5821_v48 = vmul.f32 -1.442695, %v2740_v0  ;;  %v3316_v39 = vmul.f32 %v10348_v10, %v2550_v46  ;;  %v11602_v44 = vld [vmem:[#allocation44_spill] sm:$0xff] }
 0x49f   : > { %v7612_v1 = vpop.eup %7611  ;;  %7631 = vrcp.f32 %v3577_v51  ;;  %v3581_v26 = vadd.f32 1.0, %v7610_v35  ;;  %v5822_v52 = vmul.f32 -1.442695, %v2742_v16  ;;  %v3317_v28 = vmul.f32 %v10350_v45, %v2552_v6  ;;  %v11604_v35 = vld [vmem:[#allocation103_spill] sm:$0xff] }
 0x4a0   : > { %v7614_v15 = vpop.eup %7613  ;;  %v3757_v11 = vmul.f32 %v7612_v1, %v3309_v5  ;;  %7633 = vrcp.f32 %v3580_v8  ;;  %v2556_v34 = vadd.f32 %v11597_v17, %v11596_v42  ;;  %v2558_v53 = vadd.f32 %v11598_v4, %v11596_v42  ;;  %v11599_v5 = vld [vmem:[#allocation40_spill] sm:$0xff] }
 0x4a1   : > { %v7616_v38 = vpop.eup %7615  ;;  %v3760_v56 = vmul.f32 %v7614_v15, %v3312_v37  ;;  %7635 = vrcp.f32 %v3581_v26  ;;  %v2560_v21 = vadd.f32 %v11600_v61, %v11599_v5  ;;  %v2562_v43 = vadd.f32 %v11601_v55, %v11599_v5  ;;  %v11606_v1 = vld [vmem:[#allocation104_spill] sm:$0xff]  ;;  %v11611_v5 = vld [vmem:[#allocation45_spill] sm:$0xff]  ;;  %v11612_v61 = vld [vmem:[#allocation114_spill] sm:$0xff] }
 0x4a2   : > { %v7618_v24 = vpop.eup %7617  ;;  %v6080_v31 = vpack.c.bf16 %v3757_v11, %v3756_v9  ;;  %v3761_v13 = vmul.f32 %v7616_v38, %v3313_v49  ;;  %7637 = vpow2.f32 %v5817_v50  ;;  %v3320_v33 = vmul.f32 %v10348_v10, %v2556_v34  ;;  %v11605_v50 = vld [vmem:[#allocation43_spill] sm:$0xff]  ;;  %v11608_v34 = vld [vmem:[#allocation46_spill] sm:$0xff] }
 0x4a3   : > { %v7620_v58 = vpop.eup %7619  ;;  %v3764_v47 = vmul.f32 %v7618_v24, %v3316_v39  ;;  %7639 = vpow2.f32 %v5818_v57  ;;  %v3321_v25 = vmul.f32 %v10350_v45, %v2558_v53  ;;  %v3324_v23 = vmul.f32 %v10348_v10, %v2560_v21  ;;  %v11607_v49 = vld [vmem:[#allocation111_spill] sm:$0xff]  ;;  %v11610_v53 = vld [vmem:[#allocation113_spill] sm:$0xff] }
 0x4a4   : > { %v7622_v18 = vpop.eup %7621  ;;  %4221 = vst [vmem:[%s9795_s22 + $0x78] sm:$0xff] %v6080_v31  ;;  %v6082_v22 = vpack.c.bf16 %v3761_v13, %v3760_v56  ;;  %v3765_v12 = vmul.f32 %v7620_v58, %v3317_v28  ;;  %7641 = vpow2.f32 %v5821_v48  ;;  %v3325_v2 = vmul.f32 %v10350_v45, %v2562_v43 }
 0x4a5   : > { %v7624_v36 = vpop.eup %7623  ;;  %v3584_v3 = vadd.f32 1.0, %v7622_v18  ;;  %7643 = vpow2.f32 %v5822_v52  ;;  %v2566_v7 = vadd.f32 %v11603_v54, %v11602_v44  ;;  %v2568_v60 = vadd.f32 %v11604_v35, %v11602_v44  ;;  %v5345_v44 = vld [vmem:[%s10021_s24 + $0x30] sm:$0xff] (%p8028_p5)  ;;  %v5347_v54 = vld [vmem:[%s10021_s24 + $0x38] sm:$0xff] (%p8028_p5)  ;;  %v5357_v35 = vld [vmem:[%s10021_s24 + $0x60] sm:$0xff] (%p8028_p5) }
 0x4a6   : > { %v7626_v20 = vpop.eup %7625  ;;  %4223 = vst [vmem:[%s9795_s22 + $0x88] sm:$0xff] %v6082_v22  ;;  %v6084_v63 = vpack.c.bf16 %v3765_v12, %v3764_v47  ;;  %v3585_v40 = vadd.f32 1.0, %v7624_v36  ;;  %v2570_v37 = vadd.f32 %v11606_v1, %v11605_v50  ;;  %v2572_v11 = vadd.f32 %v11607_v49, %v11605_v50  ;;  %v11609_v47 = vld [vmem:[#allocation112_spill] sm:$0xff]  ;;  %5346 = vst [vmem:[%s10898_s27 + $0x180] sm:$0xff] (%p8028_p5), %v5345_v44  ;;  %v5365_v50 = vld [vmem:[%s10021_s24 + $0x80] sm:$0xff] (%p8028_p5) }
 0x4a7   : > { %v7628_v19 = vpop.eup %7627  ;;  %7645 = vrcp.f32 %v3584_v3  ;;  %v3588_v27 = vadd.f32 1.0, %v7626_v20  ;;  %v3328_v38 = vmul.f32 %v10348_v10, %v2566_v7  ;;  %v3329_v52 = vmul.f32 %v10350_v45, %v2568_v60  ;;  %v11613_v3 = vld [vmem:[#allocation115_spill] sm:$0xff]  ;;  %v5349_v7 = vld [vmem:[%s10021_s24 + $0x40] sm:$0xff] (%p8028_p5)  ;;  %5348 = vst [vmem:[%s10898_s27 + $0x188] sm:$0xff] (%p8028_p5), %v5347_v54  ;;  %5358 = vst [vmem:[%s10898_s27 + $0x300] sm:$0xff] (%p8028_p5), %v5357_v35 }
 0x4a8   : > { %v7630_v59 = vpop.eup %7629  ;;  %4225 = vst [vmem:[%s9795_s22 + $0x98] sm:$0xff] %v6084_v63  ;;  %7647 = vrcp.f32 %v3585_v40  ;;  %v3589_v62 = vadd.f32 1.0, %v7628_v19  ;;  %v3332_v28 = vmul.f32 %v10348_v10, %v2570_v37  ;;  %v3333_v58 = vmul.f32 %v10350_v45, %v2572_v11  ;;  %5350 = vst [vmem:[%s10898_s27 + $0x200] sm:$0xff] (%p8028_p5), %v5349_v7  ;;  %v5359_v60 = vld [vmem:[%s10021_s24 + $0x68] sm:$0xff] (%p8028_p5)  ;;  %v5369_v37 = vld [vmem:[%s10021_s24 + $0x90] sm:$0xff] (%p8028_p5) }
 0x4a9   : > { %v7632_v29 = vpop.eup %7631  ;;  %v3768_v9 = vmul.f32 %v7630_v59, %v3320_v33  ;;  %7649 = vrcp.f32 %v3588_v27  ;;  %v2576_v18 = vadd.f32 %v11609_v47, %v11608_v34  ;;  %v2578_v22 = vadd.f32 %v11610_v53, %v11608_v34  ;;  %5360 = vst [vmem:[%s10898_s27 + $0x308] sm:$0xff] (%p8028_p5), %v5359_v60  ;;  %v5367_v1 = vld [vmem:[%s10021_s24 + $0x88] sm:$0xff] (%p8028_p5)  ;;  %5366 = vst [vmem:[%s10898_s27 + $0x400] sm:$0xff] (%p8028_p5), %v5365_v50  ;;  %v5377_v49 = vld [vmem:[%s10021_s24 + $0xb0] sm:$0xff] (%p8028_p5) }
 0x4aa   : > { %v7634_v14 = vpop.eup %7633  ;;  %v3769_v30 = vmul.f32 %v7632_v29, %v3321_v25  ;;  %7651 = vrcp.f32 %v3589_v62  ;;  %v2580_v21 = vadd.f32 %v11612_v61, %v11611_v5  ;;  %v2582_v20 = vadd.f32 %v11613_v3, %v11611_v5  ;;  %5368 = vst [vmem:[%s10898_s27 + $0x408] sm:$0xff] (%p8028_p5), %v5367_v1  ;;  %5370 = vst [vmem:[%s10898_s27 + $0x480] sm:$0xff] (%p8028_p5), %v5369_v37  ;;  %v5379_v11 = vld [vmem:[%s10021_s24 + $0xb8] sm:$0xff] (%p8028_p5) }
 0x4ab   : > { %v7636_v41 = vpop.eup %7635  ;;  %v3772_v32 = vmul.f32 %v7634_v14, %v3324_v23  ;;  %v3336_v43 = vmul.f32 %v10348_v10, %v2576_v18  ;;  %v3337_v40 = vmul.f32 %v10350_v45, %v2578_v22  ;;  %5378 = vst [vmem:[%s10898_s27 + $0x580] sm:$0xff] (%p8028_p5), %v5377_v49  ;;  %5380 = vst [vmem:[%s10898_s27 + $0x588] sm:$0xff] (%p8028_p5), %v5379_v11 }
 0x4ac   : > { %v7638_v0 = vpop.eup %7637  ;;  %v6086_v46 = vpack.c.bf16 %v3769_v30, %v3768_v9  ;;  %v3773_v51 = vmul.f32 %v7636_v41, %v3325_v2  ;;  %v3340_v33 = vmul.f32 %v10348_v10, %v2580_v21  ;;  %v3341_v25 = vmul.f32 %v10350_v45, %v2582_v20  ;;  %v5333_v45 = vld [vmem:[%s10021_s24] sm:$0xff] (%p8028_p5)  ;;  %v5335_v10 = vld [vmem:[%s10021_s24 + $0x8] sm:$0xff] (%p8028_p5)  ;;  %v5337_v30 = vld [vmem:[%s10021_s24 + $0x10] sm:$0xff] (%p8028_p5) }
 0x4ad   : > { %v7640_v16 = vpop.eup %7639  ;;  %v3592_v6 = vadd.f32 1.0, %v7638_v0  ;;  %v5339_v41 = vld [vmem:[%s10021_s24 + $0x18] sm:$0xff] (%p8028_p5)  ;;  %v5343_v0 = vld [vmem:[%s10021_s24 + $0x28] sm:$0xff] (%p8028_p5)  ;;  %5334 = vst [vmem:[%s10898_s27] sm:$0xff] (%p8028_p5), %v5333_v45  ;;  %5336 = vst [vmem:[%s10898_s27 + $0x8] sm:$0xff] (%p8028_p5), %v5335_v10 }
 0x4ae   : > { %v7642_v8 = vpop.eup %7641  ;;  %4227 = vst [vmem:[%s9795_s22 + $0xa8] sm:$0xff] %v6086_v46  ;;  %v6088_v26 = vpack.c.bf16 %v3773_v51, %v3772_v32  ;;  %v3593_v57 = vadd.f32 1.0, %v7640_v16  ;;  %v5341_v32 = vld [vmem:[%s10021_s24 + $0x20] sm:$0xff] (%p8028_p5)  ;;  %5338 = vst [vmem:[%s10898_s27 + $0x80] sm:$0xff] (%p8028_p5), %v5337_v30  ;;  %v5351_v46 = vld [vmem:[%s10021_s24 + $0x48] sm:$0xff] (%p8028_p5) }
 0x4af   : > { %v7644_v15 = vpop.eup %7643  ;;  %7653 = vrcp.f32 %v3592_v6  ;;  %v3596_v48 = vadd.f32 1.0, %v7642_v8  ;;  %5340 = vst [vmem:[%s10898_s27 + $0x88] sm:$0xff] (%p8028_p5), %v5339_v41  ;;  %5342 = vst [vmem:[%s10898_s27 + $0x100] sm:$0xff] (%p8028_p5), %v5341_v32  ;;  %v5353_v51 = vld [vmem:[%s10021_s24 + $0x50] sm:$0xff] (%p8028_p5)  ;;  %v5355_v16 = vld [vmem:[%s10021_s24 + $0x58] sm:$0xff] (%p8028_p5) }
 0x4b0   : > { %4229 = vst [vmem:[%s9795_s22 + $0xb8] sm:$0xff] %v6088_v26  ;;  %7655 = vrcp.f32 %v3593_v57  ;;  %v3597_v39 = vadd.f32 1.0, %v7644_v15  ;;  %5344 = vst [vmem:[%s10898_s27 + $0x108] sm:$0xff] (%p8028_p5), %v5343_v0  ;;  %v5361_v6 = vld [vmem:[%s10021_s24 + $0x70] sm:$0xff] (%p8028_p5)  ;;  %v5363_v8 = vld [vmem:[%s10021_s24 + $0x78] sm:$0xff] (%p8028_p5) }
 0x4b1   : > { %v7646_v56 = vpop.eup %7645  ;;  %7657 = vrcp.f32 %v3596_v48  ;;  %5352 = vst [vmem:[%s10898_s27 + $0x208] sm:$0xff] (%p8028_p5), %v5351_v46  ;;  %5354 = vst [vmem:[%s10898_s27 + $0x280] sm:$0xff] (%p8028_p5), %v5353_v51  ;;  %v5371_v26 = vld [vmem:[%s10021_s24 + $0x98] sm:$0xff] (%p8028_p5)  ;;  %v5373_v57 = vld [vmem:[%s10021_s24 + $0xa0] sm:$0xff] (%p8028_p5) }
 0x4b2   : > { %v7648_v24 = vpop.eup %7647  ;;  %v3776_v31 = vmul.f32 %v7646_v56, %v3328_v38  ;;  %7659 = vrcp.f32 %v3597_v39  ;;  %5356 = vst [vmem:[%s10898_s27 + $0x288] sm:$0xff] (%p8028_p5), %v5355_v16  ;;  %5362 = vst [vmem:[%s10898_s27 + $0x380] sm:$0xff] (%p8028_p5), %v5361_v6  ;;  %v5375_v15 = vld [vmem:[%s10021_s24 + $0xa8] sm:$0xff] (%p8028_p5)  ;;  %v5381_v48 = vld [vmem:[%s10021_s24 + $0xc0] sm:$0xff] (%p8028_p5) }
 0x4b3   : > { %v7650_v13 = vpop.eup %7649  ;;  %v3777_v42 = vmul.f32 %v7648_v24, %v3329_v52  ;;  %5364 = vst [vmem:[%s10898_s27 + $0x388] sm:$0xff] (%p8028_p5), %v5363_v8  ;;  %5372 = vst [vmem:[%s10898_s27 + $0x488] sm:$0xff] (%p8028_p5), %v5371_v26  ;;  %v5383_v38 = vld [vmem:[%s10021_s24 + $0xc8] sm:$0xff] (%p8028_p5)  ;;  %v5385_v39 = vld [vmem:[%s10021_s24 + $0xd0] sm:$0xff] (%p8028_p5) }
 0x4b4   : > { %v7652_v17 = vpop.eup %7651  ;;  %v3780_v4 = vmul.f32 %v7650_v13, %v3332_v28  ;;  %5374 = vst [vmem:[%s10898_s27 + $0x500] sm:$0xff] (%p8028_p5), %v5373_v57  ;;  %5376 = vst [vmem:[%s10898_s27 + $0x508] sm:$0xff] (%p8028_p5), %v5375_v15  ;;  %v5387_v56 = vld [vmem:[%s10021_s24 + $0xd8] sm:$0xff] (%p8028_p5)  ;;  %v5389_v52 = vld [vmem:[%s10021_s24 + $0xe0] sm:$0xff] (%p8028_p5) }
 0x4b5   : > { %v6090_v12 = vpack.c.bf16 %v3777_v42, %v3776_v31  ;;  %v3781_v36 = vmul.f32 %v7652_v17, %v3333_v58  ;;  %5382 = vst [vmem:[%s10898_s27 + $0x600] sm:$0xff] (%p8028_p5), %v5381_v48  ;;  %5384 = vst [vmem:[%s10898_s27 + $0x608] sm:$0xff] (%p8028_p5), %v5383_v38  ;;  %v5391_v24 = vld [vmem:[%s10021_s24 + $0xe8] sm:$0xff] (%p8028_p5)  ;;  %v5393_v28 = vld [vmem:[%s10021_s24 + $0xf0] sm:$0xff] (%p8028_p5) }
 0x4b6   : > { %5386 = vst [vmem:[%s10898_s27 + $0x680] sm:$0xff] (%p8028_p5), %v5385_v39  ;;  %5388 = vst [vmem:[%s10898_s27 + $0x688] sm:$0xff] (%p8028_p5), %v5387_v56  ;;  %v5395_v31 = vld [vmem:[%s10021_s24 + $0xf8] sm:$0xff] (%p8028_p5) }
 0x4b7   : > { %4231 = vst [vmem:[%s9795_s22 + $0xc8] sm:$0xff] %v6090_v12  ;;  %v6092_v55 = vpack.c.bf16 %v3781_v36, %v3780_v4  ;;  %5390 = vst [vmem:[%s10898_s27 + $0x700] sm:$0xff] (%p8028_p5), %v5389_v52 }
 0x4b8   : > { %5392 = vst [vmem:[%s10898_s27 + $0x708] sm:$0xff] (%p8028_p5), %v5391_v24  ;;  %5394 = vst [vmem:[%s10898_s27 + $0x780] sm:$0xff] (%p8028_p5), %v5393_v28 }
 0x4b9   : > { %v7654_v63 = vpop.eup %7653  ;;  %4233 = vst [vmem:[%s9795_s22 + $0xd8] sm:$0xff] %v6092_v55  ;;  %5396 = vst [vmem:[%s10898_s27 + $0x788] sm:$0xff] (%p8028_p5), %v5395_v31 }
 0x4ba   : > { %v7656_v19 = vpop.eup %7655  ;;  %v3784_v27 = vmul.f32 %v7654_v63, %v3336_v43 }
 0x4bb   : > { %v7658_v59 = vpop.eup %7657  ;;  %v3785_v62 = vmul.f32 %v7656_v19, %v3337_v40  ;;  %5317 = sbr.rel (!%p8028_p5) target bundleno = 1218 (0x4c2), region = 72 }
 0x4bc   : > { %v7660_v29 = vpop.eup %7659  ;;  %v3788_v23 = vmul.f32 %v7658_v59, %v3340_v33 }
 0x4bd   : > { %v6094_v9 = vpack.c.bf16 %v3785_v62, %v3784_v27  ;;  %v3789_v14 = vmul.f32 %v7660_v29, %v3341_v25 }
 0x4bf   : > { %4235 = vst [vmem:[%s9795_s22 + $0xe8] sm:$0xff] %v6094_v9  ;;  %v6096_v2 = vpack.c.bf16 %v3789_v14, %v3788_v23 }
 0x4c1   : > { %4237 = vst [vmem:[%s9795_s22 + $0xf8] sm:$0xff] %v6096_v2 }
 0x4c2 PF: > { %5402 = sbr.rel (!%p8028_p5) target bundleno = 1236 (0x4d4), region = 95  ;;  %s6162_s18 = sshll.u32 (%p8028_p5), %s7913_s17, 4  ;;  %v5418_v13 = vld [vmem:[%s9795_s22] sm:$0xff] (%p8028_p5)  ;;  %v5420_v58 = vld [vmem:[%s9795_s22 + $0x8] sm:$0xff] (%p8028_p5)  ;;  %v5422_v42 = vld [vmem:[%s9795_s22 + $0x10] sm:$0xff] (%p8028_p5) }
 0x4c3   : > { %s10970_s25 = scalar_lea.vmem (%p8028_p5), %s11055_s9, %s6162_s18  ;;  %v5424_v17 = vld [vmem:[%s9795_s22 + $0x18] sm:$0xff] (%p8028_p5)  ;;  %v5426_v34 = vld [vmem:[%s9795_s22 + $0x20] sm:$0xff] (%p8028_p5)  ;;  %v5428_v47 = vld [vmem:[%s9795_s22 + $0x28] sm:$0xff] (%p8028_p5) }
 0x4c4   : > { %5419 = vst [vmem:[%s10970_s25] sm:$0xff] (%p8028_p5), %v5418_v13  ;;  %5421 = vst [vmem:[%s10970_s25 + $0x8] sm:$0xff] (%p8028_p5), %v5420_v58  ;;  %v5430_v18 = vld [vmem:[%s9795_s22 + $0x30] sm:$0xff] (%p8028_p5)  ;;  %v5432_v4 = vld [vmem:[%s9795_s22 + $0x38] sm:$0xff] (%p8028_p5) }
 0x4c5   : > { %5423 = vst [vmem:[%s10970_s25 + $0x80] sm:$0xff] (%p8028_p5), %v5422_v42  ;;  %5425 = vst [vmem:[%s10970_s25 + $0x88] sm:$0xff] (%p8028_p5), %v5424_v17  ;;  %v5434_v53 = vld [vmem:[%s9795_s22 + $0x40] sm:$0xff] (%p8028_p5)  ;;  %v5436_v22 = vld [vmem:[%s9795_s22 + $0x48] sm:$0xff] (%p8028_p5) }
 0x4c6   : > { %5427 = vst [vmem:[%s10970_s25 + $0x100] sm:$0xff] (%p8028_p5), %v5426_v34  ;;  %5429 = vst [vmem:[%s10970_s25 + $0x108] sm:$0xff] (%p8028_p5), %v5428_v47  ;;  %v5438_v12 = vld [vmem:[%s9795_s22 + $0x50] sm:$0xff] (%p8028_p5)  ;;  %v5440_v36 = vld [vmem:[%s9795_s22 + $0x58] sm:$0xff] (%p8028_p5) }
 0x4c7   : > { %5431 = vst [vmem:[%s10970_s25 + $0x180] sm:$0xff] (%p8028_p5), %v5430_v18  ;;  %5433 = vst [vmem:[%s10970_s25 + $0x188] sm:$0xff] (%p8028_p5), %v5432_v4  ;;  %v5442_v5 = vld [vmem:[%s9795_s22 + $0x60] sm:$0xff] (%p8028_p5)  ;;  %v5444_v61 = vld [vmem:[%s9795_s22 + $0x68] sm:$0xff] (%p8028_p5) }
 0x4c8   : > { %5435 = vst [vmem:[%s10970_s25 + $0x200] sm:$0xff] (%p8028_p5), %v5434_v53  ;;  %5437 = vst [vmem:[%s10970_s25 + $0x208] sm:$0xff] (%p8028_p5), %v5436_v22  ;;  %v5446_v21 = vld [vmem:[%s9795_s22 + $0x70] sm:$0xff] (%p8028_p5)  ;;  %v5448_v3 = vld [vmem:[%s9795_s22 + $0x78] sm:$0xff] (%p8028_p5) }
 0x4c9   : > { %5439 = vst [vmem:[%s10970_s25 + $0x280] sm:$0xff] %v5438_v12  ;;  %5441 = vst [vmem:[%s10970_s25 + $0x288] sm:$0xff] %v5440_v36  ;;  %v5450_v20 = vld [vmem:[%s9795_s22 + $0x80] sm:$0xff]  ;;  %v5452_v55 = vld [vmem:[%s9795_s22 + $0x88] sm:$0xff] }
 0x4ca   : > { %5443 = vst [vmem:[%s10970_s25 + $0x300] sm:$0xff] %v5442_v5  ;;  %5445 = vst [vmem:[%s10970_s25 + $0x308] sm:$0xff] %v5444_v61  ;;  %v5454_v43 = vld [vmem:[%s9795_s22 + $0x90] sm:$0xff]  ;;  %v5456_v63 = vld [vmem:[%s9795_s22 + $0x98] sm:$0xff] }
 0x4cb   : > { %5447 = vst [vmem:[%s10970_s25 + $0x380] sm:$0xff] %v5446_v21  ;;  %5449 = vst [vmem:[%s10970_s25 + $0x388] sm:$0xff] %v5448_v3  ;;  %v5458_v40 = vld [vmem:[%s9795_s22 + $0xa0] sm:$0xff]  ;;  %v5460_v19 = vld [vmem:[%s9795_s22 + $0xa8] sm:$0xff] }
 0x4cc   : > { %5451 = vst [vmem:[%s10970_s25 + $0x400] sm:$0xff] %v5450_v20  ;;  %5453 = vst [vmem:[%s10970_s25 + $0x408] sm:$0xff] %v5452_v55  ;;  %v5462_v33 = vld [vmem:[%s9795_s22 + $0xb0] sm:$0xff]  ;;  %v5464_v27 = vld [vmem:[%s9795_s22 + $0xb8] sm:$0xff] }
 0x4cd   : > { %5455 = vst [vmem:[%s10970_s25 + $0x480] sm:$0xff] %v5454_v43  ;;  %5457 = vst [vmem:[%s10970_s25 + $0x488] sm:$0xff] %v5456_v63  ;;  %v5466_v59 = vld [vmem:[%s9795_s22 + $0xc0] sm:$0xff]  ;;  %v5468_v25 = vld [vmem:[%s9795_s22 + $0xc8] sm:$0xff] }
 0x4ce   : > { %5459 = vst [vmem:[%s10970_s25 + $0x500] sm:$0xff] %v5458_v40  ;;  %5461 = vst [vmem:[%s10970_s25 + $0x508] sm:$0xff] %v5460_v19  ;;  %v5470_v62 = vld [vmem:[%s9795_s22 + $0xd0] sm:$0xff]  ;;  %v5472_v29 = vld [vmem:[%s9795_s22 + $0xd8] sm:$0xff] }
 0x4cf   : > { %5463 = vst [vmem:[%s10970_s25 + $0x580] sm:$0xff] %v5462_v33  ;;  %5465 = vst [vmem:[%s10970_s25 + $0x588] sm:$0xff] %v5464_v27  ;;  %v5474_v23 = vld [vmem:[%s9795_s22 + $0xe0] sm:$0xff]  ;;  %v5476_v9 = vld [vmem:[%s9795_s22 + $0xe8] sm:$0xff] }
 0x4d0   : > { %5467 = vst [vmem:[%s10970_s25 + $0x600] sm:$0xff] %v5466_v59  ;;  %5469 = vst [vmem:[%s10970_s25 + $0x608] sm:$0xff] %v5468_v25  ;;  %v5478_v14 = vld [vmem:[%s9795_s22 + $0xf0] sm:$0xff]  ;;  %v5480_v2 = vld [vmem:[%s9795_s22 + $0xf8] sm:$0xff] }
 0x4d1   : > { %5471 = vst [vmem:[%s10970_s25 + $0x680] sm:$0xff] %v5470_v62  ;;  %5473 = vst [vmem:[%s10970_s25 + $0x688] sm:$0xff] %v5472_v29 }
 0x4d2   : > { %5475 = vst [vmem:[%s10970_s25 + $0x700] sm:$0xff] %v5474_v23  ;;  %5477 = vst [vmem:[%s10970_s25 + $0x708] sm:$0xff] %v5476_v9 }
 0x4d3   : > { %5479 = vst [vmem:[%s10970_s25 + $0x780] sm:$0xff] %v5478_v14  ;;  %5481 = vst [vmem:[%s10970_s25 + $0x788] sm:$0xff] %v5480_v2 }
 0x4d4 PF: > { %p23_p5 = scmp.ge.s32.totalorder %s8015_s12, 10   ;;  %s11614_s13 = smov %s7822_s14 }
 0x4d5   : > { %s11615_s14 = smov %s7826_s15  ;;  %s11616_s15 = smov %s8024_s11 }
 0x4d6   : > { %s11617_s16 = smov %s8015_s12  ;;  %25 = sbr.rel (!%p23_p5) target bundleno = 5 (0x5), region = 177 }
 0x4dd   :  { %5516 = vsyncpa [#allocation3], 1 }
 0x4de   :  { %5518 = vsyncpa [#allocation3 + $0x1], 1 }
 0x4df   :  { %5519 = vsyncpa [#allocation5], 1 }
 0x4e0   :  { %5520 = vsyncpa [#allocation8], 1 }

// kernel: triangle_multiplication.4
= control target key start
LH: loop header
LB: loop body
LE: loop exit
PB: predicated region body
PF: predicated region fallthrough
CT: control target
= control target key end

     0   :  { %s8371_s9 = smov 0   ;;  %s8373_s10 = smov 0   ;;  %s9570_s0 = inlined_call_operand.vmem [shape: bf16[128,64,64], index: 0, kind: input, shape index: {}]   ;;  %s9571_s1 = inlined_call_operand.vmem [shape: bf16[128,64,64], index: 1, kind: input, shape index: {}]   ;;  %s9572_s2 = inlined_call_operand.vmem [shape: bf16[128,64,64], index: 2, kind: output, shape index: {}]  }
   0x1   :  { %s8375_s11 = smov 0  }
   0x2 LB: > { %s24_s12 = sadd.s32 1, %s8350_s10  ;;  %p6245_p0 = scmp.ge.s32.totalorder %s8354_s11, 1  ;;  %s8354_s11 = sphi %s8375_s11, %s12_s11   ;;  %s8350_s10 = sphi %s8373_s10, %s9574_s10   ;;  %s8346_s9 = sphi %s8371_s9, %s9573_s9  }
   0x3   : > { %p26_p1 = scmp.ge.s32.totalorder %s24_s12, 4  ;;  %p147_p2 = scmp.lt.s32.totalorder %s8354_s11, 5 }
   0x5   : > { %s9576_s12 = smov (%p26_p1, %s24_s12), 0  ;;  %p148_p3 = pnand %p6245_p0, %p147_p2 }
   0x6   : > { %s6246_s13 = sshll.u32 (!%p148_p3), %s8346_s9, 5  ;;  %vm769_vm0 = vcmask (!%p148_p3), 523264   ;;  %vm5882_vm1 = vcmask (!%p148_p3), 519168  }
   0x7   : > { %151 = sbr.rel (%p148_p3) target bundleno = 757 (0x2f5), region = 28  ;;  %p187_p4 = scmp.lt.s32.totalorder (!%p148_p3), %s6246_s13, 127 }
   0xe   : > { %s9578_s13 = smov (!%p187_p4, %s6246_s13), 127 }
   0xf   : > { %s8389_s14 = sshll.u32 %s9578_s13, 5 }
  0x10   : > { %s8395_s17 = scalar_lea.vmem %s9571_s1, %s8389_s14  ;;  %s8411_s20 = scalar_lea.vmem %s9570_s0, %s8389_s14 }
  0x11   : > { %v8076_v0 = vld [vmem:[%s8395_s17] sm:$0xff]   ;;  %v8078_v3 = vld [vmem:[%s8395_s17 + $0x8] sm:$0xff]   ;;  %v8080_v6 = vld [vmem:[%s8395_s17 + $0x10] sm:$0xff]   ;;  %s8712_s23 = scalar_lea.vmem %s9572_s2, %s8389_s14 }
  0x12   : > { %v8077_v1 = vld [vmem:[%s8395_s17 + $0x20] sm:$0xff]   ;;  %7924 = vmatprep.subr.msk.bf16.mxu0 %vm769_vm0, %v8076_v0  ;;  %v783_v2 = vsel %vm769_vm0, %v8076_v0, 0  ;;  %v8079_v5 = vld [vmem:[%s8395_s17 + $0x28] sm:$0xff]   ;;  %v8081_v7 = vld [vmem:[%s8395_s17 + $0x30] sm:$0xff]   ;;  %v786_v8 = vsel %vm769_vm0, %v8078_v3, 0  ;;  %v789_v12 = vsel %vm769_vm0, %v8080_v6, 0 }
  0x13   : > { %7928 = vmatprep.subr.msk.bf16.mxu1 %vm769_vm0, %v8077_v1  ;;  %7413 = vmatpush3.bf16.xpose.msra.mxu0 %v783_v2  ;;  %v912_v4 = vsel %vm769_vm0, %v8077_v1, 0  ;;  %v8084_v9 = vld [vmem:[%s8411_s20] sm:$0xff]   ;;  %v915_v10 = vsel %vm769_vm0, %v8079_v5, 0  ;;  %v8082_v13 = vld [vmem:[%s8395_s17 + $0x18] sm:$0xff]   ;;  %v918_v14 = vsel %vm769_vm0, %v8081_v7, 0  ;;  %v8086_v20 = vld [vmem:[%s8411_s20 + $0x8] sm:$0xff]  }
  0x14   : > { %7429 = vmatpush3.bf16.xpose.msra.mxu1 %v912_v4  ;;  %7925 = vmatprep.subr.msk.bf16.mxu0 %vm769_vm0, %v8078_v3  ;;  %v8085_v11 = vld [vmem:[%s8411_s20 + $0x20] sm:$0xff]   ;;  %v8083_v15 = vld [vmem:[%s8395_s17 + $0x38] sm:$0xff]   ;;  %v792_v16 = vsel %vm769_vm0, %v8082_v13, 0  ;;  %v8087_v21 = vld [vmem:[%s8411_s20 + $0x28] sm:$0xff]  }
  0x15   : > { %7929 = vmatprep.subr.msk.bf16.mxu1 %vm769_vm0, %v8079_v5  ;;  %7420 = vmatprep.mubr.msk.bf16.mxu0 %vm769_vm0, %v8084_v9  ;;  %v8088_v17 = vld [vmem:[%s8395_s17 + $0x40] sm:$0xff]   ;;  %v921_v18 = vsel %vm769_vm0, %v8083_v15, 0  ;;  %v8090_v22 = vld [vmem:[%s8395_s17 + $0x48] sm:$0xff]   ;;  %v8094_v26 = vld [vmem:[%s8411_s20 + $0x10] sm:$0xff]  }
  0x16   : > { %7436 = vmatprep.mubr.msk.bf16.mxu1 %vm769_vm0, %v8085_v11  ;;  %v8089_v19 = vld [vmem:[%s8395_s17 + $0x60] sm:$0xff]   ;;  %v1041_v23 = vsel %vm769_vm0, %v8088_v17, 0  ;;  %v8091_v24 = vld [vmem:[%s8395_s17 + $0x68] sm:$0xff]   ;;  %v8095_v27 = vld [vmem:[%s8411_s20 + $0x30] sm:$0xff]   ;;  %v1044_v31 = vsel %vm769_vm0, %v8090_v22, 0 }
  0x17   : > { %v1170_v25 = vsel %vm769_vm0, %v8089_v19, 0  ;;  %v8092_v28 = vld [vmem:[%s8395_s17 + $0x50] sm:$0xff]   ;;  %v8096_v29 = vld [vmem:[%s8411_s20 + $0x18] sm:$0xff]   ;;  %v1173_v33 = vsel %vm769_vm0, %v8091_v24, 0  ;;  %v8100_v34 = vld [vmem:[%s8411_s20 + $0x40] sm:$0xff]  }
  0x18   : > { %v8097_v30 = vld [vmem:[%s8411_s20 + $0x38] sm:$0xff]   ;;  %v8093_v32 = vld [vmem:[%s8395_s17 + $0x70] sm:$0xff]   ;;  %v8101_v35 = vld [vmem:[%s8411_s20 + $0x60] sm:$0xff]   ;;  %v1047_v36 = vsel %vm769_vm0, %v8092_v28, 0 }
  0x19   : > { %v8098_v37 = vld [vmem:[%s8395_s17 + $0x58] sm:$0xff]   ;;  %v1176_v38 = vsel %vm769_vm0, %v8093_v32, 0  ;;  %v8104_v41 = vld [vmem:[%s8395_s17 + $0x80] sm:$0xff]   ;;  %v8102_v44 = vld [vmem:[%s8411_s20 + $0x48] sm:$0xff]  }
  0x1a   : > { %v8099_v39 = vld [vmem:[%s8395_s17 + $0x78] sm:$0xff]   ;;  %v1050_v40 = vsel %vm769_vm0, %v8098_v37, 0  ;;  %v8105_v43 = vld [vmem:[%s8395_s17 + $0xa0] sm:$0xff]   ;;  %v8103_v45 = vld [vmem:[%s8411_s20 + $0x68] sm:$0xff]   ;;  %v1299_v47 = vsel %vm769_vm0, %v8104_v41, 0 }
  0x1b   : > { %7415 = vmatpush3.bf16.xpose.msra.mxu0 %v786_v8  ;;  %v1179_v42 = vsel %vm769_vm0, %v8099_v39, 0  ;;  %v8106_v46 = vld [vmem:[%s8395_s17 + $0x88] sm:$0xff]   ;;  %v1428_v49 = vsel %vm769_vm0, %v8105_v43, 0  ;;  %v8110_v50 = vld [vmem:[%s8411_s20 + $0x50] sm:$0xff]   ;;  %v8112_v53 = vld [vmem:[%s8411_s20 + $0x58] sm:$0xff]  }
  0x1c   : > { %7431 = vmatpush3.bf16.xpose.msra.mxu1 %v915_v10  ;;  %7926 = vmatprep.subr.msk.bf16.mxu0 %vm769_vm0, %v8080_v6  ;;  %v8107_v48 = vld [vmem:[%s8395_s17 + $0xa8] sm:$0xff]   ;;  %v8111_v51 = vld [vmem:[%s8411_s20 + $0x70] sm:$0xff]   ;;  %v8113_v54 = vld [vmem:[%s8411_s20 + $0x78] sm:$0xff]   ;;  %v1302_v55 = vsel %vm769_vm0, %v8106_v46, 0 }
  0x1d   : > { %7930 = vmatprep.subr.msk.bf16.mxu1 %vm769_vm0, %v8081_v7  ;;  %v8108_v52 = vld [vmem:[%s8395_s17 + $0x90] sm:$0xff]   ;;  %v1431_v57 = vsel %vm769_vm0, %v8107_v48, 0  ;;  %v8116_v58 = vld [vmem:[%s8411_s20 + $0x80] sm:$0xff]   ;;  %v8114_v61 = vld [vmem:[%s8395_s17 + $0x98] sm:$0xff]  }
  0x1e   : > { %v8109_v56 = vld [vmem:[%s8395_s17 + $0xb0] sm:$0xff]   ;;  %v8117_v59 = vld [vmem:[%s8411_s20 + $0xa0] sm:$0xff]   ;;  %v1305_v60 = vsel %vm769_vm0, %v8108_v52, 0  ;;  %v8115_v63 = vld [vmem:[%s8395_s17 + $0xb8] sm:$0xff]   ;;  %v1308_v0 = vsel %vm769_vm0, %v8114_v61, 0 }
  0x1f   : > { %v1434_v62 = vsel %vm769_vm0, %v8109_v56, 0  ;;  %v8120_v1 = vld [vmem:[%s8395_s17 + $0xc0] sm:$0xff]   ;;  %v1437_v2 = vsel %vm769_vm0, %v8115_v63, 0  ;;  %v8118_v4 = vld [vmem:[%s8411_s20 + $0x88] sm:$0xff]   ;;  %v8126_v10 = vld [vmem:[%s8411_s20 + $0x90] sm:$0xff]  }
  0x20   : > { %v8121_v3 = vld [vmem:[%s8395_s17 + $0xe0] sm:$0xff]   ;;  %v8119_v5 = vld [vmem:[%s8411_s20 + $0xa8] sm:$0xff]   ;;  %v1557_v7 = vsel %vm769_vm0, %v8120_v1, 0  ;;  %v8127_v11 = vld [vmem:[%s8411_s20 + $0xb0] sm:$0xff]  }
  0x21   : > { %v8122_v6 = vld [vmem:[%s8395_s17 + $0xc8] sm:$0xff]   ;;  %v1686_v9 = vsel %vm769_vm0, %v8121_v3, 0 }
  0x22   : > { %v8123_v8 = vld [vmem:[%s8395_s17 + $0xe8] sm:$0xff]  }
  0x23   : > { %7417 = vmatpush3.bf16.xpose.msra.mxu0 %v789_v12  ;;  %v8124_v12 = vld [vmem:[%s8395_s17 + $0xd0] sm:$0xff]  }
  0x24   : > { %7433 = vmatpush3.bf16.xpose.msra.mxu1 %v918_v14  ;;  %7927 = vmatprep.subr.msk.bf16.mxu0 %vm769_vm0, %v8082_v13  ;;  %v8128_v13 = vld [vmem:[%s8411_s20 + $0x98] sm:$0xff]  }
  0x25   : > { %7931 = vmatprep.subr.msk.bf16.mxu1 %vm769_vm0, %v8083_v15  ;;  %v8129_v14 = vld [vmem:[%s8411_s20 + $0xb8] sm:$0xff]   ;;  %v1560_v15 = vsel %vm769_vm0, %v8122_v6, 0 }
  0x2b   : > { %7419 = vmatpush3.bf16.xpose.msra.mxu0 %v792_v16  ;;  %v8125_v16 = vld [vmem:[%s8395_s17 + $0xf0] sm:$0xff]  }
  0x2c   : > { %7435 = vmatpush3.bf16.xpose.msra.mxu1 %v921_v18  ;;  %7932 = vmatprep.subr.msk.bf16.mxu0 %vm769_vm0, %v8088_v17  ;;  %v1689_v17 = vsel %vm769_vm0, %v8123_v8, 0  ;;  %v8132_v18 = vld [vmem:[%s8411_s20 + $0xc0] sm:$0xff]  }
  0x2d   : > { %7936 = vmatprep.subr.msk.bf16.mxu1 %vm769_vm0, %v8089_v19  ;;  %v8133_v19 = vld [vmem:[%s8411_s20 + $0xe0] sm:$0xff]  }
  0x32   : > { %7421 = vmatmul.mubr.msk.bf16.vlgmr.msra.gmra.mrb[0].mxu0 %vm769_vm0, %v8086_v20  ;;  %v1563_v20 = vsel %vm769_vm0, %v8124_v12, 0 }
  0x33   : > { %7437 = vmatmul.mubr.msk.bf16.vlgmr.msra.gmra.mrb[0].mxu1 %vm769_vm0, %v8087_v21  ;;  %7445 = vmatpush3.bf16.xpose.msra.mxu0 %v1041_v23  ;;  %v8130_v21 = vld [vmem:[%s8395_s17 + $0xd8] sm:$0xff]  }
  0x34   : > { %7461 = vmatpush3.bf16.xpose.msra.mxu1 %v1170_v25  ;;  %7933 = vmatprep.subr.msk.bf16.mxu0 %vm769_vm0, %v8090_v22  ;;  %v1692_v22 = vsel %vm769_vm0, %v8125_v16, 0  ;;  %v8131_v23 = vld [vmem:[%s8395_s17 + $0xf8] sm:$0xff]   ;;  %v8136_v25 = vld [vmem:[%s8395_s17 + $0x100] sm:$0xff]  }
  0x35   : > { %7937 = vmatprep.subr.msk.bf16.mxu1 %vm769_vm0, %v8091_v24  ;;  %7424 = vmatprep.mubr.msk.bf16.mxu0 %vm769_vm0, %v8094_v26  ;;  %v1566_v24 = vsel %vm769_vm0, %v8130_v21, 0  ;;  %v1695_v26 = vsel %vm769_vm0, %v8131_v23, 0 }
  0x36   : > { %7440 = vmatprep.mubr.msk.bf16.mxu1 %vm769_vm0, %v8095_v27  ;;  %v8137_v27 = vld [vmem:[%s8395_s17 + $0x120] sm:$0xff]  }
  0x3a   : > { %7425 = vmatmul.mubr.msk.bf16.gmra.mrb[4].mxu0 %vm769_vm0, %v8096_v29  ;;  %v1815_v29 = vsel %vm769_vm0, %v8136_v25, 0 }
  0x3b   : > { %7447 = vmatpush3.bf16.xpose.msra.mxu0 %v1044_v31  ;;  %7441 = vmatmul.mubr.msk.bf16.gmra.mrb[4].mxu1 %vm769_vm0, %v8097_v30  ;;  %v8135_v30 = vld [vmem:[%s8411_s20 + $0xe8] sm:$0xff]  }
  0x3c   : > { %7463 = vmatpush3.bf16.xpose.msra.mxu1 %v1173_v33  ;;  %7934 = vmatprep.subr.msk.bf16.mxu0 %vm769_vm0, %v8092_v28  ;;  %v8134_v28 = vld [vmem:[%s8411_s20 + $0xc8] sm:$0xff]  }
  0x3d   : > { %7938 = vmatprep.subr.msk.bf16.mxu1 %vm769_vm0, %v8093_v32  ;;  %7452 = vmatprep.mubr.msk.bf16.mxu0 %vm769_vm0, %v8100_v34  ;;  %v8138_v31 = vld [vmem:[%s8395_s17 + $0x108] sm:$0xff]   ;;  %v1944_v32 = vsel %vm769_vm0, %v8137_v27, 0  ;;  %v8142_v34 = vld [vmem:[%s8411_s20 + $0xd0] sm:$0xff]  }
  0x3e   : > { %7468 = vmatprep.mubr.msk.bf16.mxu1 %vm769_vm0, %v8101_v35  ;;  %v8139_v33 = vld [vmem:[%s8395_s17 + $0x128] sm:$0xff]   ;;  %v8143_v35 = vld [vmem:[%s8411_s20 + $0xf0] sm:$0xff]  }
  0x43   : > { %7449 = vmatpush3.bf16.xpose.msra.mxu0 %v1047_v36  ;;  %v1818_v36 = vsel %vm769_vm0, %v8138_v31, 0 }
  0x44   : > { %7465 = vmatpush3.bf16.xpose.msra.mxu1 %v1176_v38  ;;  %7935 = vmatprep.subr.msk.bf16.mxu0 %vm769_vm0, %v8098_v37  ;;  %v8144_v37 = vld [vmem:[%s8411_s20 + $0xd8] sm:$0xff]   ;;  %v1947_v38 = vsel %vm769_vm0, %v8139_v33, 0 }
  0x45   : > { %7939 = vmatprep.subr.msk.bf16.mxu1 %vm769_vm0, %v8099_v39  ;;  %v8140_v39 = vld [vmem:[%s8395_s17 + $0x110] sm:$0xff]  }
  0x4b   : > { %7451 = vmatpush3.bf16.xpose.msra.mxu0 %v1050_v40  ;;  %v8145_v40 = vld [vmem:[%s8411_s20 + $0xf8] sm:$0xff]  }
  0x4c   : > { %7467 = vmatpush3.bf16.xpose.msra.mxu1 %v1179_v42  ;;  %7940 = vmatprep.subr.msk.bf16.mxu0 %vm769_vm0, %v8104_v41  ;;  %v8141_v41 = vld [vmem:[%s8395_s17 + $0x130] sm:$0xff]   ;;  %v8148_v42 = vld [vmem:[%s8411_s20 + $0x100] sm:$0xff]  }
  0x4d   : > { %7944 = vmatprep.subr.msk.bf16.mxu1 %vm769_vm0, %v8105_v43  ;;  %v8149_v43 = vld [vmem:[%s8411_s20 + $0x120] sm:$0xff]  }
  0x52   : > { %7453 = vmatmul.mubr.msk.bf16.vlgmr.msra.gmra.mrb[8].mxu0 %vm769_vm0, %v8102_v44  ;;  %v1821_v44 = vsel %vm769_vm0, %v8140_v39, 0 }
  0x53   : > { %7469 = vmatmul.mubr.msk.bf16.vlgmr.msra.gmra.mrb[8].mxu1 %vm769_vm0, %v8103_v45  ;;  %7477 = vmatpush3.bf16.xpose.msra.mxu0 %v1299_v47  ;;  %v1950_v45 = vsel %vm769_vm0, %v8141_v41, 0  ;;  %v8147_v47 = vld [vmem:[%s8395_s17 + $0x138] sm:$0xff]  }
  0x54   : > { %7493 = vmatpush3.bf16.xpose.msra.mxu1 %v1428_v49  ;;  %7941 = vmatprep.subr.msk.bf16.mxu0 %vm769_vm0, %v8106_v46  ;;  %v8146_v46 = vld [vmem:[%s8395_s17 + $0x118] sm:$0xff]   ;;  %v8152_v49 = vld [vmem:[%s8395_s17 + $0x140] sm:$0xff]  }
  0x55   : > { %7945 = vmatprep.subr.msk.bf16.mxu1 %vm769_vm0, %v8107_v48  ;;  %7456 = vmatprep.mubr.msk.bf16.mxu0 %vm769_vm0, %v8110_v50  ;;  %v1824_v48 = vsel %vm769_vm0, %v8146_v46, 0  ;;  %v1953_v50 = vsel %vm769_vm0, %v8147_v47, 0 }
  0x56   : > { %7472 = vmatprep.mubr.msk.bf16.mxu1 %vm769_vm0, %v8111_v51  ;;  %v8153_v51 = vld [vmem:[%s8395_s17 + $0x160] sm:$0xff]  }
  0x5a   : > { %7457 = vmatmul.mubr.msk.bf16.gmra.mrb[12].mxu0 %vm769_vm0, %v8112_v53  ;;  %v2073_v53 = vsel %vm769_vm0, %v8152_v49, 0 }
  0x5b   : > { %7479 = vmatpush3.bf16.xpose.msra.mxu0 %v1302_v55  ;;  %7473 = vmatmul.mubr.msk.bf16.gmra.mrb[12].mxu1 %vm769_vm0, %v8113_v54  ;;  %v8151_v54 = vld [vmem:[%s8411_s20 + $0x128] sm:$0xff]  }
  0x5c   : > { %7495 = vmatpush3.bf16.xpose.msra.mxu1 %v1431_v57  ;;  %7942 = vmatprep.subr.msk.bf16.mxu0 %vm769_vm0, %v8108_v52  ;;  %v8150_v52 = vld [vmem:[%s8411_s20 + $0x108] sm:$0xff]  }
  0x5d   : > { %7946 = vmatprep.subr.msk.bf16.mxu1 %vm769_vm0, %v8109_v56  ;;  %7484 = vmatprep.mubr.msk.bf16.mxu0 %vm769_vm0, %v8116_v58  ;;  %v8154_v55 = vld [vmem:[%s8395_s17 + $0x148] sm:$0xff]   ;;  %v2202_v56 = vsel %vm769_vm0, %v8153_v51, 0  ;;  %v8158_v58 = vld [vmem:[%s8411_s20 + $0x110] sm:$0xff]  }
  0x5e   : > { %7500 = vmatprep.mubr.msk.bf16.mxu1 %vm769_vm0, %v8117_v59  ;;  %v8155_v57 = vld [vmem:[%s8395_s17 + $0x168] sm:$0xff]   ;;  %v8159_v59 = vld [vmem:[%s8411_s20 + $0x130] sm:$0xff]  }
  0x63   : > { %7481 = vmatpush3.bf16.xpose.msra.mxu0 %v1305_v60  ;;  %v2076_v60 = vsel %vm769_vm0, %v8154_v55, 0 }
  0x64   : > { %7497 = vmatpush3.bf16.xpose.msra.mxu1 %v1434_v62  ;;  %7943 = vmatprep.subr.msk.bf16.mxu0 %vm769_vm0, %v8114_v61  ;;  %v8160_v61 = vld [vmem:[%s8411_s20 + $0x118] sm:$0xff]   ;;  %v2205_v62 = vsel %vm769_vm0, %v8155_v57, 0 }
  0x65   : > { %7947 = vmatprep.subr.msk.bf16.mxu1 %vm769_vm0, %v8115_v63  ;;  %v8156_v63 = vld [vmem:[%s8395_s17 + $0x150] sm:$0xff]  }
  0x6b   : > { %7483 = vmatpush3.bf16.xpose.msra.mxu0 %v1308_v0  ;;  %v8161_v0 = vld [vmem:[%s8411_s20 + $0x138] sm:$0xff]  }
  0x6c   : > { %7499 = vmatpush3.bf16.xpose.msra.mxu1 %v1437_v2  ;;  %7948 = vmatprep.subr.msk.bf16.mxu0 %vm769_vm0, %v8120_v1  ;;  %v8157_v1 = vld [vmem:[%s8395_s17 + $0x170] sm:$0xff]   ;;  %v8164_v2 = vld [vmem:[%s8411_s20 + $0x140] sm:$0xff]  }
  0x6d   : > { %7952 = vmatprep.subr.msk.bf16.mxu1 %vm769_vm0, %v8121_v3  ;;  %v8165_v3 = vld [vmem:[%s8411_s20 + $0x160] sm:$0xff]  }
  0x72   : > { %7485 = vmatmul.mubr.msk.bf16.vlgmr.msra.gmra.mrb[16].mxu0 %vm769_vm0, %v8118_v4  ;;  %v2079_v4 = vsel %vm769_vm0, %v8156_v63, 0 }
  0x73   : > { %7501 = vmatmul.mubr.msk.bf16.vlgmr.msra.gmra.mrb[16].mxu1 %vm769_vm0, %v8119_v5  ;;  %7509 = vmatpush3.bf16.xpose.msra.mxu0 %v1557_v7  ;;  %v2208_v5 = vsel %vm769_vm0, %v8157_v1, 0  ;;  %v8163_v7 = vld [vmem:[%s8395_s17 + $0x178] sm:$0xff]  }
  0x74   : > { %7525 = vmatpush3.bf16.xpose.msra.mxu1 %v1686_v9  ;;  %7949 = vmatprep.subr.msk.bf16.mxu0 %vm769_vm0, %v8122_v6  ;;  %v8162_v6 = vld [vmem:[%s8395_s17 + $0x158] sm:$0xff]   ;;  %v8168_v9 = vld [vmem:[%s8395_s17 + $0x180] sm:$0xff]  }
  0x75   : > { %7953 = vmatprep.subr.msk.bf16.mxu1 %vm769_vm0, %v8123_v8  ;;  %7488 = vmatprep.mubr.msk.bf16.mxu0 %vm769_vm0, %v8126_v10  ;;  %v2082_v8 = vsel %vm769_vm0, %v8162_v6, 0  ;;  %v2211_v10 = vsel %vm769_vm0, %v8163_v7, 0 }
  0x76   : > { %7504 = vmatprep.mubr.msk.bf16.mxu1 %vm769_vm0, %v8127_v11  ;;  %v8169_v11 = vld [vmem:[%s8395_s17 + $0x1a0] sm:$0xff]  }
  0x7a   : > { %7489 = vmatmul.mubr.msk.bf16.gmra.mrb[20].mxu0 %vm769_vm0, %v8128_v13  ;;  %v2331_v13 = vsel %vm769_vm0, %v8168_v9, 0 }
  0x7b   : > { %7511 = vmatpush3.bf16.xpose.msra.mxu0 %v1560_v15  ;;  %7505 = vmatmul.mubr.msk.bf16.gmra.mrb[20].mxu1 %vm769_vm0, %v8129_v14  ;;  %v8167_v14 = vld [vmem:[%s8411_s20 + $0x168] sm:$0xff]  }
  0x7c   : > { %7527 = vmatpush3.bf16.xpose.msra.mxu1 %v1689_v17  ;;  %7950 = vmatprep.subr.msk.bf16.mxu0 %vm769_vm0, %v8124_v12  ;;  %v8166_v12 = vld [vmem:[%s8411_s20 + $0x148] sm:$0xff]  }
  0x7d   : > { %7954 = vmatprep.subr.msk.bf16.mxu1 %vm769_vm0, %v8125_v16  ;;  %7516 = vmatprep.mubr.msk.bf16.mxu0 %vm769_vm0, %v8132_v18  ;;  %v8170_v15 = vld [vmem:[%s8395_s17 + $0x188] sm:$0xff]   ;;  %v2460_v16 = vsel %vm769_vm0, %v8169_v11, 0  ;;  %v8174_v18 = vld [vmem:[%s8411_s20 + $0x150] sm:$0xff]  }
  0x7e   : > { %7532 = vmatprep.mubr.msk.bf16.mxu1 %vm769_vm0, %v8133_v19  ;;  %v8171_v17 = vld [vmem:[%s8395_s17 + $0x1a8] sm:$0xff]   ;;  %v8175_v19 = vld [vmem:[%s8411_s20 + $0x170] sm:$0xff]  }
  0x83   : > { %7513 = vmatpush3.bf16.xpose.msra.mxu0 %v1563_v20  ;;  %v2334_v20 = vsel %vm769_vm0, %v8170_v15, 0 }
  0x84   : > { %7529 = vmatpush3.bf16.xpose.msra.mxu1 %v1692_v22  ;;  %7951 = vmatprep.subr.msk.bf16.mxu0 %vm769_vm0, %v8130_v21  ;;  %v8176_v21 = vld [vmem:[%s8411_s20 + $0x158] sm:$0xff]   ;;  %v2463_v22 = vsel %vm769_vm0, %v8171_v17, 0 }
  0x85   : > { %7955 = vmatprep.subr.msk.bf16.mxu1 %vm769_vm0, %v8131_v23  ;;  %v8172_v23 = vld [vmem:[%s8395_s17 + $0x190] sm:$0xff]  }
  0x8b   : > { %7515 = vmatpush3.bf16.xpose.msra.mxu0 %v1566_v24  ;;  %v8177_v24 = vld [vmem:[%s8411_s20 + $0x178] sm:$0xff]  }
  0x8c   : > { %7531 = vmatpush3.bf16.xpose.msra.mxu1 %v1695_v26  ;;  %7956 = vmatprep.subr.msk.bf16.mxu0 %vm769_vm0, %v8136_v25  ;;  %v8173_v25 = vld [vmem:[%s8395_s17 + $0x1b0] sm:$0xff]   ;;  %v8180_v26 = vld [vmem:[%s8411_s20 + $0x180] sm:$0xff]  }
  0x8d   : > { %7960 = vmatprep.subr.msk.bf16.mxu1 %vm769_vm0, %v8137_v27  ;;  %v8181_v27 = vld [vmem:[%s8411_s20 + $0x1a0] sm:$0xff]  }
  0x92   : > { %7517 = vmatmul.mubr.msk.bf16.vlgmr.msra.gmra.mrb[24].mxu0 %vm769_vm0, %v8134_v28  ;;  %v2337_v28 = vsel %vm769_vm0, %v8172_v23, 0 }
  0x93   : > { %7533 = vmatmul.mubr.msk.bf16.vlgmr.msra.gmra.mrb[24].mxu1 %vm769_vm0, %v8135_v30  ;;  %7541 = vmatpush3.bf16.xpose.msra.mxu0 %v1815_v29  ;;  %v2466_v29 = vsel %vm769_vm0, %v8173_v25, 0  ;;  %v8178_v30 = vld [vmem:[%s8395_s17 + $0x198] sm:$0xff]  }
  0x94   : > { %7557 = vmatpush3.bf16.xpose.msra.mxu1 %v1944_v32  ;;  %7957 = vmatprep.subr.msk.bf16.mxu0 %vm769_vm0, %v8138_v31  ;;  %v8179_v31 = vld [vmem:[%s8395_s17 + $0x1b8] sm:$0xff]   ;;  %v2340_v32 = vsel %vm769_vm0, %v8178_v30, 0 }
  0x95   : > { %7961 = vmatprep.subr.msk.bf16.mxu1 %vm769_vm0, %v8139_v33  ;;  %7520 = vmatprep.mubr.msk.bf16.mxu0 %vm769_vm0, %v8142_v34  ;;  %v8184_v33 = vld [vmem:[%s8395_s17 + $0x1c0] sm:$0xff]   ;;  %v2469_v34 = vsel %vm769_vm0, %v8179_v31, 0 }
  0x96   : > { %7536 = vmatprep.mubr.msk.bf16.mxu1 %vm769_vm0, %v8143_v35  ;;  %v8185_v35 = vld [vmem:[%s8395_s17 + $0x1e0] sm:$0xff]  }
  0x9a   : > { %7521 = vmatmul.mubr.msk.bf16.gmra.mrb[28].mxu0 %vm769_vm0, %v8144_v37  ;;  %v2589_v37 = vsel %vm769_vm0, %v8184_v33, 0 }
  0x9b   : > { %7543 = vmatpush3.bf16.xpose.msra.mxu0 %v1818_v36  ;;  %7537 = vmatmul.mubr.msk.bf16.gmra.mrb[28].mxu1 %vm769_vm0, %v8145_v40  ;;  %v8182_v36 = vld [vmem:[%s8411_s20 + $0x188] sm:$0xff]   ;;  %v2718_v40 = vsel %vm769_vm0, %v8185_v35, 0 }
  0x9c   : > { %7559 = vmatpush3.bf16.xpose.msra.mxu1 %v1947_v38  ;;  %7958 = vmatprep.subr.msk.bf16.mxu0 %vm769_vm0, %v8140_v39  ;;  %v8183_v38 = vld [vmem:[%s8411_s20 + $0x1a8] sm:$0xff]  }
  0x9d   : > { %7962 = vmatprep.subr.msk.bf16.mxu1 %vm769_vm0, %v8141_v41  ;;  %7548 = vmatprep.mubr.msk.bf16.mxu0 %vm769_vm0, %v8148_v42  ;;  %v8186_v39 = vld [vmem:[%s8395_s17 + $0x1c8] sm:$0xff]   ;;  %v8190_v42 = vld [vmem:[%s8411_s20 + $0x190] sm:$0xff]  }
  0x9e   : > { %7564 = vmatprep.mubr.msk.bf16.mxu1 %vm769_vm0, %v8149_v43  ;;  %v8187_v41 = vld [vmem:[%s8395_s17 + $0x1e8] sm:$0xff]   ;;  %v8191_v43 = vld [vmem:[%s8411_s20 + $0x1b0] sm:$0xff]  }
  0xa3   : > { %7545 = vmatpush3.bf16.xpose.msra.mxu0 %v1821_v44  ;;  %v2592_v44 = vsel %vm769_vm0, %v8186_v39, 0 }
  0xa4   : > { %7561 = vmatpush3.bf16.xpose.msra.mxu1 %v1950_v45  ;;  %7959 = vmatprep.subr.msk.bf16.mxu0 %vm769_vm0, %v8146_v46  ;;  %v8192_v45 = vld [vmem:[%s8411_s20 + $0x198] sm:$0xff]   ;;  %v2721_v46 = vsel %vm769_vm0, %v8187_v41, 0 }
  0xa5   : > { %7963 = vmatprep.subr.msk.bf16.mxu1 %vm769_vm0, %v8147_v47  ;;  %v8188_v47 = vld [vmem:[%s8395_s17 + $0x1d0] sm:$0xff]  }
  0xab   : > { %7547 = vmatpush3.bf16.xpose.msra.mxu0 %v1824_v48  ;;  %v8193_v48 = vld [vmem:[%s8411_s20 + $0x1b8] sm:$0xff]  }
  0xac   : > { %7563 = vmatpush3.bf16.xpose.msra.mxu1 %v1953_v50  ;;  %7964 = vmatprep.subr.msk.bf16.mxu0 %vm769_vm0, %v8152_v49  ;;  %v8189_v49 = vld [vmem:[%s8395_s17 + $0x1f0] sm:$0xff]   ;;  %v8196_v50 = vld [vmem:[%s8411_s20 + $0x1c0] sm:$0xff]  }
  0xad   : > { %7968 = vmatprep.subr.msk.bf16.mxu1 %vm769_vm0, %v8153_v51  ;;  %v8197_v51 = vld [vmem:[%s8411_s20 + $0x1e0] sm:$0xff]  }
  0xb2   : > { %7549 = vmatmul.mubr.msk.bf16.vlgmr.msra.gmra.mrb[32].mxu0 %vm769_vm0, %v8150_v52  ;;  %v2595_v52 = vsel %vm769_vm0, %v8188_v47, 0 }
  0xb3   : > { %7565 = vmatmul.mubr.msk.bf16.vlgmr.msra.gmra.mrb[32].mxu1 %vm769_vm0, %v8151_v54  ;;  %7573 = vmatpush3.bf16.xpose.msra.mxu0 %v2073_v53  ;;  %v8194_v53 = vld [vmem:[%s8395_s17 + $0x1d8] sm:$0xff]   ;;  %v2724_v54 = vsel %vm769_vm0, %v8189_v49, 0 }
  0xb4   : > { %7589 = vmatpush3.bf16.xpose.msra.mxu1 %v2202_v56  ;;  %7965 = vmatprep.subr.msk.bf16.mxu0 %vm769_vm0, %v8154_v55  ;;  %v8195_v55 = vld [vmem:[%s8395_s17 + $0x1f8] sm:$0xff]  }
  0xb5   : > { %7969 = vmatprep.subr.msk.bf16.mxu1 %vm769_vm0, %v8155_v57  ;;  %7552 = vmatprep.mubr.msk.bf16.mxu0 %vm769_vm0, %v8158_v58 }
  0xb6   : > { %7568 = vmatprep.mubr.msk.bf16.mxu1 %vm769_vm0, %v8159_v59 }
  0xba   : > { %7553 = vmatmul.mubr.msk.bf16.gmra.mrb[36].mxu0 %vm769_vm0, %v8160_v61 }
  0xbb   : > { %7575 = vmatpush3.bf16.xpose.msra.mxu0 %v2076_v60  ;;  %7569 = vmatmul.mubr.msk.bf16.gmra.mrb[36].mxu1 %vm769_vm0, %v8161_v0 }
  0xbc   : > { %7591 = vmatpush3.bf16.xpose.msra.mxu1 %v2205_v62  ;;  %7966 = vmatprep.subr.msk.bf16.mxu0 %vm769_vm0, %v8156_v63 }
  0xbd   : > { %7970 = vmatprep.subr.msk.bf16.mxu1 %vm769_vm0, %v8157_v1  ;;  %7580 = vmatprep.mubr.msk.bf16.mxu0 %vm769_vm0, %v8164_v2 }
  0xbe   : > { %7596 = vmatprep.mubr.msk.bf16.mxu1 %vm769_vm0, %v8165_v3 }
  0xc3   : > { %7577 = vmatpush3.bf16.xpose.msra.mxu0 %v2079_v4  ;;  %v2598_v4 = vsel %vm769_vm0, %v8194_v53, 0 }
  0xc4   : > { %7593 = vmatpush3.bf16.xpose.msra.mxu1 %v2208_v5  ;;  %7967 = vmatprep.subr.msk.bf16.mxu0 %vm769_vm0, %v8162_v6  ;;  %v8200_v5 = vld [vmem:[%s8395_s17 + $0x200] sm:$0xff]  }
  0xc5   : > { %7971 = vmatprep.subr.msk.bf16.mxu1 %vm769_vm0, %v8163_v7 }
  0xcb   : > { %7579 = vmatpush3.bf16.xpose.msra.mxu0 %v2082_v8 }
  0xcc   : > { %7595 = vmatpush3.bf16.xpose.msra.mxu1 %v2211_v10  ;;  %7972 = vmatprep.subr.msk.bf16.mxu0 %vm769_vm0, %v8168_v9  ;;  %v2727_v9 = vsel %vm769_vm0, %v8195_v55, 0  ;;  %v8201_v10 = vld [vmem:[%s8395_s17 + $0x220] sm:$0xff]  }
  0xcd   : > { %7976 = vmatprep.subr.msk.bf16.mxu1 %vm769_vm0, %v8169_v11 }
  0xd2   : > { %7581 = vmatmul.mubr.msk.bf16.vlgmr.msra.gmra.mrb[40].mxu0 %vm769_vm0, %v8166_v12 }
  0xd3   : > { %7597 = vmatmul.mubr.msk.bf16.vlgmr.msra.gmra.mrb[40].mxu1 %vm769_vm0, %v8167_v14  ;;  %7605 = vmatpush3.bf16.xpose.msra.mxu0 %v2331_v13  ;;  %v8198_v13 = vld [vmem:[%s8411_s20 + $0x1c8] sm:$0xff]  }
  0xd4   : > { %7621 = vmatpush3.bf16.xpose.msra.mxu1 %v2460_v16  ;;  %7973 = vmatprep.subr.msk.bf16.mxu0 %vm769_vm0, %v8170_v15 }
  0xd5   : > { %7977 = vmatprep.subr.msk.bf16.mxu1 %vm769_vm0, %v8171_v17  ;;  %7584 = vmatprep.mubr.msk.bf16.mxu0 %vm769_vm0, %v8174_v18  ;;  %v8199_v17 = vld [vmem:[%s8411_s20 + $0x1e8] sm:$0xff]  }
  0xd6   : > { %7600 = vmatprep.mubr.msk.bf16.mxu1 %vm769_vm0, %v8175_v19 }
  0xda   : > { %7585 = vmatmul.mubr.msk.bf16.gmra.mrb[44].mxu0 %vm769_vm0, %v8176_v21 }
  0xdb   : > { %7607 = vmatpush3.bf16.xpose.msra.mxu0 %v2334_v20  ;;  %7601 = vmatmul.mubr.msk.bf16.gmra.mrb[44].mxu1 %vm769_vm0, %v8177_v24 }
  0xdc   : > { %7623 = vmatpush3.bf16.xpose.msra.mxu1 %v2463_v22  ;;  %7974 = vmatprep.subr.msk.bf16.mxu0 %vm769_vm0, %v8172_v23  ;;  %v2847_v22 = vsel %vm769_vm0, %v8200_v5, 0  ;;  %v8202_v23 = vld [vmem:[%s8395_s17 + $0x208] sm:$0xff]  }
  0xdd   : > { %7978 = vmatprep.subr.msk.bf16.mxu1 %vm769_vm0, %v8173_v25  ;;  %7612 = vmatprep.mubr.msk.bf16.mxu0 %vm769_vm0, %v8180_v26 }
  0xde   : > { %7628 = vmatprep.mubr.msk.bf16.mxu1 %vm769_vm0, %v8181_v27 }
  0xe3   : > { %7609 = vmatpush3.bf16.xpose.msra.mxu0 %v2337_v28  ;;  %v2976_v28 = vsel %vm769_vm0, %v8201_v10, 0 }
  0xe4   : > { %7625 = vmatpush3.bf16.xpose.msra.mxu1 %v2466_v29  ;;  %7975 = vmatprep.subr.msk.bf16.mxu0 %vm769_vm0, %v8178_v30  ;;  %v8203_v29 = vld [vmem:[%s8395_s17 + $0x228] sm:$0xff]  }
  0xe5   : > { %7979 = vmatprep.subr.msk.bf16.mxu1 %vm769_vm0, %v8179_v31 }
  0xeb   : > { %7611 = vmatpush3.bf16.xpose.msra.mxu0 %v2340_v32 }
  0xec   : > { %7627 = vmatpush3.bf16.xpose.msra.mxu1 %v2469_v34  ;;  %7980 = vmatprep.subr.msk.bf16.mxu0 %vm769_vm0, %v8184_v33  ;;  %v8206_v33 = vld [vmem:[%s8411_s20 + $0x1d0] sm:$0xff]  }
  0xed   : > { %7984 = vmatprep.subr.msk.bf16.mxu1 %vm769_vm0, %v8185_v35  ;;  %v8207_v35 = vld [vmem:[%s8411_s20 + $0x1f0] sm:$0xff]  }
  0xf2   : > { %7613 = vmatmul.mubr.msk.bf16.vlgmr.msra.gmra.mrb[48].mxu0 %vm769_vm0, %v8182_v36  ;;  %v8208_v36 = vld [vmem:[%s8411_s20 + $0x1d8] sm:$0xff]  }
  0xf3   : > { %7629 = vmatmul.mubr.msk.bf16.vlgmr.msra.gmra.mrb[48].mxu1 %vm769_vm0, %v8183_v38  ;;  %7637 = vmatpush3.bf16.xpose.msra.mxu0 %v2589_v37  ;;  %v8209_v37 = vld [vmem:[%s8411_s20 + $0x1f8] sm:$0xff]   ;;  %v2850_v38 = vsel %vm769_vm0, %v8202_v23, 0 }
  0xf4   : > { %7653 = vmatpush3.bf16.xpose.msra.mxu1 %v2718_v40  ;;  %7981 = vmatprep.subr.msk.bf16.mxu0 %vm769_vm0, %v8186_v39  ;;  %v8204_v39 = vld [vmem:[%s8395_s17 + $0x210] sm:$0xff]   ;;  %v2979_v40 = vsel %vm769_vm0, %v8203_v29, 0 }
  0xf5   : > { %7985 = vmatprep.subr.msk.bf16.mxu1 %vm769_vm0, %v8187_v41  ;;  %7616 = vmatprep.mubr.msk.bf16.mxu0 %vm769_vm0, %v8190_v42  ;;  %v8205_v41 = vld [vmem:[%s8395_s17 + $0x230] sm:$0xff]   ;;  %v8212_v42 = vld [vmem:[%s8411_s20 + $0x200] sm:$0xff]  }
  0xf6   : > { %7632 = vmatprep.mubr.msk.bf16.mxu1 %vm769_vm0, %v8191_v43  ;;  %v8213_v43 = vld [vmem:[%s8411_s20 + $0x220] sm:$0xff]  }
  0xfa   : > { %7617 = vmatmul.mubr.msk.bf16.gmra.mrb[52].mxu0 %vm769_vm0, %v8192_v45  ;;  %v8210_v45 = vld [vmem:[%s8395_s17 + $0x218] sm:$0xff]  }
  0xfb   : > { %7639 = vmatpush3.bf16.xpose.msra.mxu0 %v2592_v44  ;;  %7633 = vmatmul.mubr.msk.bf16.gmra.mrb[52].mxu1 %vm769_vm0, %v8193_v48  ;;  %v2853_v44 = vsel %vm769_vm0, %v8204_v39, 0 }
  0xfc   : > { %7655 = vmatpush3.bf16.xpose.msra.mxu1 %v2721_v46  ;;  %7982 = vmatprep.subr.msk.bf16.mxu0 %vm769_vm0, %v8188_v47  ;;  %v2982_v46 = vsel %vm769_vm0, %v8205_v41, 0  ;;  %v8211_v47 = vld [vmem:[%s8395_s17 + $0x238] sm:$0xff]  }
  0xfd   : > { %7986 = vmatprep.subr.msk.bf16.mxu1 %vm769_vm0, %v8189_v49  ;;  %7644 = vmatprep.mubr.msk.bf16.mxu0 %vm769_vm0, %v8196_v50 }
  0xfe   : > { %7660 = vmatprep.mubr.msk.bf16.mxu1 %vm769_vm0, %v8197_v51 }
 0x103   : > { %7641 = vmatpush3.bf16.xpose.msra.mxu0 %v2595_v52 }
 0x104   : > { %7657 = vmatpush3.bf16.xpose.msra.mxu1 %v2724_v54  ;;  %7983 = vmatprep.subr.msk.bf16.mxu0 %vm769_vm0, %v8194_v53 }
 0x105   : > { %v7422_v56 = vpop.f32.mrb[0].mxu0  ;;  %7987 = vmatprep.subr.msk.bf16.mxu1 %vm769_vm0, %v8195_v55 }
 0x106   : > { %v6902_v57 = vpack.c.bf16 %v7422_v56, %v7422_v56  ;;  %v7438_v58 = vpop.f32.mrb[0].mxu1  ;;  %v828_v59 = vpop.f32.mrb[1].mxu0 }
 0x107   : > { %v6910_v60 = vpack.c.bf16 %v7438_v58, %v7438_v58  ;;  %v6900_v61 = vpack.c.bf16 %v828_v59, %v828_v59  ;;  %v957_v62 = vpop.f32.mrb[1].mxu1  ;;  %v7423_v63 = vpop.f32.mrb[2].mxu0 }
 0x108   : > { %5885 = vst.msk [vmem:[%s8712_s23 + $0x8] sm:$0xf] %vm5882_vm1, %v6902_v57  ;;  %v6908_v0 = vpack.c.bf16 %v957_v62, %v957_v62  ;;  %v6903_v1 = vpack.c.bf16 %v7423_v63, %v7423_v63  ;;  %v7439_v2 = vpop.f32.mrb[2].mxu1  ;;  %v831_v3 = vpop.f32.mrb[3].mxu0 }
 0x109   : > { %5893 = vst.msk [vmem:[%s8712_s23 + $0x28] sm:$0xf] %vm5882_vm1, %v6910_v60  ;;  %5883 = vst.msk [vmem:[%s8712_s23] sm:$0xf] %vm5882_vm1, %v6900_v61  ;;  %v6911_v6 = vpack.c.bf16 %v7439_v2, %v7439_v2  ;;  %v6901_v7 = vpack.c.bf16 %v831_v3, %v831_v3  ;;  %v960_v8 = vpop.f32.mrb[3].mxu1  ;;  %v2856_v60 = vsel %vm769_vm0, %v8210_v45, 0 }
 0x10a   : > { %5891 = vst.msk [vmem:[%s8712_s23 + $0x20] sm:$0xf] %vm5882_vm1, %v6908_v0  ;;  %5886 = vst.msk [vmem:[%s8712_s23 + $0xc] sm:$0xf] %vm5882_vm1, %v6903_v1  ;;  %v6909_v11 = vpack.c.bf16 %v960_v8, %v960_v8  ;;  %v8216_v61 = vld [vmem:[%s8395_s17 + $0x240] sm:$0xff]   ;;  %v2985_v1 = vsel %vm769_vm0, %v8211_v47, 0 }
 0x10b   : > { %5894 = vst.msk [vmem:[%s8712_s23 + $0x2c] sm:$0xf] %vm5882_vm1, %v6911_v6  ;;  %5884 = vst.msk [vmem:[%s8712_s23 + $0x4] sm:$0xf] %vm5882_vm1, %v6901_v7  ;;  %7643 = vmatpush3.bf16.xpose.msra.mxu0 %v2598_v4  ;;  %v8217_v2 = vld [vmem:[%s8395_s17 + $0x260] sm:$0xff]  }
 0x10c   : > { %5892 = vst.msk [vmem:[%s8712_s23 + $0x24] sm:$0xf] %vm5882_vm1, %v6909_v11  ;;  %7659 = vmatpush3.bf16.xpose.msra.mxu1 %v2727_v9  ;;  %7988 = vmatprep.subr.msk.bf16.mxu0 %vm769_vm0, %v8200_v5  ;;  %v8214_v5 = vld [vmem:[%s8411_s20 + $0x208] sm:$0xff]  }
 0x10d   : > { %7992 = vmatprep.subr.msk.bf16.mxu1 %vm769_vm0, %v8201_v10  ;;  %v7426_v12 = vpop.f32.mrb[4].mxu0  ;;  %v8215_v9 = vld [vmem:[%s8411_s20 + $0x228] sm:$0xff]  }
 0x10e   : > { %v6906_v14 = vpack.c.bf16 %v7426_v12, %v7426_v12  ;;  %v7442_v15 = vpop.f32.mrb[4].mxu1  ;;  %v844_v16 = vpop.f32.mrb[5].mxu0 }
 0x10f   : > { %v6914_v18 = vpack.c.bf16 %v7442_v15, %v7442_v15  ;;  %v6904_v19 = vpack.c.bf16 %v844_v16, %v844_v16  ;;  %v973_v20 = vpop.f32.mrb[5].mxu1  ;;  %v7427_v21 = vpop.f32.mrb[6].mxu0  ;;  %v8218_v15 = vld [vmem:[%s8395_s17 + $0x248] sm:$0xff]  }
 0x110   : > { %5889 = vst.msk [vmem:[%s8712_s23 + $0x18] sm:$0xf] %vm5882_vm1, %v6906_v14  ;;  %v6912_v24 = vpack.c.bf16 %v973_v20, %v973_v20  ;;  %v6907_v25 = vpack.c.bf16 %v7427_v21, %v7427_v21  ;;  %v7443_v26 = vpop.f32.mrb[6].mxu1  ;;  %v847_v27 = vpop.f32.mrb[7].mxu0  ;;  %v3105_v14 = vsel %vm769_vm0, %v8216_v61, 0  ;;  %v3234_v20 = vsel %vm769_vm0, %v8217_v2, 0 }
 0x111   : > { %5897 = vst.msk [vmem:[%s8712_s23 + $0x38] sm:$0xf] %vm5882_vm1, %v6914_v18  ;;  %5887 = vst.msk [vmem:[%s8712_s23 + $0x10] sm:$0xf] %vm5882_vm1, %v6904_v19  ;;  %v6915_v30 = vpack.c.bf16 %v7443_v26, %v7443_v26  ;;  %v6905_v31 = vpack.c.bf16 %v847_v27, %v847_v27  ;;  %v976_v32 = vpop.f32.mrb[7].mxu1  ;;  %v8219_v21 = vld [vmem:[%s8395_s17 + $0x268] sm:$0xff]  }
 0x112   : > { %7645 = vmatmul.mubr.msk.bf16.vlgmr.msra.gmra.mrb[56].mxu0 %vm769_vm0, %v8198_v13  ;;  %5895 = vst.msk [vmem:[%s8712_s23 + $0x30] sm:$0xf] %vm5882_vm1, %v6912_v24  ;;  %5890 = vst.msk [vmem:[%s8712_s23 + $0x1c] sm:$0xf] %vm5882_vm1, %v6907_v25  ;;  %v6913_v34 = vpack.c.bf16 %v976_v32, %v976_v32  ;;  %v8222_v25 = vld [vmem:[%s8411_s20 + $0x210] sm:$0xff]   ;;  %v3237_v32 = vsel %vm769_vm0, %v8219_v21, 0 }
 0x113   : > { %7661 = vmatmul.mubr.msk.bf16.vlgmr.msra.gmra.mrb[56].mxu1 %vm769_vm0, %v8199_v17  ;;  %7669 = vmatpush3.bf16.xpose.msra.mxu0 %v2847_v22  ;;  %5898 = vst.msk [vmem:[%s8712_s23 + $0x3c] sm:$0xf] %vm5882_vm1, %v6915_v30  ;;  %5888 = vst.msk [vmem:[%s8712_s23 + $0x14] sm:$0xf] %vm5882_vm1, %v6905_v31  ;;  %v8223_v27 = vld [vmem:[%s8411_s20 + $0x230] sm:$0xff]   ;;  %v3108_v30 = vsel %vm769_vm0, %v8218_v15, 0 }
 0x114   : > { %7685 = vmatpush3.bf16.xpose.msra.mxu1 %v2976_v28  ;;  %7989 = vmatprep.subr.msk.bf16.mxu0 %vm769_vm0, %v8202_v23  ;;  %5896 = vst.msk [vmem:[%s8712_s23 + $0x34] sm:$0xf] %vm5882_vm1, %v6913_v34  ;;  %v8224_v28 = vld [vmem:[%s8411_s20 + $0x218] sm:$0xff]   ;;  %v8220_v31 = vld [vmem:[%s8395_s17 + $0x250] sm:$0xff]   ;;  %v8228_v34 = vld [vmem:[%s8411_s20 + $0x240] sm:$0xff]  }
 0x115   : > { %7993 = vmatprep.subr.msk.bf16.mxu1 %vm769_vm0, %v8203_v29  ;;  %7648 = vmatprep.mubr.msk.bf16.mxu0 %vm769_vm0, %v8206_v33  ;;  %v8225_v29 = vld [vmem:[%s8411_s20 + $0x238] sm:$0xff]   ;;  %v8221_v33 = vld [vmem:[%s8395_s17 + $0x270] sm:$0xff]  }
 0x116   : > { %7664 = vmatprep.mubr.msk.bf16.mxu1 %vm769_vm0, %v8207_v35  ;;  %v8229_v35 = vld [vmem:[%s8411_s20 + $0x260] sm:$0xff]  }
 0x11a   : > { %7649 = vmatmul.mubr.msk.bf16.gmra.mrb[60].mxu0 %vm769_vm0, %v8208_v36  ;;  %v3111_v36 = vsel %vm769_vm0, %v8220_v31, 0 }
 0x11b   : > { %7671 = vmatpush3.bf16.xpose.msra.mxu0 %v2850_v38  ;;  %7665 = vmatmul.mubr.msk.bf16.gmra.mrb[60].mxu1 %vm769_vm0, %v8209_v37  ;;  %v8226_v37 = vld [vmem:[%s8395_s17 + $0x258] sm:$0xff]   ;;  %v3240_v38 = vsel %vm769_vm0, %v8221_v33, 0 }
 0x11c   : > { %7687 = vmatpush3.bf16.xpose.msra.mxu1 %v2979_v40  ;;  %7990 = vmatprep.subr.msk.bf16.mxu0 %vm769_vm0, %v8204_v39  ;;  %v8227_v39 = vld [vmem:[%s8395_s17 + $0x278] sm:$0xff]  }
 0x11d   : > { %7994 = vmatprep.subr.msk.bf16.mxu1 %vm769_vm0, %v8205_v41  ;;  %7676 = vmatprep.mubr.msk.bf16.mxu0 %vm769_vm0, %v8212_v42 }
 0x11e   : > { %7692 = vmatprep.mubr.msk.bf16.mxu1 %vm769_vm0, %v8213_v43 }
 0x123   : > { %7673 = vmatpush3.bf16.xpose.msra.mxu0 %v2853_v44 }
 0x124   : > { %7689 = vmatpush3.bf16.xpose.msra.mxu1 %v2982_v46  ;;  %7991 = vmatprep.subr.msk.bf16.mxu0 %vm769_vm0, %v8210_v45 }
 0x125   : > { %v7454_v48 = vpop.f32.mrb[8].mxu0  ;;  %7995 = vmatprep.subr.msk.bf16.mxu1 %vm769_vm0, %v8211_v47 }
 0x126   : > { %v6918_v49 = vpack.c.bf16 %v7454_v48, %v7454_v48  ;;  %v7470_v50 = vpop.f32.mrb[8].mxu1  ;;  %v1086_v51 = vpop.f32.mrb[9].mxu0 }
 0x127   : > { %v6926_v52 = vpack.c.bf16 %v7470_v50, %v7470_v50  ;;  %v6916_v53 = vpack.c.bf16 %v1086_v51, %v1086_v51  ;;  %v1215_v54 = vpop.f32.mrb[9].mxu1  ;;  %v7455_v55 = vpop.f32.mrb[10].mxu0 }
 0x128   : > { %5901 = vst.msk [vmem:[%s8712_s23 + $0x48] sm:$0xf] %vm5882_vm1, %v6918_v49  ;;  %v6924_v56 = vpack.c.bf16 %v1215_v54, %v1215_v54  ;;  %v6919_v57 = vpack.c.bf16 %v7455_v55, %v7455_v55  ;;  %v7471_v58 = vpop.f32.mrb[10].mxu1  ;;  %v1089_v59 = vpop.f32.mrb[11].mxu0 }
 0x129   : > { %5909 = vst.msk [vmem:[%s8712_s23 + $0x68] sm:$0xf] %vm5882_vm1, %v6926_v52  ;;  %5899 = vst.msk [vmem:[%s8712_s23 + $0x40] sm:$0xf] %vm5882_vm1, %v6916_v53  ;;  %v6927_v62 = vpack.c.bf16 %v7471_v58, %v7471_v58  ;;  %v6917_v63 = vpack.c.bf16 %v1089_v59, %v1089_v59  ;;  %v1218_v0 = vpop.f32.mrb[11].mxu1  ;;  %v3114_v52 = vsel %vm769_vm0, %v8226_v37, 0 }
 0x12a   : > { %5907 = vst.msk [vmem:[%s8712_s23 + $0x60] sm:$0xf] %vm5882_vm1, %v6924_v56  ;;  %5902 = vst.msk [vmem:[%s8712_s23 + $0x4c] sm:$0xf] %vm5882_vm1, %v6919_v57  ;;  %v6925_v3 = vpack.c.bf16 %v1218_v0, %v1218_v0  ;;  %v8232_v53 = vld [vmem:[%s8395_s17 + $0x280] sm:$0xff]   ;;  %v3243_v57 = vsel %vm769_vm0, %v8227_v39, 0 }
 0x12b   : > { %5910 = vst.msk [vmem:[%s8712_s23 + $0x6c] sm:$0xf] %vm5882_vm1, %v6927_v62  ;;  %5900 = vst.msk [vmem:[%s8712_s23 + $0x44] sm:$0xf] %vm5882_vm1, %v6917_v63  ;;  %7675 = vmatpush3.bf16.xpose.msra.mxu0 %v2856_v60  ;;  %v8233_v58 = vld [vmem:[%s8395_s17 + $0x2a0] sm:$0xff]  }
 0x12c   : > { %5908 = vst.msk [vmem:[%s8712_s23 + $0x64] sm:$0xf] %vm5882_vm1, %v6925_v3  ;;  %7691 = vmatpush3.bf16.xpose.msra.mxu1 %v2985_v1  ;;  %7996 = vmatprep.subr.msk.bf16.mxu0 %vm769_vm0, %v8216_v61  ;;  %v8230_v61 = vld [vmem:[%s8411_s20 + $0x248] sm:$0xff]  }
 0x12d   : > { %8000 = vmatprep.subr.msk.bf16.mxu1 %vm769_vm0, %v8217_v2  ;;  %v7458_v4 = vpop.f32.mrb[12].mxu0  ;;  %v8231_v1 = vld [vmem:[%s8411_s20 + $0x268] sm:$0xff]  }
 0x12e   : > { %v6922_v6 = vpack.c.bf16 %v7458_v4, %v7458_v4  ;;  %v7474_v7 = vpop.f32.mrb[12].mxu1  ;;  %v1102_v8 = vpop.f32.mrb[13].mxu0 }
 0x12f   : > { %v6930_v10 = vpack.c.bf16 %v7474_v7, %v7474_v7  ;;  %v6920_v11 = vpack.c.bf16 %v1102_v8, %v1102_v8  ;;  %v1231_v12 = vpop.f32.mrb[13].mxu1  ;;  %v7459_v13 = vpop.f32.mrb[14].mxu0  ;;  %v8234_v7 = vld [vmem:[%s8395_s17 + $0x288] sm:$0xff]  }
 0x130   : > { %5905 = vst.msk [vmem:[%s8712_s23 + $0x58] sm:$0xf] %vm5882_vm1, %v6922_v6  ;;  %v6928_v16 = vpack.c.bf16 %v1231_v12, %v1231_v12  ;;  %v6923_v17 = vpack.c.bf16 %v7459_v13, %v7459_v13  ;;  %v7475_v18 = vpop.f32.mrb[14].mxu1  ;;  %v1105_v19 = vpop.f32.mrb[15].mxu0  ;;  %v3363_v6 = vsel %vm769_vm0, %v8232_v53, 0  ;;  %v3492_v12 = vsel %vm769_vm0, %v8233_v58, 0 }
 0x131   : > { %5913 = vst.msk [vmem:[%s8712_s23 + $0x78] sm:$0xf] %vm5882_vm1, %v6930_v10  ;;  %5903 = vst.msk [vmem:[%s8712_s23 + $0x50] sm:$0xf] %vm5882_vm1, %v6920_v11  ;;  %v6931_v22 = vpack.c.bf16 %v7475_v18, %v7475_v18  ;;  %v6921_v23 = vpack.c.bf16 %v1105_v19, %v1105_v19  ;;  %v1234_v24 = vpop.f32.mrb[15].mxu1  ;;  %v8235_v13 = vld [vmem:[%s8395_s17 + $0x2a8] sm:$0xff]  }
 0x132   : > { %7677 = vmatmul.mubr.msk.bf16.vlgmr.msra.gmra.mrb[64].mxu0 %vm769_vm0, %v8214_v5  ;;  %5911 = vst.msk [vmem:[%s8712_s23 + $0x70] sm:$0xf] %vm5882_vm1, %v6928_v16  ;;  %5906 = vst.msk [vmem:[%s8712_s23 + $0x5c] sm:$0xf] %vm5882_vm1, %v6923_v17  ;;  %v6929_v26 = vpack.c.bf16 %v1234_v24, %v1234_v24  ;;  %v8238_v17 = vld [vmem:[%s8411_s20 + $0x250] sm:$0xff]   ;;  %v3495_v24 = vsel %vm769_vm0, %v8235_v13, 0 }
 0x133   : > { %7693 = vmatmul.mubr.msk.bf16.vlgmr.msra.gmra.mrb[64].mxu1 %vm769_vm0, %v8215_v9  ;;  %7701 = vmatpush3.bf16.xpose.msra.mxu0 %v3105_v14  ;;  %5914 = vst.msk [vmem:[%s8712_s23 + $0x7c] sm:$0xf] %vm5882_vm1, %v6931_v22  ;;  %5904 = vst.msk [vmem:[%s8712_s23 + $0x54] sm:$0xf] %vm5882_vm1, %v6921_v23  ;;  %v8239_v19 = vld [vmem:[%s8411_s20 + $0x270] sm:$0xff]   ;;  %v3366_v22 = vsel %vm769_vm0, %v8234_v7, 0 }
 0x134   : > { %7717 = vmatpush3.bf16.xpose.msra.mxu1 %v3234_v20  ;;  %7997 = vmatprep.subr.msk.bf16.mxu0 %vm769_vm0, %v8218_v15  ;;  %5912 = vst.msk [vmem:[%s8712_s23 + $0x74] sm:$0xf] %vm5882_vm1, %v6929_v26  ;;  %v8240_v20 = vld [vmem:[%s8411_s20 + $0x258] sm:$0xff]   ;;  %v8236_v23 = vld [vmem:[%s8395_s17 + $0x290] sm:$0xff]   ;;  %v8244_v26 = vld [vmem:[%s8411_s20 + $0x280] sm:$0xff]  }
 0x135   : > { %8001 = vmatprep.subr.msk.bf16.mxu1 %vm769_vm0, %v8219_v21  ;;  %7680 = vmatprep.mubr.msk.bf16.mxu0 %vm769_vm0, %v8222_v25  ;;  %v8241_v21 = vld [vmem:[%s8411_s20 + $0x278] sm:$0xff]   ;;  %v8237_v25 = vld [vmem:[%s8395_s17 + $0x2b0] sm:$0xff]  }
 0x136   : > { %7696 = vmatprep.mubr.msk.bf16.mxu1 %vm769_vm0, %v8223_v27  ;;  %v8245_v27 = vld [vmem:[%s8411_s20 + $0x2a0] sm:$0xff]  }
 0x13a   : > { %7681 = vmatmul.mubr.msk.bf16.gmra.mrb[68].mxu0 %vm769_vm0, %v8224_v28  ;;  %v3369_v28 = vsel %vm769_vm0, %v8236_v23, 0 }
 0x13b   : > { %7703 = vmatpush3.bf16.xpose.msra.mxu0 %v3108_v30  ;;  %7697 = vmatmul.mubr.msk.bf16.gmra.mrb[68].mxu1 %vm769_vm0, %v8225_v29  ;;  %v8242_v29 = vld [vmem:[%s8395_s17 + $0x298] sm:$0xff]   ;;  %v3498_v30 = vsel %vm769_vm0, %v8237_v25, 0 }
 0x13c   : > { %7719 = vmatpush3.bf16.xpose.msra.mxu1 %v3237_v32  ;;  %7998 = vmatprep.subr.msk.bf16.mxu0 %vm769_vm0, %v8220_v31  ;;  %v8243_v31 = vld [vmem:[%s8395_s17 + $0x2b8] sm:$0xff]  }
 0x13d   : > { %8002 = vmatprep.subr.msk.bf16.mxu1 %vm769_vm0, %v8221_v33  ;;  %7708 = vmatprep.mubr.msk.bf16.mxu0 %vm769_vm0, %v8228_v34 }
 0x13e   : > { %7724 = vmatprep.mubr.msk.bf16.mxu1 %vm769_vm0, %v8229_v35 }
 0x143   : > { %7705 = vmatpush3.bf16.xpose.msra.mxu0 %v3111_v36 }
 0x144   : > { %7721 = vmatpush3.bf16.xpose.msra.mxu1 %v3240_v38  ;;  %7999 = vmatprep.subr.msk.bf16.mxu0 %vm769_vm0, %v8226_v37 }
 0x145   : > { %v7486_v40 = vpop.f32.mrb[16].mxu0  ;;  %8003 = vmatprep.subr.msk.bf16.mxu1 %vm769_vm0, %v8227_v39 }
 0x146   : > { %v6934_v41 = vpack.c.bf16 %v7486_v40, %v7486_v40  ;;  %v7502_v42 = vpop.f32.mrb[16].mxu1  ;;  %v1344_v43 = vpop.f32.mrb[17].mxu0 }
 0x147   : > { %v6942_v44 = vpack.c.bf16 %v7502_v42, %v7502_v42  ;;  %v6932_v45 = vpack.c.bf16 %v1344_v43, %v1344_v43  ;;  %v1473_v46 = vpop.f32.mrb[17].mxu1  ;;  %v7487_v47 = vpop.f32.mrb[18].mxu0 }
 0x148   : > { %5917 = vst.msk [vmem:[%s8712_s23 + $0x88] sm:$0xf] %vm5882_vm1, %v6934_v41  ;;  %v6940_v48 = vpack.c.bf16 %v1473_v46, %v1473_v46  ;;  %v6935_v49 = vpack.c.bf16 %v7487_v47, %v7487_v47  ;;  %v7503_v50 = vpop.f32.mrb[18].mxu1  ;;  %v1347_v51 = vpop.f32.mrb[19].mxu0 }
 0x149   : > { %5925 = vst.msk [vmem:[%s8712_s23 + $0xa8] sm:$0xf] %vm5882_vm1, %v6942_v44  ;;  %5915 = vst.msk [vmem:[%s8712_s23 + $0x80] sm:$0xf] %vm5882_vm1, %v6932_v45  ;;  %v6943_v54 = vpack.c.bf16 %v7503_v50, %v7503_v50  ;;  %v6933_v55 = vpack.c.bf16 %v1347_v51, %v1347_v51  ;;  %v1476_v56 = vpop.f32.mrb[19].mxu1  ;;  %v3372_v44 = vsel %vm769_vm0, %v8242_v29, 0 }
 0x14a   : > { %5923 = vst.msk [vmem:[%s8712_s23 + $0xa0] sm:$0xf] %vm5882_vm1, %v6940_v48  ;;  %5918 = vst.msk [vmem:[%s8712_s23 + $0x8c] sm:$0xf] %vm5882_vm1, %v6935_v49  ;;  %v6941_v59 = vpack.c.bf16 %v1476_v56, %v1476_v56  ;;  %v8248_v45 = vld [vmem:[%s8395_s17 + $0x2c0] sm:$0xff]   ;;  %v3501_v49 = vsel %vm769_vm0, %v8243_v31, 0 }
 0x14b   : > { %5926 = vst.msk [vmem:[%s8712_s23 + $0xac] sm:$0xf] %vm5882_vm1, %v6943_v54  ;;  %5916 = vst.msk [vmem:[%s8712_s23 + $0x84] sm:$0xf] %vm5882_vm1, %v6933_v55  ;;  %7707 = vmatpush3.bf16.xpose.msra.mxu0 %v3114_v52  ;;  %v8249_v50 = vld [vmem:[%s8395_s17 + $0x2e0] sm:$0xff]  }
 0x14c   : > { %5924 = vst.msk [vmem:[%s8712_s23 + $0xa4] sm:$0xf] %vm5882_vm1, %v6941_v59  ;;  %7723 = vmatpush3.bf16.xpose.msra.mxu1 %v3243_v57  ;;  %8004 = vmatprep.subr.msk.bf16.mxu0 %vm769_vm0, %v8232_v53  ;;  %v8246_v53 = vld [vmem:[%s8411_s20 + $0x288] sm:$0xff]  }
 0x14d   : > { %8008 = vmatprep.subr.msk.bf16.mxu1 %vm769_vm0, %v8233_v58  ;;  %v7490_v60 = vpop.f32.mrb[20].mxu0  ;;  %v8247_v57 = vld [vmem:[%s8411_s20 + $0x2a8] sm:$0xff]  }
 0x14e   : > { %v6938_v62 = vpack.c.bf16 %v7490_v60, %v7490_v60  ;;  %v7506_v63 = vpop.f32.mrb[20].mxu1  ;;  %v1360_v0 = vpop.f32.mrb[21].mxu0 }
 0x14f   : > { %v6946_v2 = vpack.c.bf16 %v7506_v63, %v7506_v63  ;;  %v6936_v3 = vpack.c.bf16 %v1360_v0, %v1360_v0  ;;  %v1489_v4 = vpop.f32.mrb[21].mxu1  ;;  %v7491_v5 = vpop.f32.mrb[22].mxu0  ;;  %v8250_v63 = vld [vmem:[%s8395_s17 + $0x2c8] sm:$0xff]  }
 0x150   : > { %5921 = vst.msk [vmem:[%s8712_s23 + $0x98] sm:$0xf] %vm5882_vm1, %v6938_v62  ;;  %v6944_v8 = vpack.c.bf16 %v1489_v4, %v1489_v4  ;;  %v6939_v9 = vpack.c.bf16 %v7491_v5, %v7491_v5  ;;  %v7507_v10 = vpop.f32.mrb[22].mxu1  ;;  %v1363_v11 = vpop.f32.mrb[23].mxu0  ;;  %v3621_v62 = vsel %vm769_vm0, %v8248_v45, 0  ;;  %v3750_v4 = vsel %vm769_vm0, %v8249_v50, 0 }
 0x151   : > { %5929 = vst.msk [vmem:[%s8712_s23 + $0xb8] sm:$0xf] %vm5882_vm1, %v6946_v2  ;;  %5919 = vst.msk [vmem:[%s8712_s23 + $0x90] sm:$0xf] %vm5882_vm1, %v6936_v3  ;;  %v6947_v14 = vpack.c.bf16 %v7507_v10, %v7507_v10  ;;  %v6937_v15 = vpack.c.bf16 %v1363_v11, %v1363_v11  ;;  %v1492_v16 = vpop.f32.mrb[23].mxu1  ;;  %v8251_v5 = vld [vmem:[%s8395_s17 + $0x2e8] sm:$0xff]  }
 0x152   : > { %7709 = vmatmul.mubr.msk.bf16.vlgmr.msra.gmra.mrb[72].mxu0 %vm769_vm0, %v8230_v61  ;;  %5927 = vst.msk [vmem:[%s8712_s23 + $0xb0] sm:$0xf] %vm5882_vm1, %v6944_v8  ;;  %5922 = vst.msk [vmem:[%s8712_s23 + $0x9c] sm:$0xf] %vm5882_vm1, %v6939_v9  ;;  %v6945_v18 = vpack.c.bf16 %v1492_v16, %v1492_v16  ;;  %v8254_v9 = vld [vmem:[%s8411_s20 + $0x290] sm:$0xff]   ;;  %v3753_v16 = vsel %vm769_vm0, %v8251_v5, 0 }
 0x153   : > { %7725 = vmatmul.mubr.msk.bf16.vlgmr.msra.gmra.mrb[72].mxu1 %vm769_vm0, %v8231_v1  ;;  %7733 = vmatpush3.bf16.xpose.msra.mxu0 %v3363_v6  ;;  %5930 = vst.msk [vmem:[%s8712_s23 + $0xbc] sm:$0xf] %vm5882_vm1, %v6947_v14  ;;  %5920 = vst.msk [vmem:[%s8712_s23 + $0x94] sm:$0xf] %vm5882_vm1, %v6937_v15  ;;  %v8255_v11 = vld [vmem:[%s8411_s20 + $0x2b0] sm:$0xff]   ;;  %v3624_v14 = vsel %vm769_vm0, %v8250_v63, 0 }
 0x154   : > { %7749 = vmatpush3.bf16.xpose.msra.mxu1 %v3492_v12  ;;  %8005 = vmatprep.subr.msk.bf16.mxu0 %vm769_vm0, %v8234_v7  ;;  %5928 = vst.msk [vmem:[%s8712_s23 + $0xb4] sm:$0xf] %vm5882_vm1, %v6945_v18  ;;  %v8256_v12 = vld [vmem:[%s8411_s20 + $0x298] sm:$0xff]   ;;  %v8252_v15 = vld [vmem:[%s8395_s17 + $0x2d0] sm:$0xff]   ;;  %v8260_v18 = vld [vmem:[%s8411_s20 + $0x2c0] sm:$0xff]  }
 0x155   : > { %8009 = vmatprep.subr.msk.bf16.mxu1 %vm769_vm0, %v8235_v13  ;;  %7712 = vmatprep.mubr.msk.bf16.mxu0 %vm769_vm0, %v8238_v17  ;;  %v8257_v13 = vld [vmem:[%s8411_s20 + $0x2b8] sm:$0xff]   ;;  %v8253_v17 = vld [vmem:[%s8395_s17 + $0x2f0] sm:$0xff]  }
 0x156   : > { %7728 = vmatprep.mubr.msk.bf16.mxu1 %vm769_vm0, %v8239_v19  ;;  %v8261_v19 = vld [vmem:[%s8411_s20 + $0x2e0] sm:$0xff]  }
 0x15a   : > { %7713 = vmatmul.mubr.msk.bf16.gmra.mrb[76].mxu0 %vm769_vm0, %v8240_v20  ;;  %v3627_v20 = vsel %vm769_vm0, %v8252_v15, 0 }
 0x15b   : > { %7735 = vmatpush3.bf16.xpose.msra.mxu0 %v3366_v22  ;;  %7729 = vmatmul.mubr.msk.bf16.gmra.mrb[76].mxu1 %vm769_vm0, %v8241_v21  ;;  %v8258_v21 = vld [vmem:[%s8395_s17 + $0x2d8] sm:$0xff]   ;;  %v3756_v22 = vsel %vm769_vm0, %v8253_v17, 0 }
 0x15c   : > { %7751 = vmatpush3.bf16.xpose.msra.mxu1 %v3495_v24  ;;  %8006 = vmatprep.subr.msk.bf16.mxu0 %vm769_vm0, %v8236_v23  ;;  %v8259_v23 = vld [vmem:[%s8395_s17 + $0x2f8] sm:$0xff]  }
 0x15d   : > { %8010 = vmatprep.subr.msk.bf16.mxu1 %vm769_vm0, %v8237_v25  ;;  %7740 = vmatprep.mubr.msk.bf16.mxu0 %vm769_vm0, %v8244_v26 }
 0x15e   : > { %7756 = vmatprep.mubr.msk.bf16.mxu1 %vm769_vm0, %v8245_v27 }
 0x163   : > { %7737 = vmatpush3.bf16.xpose.msra.mxu0 %v3369_v28 }
 0x164   : > { %7753 = vmatpush3.bf16.xpose.msra.mxu1 %v3498_v30  ;;  %8007 = vmatprep.subr.msk.bf16.mxu0 %vm769_vm0, %v8242_v29 }
 0x165   : > { %v7518_v32 = vpop.f32.mrb[24].mxu0  ;;  %8011 = vmatprep.subr.msk.bf16.mxu1 %vm769_vm0, %v8243_v31 }
 0x166   : > { %v6950_v33 = vpack.c.bf16 %v7518_v32, %v7518_v32  ;;  %v7534_v34 = vpop.f32.mrb[24].mxu1  ;;  %v1602_v35 = vpop.f32.mrb[25].mxu0 }
 0x167   : > { %v6958_v36 = vpack.c.bf16 %v7534_v34, %v7534_v34  ;;  %v6948_v37 = vpack.c.bf16 %v1602_v35, %v1602_v35  ;;  %v1731_v38 = vpop.f32.mrb[25].mxu1  ;;  %v7519_v39 = vpop.f32.mrb[26].mxu0 }
 0x168   : > { %5933 = vst.msk [vmem:[%s8712_s23 + $0xc8] sm:$0xf] %vm5882_vm1, %v6950_v33  ;;  %v6956_v40 = vpack.c.bf16 %v1731_v38, %v1731_v38  ;;  %v6951_v41 = vpack.c.bf16 %v7519_v39, %v7519_v39  ;;  %v7535_v42 = vpop.f32.mrb[26].mxu1  ;;  %v1605_v43 = vpop.f32.mrb[27].mxu0 }
 0x169   : > { %5941 = vst.msk [vmem:[%s8712_s23 + $0xe8] sm:$0xf] %vm5882_vm1, %v6958_v36  ;;  %5931 = vst.msk [vmem:[%s8712_s23 + $0xc0] sm:$0xf] %vm5882_vm1, %v6948_v37  ;;  %v6959_v46 = vpack.c.bf16 %v7535_v42, %v7535_v42  ;;  %v6949_v47 = vpack.c.bf16 %v1605_v43, %v1605_v43  ;;  %v1734_v48 = vpop.f32.mrb[27].mxu1  ;;  %v3630_v36 = vsel %vm769_vm0, %v8258_v21, 0 }
 0x16a   : > { %5939 = vst.msk [vmem:[%s8712_s23 + $0xe0] sm:$0xf] %vm5882_vm1, %v6956_v40  ;;  %5934 = vst.msk [vmem:[%s8712_s23 + $0xcc] sm:$0xf] %vm5882_vm1, %v6951_v41  ;;  %v6957_v51 = vpack.c.bf16 %v1734_v48, %v1734_v48  ;;  %v8264_v37 = vld [vmem:[%s8395_s17 + $0x300] sm:$0xff]   ;;  %v3759_v41 = vsel %vm769_vm0, %v8259_v23, 0 }
 0x16b   : > { %5942 = vst.msk [vmem:[%s8712_s23 + $0xec] sm:$0xf] %vm5882_vm1, %v6959_v46  ;;  %5932 = vst.msk [vmem:[%s8712_s23 + $0xc4] sm:$0xf] %vm5882_vm1, %v6949_v47  ;;  %7739 = vmatpush3.bf16.xpose.msra.mxu0 %v3372_v44  ;;  %v8265_v42 = vld [vmem:[%s8395_s17 + $0x320] sm:$0xff]  }
 0x16c   : > { %5940 = vst.msk [vmem:[%s8712_s23 + $0xe4] sm:$0xf] %vm5882_vm1, %v6957_v51  ;;  %7755 = vmatpush3.bf16.xpose.msra.mxu1 %v3501_v49  ;;  %8012 = vmatprep.subr.msk.bf16.mxu0 %vm769_vm0, %v8248_v45  ;;  %v8262_v45 = vld [vmem:[%s8411_s20 + $0x2c8] sm:$0xff]  }
 0x16d   : > { %8016 = vmatprep.subr.msk.bf16.mxu1 %vm769_vm0, %v8249_v50  ;;  %v7522_v52 = vpop.f32.mrb[28].mxu0  ;;  %v8263_v49 = vld [vmem:[%s8411_s20 + $0x2e8] sm:$0xff]  }
 0x16e   : > { %v6954_v54 = vpack.c.bf16 %v7522_v52, %v7522_v52  ;;  %v7538_v55 = vpop.f32.mrb[28].mxu1  ;;  %v1618_v56 = vpop.f32.mrb[29].mxu0 }
 0x16f   : > { %v6962_v58 = vpack.c.bf16 %v7538_v55, %v7538_v55  ;;  %v6952_v59 = vpack.c.bf16 %v1618_v56, %v1618_v56  ;;  %v1747_v60 = vpop.f32.mrb[29].mxu1  ;;  %v7523_v61 = vpop.f32.mrb[30].mxu0  ;;  %v8266_v55 = vld [vmem:[%s8395_s17 + $0x308] sm:$0xff]  }
 0x170   : > { %5937 = vst.msk [vmem:[%s8712_s23 + $0xd8] sm:$0xf] %vm5882_vm1, %v6954_v54  ;;  %v6960_v0 = vpack.c.bf16 %v1747_v60, %v1747_v60  ;;  %v6955_v1 = vpack.c.bf16 %v7523_v61, %v7523_v61  ;;  %v7539_v2 = vpop.f32.mrb[30].mxu1  ;;  %v1621_v3 = vpop.f32.mrb[31].mxu0  ;;  %v3879_v54 = vsel %vm769_vm0, %v8264_v37, 0  ;;  %v4008_v60 = vsel %vm769_vm0, %v8265_v42, 0 }
 0x171   : > { %5945 = vst.msk [vmem:[%s8712_s23 + $0xf8] sm:$0xf] %vm5882_vm1, %v6962_v58  ;;  %5935 = vst.msk [vmem:[%s8712_s23 + $0xd0] sm:$0xf] %vm5882_vm1, %v6952_v59  ;;  %v6963_v6 = vpack.c.bf16 %v7539_v2, %v7539_v2  ;;  %v6953_v7 = vpack.c.bf16 %v1621_v3, %v1621_v3  ;;  %v1750_v8 = vpop.f32.mrb[31].mxu1  ;;  %v8267_v61 = vld [vmem:[%s8395_s17 + $0x328] sm:$0xff]  }
 0x172   : > { %7741 = vmatmul.mubr.msk.bf16.vlgmr.msra.gmra.mrb[80].mxu0 %vm769_vm0, %v8246_v53  ;;  %5943 = vst.msk [vmem:[%s8712_s23 + $0xf0] sm:$0xf] %vm5882_vm1, %v6960_v0  ;;  %5938 = vst.msk [vmem:[%s8712_s23 + $0xdc] sm:$0xf] %vm5882_vm1, %v6955_v1  ;;  %v6961_v10 = vpack.c.bf16 %v1750_v8, %v1750_v8  ;;  %v8270_v1 = vld [vmem:[%s8411_s20 + $0x2d0] sm:$0xff]   ;;  %v4011_v8 = vsel %vm769_vm0, %v8267_v61, 0 }
 0x173   : > { %7757 = vmatmul.mubr.msk.bf16.vlgmr.msra.gmra.mrb[80].mxu1 %vm769_vm0, %v8247_v57  ;;  %7765 = vmatpush3.bf16.xpose.msra.mxu0 %v3621_v62  ;;  %5946 = vst.msk [vmem:[%s8712_s23 + $0xfc] sm:$0xf] %vm5882_vm1, %v6963_v6  ;;  %5936 = vst.msk [vmem:[%s8712_s23 + $0xd4] sm:$0xf] %vm5882_vm1, %v6953_v7  ;;  %v8271_v3 = vld [vmem:[%s8411_s20 + $0x2f0] sm:$0xff]   ;;  %v3882_v6 = vsel %vm769_vm0, %v8266_v55, 0 }
 0x174   : > { %7781 = vmatpush3.bf16.xpose.msra.mxu1 %v3750_v4  ;;  %8013 = vmatprep.subr.msk.bf16.mxu0 %vm769_vm0, %v8250_v63  ;;  %5944 = vst.msk [vmem:[%s8712_s23 + $0xf4] sm:$0xf] %vm5882_vm1, %v6961_v10  ;;  %v8272_v4 = vld [vmem:[%s8411_s20 + $0x2d8] sm:$0xff]   ;;  %v8268_v7 = vld [vmem:[%s8395_s17 + $0x310] sm:$0xff]   ;;  %v8276_v10 = vld [vmem:[%s8411_s20 + $0x300] sm:$0xff]  }
 0x175   : > { %8017 = vmatprep.subr.msk.bf16.mxu1 %vm769_vm0, %v8251_v5  ;;  %7744 = vmatprep.mubr.msk.bf16.mxu0 %vm769_vm0, %v8254_v9  ;;  %v8273_v5 = vld [vmem:[%s8411_s20 + $0x2f8] sm:$0xff]   ;;  %v8269_v9 = vld [vmem:[%s8395_s17 + $0x330] sm:$0xff]  }
 0x176   : > { %7760 = vmatprep.mubr.msk.bf16.mxu1 %vm769_vm0, %v8255_v11  ;;  %v8277_v11 = vld [vmem:[%s8411_s20 + $0x320] sm:$0xff]  }
 0x17a   : > { %7745 = vmatmul.mubr.msk.bf16.gmra.mrb[84].mxu0 %vm769_vm0, %v8256_v12  ;;  %v3885_v12 = vsel %vm769_vm0, %v8268_v7, 0 }
 0x17b   : > { %7767 = vmatpush3.bf16.xpose.msra.mxu0 %v3624_v14  ;;  %7761 = vmatmul.mubr.msk.bf16.gmra.mrb[84].mxu1 %vm769_vm0, %v8257_v13  ;;  %v8274_v13 = vld [vmem:[%s8395_s17 + $0x318] sm:$0xff]   ;;  %v4014_v14 = vsel %vm769_vm0, %v8269_v9, 0 }
 0x17c   : > { %7783 = vmatpush3.bf16.xpose.msra.mxu1 %v3753_v16  ;;  %8014 = vmatprep.subr.msk.bf16.mxu0 %vm769_vm0, %v8252_v15  ;;  %v8275_v15 = vld [vmem:[%s8395_s17 + $0x338] sm:$0xff]  }
 0x17d   : > { %8018 = vmatprep.subr.msk.bf16.mxu1 %vm769_vm0, %v8253_v17  ;;  %7772 = vmatprep.mubr.msk.bf16.mxu0 %vm769_vm0, %v8260_v18 }
 0x17e   : > { %7788 = vmatprep.mubr.msk.bf16.mxu1 %vm769_vm0, %v8261_v19 }
 0x183   : > { %7769 = vmatpush3.bf16.xpose.msra.mxu0 %v3627_v20 }
 0x184   : > { %7785 = vmatpush3.bf16.xpose.msra.mxu1 %v3756_v22  ;;  %8015 = vmatprep.subr.msk.bf16.mxu0 %vm769_vm0, %v8258_v21 }
 0x185   : > { %v7550_v24 = vpop.f32.mrb[32].mxu0  ;;  %8019 = vmatprep.subr.msk.bf16.mxu1 %vm769_vm0, %v8259_v23 }
 0x186   : > { %v6966_v25 = vpack.c.bf16 %v7550_v24, %v7550_v24  ;;  %v7566_v26 = vpop.f32.mrb[32].mxu1  ;;  %v1860_v27 = vpop.f32.mrb[33].mxu0 }
 0x187   : > { %v6974_v28 = vpack.c.bf16 %v7566_v26, %v7566_v26  ;;  %v6964_v29 = vpack.c.bf16 %v1860_v27, %v1860_v27  ;;  %v1989_v30 = vpop.f32.mrb[33].mxu1  ;;  %v7551_v31 = vpop.f32.mrb[34].mxu0 }
 0x188   : > { %5949 = vst.msk [vmem:[%s8712_s23 + $0x108] sm:$0xf] %vm5882_vm1, %v6966_v25  ;;  %v6972_v32 = vpack.c.bf16 %v1989_v30, %v1989_v30  ;;  %v6967_v33 = vpack.c.bf16 %v7551_v31, %v7551_v31  ;;  %v7567_v34 = vpop.f32.mrb[34].mxu1  ;;  %v1863_v35 = vpop.f32.mrb[35].mxu0 }
 0x189   : > { %5957 = vst.msk [vmem:[%s8712_s23 + $0x128] sm:$0xf] %vm5882_vm1, %v6974_v28  ;;  %5947 = vst.msk [vmem:[%s8712_s23 + $0x100] sm:$0xf] %vm5882_vm1, %v6964_v29  ;;  %v6975_v38 = vpack.c.bf16 %v7567_v34, %v7567_v34  ;;  %v6965_v39 = vpack.c.bf16 %v1863_v35, %v1863_v35  ;;  %v1992_v40 = vpop.f32.mrb[35].mxu1  ;;  %v3888_v28 = vsel %vm769_vm0, %v8274_v13, 0 }
 0x18a   : > { %5955 = vst.msk [vmem:[%s8712_s23 + $0x120] sm:$0xf] %vm5882_vm1, %v6972_v32  ;;  %5950 = vst.msk [vmem:[%s8712_s23 + $0x10c] sm:$0xf] %vm5882_vm1, %v6967_v33  ;;  %v6973_v43 = vpack.c.bf16 %v1992_v40, %v1992_v40  ;;  %v8280_v29 = vld [vmem:[%s8395_s17 + $0x340] sm:$0xff]   ;;  %v4017_v33 = vsel %vm769_vm0, %v8275_v15, 0 }
 0x18b   : > { %5958 = vst.msk [vmem:[%s8712_s23 + $0x12c] sm:$0xf] %vm5882_vm1, %v6975_v38  ;;  %5948 = vst.msk [vmem:[%s8712_s23 + $0x104] sm:$0xf] %vm5882_vm1, %v6965_v39  ;;  %7771 = vmatpush3.bf16.xpose.msra.mxu0 %v3630_v36  ;;  %v8281_v34 = vld [vmem:[%s8395_s17 + $0x360] sm:$0xff]  }
 0x18c   : > { %5956 = vst.msk [vmem:[%s8712_s23 + $0x124] sm:$0xf] %vm5882_vm1, %v6973_v43  ;;  %7787 = vmatpush3.bf16.xpose.msra.mxu1 %v3759_v41  ;;  %8020 = vmatprep.subr.msk.bf16.mxu0 %vm769_vm0, %v8264_v37  ;;  %v8278_v37 = vld [vmem:[%s8411_s20 + $0x308] sm:$0xff]  }
 0x18d   : > { %8024 = vmatprep.subr.msk.bf16.mxu1 %vm769_vm0, %v8265_v42  ;;  %v7554_v44 = vpop.f32.mrb[36].mxu0  ;;  %v8279_v41 = vld [vmem:[%s8411_s20 + $0x328] sm:$0xff]  }
 0x18e   : > { %v6970_v46 = vpack.c.bf16 %v7554_v44, %v7554_v44  ;;  %v7570_v47 = vpop.f32.mrb[36].mxu1  ;;  %v1876_v48 = vpop.f32.mrb[37].mxu0 }
 0x18f   : > { %v6978_v50 = vpack.c.bf16 %v7570_v47, %v7570_v47  ;;  %v6968_v51 = vpack.c.bf16 %v1876_v48, %v1876_v48  ;;  %v2005_v52 = vpop.f32.mrb[37].mxu1  ;;  %v7555_v53 = vpop.f32.mrb[38].mxu0  ;;  %v8282_v47 = vld [vmem:[%s8395_s17 + $0x348] sm:$0xff]  }
 0x190   : > { %5953 = vst.msk [vmem:[%s8712_s23 + $0x118] sm:$0xf] %vm5882_vm1, %v6970_v46  ;;  %v6976_v56 = vpack.c.bf16 %v2005_v52, %v2005_v52  ;;  %v6971_v57 = vpack.c.bf16 %v7555_v53, %v7555_v53  ;;  %v7571_v58 = vpop.f32.mrb[38].mxu1  ;;  %v1879_v59 = vpop.f32.mrb[39].mxu0  ;;  %v4137_v46 = vsel %vm769_vm0, %v8280_v29, 0  ;;  %v4266_v52 = vsel %vm769_vm0, %v8281_v34, 0 }
 0x191   : > { %5961 = vst.msk [vmem:[%s8712_s23 + $0x138] sm:$0xf] %vm5882_vm1, %v6978_v50  ;;  %5951 = vst.msk [vmem:[%s8712_s23 + $0x110] sm:$0xf] %vm5882_vm1, %v6968_v51  ;;  %v6979_v62 = vpack.c.bf16 %v7571_v58, %v7571_v58  ;;  %v6969_v63 = vpack.c.bf16 %v1879_v59, %v1879_v59  ;;  %v2008_v0 = vpop.f32.mrb[39].mxu1  ;;  %v8283_v53 = vld [vmem:[%s8395_s17 + $0x368] sm:$0xff]  }
 0x192   : > { %7773 = vmatmul.mubr.msk.bf16.vlgmr.msra.gmra.mrb[88].mxu0 %vm769_vm0, %v8262_v45  ;;  %5959 = vst.msk [vmem:[%s8712_s23 + $0x130] sm:$0xf] %vm5882_vm1, %v6976_v56  ;;  %5954 = vst.msk [vmem:[%s8712_s23 + $0x11c] sm:$0xf] %vm5882_vm1, %v6971_v57  ;;  %v6977_v2 = vpack.c.bf16 %v2008_v0, %v2008_v0  ;;  %v8286_v57 = vld [vmem:[%s8411_s20 + $0x310] sm:$0xff]   ;;  %v4269_v0 = vsel %vm769_vm0, %v8283_v53, 0 }
 0x193   : > { %7789 = vmatmul.mubr.msk.bf16.vlgmr.msra.gmra.mrb[88].mxu1 %vm769_vm0, %v8263_v49  ;;  %7797 = vmatpush3.bf16.xpose.msra.mxu0 %v3879_v54  ;;  %5962 = vst.msk [vmem:[%s8712_s23 + $0x13c] sm:$0xf] %vm5882_vm1, %v6979_v62  ;;  %5952 = vst.msk [vmem:[%s8712_s23 + $0x114] sm:$0xf] %vm5882_vm1, %v6969_v63  ;;  %v8287_v59 = vld [vmem:[%s8411_s20 + $0x330] sm:$0xff]   ;;  %v4140_v62 = vsel %vm769_vm0, %v8282_v47, 0 }
 0x194   : > { %7813 = vmatpush3.bf16.xpose.msra.mxu1 %v4008_v60  ;;  %8021 = vmatprep.subr.msk.bf16.mxu0 %vm769_vm0, %v8266_v55  ;;  %5960 = vst.msk [vmem:[%s8712_s23 + $0x134] sm:$0xf] %vm5882_vm1, %v6977_v2  ;;  %v8288_v60 = vld [vmem:[%s8411_s20 + $0x318] sm:$0xff]   ;;  %v8284_v63 = vld [vmem:[%s8395_s17 + $0x350] sm:$0xff]   ;;  %v8292_v2 = vld [vmem:[%s8411_s20 + $0x340] sm:$0xff]  }
 0x195   : > { %8025 = vmatprep.subr.msk.bf16.mxu1 %vm769_vm0, %v8267_v61  ;;  %7776 = vmatprep.mubr.msk.bf16.mxu0 %vm769_vm0, %v8270_v1  ;;  %v8289_v61 = vld [vmem:[%s8411_s20 + $0x338] sm:$0xff]   ;;  %v8285_v1 = vld [vmem:[%s8395_s17 + $0x370] sm:$0xff]  }
 0x196   : > { %7792 = vmatprep.mubr.msk.bf16.mxu1 %vm769_vm0, %v8271_v3  ;;  %v8293_v3 = vld [vmem:[%s8411_s20 + $0x360] sm:$0xff]  }
 0x19a   : > { %7777 = vmatmul.mubr.msk.bf16.gmra.mrb[92].mxu0 %vm769_vm0, %v8272_v4  ;;  %v4143_v4 = vsel %vm769_vm0, %v8284_v63, 0 }
 0x19b   : > { %7799 = vmatpush3.bf16.xpose.msra.mxu0 %v3882_v6  ;;  %7793 = vmatmul.mubr.msk.bf16.gmra.mrb[92].mxu1 %vm769_vm0, %v8273_v5  ;;  %v8290_v5 = vld [vmem:[%s8395_s17 + $0x358] sm:$0xff]   ;;  %v4272_v6 = vsel %vm769_vm0, %v8285_v1, 0 }
 0x19c   : > { %7815 = vmatpush3.bf16.xpose.msra.mxu1 %v4011_v8  ;;  %8022 = vmatprep.subr.msk.bf16.mxu0 %vm769_vm0, %v8268_v7  ;;  %v8291_v7 = vld [vmem:[%s8395_s17 + $0x378] sm:$0xff]  }
 0x19d   : > { %8026 = vmatprep.subr.msk.bf16.mxu1 %vm769_vm0, %v8269_v9  ;;  %7804 = vmatprep.mubr.msk.bf16.mxu0 %vm769_vm0, %v8276_v10 }
 0x19e   : > { %7820 = vmatprep.mubr.msk.bf16.mxu1 %vm769_vm0, %v8277_v11 }
 0x1a3   : > { %7801 = vmatpush3.bf16.xpose.msra.mxu0 %v3885_v12 }
 0x1a4   : > { %7817 = vmatpush3.bf16.xpose.msra.mxu1 %v4014_v14  ;;  %8023 = vmatprep.subr.msk.bf16.mxu0 %vm769_vm0, %v8274_v13 }
 0x1a5   : > { %v7582_v16 = vpop.f32.mrb[40].mxu0  ;;  %8027 = vmatprep.subr.msk.bf16.mxu1 %vm769_vm0, %v8275_v15 }
 0x1a6   : > { %v6982_v17 = vpack.c.bf16 %v7582_v16, %v7582_v16  ;;  %v7598_v18 = vpop.f32.mrb[40].mxu1  ;;  %v2118_v19 = vpop.f32.mrb[41].mxu0 }
 0x1a7   : > { %v6990_v20 = vpack.c.bf16 %v7598_v18, %v7598_v18  ;;  %v6980_v21 = vpack.c.bf16 %v2118_v19, %v2118_v19  ;;  %v2247_v22 = vpop.f32.mrb[41].mxu1  ;;  %v7583_v23 = vpop.f32.mrb[42].mxu0 }
 0x1a8   : > { %5965 = vst.msk [vmem:[%s8712_s23 + $0x148] sm:$0xf] %vm5882_vm1, %v6982_v17  ;;  %v6988_v24 = vpack.c.bf16 %v2247_v22, %v2247_v22  ;;  %v6983_v25 = vpack.c.bf16 %v7583_v23, %v7583_v23  ;;  %v7599_v26 = vpop.f32.mrb[42].mxu1  ;;  %v2121_v27 = vpop.f32.mrb[43].mxu0 }
 0x1a9   : > { %5973 = vst.msk [vmem:[%s8712_s23 + $0x168] sm:$0xf] %vm5882_vm1, %v6990_v20  ;;  %5963 = vst.msk [vmem:[%s8712_s23 + $0x140] sm:$0xf] %vm5882_vm1, %v6980_v21  ;;  %v6991_v30 = vpack.c.bf16 %v7599_v26, %v7599_v26  ;;  %v6981_v31 = vpack.c.bf16 %v2121_v27, %v2121_v27  ;;  %v2250_v32 = vpop.f32.mrb[43].mxu1  ;;  %v4146_v20 = vsel %vm769_vm0, %v8290_v5, 0 }
 0x1aa   : > { %5971 = vst.msk [vmem:[%s8712_s23 + $0x160] sm:$0xf] %vm5882_vm1, %v6988_v24  ;;  %5966 = vst.msk [vmem:[%s8712_s23 + $0x14c] sm:$0xf] %vm5882_vm1, %v6983_v25  ;;  %v6989_v35 = vpack.c.bf16 %v2250_v32, %v2250_v32  ;;  %v8296_v21 = vld [vmem:[%s8395_s17 + $0x380] sm:$0xff]   ;;  %v4275_v25 = vsel %vm769_vm0, %v8291_v7, 0 }
 0x1ab   : > { %5974 = vst.msk [vmem:[%s8712_s23 + $0x16c] sm:$0xf] %vm5882_vm1, %v6991_v30  ;;  %5964 = vst.msk [vmem:[%s8712_s23 + $0x144] sm:$0xf] %vm5882_vm1, %v6981_v31  ;;  %7803 = vmatpush3.bf16.xpose.msra.mxu0 %v3888_v28  ;;  %v8297_v26 = vld [vmem:[%s8395_s17 + $0x3a0] sm:$0xff]  }
 0x1ac   : > { %5972 = vst.msk [vmem:[%s8712_s23 + $0x164] sm:$0xf] %vm5882_vm1, %v6989_v35  ;;  %7819 = vmatpush3.bf16.xpose.msra.mxu1 %v4017_v33  ;;  %8028 = vmatprep.subr.msk.bf16.mxu0 %vm769_vm0, %v8280_v29  ;;  %v8294_v29 = vld [vmem:[%s8411_s20 + $0x348] sm:$0xff]  }
 0x1ad   : > { %8032 = vmatprep.subr.msk.bf16.mxu1 %vm769_vm0, %v8281_v34  ;;  %v7586_v36 = vpop.f32.mrb[44].mxu0  ;;  %v8295_v33 = vld [vmem:[%s8411_s20 + $0x368] sm:$0xff]  }
 0x1ae   : > { %v6986_v38 = vpack.c.bf16 %v7586_v36, %v7586_v36  ;;  %v7602_v39 = vpop.f32.mrb[44].mxu1  ;;  %v2134_v40 = vpop.f32.mrb[45].mxu0 }
 0x1af   : > { %v6994_v42 = vpack.c.bf16 %v7602_v39, %v7602_v39  ;;  %v6984_v43 = vpack.c.bf16 %v2134_v40, %v2134_v40  ;;  %v2263_v44 = vpop.f32.mrb[45].mxu1  ;;  %v7587_v45 = vpop.f32.mrb[46].mxu0  ;;  %v8298_v39 = vld [vmem:[%s8395_s17 + $0x388] sm:$0xff]  }
 0x1b0   : > { %5969 = vst.msk [vmem:[%s8712_s23 + $0x158] sm:$0xf] %vm5882_vm1, %v6986_v38  ;;  %v6992_v48 = vpack.c.bf16 %v2263_v44, %v2263_v44  ;;  %v6987_v49 = vpack.c.bf16 %v7587_v45, %v7587_v45  ;;  %v7603_v50 = vpop.f32.mrb[46].mxu1  ;;  %v2137_v51 = vpop.f32.mrb[47].mxu0  ;;  %v4395_v38 = vsel %vm769_vm0, %v8296_v21, 0  ;;  %v4524_v44 = vsel %vm769_vm0, %v8297_v26, 0 }
 0x1b1   : > { %5977 = vst.msk [vmem:[%s8712_s23 + $0x178] sm:$0xf] %vm5882_vm1, %v6994_v42  ;;  %5967 = vst.msk [vmem:[%s8712_s23 + $0x150] sm:$0xf] %vm5882_vm1, %v6984_v43  ;;  %v6995_v54 = vpack.c.bf16 %v7603_v50, %v7603_v50  ;;  %v6985_v55 = vpack.c.bf16 %v2137_v51, %v2137_v51  ;;  %v2266_v56 = vpop.f32.mrb[47].mxu1  ;;  %v8299_v45 = vld [vmem:[%s8395_s17 + $0x3a8] sm:$0xff]  }
 0x1b2   : > { %7805 = vmatmul.mubr.msk.bf16.vlgmr.msra.gmra.mrb[96].mxu0 %vm769_vm0, %v8278_v37  ;;  %5975 = vst.msk [vmem:[%s8712_s23 + $0x170] sm:$0xf] %vm5882_vm1, %v6992_v48  ;;  %5970 = vst.msk [vmem:[%s8712_s23 + $0x15c] sm:$0xf] %vm5882_vm1, %v6987_v49  ;;  %v6993_v58 = vpack.c.bf16 %v2266_v56, %v2266_v56  ;;  %v8302_v49 = vld [vmem:[%s8411_s20 + $0x350] sm:$0xff]   ;;  %v4527_v56 = vsel %vm769_vm0, %v8299_v45, 0 }
 0x1b3   : > { %7821 = vmatmul.mubr.msk.bf16.vlgmr.msra.gmra.mrb[96].mxu1 %vm769_vm0, %v8279_v41  ;;  %7829 = vmatpush3.bf16.xpose.msra.mxu0 %v4137_v46  ;;  %5978 = vst.msk [vmem:[%s8712_s23 + $0x17c] sm:$0xf] %vm5882_vm1, %v6995_v54  ;;  %5968 = vst.msk [vmem:[%s8712_s23 + $0x154] sm:$0xf] %vm5882_vm1, %v6985_v55  ;;  %v8303_v51 = vld [vmem:[%s8411_s20 + $0x370] sm:$0xff]   ;;  %v4398_v54 = vsel %vm769_vm0, %v8298_v39, 0 }
 0x1b4   : > { %7845 = vmatpush3.bf16.xpose.msra.mxu1 %v4266_v52  ;;  %8029 = vmatprep.subr.msk.bf16.mxu0 %vm769_vm0, %v8282_v47  ;;  %5976 = vst.msk [vmem:[%s8712_s23 + $0x174] sm:$0xf] %vm5882_vm1, %v6993_v58  ;;  %v8304_v52 = vld [vmem:[%s8411_s20 + $0x358] sm:$0xff]   ;;  %v8300_v55 = vld [vmem:[%s8395_s17 + $0x390] sm:$0xff]   ;;  %v8308_v58 = vld [vmem:[%s8411_s20 + $0x380] sm:$0xff]  }
 0x1b5   : > { %8033 = vmatprep.subr.msk.bf16.mxu1 %vm769_vm0, %v8283_v53  ;;  %7808 = vmatprep.mubr.msk.bf16.mxu0 %vm769_vm0, %v8286_v57  ;;  %v8305_v53 = vld [vmem:[%s8411_s20 + $0x378] sm:$0xff]   ;;  %v8301_v57 = vld [vmem:[%s8395_s17 + $0x3b0] sm:$0xff]  }
 0x1b6   : > { %7824 = vmatprep.mubr.msk.bf16.mxu1 %vm769_vm0, %v8287_v59  ;;  %v8309_v59 = vld [vmem:[%s8411_s20 + $0x3a0] sm:$0xff]  }
 0x1ba   : > { %7809 = vmatmul.mubr.msk.bf16.gmra.mrb[100].mxu0 %vm769_vm0, %v8288_v60  ;;  %v4401_v60 = vsel %vm769_vm0, %v8300_v55, 0 }
 0x1bb   : > { %7831 = vmatpush3.bf16.xpose.msra.mxu0 %v4140_v62  ;;  %7825 = vmatmul.mubr.msk.bf16.gmra.mrb[100].mxu1 %vm769_vm0, %v8289_v61  ;;  %v8306_v61 = vld [vmem:[%s8395_s17 + $0x398] sm:$0xff]   ;;  %v4530_v62 = vsel %vm769_vm0, %v8301_v57, 0 }
 0x1bc   : > { %7847 = vmatpush3.bf16.xpose.msra.mxu1 %v4269_v0  ;;  %8030 = vmatprep.subr.msk.bf16.mxu0 %vm769_vm0, %v8284_v63  ;;  %v8307_v63 = vld [vmem:[%s8395_s17 + $0x3b8] sm:$0xff]  }
 0x1bd   : > { %8034 = vmatprep.subr.msk.bf16.mxu1 %vm769_vm0, %v8285_v1  ;;  %7836 = vmatprep.mubr.msk.bf16.mxu0 %vm769_vm0, %v8292_v2 }
 0x1be   : > { %7852 = vmatprep.mubr.msk.bf16.mxu1 %vm769_vm0, %v8293_v3 }
 0x1c3   : > { %7833 = vmatpush3.bf16.xpose.msra.mxu0 %v4143_v4 }
 0x1c4   : > { %7849 = vmatpush3.bf16.xpose.msra.mxu1 %v4272_v6  ;;  %8031 = vmatprep.subr.msk.bf16.mxu0 %vm769_vm0, %v8290_v5 }
 0x1c5   : > { %v7614_v8 = vpop.f32.mrb[48].mxu0  ;;  %8035 = vmatprep.subr.msk.bf16.mxu1 %vm769_vm0, %v8291_v7 }
 0x1c6   : > { %v6998_v9 = vpack.c.bf16 %v7614_v8, %v7614_v8  ;;  %v7630_v10 = vpop.f32.mrb[48].mxu1  ;;  %v2376_v11 = vpop.f32.mrb[49].mxu0 }
 0x1c7   : > { %v7006_v12 = vpack.c.bf16 %v7630_v10, %v7630_v10  ;;  %v6996_v13 = vpack.c.bf16 %v2376_v11, %v2376_v11  ;;  %v2505_v14 = vpop.f32.mrb[49].mxu1  ;;  %v7615_v15 = vpop.f32.mrb[50].mxu0 }
 0x1c8   : > { %5981 = vst.msk [vmem:[%s8712_s23 + $0x188] sm:$0xf] %vm5882_vm1, %v6998_v9  ;;  %v7004_v16 = vpack.c.bf16 %v2505_v14, %v2505_v14  ;;  %v6999_v17 = vpack.c.bf16 %v7615_v15, %v7615_v15  ;;  %v7631_v18 = vpop.f32.mrb[50].mxu1  ;;  %v2379_v19 = vpop.f32.mrb[51].mxu0 }
 0x1c9   : > { %5989 = vst.msk [vmem:[%s8712_s23 + $0x1a8] sm:$0xf] %vm5882_vm1, %v7006_v12  ;;  %5979 = vst.msk [vmem:[%s8712_s23 + $0x180] sm:$0xf] %vm5882_vm1, %v6996_v13  ;;  %v7007_v22 = vpack.c.bf16 %v7631_v18, %v7631_v18  ;;  %v6997_v23 = vpack.c.bf16 %v2379_v19, %v2379_v19  ;;  %v2508_v24 = vpop.f32.mrb[51].mxu1  ;;  %v4404_v12 = vsel %vm769_vm0, %v8306_v61, 0 }
 0x1ca   : > { %5987 = vst.msk [vmem:[%s8712_s23 + $0x1a0] sm:$0xf] %vm5882_vm1, %v7004_v16  ;;  %5982 = vst.msk [vmem:[%s8712_s23 + $0x18c] sm:$0xf] %vm5882_vm1, %v6999_v17  ;;  %v7005_v27 = vpack.c.bf16 %v2508_v24, %v2508_v24  ;;  %v8312_v13 = vld [vmem:[%s8395_s17 + $0x3c0] sm:$0xff]   ;;  %v4533_v17 = vsel %vm769_vm0, %v8307_v63, 0 }
 0x1cb   : > { %5990 = vst.msk [vmem:[%s8712_s23 + $0x1ac] sm:$0xf] %vm5882_vm1, %v7007_v22  ;;  %5980 = vst.msk [vmem:[%s8712_s23 + $0x184] sm:$0xf] %vm5882_vm1, %v6997_v23  ;;  %7835 = vmatpush3.bf16.xpose.msra.mxu0 %v4146_v20  ;;  %v8313_v18 = vld [vmem:[%s8395_s17 + $0x3e0] sm:$0xff]  }
 0x1cc   : > { %5988 = vst.msk [vmem:[%s8712_s23 + $0x1a4] sm:$0xf] %vm5882_vm1, %v7005_v27  ;;  %7851 = vmatpush3.bf16.xpose.msra.mxu1 %v4275_v25  ;;  %8036 = vmatprep.subr.msk.bf16.mxu0 %vm769_vm0, %v8296_v21  ;;  %v8310_v21 = vld [vmem:[%s8411_s20 + $0x388] sm:$0xff]  }
 0x1cd   : > { %8040 = vmatprep.subr.msk.bf16.mxu1 %vm769_vm0, %v8297_v26  ;;  %v7618_v28 = vpop.f32.mrb[52].mxu0  ;;  %v8311_v25 = vld [vmem:[%s8411_s20 + $0x3a8] sm:$0xff]  }
 0x1ce   : > { %v7002_v30 = vpack.c.bf16 %v7618_v28, %v7618_v28  ;;  %v7634_v31 = vpop.f32.mrb[52].mxu1  ;;  %v2392_v32 = vpop.f32.mrb[53].mxu0 }
 0x1cf   : > { %v7010_v34 = vpack.c.bf16 %v7634_v31, %v7634_v31  ;;  %v7000_v35 = vpack.c.bf16 %v2392_v32, %v2392_v32  ;;  %v2521_v36 = vpop.f32.mrb[53].mxu1  ;;  %v7619_v37 = vpop.f32.mrb[54].mxu0  ;;  %v8314_v31 = vld [vmem:[%s8395_s17 + $0x3c8] sm:$0xff]  }
 0x1d0   : > { %5985 = vst.msk [vmem:[%s8712_s23 + $0x198] sm:$0xf] %vm5882_vm1, %v7002_v30  ;;  %v7008_v40 = vpack.c.bf16 %v2521_v36, %v2521_v36  ;;  %v7003_v41 = vpack.c.bf16 %v7619_v37, %v7619_v37  ;;  %v7635_v42 = vpop.f32.mrb[54].mxu1  ;;  %v2395_v43 = vpop.f32.mrb[55].mxu0  ;;  %v4653_v30 = vsel %vm769_vm0, %v8312_v13, 0  ;;  %v4782_v36 = vsel %vm769_vm0, %v8313_v18, 0 }
 0x1d1   : > { %5993 = vst.msk [vmem:[%s8712_s23 + $0x1b8] sm:$0xf] %vm5882_vm1, %v7010_v34  ;;  %5983 = vst.msk [vmem:[%s8712_s23 + $0x190] sm:$0xf] %vm5882_vm1, %v7000_v35  ;;  %v7011_v46 = vpack.c.bf16 %v7635_v42, %v7635_v42  ;;  %v7001_v47 = vpack.c.bf16 %v2395_v43, %v2395_v43  ;;  %v2524_v48 = vpop.f32.mrb[55].mxu1  ;;  %v8315_v37 = vld [vmem:[%s8395_s17 + $0x3e8] sm:$0xff]  }
 0x1d2   : > { %7837 = vmatmul.mubr.msk.bf16.vlgmr.msra.gmra.mrb[104].mxu0 %vm769_vm0, %v8294_v29  ;;  %5991 = vst.msk [vmem:[%s8712_s23 + $0x1b0] sm:$0xf] %vm5882_vm1, %v7008_v40  ;;  %5986 = vst.msk [vmem:[%s8712_s23 + $0x19c] sm:$0xf] %vm5882_vm1, %v7003_v41  ;;  %v7009_v50 = vpack.c.bf16 %v2524_v48, %v2524_v48  ;;  %v8318_v41 = vld [vmem:[%s8411_s20 + $0x390] sm:$0xff]   ;;  %v4785_v48 = vsel %vm769_vm0, %v8315_v37, 0 }
 0x1d3   : > { %7853 = vmatmul.mubr.msk.bf16.vlgmr.msra.gmra.mrb[104].mxu1 %vm769_vm0, %v8295_v33  ;;  %7861 = vmatpush3.bf16.xpose.msra.mxu0 %v4395_v38  ;;  %5994 = vst.msk [vmem:[%s8712_s23 + $0x1bc] sm:$0xf] %vm5882_vm1, %v7011_v46  ;;  %5984 = vst.msk [vmem:[%s8712_s23 + $0x194] sm:$0xf] %vm5882_vm1, %v7001_v47  ;;  %v8319_v43 = vld [vmem:[%s8411_s20 + $0x3b0] sm:$0xff]   ;;  %v4656_v46 = vsel %vm769_vm0, %v8314_v31, 0 }
 0x1d4   : > { %7877 = vmatpush3.bf16.xpose.msra.mxu1 %v4524_v44  ;;  %8037 = vmatprep.subr.msk.bf16.mxu0 %vm769_vm0, %v8298_v39  ;;  %5992 = vst.msk [vmem:[%s8712_s23 + $0x1b4] sm:$0xf] %vm5882_vm1, %v7009_v50  ;;  %v8320_v44 = vld [vmem:[%s8411_s20 + $0x398] sm:$0xff]   ;;  %v8316_v47 = vld [vmem:[%s8395_s17 + $0x3d0] sm:$0xff]   ;;  %v8324_v50 = vld [vmem:[%s8411_s20 + $0x3c0] sm:$0xff]  }
 0x1d5   : > { %8041 = vmatprep.subr.msk.bf16.mxu1 %vm769_vm0, %v8299_v45  ;;  %7840 = vmatprep.mubr.msk.bf16.mxu0 %vm769_vm0, %v8302_v49  ;;  %v8321_v45 = vld [vmem:[%s8411_s20 + $0x3b8] sm:$0xff]   ;;  %v8317_v49 = vld [vmem:[%s8395_s17 + $0x3f0] sm:$0xff]  }
 0x1d6   : > { %7856 = vmatprep.mubr.msk.bf16.mxu1 %vm769_vm0, %v8303_v51  ;;  %v8325_v51 = vld [vmem:[%s8411_s20 + $0x3e0] sm:$0xff]  }
 0x1da   : > { %7841 = vmatmul.mubr.msk.bf16.gmra.mrb[108].mxu0 %vm769_vm0, %v8304_v52  ;;  %v4659_v52 = vsel %vm769_vm0, %v8316_v47, 0 }
 0x1db   : > { %7863 = vmatpush3.bf16.xpose.msra.mxu0 %v4398_v54  ;;  %7857 = vmatmul.mubr.msk.bf16.gmra.mrb[108].mxu1 %vm769_vm0, %v8305_v53  ;;  %v8322_v53 = vld [vmem:[%s8395_s17 + $0x3d8] sm:$0xff]   ;;  %v4788_v54 = vsel %vm769_vm0, %v8317_v49, 0 }
 0x1dc   : > { %7879 = vmatpush3.bf16.xpose.msra.mxu1 %v4527_v56  ;;  %8038 = vmatprep.subr.msk.bf16.mxu0 %vm769_vm0, %v8300_v55  ;;  %v8323_v55 = vld [vmem:[%s8395_s17 + $0x3f8] sm:$0xff]  }
 0x1dd   : > { %8042 = vmatprep.subr.msk.bf16.mxu1 %vm769_vm0, %v8301_v57  ;;  %7868 = vmatprep.mubr.msk.bf16.mxu0 %vm769_vm0, %v8308_v58 }
 0x1de   : > { %7884 = vmatprep.mubr.msk.bf16.mxu1 %vm769_vm0, %v8309_v59 }
 0x1e3   : > { %7865 = vmatpush3.bf16.xpose.msra.mxu0 %v4401_v60 }
 0x1e4   : > { %7881 = vmatpush3.bf16.xpose.msra.mxu1 %v4530_v62  ;;  %8039 = vmatprep.subr.msk.bf16.mxu0 %vm769_vm0, %v8306_v61 }
 0x1e5   : > { %v7646_v0 = vpop.f32.mrb[56].mxu0  ;;  %8043 = vmatprep.subr.msk.bf16.mxu1 %vm769_vm0, %v8307_v63 }
 0x1e6   : > { %v7014_v1 = vpack.c.bf16 %v7646_v0, %v7646_v0  ;;  %v7662_v2 = vpop.f32.mrb[56].mxu1  ;;  %v2634_v3 = vpop.f32.mrb[57].mxu0 }
 0x1e7   : > { %v7022_v4 = vpack.c.bf16 %v7662_v2, %v7662_v2  ;;  %v7012_v5 = vpack.c.bf16 %v2634_v3, %v2634_v3  ;;  %v2763_v6 = vpop.f32.mrb[57].mxu1  ;;  %v7647_v7 = vpop.f32.mrb[58].mxu0 }
 0x1e8   : > { %5997 = vst.msk [vmem:[%s8712_s23 + $0x1c8] sm:$0xf] %vm5882_vm1, %v7014_v1  ;;  %v7020_v8 = vpack.c.bf16 %v2763_v6, %v2763_v6  ;;  %v7015_v9 = vpack.c.bf16 %v7647_v7, %v7647_v7  ;;  %v7663_v10 = vpop.f32.mrb[58].mxu1  ;;  %v2637_v11 = vpop.f32.mrb[59].mxu0 }
 0x1e9   : > { %6005 = vst.msk [vmem:[%s8712_s23 + $0x1e8] sm:$0xf] %vm5882_vm1, %v7022_v4  ;;  %5995 = vst.msk [vmem:[%s8712_s23 + $0x1c0] sm:$0xf] %vm5882_vm1, %v7012_v5  ;;  %v7023_v14 = vpack.c.bf16 %v7663_v10, %v7663_v10  ;;  %v7013_v15 = vpack.c.bf16 %v2637_v11, %v2637_v11  ;;  %v2766_v16 = vpop.f32.mrb[59].mxu1  ;;  %v4662_v4 = vsel %vm769_vm0, %v8322_v53, 0 }
 0x1ea   : > { %6003 = vst.msk [vmem:[%s8712_s23 + $0x1e0] sm:$0xf] %vm5882_vm1, %v7020_v8  ;;  %5998 = vst.msk [vmem:[%s8712_s23 + $0x1cc] sm:$0xf] %vm5882_vm1, %v7015_v9  ;;  %v7021_v19 = vpack.c.bf16 %v2766_v16, %v2766_v16  ;;  %v4791_v8 = vsel %vm769_vm0, %v8323_v55, 0  ;;  %v8326_v11 = vld [vmem:[%s8411_s20 + $0x3c8] sm:$0xff]  }
 0x1eb   : > { %6006 = vst.msk [vmem:[%s8712_s23 + $0x1ec] sm:$0xf] %vm5882_vm1, %v7023_v14  ;;  %5996 = vst.msk [vmem:[%s8712_s23 + $0x1c4] sm:$0xf] %vm5882_vm1, %v7013_v15  ;;  %7867 = vmatpush3.bf16.xpose.msra.mxu0 %v4404_v12  ;;  %v8327_v15 = vld [vmem:[%s8411_s20 + $0x3e8] sm:$0xff]   ;;  %v8328_v16 = vld [vmem:[%s8411_s20 + $0x3d0] sm:$0xff]  }
 0x1ec   : > { %6004 = vst.msk [vmem:[%s8712_s23 + $0x1e4] sm:$0xf] %vm5882_vm1, %v7021_v19  ;;  %7883 = vmatpush3.bf16.xpose.msra.mxu1 %v4533_v17  ;;  %8044 = vmatprep.subr.msk.bf16.mxu0 %vm769_vm0, %v8312_v13 }
 0x1ed   : > { %8048 = vmatprep.subr.msk.bf16.mxu1 %vm769_vm0, %v8313_v18  ;;  %v7650_v20 = vpop.f32.mrb[60].mxu0 }
 0x1ee   : > { %v7018_v22 = vpack.c.bf16 %v7650_v20, %v7650_v20  ;;  %v7666_v23 = vpop.f32.mrb[60].mxu1  ;;  %v2650_v24 = vpop.f32.mrb[61].mxu0 }
 0x1ef   : > { %v7026_v26 = vpack.c.bf16 %v7666_v23, %v7666_v23  ;;  %v7016_v27 = vpack.c.bf16 %v2650_v24, %v2650_v24  ;;  %v2779_v28 = vpop.f32.mrb[61].mxu1  ;;  %v7651_v29 = vpop.f32.mrb[62].mxu0 }
 0x1f0   : > { %6001 = vst.msk [vmem:[%s8712_s23 + $0x1d8] sm:$0xf] %vm5882_vm1, %v7018_v22  ;;  %v7024_v32 = vpack.c.bf16 %v2779_v28, %v2779_v28  ;;  %v7019_v33 = vpack.c.bf16 %v7651_v29, %v7651_v29  ;;  %v7667_v34 = vpop.f32.mrb[62].mxu1  ;;  %v2653_v35 = vpop.f32.mrb[63].mxu0 }
 0x1f1   : > { %6009 = vst.msk [vmem:[%s8712_s23 + $0x1f8] sm:$0xf] %vm5882_vm1, %v7026_v26  ;;  %5999 = vst.msk [vmem:[%s8712_s23 + $0x1d0] sm:$0xf] %vm5882_vm1, %v7016_v27  ;;  %v7027_v38 = vpack.c.bf16 %v7667_v34, %v7667_v34  ;;  %v7017_v39 = vpack.c.bf16 %v2653_v35, %v2653_v35  ;;  %v2782_v40 = vpop.f32.mrb[63].mxu1 }
 0x1f2   : > { %7869 = vmatmul.mubr.msk.bf16.vlgmr.msra.gmra.mrb[112].mxu0 %vm769_vm0, %v8310_v21  ;;  %6007 = vst.msk [vmem:[%s8712_s23 + $0x1f0] sm:$0xf] %vm5882_vm1, %v7024_v32  ;;  %6002 = vst.msk [vmem:[%s8712_s23 + $0x1dc] sm:$0xf] %vm5882_vm1, %v7019_v33  ;;  %v7025_v42 = vpack.c.bf16 %v2782_v40, %v2782_v40  ;;  %v8329_v21 = vld [vmem:[%s8411_s20 + $0x3f0] sm:$0xff]  }
 0x1f3   : > { %7885 = vmatmul.mubr.msk.bf16.vlgmr.msra.gmra.mrb[112].mxu1 %vm769_vm0, %v8311_v25  ;;  %7893 = vmatpush3.bf16.xpose.msra.mxu0 %v4653_v30  ;;  %6010 = vst.msk [vmem:[%s8712_s23 + $0x1fc] sm:$0xf] %vm5882_vm1, %v7027_v38  ;;  %6000 = vst.msk [vmem:[%s8712_s23 + $0x1d4] sm:$0xf] %vm5882_vm1, %v7017_v39  ;;  %v8330_v30 = vld [vmem:[%s8411_s20 + $0x3d8] sm:$0xff]  }
 0x1f4   : > { %7909 = vmatpush3.bf16.xpose.msra.mxu1 %v4782_v36  ;;  %8045 = vmatprep.subr.msk.bf16.mxu0 %vm769_vm0, %v8314_v31  ;;  %6008 = vst.msk [vmem:[%s8712_s23 + $0x1f4] sm:$0xf] %vm5882_vm1, %v7025_v42  ;;  %v8331_v31 = vld [vmem:[%s8411_s20 + $0x3f8] sm:$0xff]  }
 0x1f5   : > { %8049 = vmatprep.subr.msk.bf16.mxu1 %vm769_vm0, %v8315_v37  ;;  %7872 = vmatprep.mubr.msk.bf16.mxu0 %vm769_vm0, %v8318_v41 }
 0x1f6   : > { %7888 = vmatprep.mubr.msk.bf16.mxu1 %vm769_vm0, %v8319_v43 }
 0x1fa   : > { %7873 = vmatmul.mubr.msk.bf16.gmra.mrb[116].mxu0 %vm769_vm0, %v8320_v44 }
 0x1fb   : > { %7895 = vmatpush3.bf16.xpose.msra.mxu0 %v4656_v46  ;;  %7889 = vmatmul.mubr.msk.bf16.gmra.mrb[116].mxu1 %vm769_vm0, %v8321_v45 }
 0x1fc   : > { %7911 = vmatpush3.bf16.xpose.msra.mxu1 %v4785_v48  ;;  %8046 = vmatprep.subr.msk.bf16.mxu0 %vm769_vm0, %v8316_v47 }
 0x1fd   : > { %8050 = vmatprep.subr.msk.bf16.mxu1 %vm769_vm0, %v8317_v49  ;;  %7900 = vmatprep.mubr.msk.bf16.mxu0 %vm769_vm0, %v8324_v50 }
 0x1fe   : > { %7916 = vmatprep.mubr.msk.bf16.mxu1 %vm769_vm0, %v8325_v51 }
 0x203   : > { %7897 = vmatpush3.bf16.xpose.msra.mxu0 %v4659_v52 }
 0x204   : > { %7913 = vmatpush3.bf16.xpose.msra.mxu1 %v4788_v54  ;;  %8047 = vmatprep.subr.msk.bf16.mxu0 %vm769_vm0, %v8322_v53 }
 0x205   : > { %v7678_v56 = vpop.f32.mrb[64].mxu0  ;;  %8051 = vmatprep.subr.msk.bf16.mxu1 %vm769_vm0, %v8323_v55 }
 0x206   : > { %v7030_v57 = vpack.c.bf16 %v7678_v56, %v7678_v56  ;;  %v7694_v58 = vpop.f32.mrb[64].mxu1  ;;  %v2892_v59 = vpop.f32.mrb[65].mxu0 }
 0x207   : > { %v7038_v60 = vpack.c.bf16 %v7694_v58, %v7694_v58  ;;  %v7028_v61 = vpack.c.bf16 %v2892_v59, %v2892_v59  ;;  %v3021_v62 = vpop.f32.mrb[65].mxu1  ;;  %v7679_v63 = vpop.f32.mrb[66].mxu0 }
 0x208   : > { %6013 = vst.msk [vmem:[%s8712_s23 + $0x208] sm:$0xf] %vm5882_vm1, %v7030_v57  ;;  %v7036_v0 = vpack.c.bf16 %v3021_v62, %v3021_v62  ;;  %v7031_v1 = vpack.c.bf16 %v7679_v63, %v7679_v63  ;;  %v7695_v2 = vpop.f32.mrb[66].mxu1  ;;  %v2895_v3 = vpop.f32.mrb[67].mxu0 }
 0x209   : > { %6021 = vst.msk [vmem:[%s8712_s23 + $0x228] sm:$0xf] %vm5882_vm1, %v7038_v60  ;;  %6011 = vst.msk [vmem:[%s8712_s23 + $0x200] sm:$0xf] %vm5882_vm1, %v7028_v61  ;;  %v7039_v5 = vpack.c.bf16 %v7695_v2, %v7695_v2  ;;  %v7029_v6 = vpack.c.bf16 %v2895_v3, %v2895_v3  ;;  %v3024_v7 = vpop.f32.mrb[67].mxu1 }
 0x20a   : > { %6019 = vst.msk [vmem:[%s8712_s23 + $0x220] sm:$0xf] %vm5882_vm1, %v7036_v0  ;;  %6014 = vst.msk [vmem:[%s8712_s23 + $0x20c] sm:$0xf] %vm5882_vm1, %v7031_v1  ;;  %v7037_v9 = vpack.c.bf16 %v3024_v7, %v3024_v7 }
 0x20b   : > { %6022 = vst.msk [vmem:[%s8712_s23 + $0x22c] sm:$0xf] %vm5882_vm1, %v7039_v5  ;;  %6012 = vst.msk [vmem:[%s8712_s23 + $0x204] sm:$0xf] %vm5882_vm1, %v7029_v6  ;;  %7899 = vmatpush3.bf16.xpose.msra.mxu0 %v4662_v4 }
 0x20c   : > { %6020 = vst.msk [vmem:[%s8712_s23 + $0x224] sm:$0xf] %vm5882_vm1, %v7037_v9  ;;  %7915 = vmatpush3.bf16.xpose.msra.mxu1 %v4791_v8 }
 0x20d   : > { %v7682_v10 = vpop.f32.mrb[68].mxu0 }
 0x20e   : > { %v7034_v12 = vpack.c.bf16 %v7682_v10, %v7682_v10  ;;  %v7698_v13 = vpop.f32.mrb[68].mxu1  ;;  %v2908_v14 = vpop.f32.mrb[69].mxu0 }
 0x20f   : > { %v7042_v17 = vpack.c.bf16 %v7698_v13, %v7698_v13  ;;  %v7032_v18 = vpack.c.bf16 %v2908_v14, %v2908_v14  ;;  %v3037_v19 = vpop.f32.mrb[69].mxu1  ;;  %v7683_v20 = vpop.f32.mrb[70].mxu0 }
 0x210   : > { %6017 = vst.msk [vmem:[%s8712_s23 + $0x218] sm:$0xf] %vm5882_vm1, %v7034_v12  ;;  %v7040_v22 = vpack.c.bf16 %v3037_v19, %v3037_v19  ;;  %v7035_v23 = vpack.c.bf16 %v7683_v20, %v7683_v20  ;;  %v7699_v24 = vpop.f32.mrb[70].mxu1  ;;  %v2911_v25 = vpop.f32.mrb[71].mxu0 }
 0x211   : > { %6025 = vst.msk [vmem:[%s8712_s23 + $0x238] sm:$0xf] %vm5882_vm1, %v7042_v17  ;;  %6015 = vst.msk [vmem:[%s8712_s23 + $0x210] sm:$0xf] %vm5882_vm1, %v7032_v18  ;;  %v7043_v26 = vpack.c.bf16 %v7699_v24, %v7699_v24  ;;  %v7033_v27 = vpack.c.bf16 %v2911_v25, %v2911_v25  ;;  %v3040_v28 = vpop.f32.mrb[71].mxu1 }
 0x212   : > { %7901 = vmatmul.mubr.msk.bf16.vlgmr.msra.gmra.mrb[120].mxu0 %vm769_vm0, %v8326_v11  ;;  %6023 = vst.msk [vmem:[%s8712_s23 + $0x230] sm:$0xf] %vm5882_vm1, %v7040_v22  ;;  %6018 = vst.msk [vmem:[%s8712_s23 + $0x21c] sm:$0xf] %vm5882_vm1, %v7035_v23  ;;  %v7041_v29 = vpack.c.bf16 %v3040_v28, %v3040_v28 }
 0x213   : > { %7917 = vmatmul.mubr.msk.bf16.vlgmr.msra.gmra.mrb[120].mxu1 %vm769_vm0, %v8327_v15  ;;  %7904 = vmatprep.mubr.msk.bf16.mxu0 %vm769_vm0, %v8328_v16  ;;  %6026 = vst.msk [vmem:[%s8712_s23 + $0x23c] sm:$0xf] %vm5882_vm1, %v7043_v26  ;;  %6016 = vst.msk [vmem:[%s8712_s23 + $0x214] sm:$0xf] %vm5882_vm1, %v7033_v27 }
 0x214   : > { %7920 = vmatprep.mubr.msk.bf16.mxu1 %vm769_vm0, %v8329_v21  ;;  %6024 = vst.msk [vmem:[%s8712_s23 + $0x234] sm:$0xf] %vm5882_vm1, %v7041_v29 }
 0x21a   : > { %7905 = vmatmul.mubr.msk.bf16.gmra.mrb[124].mxu0 %vm769_vm0, %v8330_v30 }
 0x21b   : > { %7921 = vmatmul.mubr.msk.bf16.gmra.mrb[124].mxu1 %vm769_vm0, %v8331_v31 }
 0x225   : > { %v7710_v32 = vpop.f32.mrb[72].mxu0 }
 0x226   : > { %v7046_v33 = vpack.c.bf16 %v7710_v32, %v7710_v32  ;;  %v7726_v34 = vpop.f32.mrb[72].mxu1  ;;  %v3150_v35 = vpop.f32.mrb[73].mxu0 }
 0x227   : > { %v7054_v36 = vpack.c.bf16 %v7726_v34, %v7726_v34  ;;  %v7044_v37 = vpack.c.bf16 %v3150_v35, %v3150_v35  ;;  %v3279_v38 = vpop.f32.mrb[73].mxu1  ;;  %v7711_v39 = vpop.f32.mrb[74].mxu0 }
 0x228   : > { %6029 = vst.msk [vmem:[%s8712_s23 + $0x248] sm:$0xf] %vm5882_vm1, %v7046_v33  ;;  %v7052_v40 = vpack.c.bf16 %v3279_v38, %v3279_v38  ;;  %v7047_v41 = vpack.c.bf16 %v7711_v39, %v7711_v39  ;;  %v7727_v42 = vpop.f32.mrb[74].mxu1  ;;  %v3153_v43 = vpop.f32.mrb[75].mxu0 }
 0x229   : > { %6037 = vst.msk [vmem:[%s8712_s23 + $0x268] sm:$0xf] %vm5882_vm1, %v7054_v36  ;;  %6027 = vst.msk [vmem:[%s8712_s23 + $0x240] sm:$0xf] %vm5882_vm1, %v7044_v37  ;;  %v7055_v44 = vpack.c.bf16 %v7727_v42, %v7727_v42  ;;  %v7045_v45 = vpack.c.bf16 %v3153_v43, %v3153_v43  ;;  %v3282_v46 = vpop.f32.mrb[75].mxu1 }
 0x22a   : > { %6035 = vst.msk [vmem:[%s8712_s23 + $0x260] sm:$0xf] %vm5882_vm1, %v7052_v40  ;;  %6030 = vst.msk [vmem:[%s8712_s23 + $0x24c] sm:$0xf] %vm5882_vm1, %v7047_v41  ;;  %v7053_v47 = vpack.c.bf16 %v3282_v46, %v3282_v46 }
 0x22b   : > { %6038 = vst.msk [vmem:[%s8712_s23 + $0x26c] sm:$0xf] %vm5882_vm1, %v7055_v44  ;;  %6028 = vst.msk [vmem:[%s8712_s23 + $0x244] sm:$0xf] %vm5882_vm1, %v7045_v45 }
 0x22c   : > { %6036 = vst.msk [vmem:[%s8712_s23 + $0x264] sm:$0xf] %vm5882_vm1, %v7053_v47 }
 0x22d   : > { %v7714_v48 = vpop.f32.mrb[76].mxu0 }
 0x22e   : > { %v7050_v49 = vpack.c.bf16 %v7714_v48, %v7714_v48  ;;  %v7730_v50 = vpop.f32.mrb[76].mxu1  ;;  %v3166_v51 = vpop.f32.mrb[77].mxu0 }
 0x22f   : > { %v7058_v52 = vpack.c.bf16 %v7730_v50, %v7730_v50  ;;  %v7048_v53 = vpack.c.bf16 %v3166_v51, %v3166_v51  ;;  %v3295_v54 = vpop.f32.mrb[77].mxu1  ;;  %v7715_v55 = vpop.f32.mrb[78].mxu0 }
 0x230   : > { %6033 = vst.msk [vmem:[%s8712_s23 + $0x258] sm:$0xf] %vm5882_vm1, %v7050_v49  ;;  %v7056_v56 = vpack.c.bf16 %v3295_v54, %v3295_v54  ;;  %v7051_v57 = vpack.c.bf16 %v7715_v55, %v7715_v55  ;;  %v7731_v58 = vpop.f32.mrb[78].mxu1  ;;  %v3169_v59 = vpop.f32.mrb[79].mxu0 }
 0x231   : > { %6041 = vst.msk [vmem:[%s8712_s23 + $0x278] sm:$0xf] %vm5882_vm1, %v7058_v52  ;;  %6031 = vst.msk [vmem:[%s8712_s23 + $0x250] sm:$0xf] %vm5882_vm1, %v7048_v53  ;;  %v7059_v60 = vpack.c.bf16 %v7731_v58, %v7731_v58  ;;  %v7049_v61 = vpack.c.bf16 %v3169_v59, %v3169_v59  ;;  %v3298_v62 = vpop.f32.mrb[79].mxu1 }
 0x232   : > { %6039 = vst.msk [vmem:[%s8712_s23 + $0x270] sm:$0xf] %vm5882_vm1, %v7056_v56  ;;  %6034 = vst.msk [vmem:[%s8712_s23 + $0x25c] sm:$0xf] %vm5882_vm1, %v7051_v57  ;;  %v7057_v63 = vpack.c.bf16 %v3298_v62, %v3298_v62 }
 0x233   : > { %6042 = vst.msk [vmem:[%s8712_s23 + $0x27c] sm:$0xf] %vm5882_vm1, %v7059_v60  ;;  %6032 = vst.msk [vmem:[%s8712_s23 + $0x254] sm:$0xf] %vm5882_vm1, %v7049_v61 }
 0x234   : > { %6040 = vst.msk [vmem:[%s8712_s23 + $0x274] sm:$0xf] %vm5882_vm1, %v7057_v63 }
 0x245   : > { %v7742_v0 = vpop.f32.mrb[80].mxu0 }
 0x246   : > { %v7062_v1 = vpack.c.bf16 %v7742_v0, %v7742_v0  ;;  %v7758_v2 = vpop.f32.mrb[80].mxu1  ;;  %v3408_v3 = vpop.f32.mrb[81].mxu0 }
 0x247   : > { %v7070_v4 = vpack.c.bf16 %v7758_v2, %v7758_v2  ;;  %v7060_v5 = vpack.c.bf16 %v3408_v3, %v3408_v3  ;;  %v3537_v6 = vpop.f32.mrb[81].mxu1  ;;  %v7743_v7 = vpop.f32.mrb[82].mxu0 }
 0x248   : > { %6045 = vst.msk [vmem:[%s8712_s23 + $0x288] sm:$0xf] %vm5882_vm1, %v7062_v1  ;;  %v7068_v8 = vpack.c.bf16 %v3537_v6, %v3537_v6  ;;  %v7063_v9 = vpack.c.bf16 %v7743_v7, %v7743_v7  ;;  %v7759_v10 = vpop.f32.mrb[82].mxu1  ;;  %v3411_v11 = vpop.f32.mrb[83].mxu0 }
 0x249   : > { %6053 = vst.msk [vmem:[%s8712_s23 + $0x2a8] sm:$0xf] %vm5882_vm1, %v7070_v4  ;;  %6043 = vst.msk [vmem:[%s8712_s23 + $0x280] sm:$0xf] %vm5882_vm1, %v7060_v5  ;;  %v7071_v12 = vpack.c.bf16 %v7759_v10, %v7759_v10  ;;  %v7061_v13 = vpack.c.bf16 %v3411_v11, %v3411_v11  ;;  %v3540_v14 = vpop.f32.mrb[83].mxu1 }
 0x24a   : > { %6051 = vst.msk [vmem:[%s8712_s23 + $0x2a0] sm:$0xf] %vm5882_vm1, %v7068_v8  ;;  %6046 = vst.msk [vmem:[%s8712_s23 + $0x28c] sm:$0xf] %vm5882_vm1, %v7063_v9  ;;  %v7069_v15 = vpack.c.bf16 %v3540_v14, %v3540_v14 }
 0x24b   : > { %6054 = vst.msk [vmem:[%s8712_s23 + $0x2ac] sm:$0xf] %vm5882_vm1, %v7071_v12  ;;  %6044 = vst.msk [vmem:[%s8712_s23 + $0x284] sm:$0xf] %vm5882_vm1, %v7061_v13 }
 0x24c   : > { %6052 = vst.msk [vmem:[%s8712_s23 + $0x2a4] sm:$0xf] %vm5882_vm1, %v7069_v15 }
 0x24d   : > { %v7746_v16 = vpop.f32.mrb[84].mxu0 }
 0x24e   : > { %v7066_v17 = vpack.c.bf16 %v7746_v16, %v7746_v16  ;;  %v7762_v18 = vpop.f32.mrb[84].mxu1  ;;  %v3424_v19 = vpop.f32.mrb[85].mxu0 }
 0x24f   : > { %v7074_v20 = vpack.c.bf16 %v7762_v18, %v7762_v18  ;;  %v7064_v21 = vpack.c.bf16 %v3424_v19, %v3424_v19  ;;  %v3553_v22 = vpop.f32.mrb[85].mxu1  ;;  %v7747_v23 = vpop.f32.mrb[86].mxu0 }
 0x250   : > { %6049 = vst.msk [vmem:[%s8712_s23 + $0x298] sm:$0xf] %vm5882_vm1, %v7066_v17  ;;  %v7072_v24 = vpack.c.bf16 %v3553_v22, %v3553_v22  ;;  %v7067_v25 = vpack.c.bf16 %v7747_v23, %v7747_v23  ;;  %v7763_v26 = vpop.f32.mrb[86].mxu1  ;;  %v3427_v27 = vpop.f32.mrb[87].mxu0 }
 0x251   : > { %6057 = vst.msk [vmem:[%s8712_s23 + $0x2b8] sm:$0xf] %vm5882_vm1, %v7074_v20  ;;  %6047 = vst.msk [vmem:[%s8712_s23 + $0x290] sm:$0xf] %vm5882_vm1, %v7064_v21  ;;  %v7075_v28 = vpack.c.bf16 %v7763_v26, %v7763_v26  ;;  %v7065_v29 = vpack.c.bf16 %v3427_v27, %v3427_v27  ;;  %v3556_v30 = vpop.f32.mrb[87].mxu1 }
 0x252   : > { %6055 = vst.msk [vmem:[%s8712_s23 + $0x2b0] sm:$0xf] %vm5882_vm1, %v7072_v24  ;;  %6050 = vst.msk [vmem:[%s8712_s23 + $0x29c] sm:$0xf] %vm5882_vm1, %v7067_v25  ;;  %v7073_v31 = vpack.c.bf16 %v3556_v30, %v3556_v30 }
 0x253   : > { %6058 = vst.msk [vmem:[%s8712_s23 + $0x2bc] sm:$0xf] %vm5882_vm1, %v7075_v28  ;;  %6048 = vst.msk [vmem:[%s8712_s23 + $0x294] sm:$0xf] %vm5882_vm1, %v7065_v29 }
 0x254   : > { %6056 = vst.msk [vmem:[%s8712_s23 + $0x2b4] sm:$0xf] %vm5882_vm1, %v7073_v31 }
 0x265   : > { %v7774_v32 = vpop.f32.mrb[88].mxu0 }
 0x266   : > { %v7078_v33 = vpack.c.bf16 %v7774_v32, %v7774_v32  ;;  %v7790_v34 = vpop.f32.mrb[88].mxu1  ;;  %v3666_v35 = vpop.f32.mrb[89].mxu0 }
 0x267   : > { %v7086_v36 = vpack.c.bf16 %v7790_v34, %v7790_v34  ;;  %v7076_v37 = vpack.c.bf16 %v3666_v35, %v3666_v35  ;;  %v3795_v38 = vpop.f32.mrb[89].mxu1  ;;  %v7775_v39 = vpop.f32.mrb[90].mxu0 }
 0x268   : > { %6061 = vst.msk [vmem:[%s8712_s23 + $0x2c8] sm:$0xf] %vm5882_vm1, %v7078_v33  ;;  %v7084_v40 = vpack.c.bf16 %v3795_v38, %v3795_v38  ;;  %v7079_v41 = vpack.c.bf16 %v7775_v39, %v7775_v39  ;;  %v7791_v42 = vpop.f32.mrb[90].mxu1  ;;  %v3669_v43 = vpop.f32.mrb[91].mxu0 }
 0x269   : > { %6069 = vst.msk [vmem:[%s8712_s23 + $0x2e8] sm:$0xf] %vm5882_vm1, %v7086_v36  ;;  %6059 = vst.msk [vmem:[%s8712_s23 + $0x2c0] sm:$0xf] %vm5882_vm1, %v7076_v37  ;;  %v7087_v44 = vpack.c.bf16 %v7791_v42, %v7791_v42  ;;  %v7077_v45 = vpack.c.bf16 %v3669_v43, %v3669_v43  ;;  %v3798_v46 = vpop.f32.mrb[91].mxu1 }
 0x26a   : > { %6067 = vst.msk [vmem:[%s8712_s23 + $0x2e0] sm:$0xf] %vm5882_vm1, %v7084_v40  ;;  %6062 = vst.msk [vmem:[%s8712_s23 + $0x2cc] sm:$0xf] %vm5882_vm1, %v7079_v41  ;;  %v7085_v47 = vpack.c.bf16 %v3798_v46, %v3798_v46 }
 0x26b   : > { %6070 = vst.msk [vmem:[%s8712_s23 + $0x2ec] sm:$0xf] %vm5882_vm1, %v7087_v44  ;;  %6060 = vst.msk [vmem:[%s8712_s23 + $0x2c4] sm:$0xf] %vm5882_vm1, %v7077_v45 }
 0x26c   : > { %6068 = vst.msk [vmem:[%s8712_s23 + $0x2e4] sm:$0xf] %vm5882_vm1, %v7085_v47 }
 0x26d   : > { %v7778_v48 = vpop.f32.mrb[92].mxu0 }
 0x26e   : > { %v7082_v49 = vpack.c.bf16 %v7778_v48, %v7778_v48  ;;  %v7794_v50 = vpop.f32.mrb[92].mxu1  ;;  %v3682_v51 = vpop.f32.mrb[93].mxu0 }
 0x26f   : > { %v7090_v52 = vpack.c.bf16 %v7794_v50, %v7794_v50  ;;  %v7080_v53 = vpack.c.bf16 %v3682_v51, %v3682_v51  ;;  %v3811_v54 = vpop.f32.mrb[93].mxu1  ;;  %v7779_v55 = vpop.f32.mrb[94].mxu0 }
 0x270   : > { %6065 = vst.msk [vmem:[%s8712_s23 + $0x2d8] sm:$0xf] %vm5882_vm1, %v7082_v49  ;;  %v7088_v56 = vpack.c.bf16 %v3811_v54, %v3811_v54  ;;  %v7083_v57 = vpack.c.bf16 %v7779_v55, %v7779_v55  ;;  %v7795_v58 = vpop.f32.mrb[94].mxu1  ;;  %v3685_v59 = vpop.f32.mrb[95].mxu0 }
 0x271   : > { %6073 = vst.msk [vmem:[%s8712_s23 + $0x2f8] sm:$0xf] %vm5882_vm1, %v7090_v52  ;;  %6063 = vst.msk [vmem:[%s8712_s23 + $0x2d0] sm:$0xf] %vm5882_vm1, %v7080_v53  ;;  %v7091_v60 = vpack.c.bf16 %v7795_v58, %v7795_v58  ;;  %v7081_v61 = vpack.c.bf16 %v3685_v59, %v3685_v59  ;;  %v3814_v62 = vpop.f32.mrb[95].mxu1 }
 0x272   : > { %6071 = vst.msk [vmem:[%s8712_s23 + $0x2f0] sm:$0xf] %vm5882_vm1, %v7088_v56  ;;  %6066 = vst.msk [vmem:[%s8712_s23 + $0x2dc] sm:$0xf] %vm5882_vm1, %v7083_v57  ;;  %v7089_v63 = vpack.c.bf16 %v3814_v62, %v3814_v62 }
 0x273   : > { %6074 = vst.msk [vmem:[%s8712_s23 + $0x2fc] sm:$0xf] %vm5882_vm1, %v7091_v60  ;;  %6064 = vst.msk [vmem:[%s8712_s23 + $0x2d4] sm:$0xf] %vm5882_vm1, %v7081_v61 }
 0x274   : > { %6072 = vst.msk [vmem:[%s8712_s23 + $0x2f4] sm:$0xf] %vm5882_vm1, %v7089_v63 }
 0x285   : > { %v7806_v0 = vpop.f32.mrb[96].mxu0 }
 0x286   : > { %v7094_v1 = vpack.c.bf16 %v7806_v0, %v7806_v0  ;;  %v7822_v2 = vpop.f32.mrb[96].mxu1  ;;  %v3924_v3 = vpop.f32.mrb[97].mxu0 }
 0x287   : > { %v7102_v4 = vpack.c.bf16 %v7822_v2, %v7822_v2  ;;  %v7092_v5 = vpack.c.bf16 %v3924_v3, %v3924_v3  ;;  %v4053_v6 = vpop.f32.mrb[97].mxu1  ;;  %v7807_v7 = vpop.f32.mrb[98].mxu0 }
 0x288   : > { %6077 = vst.msk [vmem:[%s8712_s23 + $0x308] sm:$0xf] %vm5882_vm1, %v7094_v1  ;;  %v7100_v8 = vpack.c.bf16 %v4053_v6, %v4053_v6  ;;  %v7095_v9 = vpack.c.bf16 %v7807_v7, %v7807_v7  ;;  %v7823_v10 = vpop.f32.mrb[98].mxu1  ;;  %v3927_v11 = vpop.f32.mrb[99].mxu0 }
 0x289   : > { %6085 = vst.msk [vmem:[%s8712_s23 + $0x328] sm:$0xf] %vm5882_vm1, %v7102_v4  ;;  %6075 = vst.msk [vmem:[%s8712_s23 + $0x300] sm:$0xf] %vm5882_vm1, %v7092_v5  ;;  %v7103_v12 = vpack.c.bf16 %v7823_v10, %v7823_v10  ;;  %v7093_v13 = vpack.c.bf16 %v3927_v11, %v3927_v11  ;;  %v4056_v14 = vpop.f32.mrb[99].mxu1 }
 0x28a   : > { %6083 = vst.msk [vmem:[%s8712_s23 + $0x320] sm:$0xf] %vm5882_vm1, %v7100_v8  ;;  %6078 = vst.msk [vmem:[%s8712_s23 + $0x30c] sm:$0xf] %vm5882_vm1, %v7095_v9  ;;  %v7101_v15 = vpack.c.bf16 %v4056_v14, %v4056_v14 }
 0x28b   : > { %6086 = vst.msk [vmem:[%s8712_s23 + $0x32c] sm:$0xf] %vm5882_vm1, %v7103_v12  ;;  %6076 = vst.msk [vmem:[%s8712_s23 + $0x304] sm:$0xf] %vm5882_vm1, %v7093_v13 }
 0x28c   : > { %6084 = vst.msk [vmem:[%s8712_s23 + $0x324] sm:$0xf] %vm5882_vm1, %v7101_v15 }
 0x28d   : > { %v7810_v16 = vpop.f32.mrb[100].mxu0 }
 0x28e   : > { %v7098_v17 = vpack.c.bf16 %v7810_v16, %v7810_v16  ;;  %v7826_v18 = vpop.f32.mrb[100].mxu1  ;;  %v3940_v19 = vpop.f32.mrb[101].mxu0 }
 0x28f   : > { %v7106_v20 = vpack.c.bf16 %v7826_v18, %v7826_v18  ;;  %v7096_v21 = vpack.c.bf16 %v3940_v19, %v3940_v19  ;;  %v4069_v22 = vpop.f32.mrb[101].mxu1  ;;  %v7811_v23 = vpop.f32.mrb[102].mxu0 }
 0x290   : > { %6081 = vst.msk [vmem:[%s8712_s23 + $0x318] sm:$0xf] %vm5882_vm1, %v7098_v17  ;;  %v7104_v24 = vpack.c.bf16 %v4069_v22, %v4069_v22  ;;  %v7099_v25 = vpack.c.bf16 %v7811_v23, %v7811_v23  ;;  %v7827_v26 = vpop.f32.mrb[102].mxu1  ;;  %v3943_v27 = vpop.f32.mrb[103].mxu0 }
 0x291   : > { %6089 = vst.msk [vmem:[%s8712_s23 + $0x338] sm:$0xf] %vm5882_vm1, %v7106_v20  ;;  %6079 = vst.msk [vmem:[%s8712_s23 + $0x310] sm:$0xf] %vm5882_vm1, %v7096_v21  ;;  %v7107_v28 = vpack.c.bf16 %v7827_v26, %v7827_v26  ;;  %v7097_v29 = vpack.c.bf16 %v3943_v27, %v3943_v27  ;;  %v4072_v30 = vpop.f32.mrb[103].mxu1 }
 0x292   : > { %6087 = vst.msk [vmem:[%s8712_s23 + $0x330] sm:$0xf] %vm5882_vm1, %v7104_v24  ;;  %6082 = vst.msk [vmem:[%s8712_s23 + $0x31c] sm:$0xf] %vm5882_vm1, %v7099_v25  ;;  %v7105_v31 = vpack.c.bf16 %v4072_v30, %v4072_v30 }
 0x293   : > { %6090 = vst.msk [vmem:[%s8712_s23 + $0x33c] sm:$0xf] %vm5882_vm1, %v7107_v28  ;;  %6080 = vst.msk [vmem:[%s8712_s23 + $0x314] sm:$0xf] %vm5882_vm1, %v7097_v29 }
 0x294   : > { %6088 = vst.msk [vmem:[%s8712_s23 + $0x334] sm:$0xf] %vm5882_vm1, %v7105_v31 }
 0x2a5   : > { %v7838_v32 = vpop.f32.mrb[104].mxu0 }
 0x2a6   : > { %v7110_v33 = vpack.c.bf16 %v7838_v32, %v7838_v32  ;;  %v7854_v34 = vpop.f32.mrb[104].mxu1  ;;  %v4182_v35 = vpop.f32.mrb[105].mxu0 }
 0x2a7   : > { %v7118_v36 = vpack.c.bf16 %v7854_v34, %v7854_v34  ;;  %v7108_v37 = vpack.c.bf16 %v4182_v35, %v4182_v35  ;;  %v4311_v38 = vpop.f32.mrb[105].mxu1  ;;  %v7839_v39 = vpop.f32.mrb[106].mxu0 }
 0x2a8   : > { %6093 = vst.msk [vmem:[%s8712_s23 + $0x348] sm:$0xf] %vm5882_vm1, %v7110_v33  ;;  %v7116_v40 = vpack.c.bf16 %v4311_v38, %v4311_v38  ;;  %v7111_v41 = vpack.c.bf16 %v7839_v39, %v7839_v39  ;;  %v7855_v42 = vpop.f32.mrb[106].mxu1  ;;  %v4185_v43 = vpop.f32.mrb[107].mxu0 }
 0x2a9   : > { %6101 = vst.msk [vmem:[%s8712_s23 + $0x368] sm:$0xf] %vm5882_vm1, %v7118_v36  ;;  %6091 = vst.msk [vmem:[%s8712_s23 + $0x340] sm:$0xf] %vm5882_vm1, %v7108_v37  ;;  %v7119_v44 = vpack.c.bf16 %v7855_v42, %v7855_v42  ;;  %v7109_v45 = vpack.c.bf16 %v4185_v43, %v4185_v43  ;;  %v4314_v46 = vpop.f32.mrb[107].mxu1 }
 0x2aa   : > { %6099 = vst.msk [vmem:[%s8712_s23 + $0x360] sm:$0xf] %vm5882_vm1, %v7116_v40  ;;  %6094 = vst.msk [vmem:[%s8712_s23 + $0x34c] sm:$0xf] %vm5882_vm1, %v7111_v41  ;;  %v7117_v47 = vpack.c.bf16 %v4314_v46, %v4314_v46 }
 0x2ab   : > { %6102 = vst.msk [vmem:[%s8712_s23 + $0x36c] sm:$0xf] %vm5882_vm1, %v7119_v44  ;;  %6092 = vst.msk [vmem:[%s8712_s23 + $0x344] sm:$0xf] %vm5882_vm1, %v7109_v45 }
 0x2ac   : > { %6100 = vst.msk [vmem:[%s8712_s23 + $0x364] sm:$0xf] %vm5882_vm1, %v7117_v47 }
 0x2ad   : > { %v7842_v48 = vpop.f32.mrb[108].mxu0 }
 0x2ae   : > { %v7114_v49 = vpack.c.bf16 %v7842_v48, %v7842_v48  ;;  %v7858_v50 = vpop.f32.mrb[108].mxu1  ;;  %v4198_v51 = vpop.f32.mrb[109].mxu0 }
 0x2af   : > { %v7122_v52 = vpack.c.bf16 %v7858_v50, %v7858_v50  ;;  %v7112_v53 = vpack.c.bf16 %v4198_v51, %v4198_v51  ;;  %v4327_v54 = vpop.f32.mrb[109].mxu1  ;;  %v7843_v55 = vpop.f32.mrb[110].mxu0 }
 0x2b0   : > { %6097 = vst.msk [vmem:[%s8712_s23 + $0x358] sm:$0xf] %vm5882_vm1, %v7114_v49  ;;  %v7120_v56 = vpack.c.bf16 %v4327_v54, %v4327_v54  ;;  %v7115_v57 = vpack.c.bf16 %v7843_v55, %v7843_v55  ;;  %v7859_v58 = vpop.f32.mrb[110].mxu1  ;;  %v4201_v59 = vpop.f32.mrb[111].mxu0 }
 0x2b1   : > { %6105 = vst.msk [vmem:[%s8712_s23 + $0x378] sm:$0xf] %vm5882_vm1, %v7122_v52  ;;  %6095 = vst.msk [vmem:[%s8712_s23 + $0x350] sm:$0xf] %vm5882_vm1, %v7112_v53  ;;  %v7123_v60 = vpack.c.bf16 %v7859_v58, %v7859_v58  ;;  %v7113_v61 = vpack.c.bf16 %v4201_v59, %v4201_v59  ;;  %v4330_v62 = vpop.f32.mrb[111].mxu1 }
 0x2b2   : > { %6103 = vst.msk [vmem:[%s8712_s23 + $0x370] sm:$0xf] %vm5882_vm1, %v7120_v56  ;;  %6098 = vst.msk [vmem:[%s8712_s23 + $0x35c] sm:$0xf] %vm5882_vm1, %v7115_v57  ;;  %v7121_v63 = vpack.c.bf16 %v4330_v62, %v4330_v62 }
 0x2b3   : > { %6106 = vst.msk [vmem:[%s8712_s23 + $0x37c] sm:$0xf] %vm5882_vm1, %v7123_v60  ;;  %6096 = vst.msk [vmem:[%s8712_s23 + $0x354] sm:$0xf] %vm5882_vm1, %v7113_v61 }
 0x2b4   : > { %6104 = vst.msk [vmem:[%s8712_s23 + $0x374] sm:$0xf] %vm5882_vm1, %v7121_v63 }
 0x2c5   : > { %v7870_v0 = vpop.f32.mrb[112].mxu0 }
 0x2c6   : > { %v7126_v1 = vpack.c.bf16 %v7870_v0, %v7870_v0  ;;  %v7886_v2 = vpop.f32.mrb[112].mxu1  ;;  %v4440_v3 = vpop.f32.mrb[113].mxu0 }
 0x2c7   : > { %v7134_v4 = vpack.c.bf16 %v7886_v2, %v7886_v2  ;;  %v7124_v5 = vpack.c.bf16 %v4440_v3, %v4440_v3  ;;  %v4569_v6 = vpop.f32.mrb[113].mxu1  ;;  %v7871_v7 = vpop.f32.mrb[114].mxu0 }
 0x2c8   : > { %6109 = vst.msk [vmem:[%s8712_s23 + $0x388] sm:$0xf] %vm5882_vm1, %v7126_v1  ;;  %v7132_v8 = vpack.c.bf16 %v4569_v6, %v4569_v6  ;;  %v7127_v9 = vpack.c.bf16 %v7871_v7, %v7871_v7  ;;  %v7887_v10 = vpop.f32.mrb[114].mxu1  ;;  %v4443_v11 = vpop.f32.mrb[115].mxu0 }
 0x2c9   : > { %6117 = vst.msk [vmem:[%s8712_s23 + $0x3a8] sm:$0xf] %vm5882_vm1, %v7134_v4  ;;  %6107 = vst.msk [vmem:[%s8712_s23 + $0x380] sm:$0xf] %vm5882_vm1, %v7124_v5  ;;  %v7135_v12 = vpack.c.bf16 %v7887_v10, %v7887_v10  ;;  %v7125_v13 = vpack.c.bf16 %v4443_v11, %v4443_v11  ;;  %v4572_v14 = vpop.f32.mrb[115].mxu1 }
 0x2ca   : > { %6115 = vst.msk [vmem:[%s8712_s23 + $0x3a0] sm:$0xf] %vm5882_vm1, %v7132_v8  ;;  %6110 = vst.msk [vmem:[%s8712_s23 + $0x38c] sm:$0xf] %vm5882_vm1, %v7127_v9  ;;  %v7133_v15 = vpack.c.bf16 %v4572_v14, %v4572_v14 }
 0x2cb   : > { %6118 = vst.msk [vmem:[%s8712_s23 + $0x3ac] sm:$0xf] %vm5882_vm1, %v7135_v12  ;;  %6108 = vst.msk [vmem:[%s8712_s23 + $0x384] sm:$0xf] %vm5882_vm1, %v7125_v13 }
 0x2cc   : > { %6116 = vst.msk [vmem:[%s8712_s23 + $0x3a4] sm:$0xf] %vm5882_vm1, %v7133_v15 }
 0x2cd   : > { %v7874_v16 = vpop.f32.mrb[116].mxu0 }
 0x2ce   : > { %v7130_v17 = vpack.c.bf16 %v7874_v16, %v7874_v16  ;;  %v7890_v18 = vpop.f32.mrb[116].mxu1  ;;  %v4456_v19 = vpop.f32.mrb[117].mxu0 }
 0x2cf   : > { %v7138_v20 = vpack.c.bf16 %v7890_v18, %v7890_v18  ;;  %v7128_v21 = vpack.c.bf16 %v4456_v19, %v4456_v19  ;;  %v4585_v22 = vpop.f32.mrb[117].mxu1  ;;  %v7875_v23 = vpop.f32.mrb[118].mxu0 }
 0x2d0   : > { %6113 = vst.msk [vmem:[%s8712_s23 + $0x398] sm:$0xf] %vm5882_vm1, %v7130_v17  ;;  %v7136_v24 = vpack.c.bf16 %v4585_v22, %v4585_v22  ;;  %v7131_v25 = vpack.c.bf16 %v7875_v23, %v7875_v23  ;;  %v7891_v26 = vpop.f32.mrb[118].mxu1  ;;  %v4459_v27 = vpop.f32.mrb[119].mxu0 }
 0x2d1   : > { %6121 = vst.msk [vmem:[%s8712_s23 + $0x3b8] sm:$0xf] %vm5882_vm1, %v7138_v20  ;;  %6111 = vst.msk [vmem:[%s8712_s23 + $0x390] sm:$0xf] %vm5882_vm1, %v7128_v21  ;;  %v7139_v28 = vpack.c.bf16 %v7891_v26, %v7891_v26  ;;  %v7129_v29 = vpack.c.bf16 %v4459_v27, %v4459_v27  ;;  %v4588_v30 = vpop.f32.mrb[119].mxu1 }
 0x2d2   : > { %6119 = vst.msk [vmem:[%s8712_s23 + $0x3b0] sm:$0xf] %vm5882_vm1, %v7136_v24  ;;  %6114 = vst.msk [vmem:[%s8712_s23 + $0x39c] sm:$0xf] %vm5882_vm1, %v7131_v25  ;;  %v7137_v31 = vpack.c.bf16 %v4588_v30, %v4588_v30 }
 0x2d3   : > { %6122 = vst.msk [vmem:[%s8712_s23 + $0x3bc] sm:$0xf] %vm5882_vm1, %v7139_v28  ;;  %6112 = vst.msk [vmem:[%s8712_s23 + $0x394] sm:$0xf] %vm5882_vm1, %v7129_v29 }
 0x2d4   : > { %6120 = vst.msk [vmem:[%s8712_s23 + $0x3b4] sm:$0xf] %vm5882_vm1, %v7137_v31 }
 0x2e5   : > { %v7902_v32 = vpop.f32.mrb[120].mxu0 }
 0x2e6   : > { %v7142_v33 = vpack.c.bf16 %v7902_v32, %v7902_v32  ;;  %v7918_v34 = vpop.f32.mrb[120].mxu1  ;;  %v4698_v35 = vpop.f32.mrb[121].mxu0 }
 0x2e7   : > { %v7150_v36 = vpack.c.bf16 %v7918_v34, %v7918_v34  ;;  %v7140_v37 = vpack.c.bf16 %v4698_v35, %v4698_v35  ;;  %v4827_v38 = vpop.f32.mrb[121].mxu1  ;;  %v7903_v39 = vpop.f32.mrb[122].mxu0 }
 0x2e8   : > { %6125 = vst.msk [vmem:[%s8712_s23 + $0x3c8] sm:$0xf] %vm5882_vm1, %v7142_v33  ;;  %v7148_v40 = vpack.c.bf16 %v4827_v38, %v4827_v38  ;;  %v7143_v41 = vpack.c.bf16 %v7903_v39, %v7903_v39  ;;  %v7919_v42 = vpop.f32.mrb[122].mxu1  ;;  %v4701_v43 = vpop.f32.mrb[123].mxu0 }
 0x2e9   : > { %6133 = vst.msk [vmem:[%s8712_s23 + $0x3e8] sm:$0xf] %vm5882_vm1, %v7150_v36  ;;  %6123 = vst.msk [vmem:[%s8712_s23 + $0x3c0] sm:$0xf] %vm5882_vm1, %v7140_v37  ;;  %v7151_v44 = vpack.c.bf16 %v7919_v42, %v7919_v42  ;;  %v7141_v45 = vpack.c.bf16 %v4701_v43, %v4701_v43  ;;  %v4830_v46 = vpop.f32.mrb[123].mxu1 }
 0x2ea   : > { %6131 = vst.msk [vmem:[%s8712_s23 + $0x3e0] sm:$0xf] %vm5882_vm1, %v7148_v40  ;;  %6126 = vst.msk [vmem:[%s8712_s23 + $0x3cc] sm:$0xf] %vm5882_vm1, %v7143_v41  ;;  %v7149_v47 = vpack.c.bf16 %v4830_v46, %v4830_v46 }
 0x2eb   : > { %6134 = vst.msk [vmem:[%s8712_s23 + $0x3ec] sm:$0xf] %vm5882_vm1, %v7151_v44  ;;  %6124 = vst.msk [vmem:[%s8712_s23 + $0x3c4] sm:$0xf] %vm5882_vm1, %v7141_v45 }
 0x2ec   : > { %6132 = vst.msk [vmem:[%s8712_s23 + $0x3e4] sm:$0xf] %vm5882_vm1, %v7149_v47 }
 0x2ed   : > { %v7906_v48 = vpop.f32.mrb[124].mxu0 }
 0x2ee   : > { %v7146_v49 = vpack.c.bf16 %v7906_v48, %v7906_v48  ;;  %v7922_v50 = vpop.f32.mrb[124].mxu1  ;;  %v4714_v51 = vpop.f32.mrb[125].mxu0 }
 0x2ef   : > { %v7154_v52 = vpack.c.bf16 %v7922_v50, %v7922_v50  ;;  %v7144_v53 = vpack.c.bf16 %v4714_v51, %v4714_v51  ;;  %v4843_v54 = vpop.f32.mrb[125].mxu1  ;;  %v7907_v55 = vpop.f32.mrb[126].mxu0 }
 0x2f0   : > { %6129 = vst.msk [vmem:[%s8712_s23 + $0x3d8] sm:$0xf] %vm5882_vm1, %v7146_v49  ;;  %v7152_v56 = vpack.c.bf16 %v4843_v54, %v4843_v54  ;;  %v7147_v57 = vpack.c.bf16 %v7907_v55, %v7907_v55  ;;  %v7923_v58 = vpop.f32.mrb[126].mxu1  ;;  %v4717_v59 = vpop.f32.mrb[127].mxu0 }
 0x2f1   : > { %6137 = vst.msk [vmem:[%s8712_s23 + $0x3f8] sm:$0xf] %vm5882_vm1, %v7154_v52  ;;  %6127 = vst.msk [vmem:[%s8712_s23 + $0x3d0] sm:$0xf] %vm5882_vm1, %v7144_v53  ;;  %v7155_v60 = vpack.c.bf16 %v7923_v58, %v7923_v58  ;;  %v7145_v61 = vpack.c.bf16 %v4717_v59, %v4717_v59  ;;  %v4846_v62 = vpop.f32.mrb[127].mxu1 }
 0x2f2   : > { %6135 = vst.msk [vmem:[%s8712_s23 + $0x3f0] sm:$0xf] %vm5882_vm1, %v7152_v56  ;;  %6130 = vst.msk [vmem:[%s8712_s23 + $0x3dc] sm:$0xf] %vm5882_vm1, %v7147_v57  ;;  %v7153_v63 = vpack.c.bf16 %v4846_v62, %v4846_v62 }
 0x2f3   : > { %6138 = vst.msk [vmem:[%s8712_s23 + $0x3fc] sm:$0xf] %vm5882_vm1, %v7155_v60  ;;  %6128 = vst.msk [vmem:[%s8712_s23 + $0x3d4] sm:$0xf] %vm5882_vm1, %v7145_v61 }
 0x2f4   : > { %6136 = vst.msk [vmem:[%s8712_s23 + $0x3f4] sm:$0xf] %vm5882_vm1, %v7153_v63 }
 0x2f5 PF: > { %s12_s11 = sadd.s32 1, %s8354_s11   ;;  %s9573_s9 = smov %s8350_s10 }
 0x2f6   : > { %p9_p5 = scmp.ge.s32.totalorder %s12_s11, 6   ;;  %s9574_s10 = smov %s9576_s12 }
 0x2f8   :  { %11 = sbr.rel (!%p9_p5) target bundleno = 2 (0x2), region = 61 }

// kernel: triangle_multiplication.5
= control target key start
LH: loop header
LB: loop body
LE: loop exit
PB: predicated region body
PF: predicated region fallthrough
CT: control target
= control target key end

     0   :  { %11 = vsyncpa [#allocation4], 0  ;;  %s3988_s0 = inlined_call_operand.vmem [shape: bf16[128,4096], index: 0, kind: input, shape index: {}]   ;;  %s3989_s1 = inlined_call_operand.vmem [shape: bf16[4096,128], index: 1, kind: input, shape index: {}]   ;;  %s3990_s2 = inlined_call_operand.vmem [shape: f32[128,1], index: 2, kind: input, shape index: {}]   ;;  %s3991_s3 = inlined_call_operand.vmem [shape: f32[128,1], index: 3, kind: input, shape index: {}]   ;;  %s3992_s4 = inlined_call_operand.vmem [shape: bf16[128,128], index: 4, kind: input, shape index: {}]   ;;  %s3993_s5 = inlined_call_operand.vmem [shape: f32[1,128], index: 5, kind: input, shape index: {}]   ;;  %s3994_s6 = inlined_call_operand.hbm [shape: f32[4096,128], index: 6, kind: output, shape index: {}]  }
   0x1   :  { %13 = vsyncpa [#allocation4 + $0x1], 0  ;;  %s2441_s21 = smov 0   ;;  %s2443_s22 = smov 0  }
   0x2   :  { %s2445_s23 = smov 0   ;;  %s2447_s24 = smov 0  }
   0x3 LB: > { %s2462_s25 = sadd.s32 4294967295, %s2400_s24   ;;  %s1956_s26 = sadd.s32 4294967294, %s2400_s24   ;;  %s2400_s24 = sphi %s2447_s24, %s4252_s24   ;;  %s2396_s23 = sphi %s2445_s23, %s4251_s23   ;;  %s2392_s22 = sphi %s2443_s22, %s4250_s22   ;;  %s2388_s21 = sphi %s2441_s21, %s4249_s21  }
   0x4   : > { %s2466_s27 = sadd.s32 1, %s2400_s24   ;;  %s26_s28 = sadd.s32 1, %s2396_s23 }
   0x5   : > { %s23_s29 = ssub.s32 %s2400_s24, %s2466_s27  ;;  %p33_p0 = scmp.ne.s32.totalorder %s2396_s23, %s2392_s22 }
   0x6   : > { %p24_p1 = scmp.eq.s32.totalorder %s23_s29, 0  ;;  %p34_p2 = scmp.eq.s32.totalorder %s2400_s24, 0 }
   0x7   : > { %p173_p3 = scmp.eq.s32.totalorder %s2462_s25, 7  ;;  %p178_p4 = scmp.ne.s32.totalorder %s2392_s22, %s2388_s21 }
   0x8   : > { %s2478_s30 = scalar_select %p24_p1, %s2396_s23, %s26_s28  }
   0x9   : > { %p35_p5 = por %p34_p2, %p33_p0  ;;  %p2480_p6 = por %p173_p3, %p33_p0 }
   0xa   : > { %p179_p7 = scmp.eq.s32.totalorder %s1956_s26, 7  ;;  %p1958_p9 = scmp.ge.s32.totalorder %s2400_s24, 8 }
   0xc   : > { %p2484_p8 = por %p179_p7, %p178_p4  ;;  %207 = sbr.rel (%p1958_p9) target bundleno = 39 (0x27), region = 32 }
  0x13   : > { %210 = sbr.rel (!%p35_p5) target bundleno = 39 (0x27), region = 36  ;;  %s212_s9 = sand.u32 (%p35_p5), 1, %s2396_s23  }
  0x14   : > { %s1981_s10 = sshll.u32 (%p35_p5), %s2400_s24, 4  ;;  %s1959_s11 = sshll.u32 (%p35_p5), %s212_s9, 8 }
  0x15   : > { %s2494_s14 = scalar_lea.vmem (%p35_p5), %s3988_s0, %s1981_s10  ;;  %s2499_s15 = scalar_lea.vmem (%p35_p5), [#allocation2], %s1959_s11 }
  0x16   : > { %v230_v0 = vld [vmem:[%s2494_s14] sm:$0xff] (%p35_p5)  ;;  %v232_v1 = vld [vmem:[%s2494_s14 + $0x8] sm:$0xff] (%p35_p5) }
  0x17   : > { %v234_v2 = vld [vmem:[%s2494_s14 + $0x80] sm:$0xff] (%p35_p5)  ;;  %231 = vst [vmem:[%s2499_s15] sm:$0xff] (%p35_p5), %v230_v0  ;;  %233 = vst [vmem:[%s2499_s15 + $0x8] sm:$0xff] (%p35_p5), %v232_v1  ;;  %v236_v3 = vld [vmem:[%s2494_s14 + $0x88] sm:$0xff] (%p35_p5) }
  0x18   : > { %235 = vst [vmem:[%s2499_s15 + $0x10] sm:$0xff] (%p35_p5), %v234_v2  ;;  %v238_v4 = vld [vmem:[%s2494_s14 + $0x100] sm:$0xff] (%p35_p5)  ;;  %v240_v5 = vld [vmem:[%s2494_s14 + $0x108] sm:$0xff] (%p35_p5)  ;;  %237 = vst [vmem:[%s2499_s15 + $0x18] sm:$0xff] (%p35_p5), %v236_v3 }
  0x19   : > { %239 = vst [vmem:[%s2499_s15 + $0x20] sm:$0xff] (%p35_p5), %v238_v4  ;;  %241 = vst [vmem:[%s2499_s15 + $0x28] sm:$0xff] (%p35_p5), %v240_v5  ;;  %v242_v6 = vld [vmem:[%s2494_s14 + $0x180] sm:$0xff] (%p35_p5)  ;;  %v244_v7 = vld [vmem:[%s2494_s14 + $0x188] sm:$0xff] (%p35_p5) }
  0x1a   : > { %v246_v8 = vld [vmem:[%s2494_s14 + $0x200] sm:$0xff]  ;;  %243 = vst [vmem:[%s2499_s15 + $0x30] sm:$0xff] %v242_v6  ;;  %245 = vst [vmem:[%s2499_s15 + $0x38] sm:$0xff] %v244_v7  ;;  %v248_v9 = vld [vmem:[%s2494_s14 + $0x208] sm:$0xff] }
  0x1b   : > { %247 = vst [vmem:[%s2499_s15 + $0x40] sm:$0xff] %v246_v8  ;;  %v250_v10 = vld [vmem:[%s2494_s14 + $0x280] sm:$0xff]  ;;  %v252_v11 = vld [vmem:[%s2494_s14 + $0x288] sm:$0xff]  ;;  %249 = vst [vmem:[%s2499_s15 + $0x48] sm:$0xff] %v248_v9 }
  0x1c   : > { %251 = vst [vmem:[%s2499_s15 + $0x50] sm:$0xff] %v250_v10  ;;  %253 = vst [vmem:[%s2499_s15 + $0x58] sm:$0xff] %v252_v11  ;;  %v254_v12 = vld [vmem:[%s2494_s14 + $0x300] sm:$0xff]  ;;  %v256_v13 = vld [vmem:[%s2494_s14 + $0x308] sm:$0xff] }
  0x1d   : > { %v258_v14 = vld [vmem:[%s2494_s14 + $0x380] sm:$0xff]  ;;  %255 = vst [vmem:[%s2499_s15 + $0x60] sm:$0xff] %v254_v12  ;;  %257 = vst [vmem:[%s2499_s15 + $0x68] sm:$0xff] %v256_v13  ;;  %v260_v15 = vld [vmem:[%s2494_s14 + $0x388] sm:$0xff] }
  0x1e   : > { %259 = vst [vmem:[%s2499_s15 + $0x70] sm:$0xff] %v258_v14  ;;  %v262_v16 = vld [vmem:[%s2494_s14 + $0x400] sm:$0xff]  ;;  %v264_v17 = vld [vmem:[%s2494_s14 + $0x408] sm:$0xff]  ;;  %261 = vst [vmem:[%s2499_s15 + $0x78] sm:$0xff] %v260_v15 }
  0x1f   : > { %263 = vst [vmem:[%s2499_s15 + $0x80] sm:$0xff] %v262_v16  ;;  %265 = vst [vmem:[%s2499_s15 + $0x88] sm:$0xff] %v264_v17  ;;  %v266_v18 = vld [vmem:[%s2494_s14 + $0x480] sm:$0xff]  ;;  %v268_v19 = vld [vmem:[%s2494_s14 + $0x488] sm:$0xff] }
  0x20   : > { %v270_v20 = vld [vmem:[%s2494_s14 + $0x500] sm:$0xff]  ;;  %267 = vst [vmem:[%s2499_s15 + $0x90] sm:$0xff] %v266_v18  ;;  %269 = vst [vmem:[%s2499_s15 + $0x98] sm:$0xff] %v268_v19  ;;  %v272_v21 = vld [vmem:[%s2494_s14 + $0x508] sm:$0xff] }
  0x21   : > { %271 = vst [vmem:[%s2499_s15 + $0xa0] sm:$0xff] %v270_v20  ;;  %v274_v22 = vld [vmem:[%s2494_s14 + $0x580] sm:$0xff]  ;;  %v276_v23 = vld [vmem:[%s2494_s14 + $0x588] sm:$0xff]  ;;  %273 = vst [vmem:[%s2499_s15 + $0xa8] sm:$0xff] %v272_v21 }
  0x22   : > { %275 = vst [vmem:[%s2499_s15 + $0xb0] sm:$0xff] %v274_v22  ;;  %277 = vst [vmem:[%s2499_s15 + $0xb8] sm:$0xff] %v276_v23  ;;  %v278_v24 = vld [vmem:[%s2494_s14 + $0x600] sm:$0xff]  ;;  %v280_v25 = vld [vmem:[%s2494_s14 + $0x608] sm:$0xff] }
  0x23   : > { %v282_v26 = vld [vmem:[%s2494_s14 + $0x680] sm:$0xff]  ;;  %279 = vst [vmem:[%s2499_s15 + $0xc0] sm:$0xff] %v278_v24  ;;  %281 = vst [vmem:[%s2499_s15 + $0xc8] sm:$0xff] %v280_v25  ;;  %v284_v27 = vld [vmem:[%s2494_s14 + $0x688] sm:$0xff] }
  0x24   : > { %283 = vst [vmem:[%s2499_s15 + $0xd0] sm:$0xff] %v282_v26  ;;  %v286_v28 = vld [vmem:[%s2494_s14 + $0x700] sm:$0xff]  ;;  %v288_v29 = vld [vmem:[%s2494_s14 + $0x708] sm:$0xff]  ;;  %285 = vst [vmem:[%s2499_s15 + $0xd8] sm:$0xff] %v284_v27 }
  0x25   : > { %287 = vst [vmem:[%s2499_s15 + $0xe0] sm:$0xff] %v286_v28  ;;  %289 = vst [vmem:[%s2499_s15 + $0xe8] sm:$0xff] %v288_v29  ;;  %v290_v30 = vld [vmem:[%s2494_s14 + $0x780] sm:$0xff]  ;;  %v292_v31 = vld [vmem:[%s2494_s14 + $0x788] sm:$0xff] }
  0x26   : > { %291 = vst [vmem:[%s2499_s15 + $0xf0] sm:$0xff] %v290_v30  ;;  %293 = vst [vmem:[%s2499_s15 + $0xf8] sm:$0xff] %v292_v31 }
  0x27 PF: > { %p1962_p10 = scmp.ge.s32.totalorder %s2400_s24, 1  ;;  %p307_p11 = scmp.lt.s32.totalorder %s2400_s24, 9 }
  0x29   : > { %p308_p12 = pnand %p1962_p10, %p307_p11 }
  0x2b   : > { %311 = sbr.rel (%p308_p12) target bundleno = 614 (0x266), region = 63 }
  0x32   : > { %v832_v32 = vld [vmem:[%s3990_s2 + $0x10] sm:$0xff]  ;;  %v830_v33 = vld [vmem:[%s3990_s2] sm:$0xff]  ;;  %v2402_v34 = vmov 0   ;;  %v833_v35 = vld [vmem:[%s3990_s2 + $0x18] sm:$0xff]  ;;  %s2583_s13 = sand.u32 1, %s2392_s22   ;;  %s1965_s16 = sshll.u32 %s2462_s25, 6 }
  0x33   : > { %2321 = vset.pattern.permute.xlu1 %v2402_v34  ;;  %2320 = vset.pattern.permute.xlu0 %v2402_v34  ;;  %v831_v36 = vld [vmem:[%s3990_s2 + $0x8] sm:$0xff]  ;;  %v990_v38 = vld [vmem:[%s3991_s3] sm:$0xff]  ;;  %s1963_s18 = sshll.u32 %s2583_s13, 8  ;;  %v993_v41 = vld [vmem:[%s3991_s3 + $0x18] sm:$0xff]  ;;  %p350_p13 = scmp.lt.s32.totalorder %s1965_s16, 511 }
  0x34   : > { %858 = vperm.xlu1 %2321, %v832_v32   ;;  %848 = vperm.xlu0 %2320, %v830_v33   ;;  %v991_v37 = vld [vmem:[%s3991_s3 + $0x8] sm:$0xff]  ;;  %v834_v40 = vld [vmem:[%s3990_s2 + $0x20] sm:$0xff]  ;;  %v992_v42 = vld [vmem:[%s3991_s3 + $0x10] sm:$0xff]  ;;  %s2604_s12 = scalar_lea.vmem [#allocation2], %s1963_s18  ;;  %s1964_s28 = sshll.u32 %s2583_s13, 9 }
  0x35   : > { %v835_v39 = vld [vmem:[%s3990_s2 + $0x28] sm:$0xff]  ;;  %v837_v43 = vld [vmem:[%s3990_s2 + $0x38] sm:$0xff]  ;;  %v836_v44 = vld [vmem:[%s3990_s2 + $0x30] sm:$0xff]  ;;  %s4254_s16 = smov (!%p350_p13, %s1965_s16), 511  ;;  %s3790_s29 = scalar_lea.vmem [#allocation3], %s1964_s28 }
  0x36   : > { %v2607_v45 = vld [vmem:[%s2604_s12] sm:$0xff]  ;;  %v2610_v46 = vld [vmem:[%s2604_s12 + $0x8] sm:$0xff]  ;;  %v2613_v47 = vld [vmem:[%s2604_s12 + $0x10] sm:$0xff]  ;;  %s1966_s17 = sshll.u32 %s4254_s16, 2  ;;  %s1982_s9 = sshll.u32 %s2462_s25, 13 }
  0x37   : > { %v2616_v48 = vld [vmem:[%s2604_s12 + $0x18] sm:$0xff]  ;;  %v2619_v49 = vld [vmem:[%s2604_s12 + $0x20] sm:$0xff]  ;;  %v995_v50 = vld [vmem:[%s3991_s3 + $0x28] sm:$0xff]  ;;  %v389_v55 = vunpack.c.l.bf16 %v2607_v45  ;;  %v390_v56 = vunpack.c.h.bf16 %v2607_v45  ;;  %v4054_v57 = vunpack.c.l.bf16 %v2613_v47  ;;  %v4053_v58 = vunpack.c.h.bf16 %v2613_v47  ;;  %s1876_s10 = sshll.u32 %s3790_s29, 4  ;;  %s3937_s14 = scalar_lea.hbm %s3994_s6, %s1982_s9  ;;  %s3939_s10 = int_to_ptr.vmem [resolvable:$true] %s1876_s10 }
  0x38   : > { %863 = vperm.xlu1 %2321, %v833_v35   ;;  %853 = vperm.xlu0 %2320, %v831_v36   ;;  %v994_v51 = vld [vmem:[%s3991_s3 + $0x20] sm:$0xff]  ;;  %v2628_v52 = vld [vmem:[%s2604_s12 + $0x28] sm:$0xff]  ;;  %v2631_v53 = vld [vmem:[%s2604_s12 + $0x30] sm:$0xff]  ;;  %v391_v59 = vunpack.c.l.bf16 %v2610_v46  ;;  %v392_v60 = vunpack.c.h.bf16 %v2610_v46  ;;  %v4052_v61 = vunpack.c.l.bf16 %v2616_v48  ;;  %v4050_v62 = vunpack.c.h.bf16 %v2616_v48  ;;  %s1863_s15 = scalar_lea.sflag [#allocation4], %s2583_s13  ;;  %s2338_s16 = scalar_lea.vmem %s3939_s10, 8192 }
  0x39   : > { %v2634_v54 = vld [vmem:[%s2604_s12 + $0x38] sm:$0xff]  ;;  %v4048_v63 = vunpack.c.l.bf16 %v2619_v49  ;;  %v4047_v0 = vunpack.c.h.bf16 %v2619_v49  ;;  %v2647_v1 = vld [vmem:[%s2604_s12 + $0x40] sm:$0xff]  ;;  %v4046_v2 = vunpack.c.l.bf16 %v2628_v52  ;;  %v4029_v3 = vunpack.c.h.bf16 %v2628_v52  ;;  %v839_v4 = vld [vmem:[%s3990_s2 + $0x48] sm:$0xff]  ;;  %p2339_p0 = scmp.ne.s32.totalorder %s3939_s10, %s2338_s16 }
  0x3a   : > { %v838_v5 = vld [vmem:[%s3990_s2 + $0x40] sm:$0xff]  ;;  %v2658_v6 = vld [vmem:[%s2604_s12 + $0x48] sm:$0xff]  ;;  %v4026_v7 = vunpack.c.l.bf16 %v2631_v53  ;;  %v4021_v8 = vunpack.c.h.bf16 %v2631_v53  ;;  %v453_v9 = vadd.f32 %v4054_v57, %v389_v55  ;;  %v474_v10 = vadd.f32 %v4053_v58, %v390_v56  ;;  %v2671_v11 = vld [vmem:[%s2604_s12 + $0x50] sm:$0xff] }
  0x3b   : > { %v4016_v12 = vunpack.c.l.bf16 %v2634_v54  ;;  %v4015_v13 = vunpack.c.h.bf16 %v2634_v54  ;;  %v495_v14 = vadd.f32 %v4052_v61, %v391_v59  ;;  %v516_v15 = vadd.f32 %v4050_v62, %v392_v60  ;;  %v2684_v16 = vld [vmem:[%s2604_s12 + $0x58] sm:$0xff]  ;;  %v2693_v21 = vld [vmem:[%s2604_s12 + $0x60] sm:$0xff]  ;;  %v996_v27 = vld [vmem:[%s3991_s3 + $0x30] sm:$0xff]  ;;  %p2340_p1 = pnand %p2339_p0, %p2480_p6 }
  0x3c   : > { %1013 = vperm.xlu1 %2321, %v991_v37   ;;  %1008 = vperm.xlu0 %2320, %v990_v38   ;;  %v4014_v17 = vunpack.c.l.bf16 %v2647_v1  ;;  %v4009_v18 = vunpack.c.h.bf16 %v2647_v1  ;;  %v454_v19 = vadd.f32 %v453_v9, %v4048_v63  ;;  %v475_v20 = vadd.f32 %v474_v10, %v4047_v0  ;;  %v997_v26 = vld [vmem:[%s3991_s3 + $0x38] sm:$0xff]  ;;  %v2708_v28 = vld [vmem:[%s2604_s12 + $0x68] sm:$0xff]  ;;  %v2717_v33 = vld [vmem:[%s2604_s12 + $0x70] sm:$0xff] }
  0x3d   : > { %v4004_v22 = vunpack.c.l.bf16 %v2658_v6  ;;  %v4003_v23 = vunpack.c.h.bf16 %v2658_v6  ;;  %v496_v24 = vadd.f32 %v495_v14, %v4046_v2  ;;  %v517_v25 = vadd.f32 %v516_v15, %v4029_v3  ;;  %v2726_v38 = vld [vmem:[%s2604_s12 + $0x78] sm:$0xff]  ;;  %v840_v9 = vld [vmem:[%s3990_s2 + $0x50] sm:$0xff]  ;;  %v2750_v10 = vld [vmem:[%s2604_s12 + $0x88] sm:$0xff]  ;;  %p2341_p2 = pneg %p2340_p1 }
  0x3e   : > { %v4002_v29 = vunpack.c.l.bf16 %v2671_v11  ;;  %v3997_v30 = vunpack.c.h.bf16 %v2671_v11  ;;  %v455_v31 = vadd.f32 %v454_v19, %v4026_v7  ;;  %v476_v32 = vadd.f32 %v475_v20, %v4021_v8  ;;  %v1001_v8 = vld [vmem:[%s3991_s3 + $0x58] sm:$0xff] }
  0x3f   : > { %v3995_v34 = vunpack.c.l.bf16 %v2684_v16  ;;  %v3996_v35 = vunpack.c.h.bf16 %v2684_v16  ;;  %v497_v36 = vadd.f32 %v496_v24, %v4016_v12  ;;  %v518_v37 = vadd.f32 %v517_v25, %v4015_v13  ;;  %v2759_v24 = vld [vmem:[%s2604_s12 + $0x90] sm:$0xff]  ;;  %v2852_v12 = vld [vmem:[%s2604_s12 + $0xd8] sm:$0xff] }
  0x40   : > { %873 = vperm.xlu1 %2321, %v835_v39   ;;  %868 = vperm.xlu0 %2320, %v834_v40   ;;  %v4001_v39 = vunpack.c.l.bf16 %v2693_v21  ;;  %v3998_v40 = vunpack.c.h.bf16 %v2693_v21  ;;  %v4005_v14 = vunpack.c.l.bf16 %v2717_v33  ;;  %v4006_v15 = vunpack.c.h.bf16 %v2717_v33 }
  0x41   : > { %v4007_v25 = vunpack.c.l.bf16 %v2726_v38  ;;  %v4109_v45 = vunpack.c.h.bf16 %v2613_v47  ;;  %v4113_v46 = vunpack.c.h.bf16 %v2616_v48 }
  0x44   : > { %1023 = vperm.xlu1 %2321, %v993_v41   ;;  %1018 = vperm.xlu0 %2320, %v992_v42   ;;  %v456_v41 = vadd.f32 %v455_v31, %v4014_v17  ;;  %v477_v42 = vadd.f32 %v476_v32, %v4009_v18  ;;  %v2768_v32 = vld [vmem:[%s2604_s12 + $0x98] sm:$0xff] }
  0x46   : > { %v457_v19 = vadd.f32 %v456_v41, %v4002_v29  ;;  %v478_v20 = vadd.f32 %v477_v42, %v3997_v30 }
  0x48   : > { %883 = vperm.xlu1 %2321, %v837_v43   ;;  %878 = vperm.xlu0 %2320, %v836_v44   ;;  %v2735_v43 = vld [vmem:[%s2604_s12 + $0x80] sm:$0xff]  ;;  %v4000_v44 = vunpack.c.l.bf16 %v2708_v28  ;;  %v458_v41 = vadd.f32 %v457_v19, %v4001_v39  ;;  %v479_v42 = vadd.f32 %v478_v20, %v3998_v40  ;;  %v999_v19 = vld [vmem:[%s3991_s3 + $0x48] sm:$0xff]  ;;  %v4017_v20 = vunpack.c.l.bf16 %v2759_v24 }
  0x49   : > { %v4018_v40 = vunpack.c.h.bf16 %v2759_v24  ;;  %v4020_v39 = vunpack.c.h.bf16 %v2768_v32 }
  0x4c   : > { %1033 = vperm.xlu1 %2321, %v995_v50   ;;  %1028 = vperm.xlu0 %2320, %v994_v51   ;;  %v3999_v50 = vunpack.c.h.bf16 %v2708_v28  ;;  %v498_v51 = vadd.f32 %v497_v36, %v4004_v22  ;;  %v4013_v36 = vunpack.c.l.bf16 %v2735_v43  ;;  %v2810_v22 = vld [vmem:[%s2604_s12 + $0xb8] sm:$0xff] }
  0x50   : > { %893 = vperm.xlu1 %2321, %v839_v4   ;;  %888 = vperm.xlu0 %2320, %v838_v5   ;;  %v519_v4 = vadd.f32 %v518_v37, %v4003_v23  ;;  %v841_v5 = vld [vmem:[%s3990_s2 + $0x58] sm:$0xff]  ;;  %v4010_v37 = vunpack.c.h.bf16 %v2735_v43 }
  0x52   : > { %v520_v31 = vadd.f32 %v519_v4, %v3996_v35  ;;  %v4011_v4 = vunpack.c.h.bf16 %v2750_v10 }
  0x54   : > { %1043 = vperm.xlu1 %2321, %v997_v26   ;;  %1038 = vperm.xlu0 %2320, %v996_v27   ;;  %v4008_v26 = vunpack.c.h.bf16 %v2726_v38  ;;  %v499_v27 = vadd.f32 %v498_v51, %v3995_v34  ;;  %v2777_v51 = vld [vmem:[%s2604_s12 + $0xa0] sm:$0xff]  ;;  %v4012_v34 = vunpack.c.l.bf16 %v2750_v10  ;;  %v521_v30 = vadd.f32 %v520_v31, %v3999_v50  ;;  %v2801_v50 = vld [vmem:[%s2604_s12 + $0xb0] sm:$0xff] }
  0x55   : > { %v480_v31 = vadd.f32 %v479_v42, %v4006_v15 }
  0x56   : > { %v500_v35 = vadd.f32 %v499_v27, %v4000_v44  ;;  %v459_v27 = vadd.f32 %v458_v41, %v4005_v14  ;;  %v4019_v44 = vunpack.c.l.bf16 %v2768_v32  ;;  %v522_v23 = vadd.f32 %v521_v30, %v4008_v26 }
  0x57   : > { %v4025_v41 = vunpack.c.l.bf16 %v2777_v51  ;;  %v4023_v14 = vunpack.c.h.bf16 %v2777_v51  ;;  %v481_v15 = vadd.f32 %v480_v31, %v4010_v37  ;;  %v4028_v31 = vunpack.c.l.bf16 %v2801_v50 }
  0x58   : > { %903 = vperm.xlu1 %2321, %v841_v5   ;;  %898 = vperm.xlu0 %2320, %v840_v9   ;;  %v998_v5 = vld [vmem:[%s3991_s3 + $0x40] sm:$0xff]  ;;  %v2792_v9 = vld [vmem:[%s2604_s12 + $0xa8] sm:$0xff]  ;;  %v501_v29 = vadd.f32 %v500_v35, %v4007_v25  ;;  %v460_v42 = vadd.f32 %v459_v27, %v4013_v36  ;;  %v523_v18 = vadd.f32 %v522_v23, %v4011_v4  ;;  %v4027_v37 = vunpack.c.h.bf16 %v2801_v50  ;;  %v2843_v4 = vld [vmem:[%s2604_s12 + $0xd0] sm:$0xff] }
  0x59   : > { %v2819_v35 = vld [vmem:[%s2604_s12 + $0xc0] sm:$0xff]  ;;  %v4024_v25 = vunpack.c.l.bf16 %v2792_v9  ;;  %v4022_v30 = vunpack.c.h.bf16 %v2792_v9  ;;  %v843_v27 = vld [vmem:[%s3990_s2 + $0x68] sm:$0xff]  ;;  %v482_v23 = vadd.f32 %v481_v15, %v4018_v40  ;;  %v4032_v36 = vunpack.c.h.bf16 %v2810_v22 }
  0x5a   : > { %v502_v26 = vadd.f32 %v501_v29, %v4012_v34  ;;  %v461_v29 = vadd.f32 %v460_v42, %v4017_v20  ;;  %v4045_v34 = vunpack.c.l.bf16 %v2810_v22  ;;  %v524_v13 = vadd.f32 %v523_v18, %v4020_v39 }
  0x5b   : > { %v4034_v42 = vunpack.c.l.bf16 %v2819_v35  ;;  %v4031_v20 = vunpack.c.h.bf16 %v2819_v35  ;;  %v483_v40 = vadd.f32 %v482_v23, %v4023_v14  ;;  %v4035_v23 = vunpack.c.h.bf16 %v2843_v4 }
  0x5c   : > { %1053 = vperm.xlu1 %2321, %v999_v19   ;;  %1048 = vperm.xlu0 %2320, %v998_v5   ;;  %v842_v19 = vld [vmem:[%s3990_s2 + $0x60] sm:$0xff]  ;;  %v2834_v5 = vld [vmem:[%s2604_s12 + $0xc8] sm:$0xff]  ;;  %v503_v17 = vadd.f32 %v502_v26, %v4019_v44  ;;  %v462_v15 = vadd.f32 %v461_v29, %v4025_v41  ;;  %v525_v39 = vadd.f32 %v524_v13, %v4022_v30  ;;  %v1000_v29 = vld [vmem:[%s3991_s3 + $0x50] sm:$0xff]  ;;  %v4043_v14 = vunpack.c.l.bf16 %v2852_v12 }
  0x5d   : > { %v4033_v26 = vunpack.c.l.bf16 %v2834_v5  ;;  %v4030_v44 = vunpack.c.h.bf16 %v2834_v5  ;;  %v484_v13 = vadd.f32 %v483_v40, %v4027_v37  ;;  %v2882_v30 = vld [vmem:[%s2604_s12 + $0xe8] sm:$0xff] }
  0x5e   : > { %v504_v18 = vadd.f32 %v503_v17, %v4024_v25  ;;  %v463_v17 = vadd.f32 %v462_v15, %v4028_v31  ;;  %v4037_v25 = vunpack.c.h.bf16 %v2852_v12  ;;  %v526_v7 = vadd.f32 %v525_v39, %v4032_v36  ;;  %v845_v39 = vld [vmem:[%s3990_s2 + $0x78] sm:$0xff] }
  0x5f   : > { %v485_v40 = vadd.f32 %v484_v13, %v4031_v20  ;;  %v4040_v13 = vunpack.c.h.bf16 %v2882_v30 }
  0x60   : > { %913 = vperm.xlu1 %2321, %v843_v27   ;;  %908 = vperm.xlu0 %2320, %v842_v19   ;;  %v2873_v27 = vld [vmem:[%s2604_s12 + $0xe0] sm:$0xff]  ;;  %v4044_v19 = vunpack.c.l.bf16 %v2843_v4  ;;  %v505_v41 = vadd.f32 %v504_v18, %v4045_v34  ;;  %v464_v15 = vadd.f32 %v463_v17, %v4034_v42  ;;  %v527_v18 = vadd.f32 %v526_v7, %v4030_v44  ;;  %v844_v17 = vld [vmem:[%s3990_s2 + $0x70] sm:$0xff]  ;;  %v2916_v44 = vld [vmem:[%s2604_s12 + $0xf8] sm:$0xff] }
  0x61   : > { %v4038_v37 = vunpack.c.l.bf16 %v2873_v27  ;;  %v4036_v31 = vunpack.c.h.bf16 %v2873_v27  ;;  %v486_v7 = vadd.f32 %v485_v40, %v4035_v23  ;;  %v1003_v23 = vld [vmem:[%s3991_s3 + $0x68] sm:$0xff] }
  0x62   : > { %v506_v3 = vadd.f32 %v505_v41, %v4033_v26  ;;  %v465_v41 = vadd.f32 %v464_v15, %v4044_v19  ;;  %v528_v36 = vadd.f32 %v527_v18, %v4037_v25  ;;  %v4049_v18 = vunpack.c.l.bf16 %v2916_v44  ;;  %v1005_v25 = vld [vmem:[%s3991_s3 + $0x78] sm:$0xff] }
  0x63   : > { %v487_v40 = vadd.f32 %v486_v7, %v4036_v31 }
  0x64   : > { %1063 = vperm.xlu1 %2321, %v1001_v8   ;;  %1058 = vperm.xlu0 %2320, %v1000_v29   ;;  %v2907_v8 = vld [vmem:[%s2604_s12 + $0xf0] sm:$0xff]  ;;  %v4042_v29 = vunpack.c.l.bf16 %v2882_v30  ;;  %v507_v20 = vadd.f32 %v506_v3, %v4043_v14  ;;  %v466_v15 = vadd.f32 %v465_v41, %v4038_v37  ;;  %v1002_v3 = vld [vmem:[%s3991_s3 + $0x60] sm:$0xff]  ;;  %v529_v41 = vadd.f32 %v528_v36, %v4040_v13  ;;  %s3766_s12 = scalar_lea.vmem %s3989_s1, %s1966_s17  ;;  %s2403_s17 = smov [#allocation3]  }
  0x65   : > { %v4041_v26 = vunpack.c.l.bf16 %v2907_v8  ;;  %v4039_v42 = vunpack.c.h.bf16 %v2907_v8  ;;  %v1004_v37 = vld [vmem:[%s3991_s3 + $0x70] sm:$0xff]  ;;  %s2342_s18 = sshll.u32 %s2403_s17, 4  ;;  %s2343_s18 = int_to_ptr.vmem [resolvable:$false] %s2342_s18 }
  0x66   : > { %s2344_s19 = scalar_lea.vmem %s2343_s18, 16384  ;;  %p2345_p3 = scmp.lt.s32.totalorder %s3939_s10, %s2343_s18 }
  0x67   : > { %v467_v7 = vadd.f32 %v466_v15, %v4041_v26  ;;  %v488_v31 = vadd.f32 %v487_v40, %v4039_v42  ;;  %p2346_p4 = scmp.lt.s32.totalorder %s2344_s19, %s2338_s16 }
  0x68   : > { %923 = vperm.xlu1 %2321, %v845_v39   ;;  %918 = vperm.xlu0 %2320, %v844_v17   ;;  %v4051_v39 = vunpack.c.h.bf16 %v2916_v44  ;;  %v508_v17 = vadd.f32 %v507_v20, %v4042_v29 }
  0x69   : > { %v489_v15 = vrot.slane %v488_v31, 4  ;;  %p2347_p5 = por %p2346_p4, %p2345_p3 }
  0x6a   : > { %v509_v20 = vadd.f32 %v508_v17, %v4049_v18  ;;  %v530_v36 = vadd.f32 %v529_v41, %v4051_v39 }
  0x6b   : > { %v490_v13 = vadd.f32 %v489_v15, %v488_v31  ;;  %p2348_p7 = pnand %p2347_p5, %p2341_p2 }
  0x6c   : > { %1073 = vperm.xlu1 %2321, %v1003_v23   ;;  %1068 = vperm.xlu0 %2320, %v1002_v3   ;;  %v468_v23 = vrot.slane %v467_v7, 4  ;;  %v510_v3 = vrot.slane %v509_v20, 4  ;;  %v531_v40 = vrot.slane %v530_v36, 4 }
  0x6d   : > { %v491_v19 = vrot.slane %v490_v13, 2 }
  0x6e   : > { %v469_v42 = vadd.f32 %v468_v23, %v467_v7  ;;  %v511_v26 = vadd.f32 %v510_v3, %v509_v20  ;;  %v532_v29 = vadd.f32 %v531_v40, %v530_v36  ;;  %v4130_v3 = vunpack.c.l.bf16 %v2647_v1 }
  0x6f   : > { %v492_v63 = vadd.f32 %v491_v19, %v490_v13 }
  0x70   : > { %1083 = vperm.xlu1 %2321, %v1005_v25   ;;  %1078 = vperm.xlu0 %2320, %v1004_v37   ;;  %v470_v14 = vrot.slane %v469_v42, 2  ;;  %v512_v34 = vrot.slane %v511_v26, 2  ;;  %v533_v2 = vrot.slane %v532_v29, 2 }
  0x71   : > { %v493_v41 = vrot.slane %v492_v63, 1 }
  0x72   : > { %v471_v0 = vadd.f32 %v470_v14, %v469_v42  ;;  %v513_v17 = vadd.f32 %v512_v34, %v511_v26  ;;  %v534_v18 = vadd.f32 %v533_v2, %v532_v29  ;;  %v4119_v42 = vunpack.c.l.bf16 %v2628_v52 }
  0x73   : > { %v494_v61 = vadd.f32 %v493_v41, %v492_v63  ;;  %v4123_v29 = vunpack.c.l.bf16 %v2631_v53  ;;  %v4133_v41 = vunpack.c.l.bf16 %v2658_v6 }
  0x74   : > { %v472_v62 = vrot.slane %v471_v0, 1  ;;  %v514_v25 = vrot.slane %v513_v17, 1  ;;  %v535_v37 = vrot.slane %v534_v18, 1 }
  0x75   : > { %v2956_v31 = vmul.f32 0.0078125, %v494_v61  ;;  %v4111_v61 = vunpack.c.l.bf16 %v2616_v48  ;;  %v4121_v48 = vunpack.c.h.bf16 %v2628_v52  ;;  %v4128_v52 = vunpack.c.h.bf16 %v2634_v54 }
  0x76   : > { %v473_v39 = vadd.f32 %v472_v62, %v471_v0  ;;  %v515_v58 = vadd.f32 %v514_v25, %v513_v17  ;;  %v536_v57 = vadd.f32 %v535_v37, %v534_v18  ;;  %v4115_v0 = vunpack.c.l.bf16 %v2619_v49 }
  0x77   : > { %v2970_v62 = vsub.f32 %v390_v56, %v2956_v31  ;;  %v2990_v56 = vsub.f32 %v4109_v45, %v2956_v31 }
  0x78   : > { %v2954_v7 = vmul.f32 0.0078125, %v473_v39  ;;  %v2958_v20 = vmul.f32 0.0078125, %v515_v58  ;;  %v2960_v36 = vmul.f32 0.0078125, %v536_v57  ;;  %v4107_v58 = vunpack.c.l.bf16 %v2613_v47 }
  0x79   : > { %4104 = vst [vmem:[#allocation7_spill] sm:$0xff] %v2970_v62  ;;  %4110 = vst [vmem:[#allocation11_spill] sm:$0xff] %v2990_v56  ;;  %v4117_v47 = vunpack.c.h.bf16 %v2619_v49  ;;  %v4125_v49 = vunpack.c.h.bf16 %v2631_v53  ;;  %v4127_v39 = vunpack.c.l.bf16 %v2634_v54  ;;  %v4131_v53 = vunpack.c.h.bf16 %v2647_v1 }
  0x7a   : > { %v2965_v2 = vsub.f32 %v389_v55, %v2954_v7  ;;  %v2975_v63 = vsub.f32 %v391_v59, %v2958_v20  ;;  %v2980_v57 = vsub.f32 %v392_v60, %v2960_v36  ;;  %v2985_v55 = vsub.f32 %v4107_v58, %v2954_v7 }
  0x7b   : > { %v2995_v59 = vsub.f32 %v4111_v61, %v2958_v20  ;;  %v3000_v60 = vsub.f32 %v4113_v46, %v2960_v36  ;;  %v3005_v34 = vsub.f32 %v4115_v0, %v2954_v7  ;;  %v3010_v14 = vsub.f32 %v4117_v47, %v2956_v31 }
  0x7c   : > { %4103 = vst [vmem:[#allocation6_spill] sm:$0xff] %v2965_v2  ;;  %4105 = vst [vmem:[#allocation8_spill] sm:$0xff] %v2975_v63  ;;  %v3015_v26 = vsub.f32 %v4119_v42, %v2958_v20  ;;  %v3020_v19 = vsub.f32 %v4121_v48, %v2960_v36  ;;  %v3025_v13 = vsub.f32 %v4123_v29, %v2954_v7  ;;  %v4135_v54 = vunpack.c.h.bf16 %v2658_v6 }
  0x7d   : > { %4106 = vst [vmem:[#allocation9_spill] sm:$0xff] %v2980_v57  ;;  %4108 = vst [vmem:[#allocation10_spill] sm:$0xff] %v2985_v55  ;;  %v3030_v18 = vsub.f32 %v4125_v49, %v2956_v31  ;;  %v3035_v23 = vsub.f32 %v4127_v39, %v2958_v20  ;;  %v3040_v15 = vsub.f32 %v4128_v52, %v2960_v36  ;;  %v4137_v58 = vunpack.c.l.bf16 %v2671_v11 }
  0x7e   : > { %4112 = vst [vmem:[#allocation12_spill] sm:$0xff] %v2995_v59  ;;  %4114 = vst [vmem:[#allocation13_spill] sm:$0xff] %v3000_v60  ;;  %v3045_v40 = vsub.f32 %v4130_v3, %v2954_v7  ;;  %v3050_v17 = vsub.f32 %v4131_v53, %v2956_v31  ;;  %v3055_v25 = vsub.f32 %v4133_v41, %v2958_v20  ;;  %v4138_v1 = vunpack.c.h.bf16 %v2671_v11 }
  0x7f   : > { %4116 = vst [vmem:[#allocation14_spill] sm:$0xff] %v3005_v34  ;;  %4118 = vst [vmem:[#allocation15_spill] sm:$0xff] %v3010_v14  ;;  %v3060_v37 = vsub.f32 %v4135_v54, %v2960_v36  ;;  %v3065_v45 = vsub.f32 %v4137_v58, %v2954_v7  ;;  %v4140_v46 = vunpack.c.l.bf16 %v2684_v16  ;;  %v4141_v6 = vunpack.c.h.bf16 %v2684_v16 }
  0x80   : > { %4120 = vst [vmem:[#allocation16_spill] sm:$0xff] %v3015_v26  ;;  %4122 = vst [vmem:[#allocation17_spill] sm:$0xff] %v3020_v19  ;;  %v3070_v61 = vsub.f32 %v4138_v1, %v2956_v31  ;;  %v4143_v42 = vunpack.c.l.bf16 %v2693_v21  ;;  %v4144_v11 = vunpack.c.h.bf16 %v2693_v21  ;;  %v4146_v49 = vunpack.c.l.bf16 %v2708_v28 }
  0x81   : > { %4124 = vst [vmem:[#allocation18_spill] sm:$0xff] %v3025_v13  ;;  %4126 = vst [vmem:[#allocation19_spill] sm:$0xff] %v3030_v18  ;;  %v3075_v0 = vsub.f32 %v4140_v46, %v2958_v20  ;;  %v3080_v47 = vsub.f32 %v4141_v6, %v2960_v36  ;;  %v4147_v16 = vunpack.c.h.bf16 %v2708_v28  ;;  %v4149_v3 = vunpack.c.l.bf16 %v2717_v33 }
  0x82   : > { %4129 = vst [vmem:[#allocation20_spill] sm:$0xff] %v3040_v15  ;;  %4132 = vst [vmem:[#allocation21_spill] sm:$0xff] %v3050_v17  ;;  %v3085_v48 = vsub.f32 %v4143_v42, %v2954_v7  ;;  %v3090_v29 = vsub.f32 %v4144_v11, %v2956_v31  ;;  %v3095_v39 = vsub.f32 %v4146_v49, %v2958_v20  ;;  %v4150_v21 = vunpack.c.h.bf16 %v2717_v33 }
  0x83   : > { %4134 = vst [vmem:[#allocation22_spill] sm:$0xff] %v3055_v25  ;;  %4136 = vst [vmem:[#allocation23_spill] sm:$0xff] %v3060_v37  ;;  %v3100_v52 = vsub.f32 %v4147_v16, %v2960_v36  ;;  %v3105_v53 = vsub.f32 %v4149_v3, %v2954_v7  ;;  %v606_v54 = vmul.f32 %v2965_v2, %v2965_v2  ;;  %v4152_v11 = vunpack.c.l.bf16 %v2726_v38 }
  0x84   : > { %4139 = vst [vmem:[#allocation24_spill] sm:$0xff] %v3070_v61  ;;  %4142 = vst [vmem:[#allocation25_spill] sm:$0xff] %v3080_v47  ;;  %v3110_v41 = vsub.f32 %v4150_v21, %v2956_v31  ;;  %v607_v58 = vmul.f32 %v2970_v62, %v2970_v62  ;;  %v608_v28 = vmul.f32 %v2975_v63, %v2975_v63  ;;  %v4153_v16 = vunpack.c.h.bf16 %v2726_v38 }
  0x85   : > { %4145 = vst [vmem:[#allocation26_spill] sm:$0xff] %v3090_v29  ;;  %4148 = vst [vmem:[#allocation27_spill] sm:$0xff] %v3100_v52  ;;  %v609_v1 = vmul.f32 %v2980_v57, %v2980_v57  ;;  %v610_v46 = vmul.f32 %v2985_v55, %v2985_v55  ;;  %v611_v33 = vmul.f32 %v2990_v56, %v2990_v56  ;;  %v4155_v21 = vunpack.c.l.bf16 %v2735_v43 }
  0x86   : > { %4151 = vst [vmem:[#allocation28_spill] sm:$0xff] %v3110_v41  ;;  %v612_v6 = vmul.f32 %v2995_v59, %v2995_v59  ;;  %v613_v42 = vmul.f32 %v3000_v60, %v3000_v60  ;;  %v3131_v49 = vsub.f32 %v4152_v11, %v2958_v20  ;;  %v3136_v3 = vsub.f32 %v4153_v16, %v2960_v36 }
  0x87   : > { %v3141_v57 = vsub.f32 %v4155_v21, %v2954_v7  ;;  %v4156_v56 = vunpack.c.h.bf16 %v2735_v43  ;;  %v614_v60 = vmul.f32 %v3005_v34, %v3005_v34  ;;  %v615_v11 = vmul.f32 %v3010_v14, %v3010_v14 }
  0x88   : > { %4154 = vst [vmem:[#allocation29_spill] sm:$0xff] %v3136_v3  ;;  %v616_v38 = vmul.f32 %v3015_v26, %v3015_v26  ;;  %v617_v16 = vmul.f32 %v3020_v19, %v3020_v19  ;;  %v618_v21 = vmul.f32 %v3025_v13, %v3025_v13  ;;  %v619_v43 = vmul.f32 %v3030_v18, %v3030_v18 }
  0x89   : > { %v3146_v62 = vsub.f32 %v4156_v56, %v2956_v31  ;;  %v620_v56 = vmul.f32 %v3035_v23, %v3035_v23  ;;  %v621_v34 = vmul.f32 %v3040_v15, %v3040_v15  ;;  %v670_v59 = vadd.f32 %v610_v46, %v606_v54 }
  0x8a   : > { %v691_v14 = vadd.f32 %v611_v33, %v607_v58  ;;  %v712_v55 = vadd.f32 %v612_v6, %v608_v28  ;;  %v733_v63 = vadd.f32 %v613_v42, %v609_v1  ;;  %v4158_v26 = vunpack.c.l.bf16 %v2750_v10 }
  0x8b   : > { %4157 = vst [vmem:[#allocation30_spill] sm:$0xff] %v3146_v62  ;;  %v4159_v13 = vunpack.c.h.bf16 %v2750_v10  ;;  %v622_v18 = vmul.f32 %v3045_v40, %v3045_v40  ;;  %v624_v15 = vmul.f32 %v3055_v25, %v3055_v25  ;;  %v671_v54 = vadd.f32 %v670_v59, %v614_v60 }
  0x8c   : > { %v3167_v19 = vsub.f32 %v4158_v26, %v2958_v20  ;;  %v692_v58 = vadd.f32 %v691_v14, %v615_v11  ;;  %v713_v28 = vadd.f32 %v712_v55, %v616_v38  ;;  %v734_v1 = vadd.f32 %v733_v63, %v617_v16 }
  0x8d   : > { %v3172_v2 = vsub.f32 %v4159_v13, %v2960_v36  ;;  %v623_v46 = vmul.f32 %v3050_v17, %v3050_v17  ;;  %v625_v26 = vmul.f32 %v3060_v37, %v3060_v37  ;;  %v626_v10 = vmul.f32 %v3065_v45, %v3065_v45 }
  0x8e   : > { %v628_v13 = vmul.f32 %v3075_v0, %v3075_v0  ;;  %v672_v33 = vadd.f32 %v671_v54, %v618_v21  ;;  %v693_v6 = vadd.f32 %v692_v58, %v619_v43  ;;  %v714_v42 = vadd.f32 %v713_v28, %v620_v56 }
  0x8f   : > { %4160 = vst [vmem:[#allocation31_spill] sm:$0xff] %v3172_v2  ;;  %v735_v25 = vadd.f32 %v734_v1, %v621_v34  ;;  %v4161_v55 = vunpack.c.l.bf16 %v2759_v24  ;;  %v4162_v59 = vunpack.c.h.bf16 %v2759_v24  ;;  %v4164_v14 = vunpack.c.l.bf16 %v2768_v32 }
  0x90   : > { %v4165_v38 = vunpack.c.h.bf16 %v2768_v32  ;;  %v630_v34 = vmul.f32 %v3085_v48, %v3085_v48  ;;  %v632_v21 = vmul.f32 %v3095_v39, %v3095_v39  ;;  %v673_v43 = vadd.f32 %v672_v33, %v622_v18 }
  0x91   : > { %v3189_v63 = vsub.f32 %v4161_v55, %v2954_v7  ;;  %v3194_v60 = vsub.f32 %v4162_v59, %v2956_v31  ;;  %v3199_v11 = vsub.f32 %v4164_v14, %v2958_v20  ;;  %v715_v24 = vadd.f32 %v714_v42, %v624_v15 }
  0x92   : > { %v3204_v16 = vsub.f32 %v4165_v38, %v2960_v36  ;;  %v627_v56 = vmul.f32 %v3070_v61, %v3070_v61  ;;  %v629_v54 = vmul.f32 %v3080_v47, %v3080_v47  ;;  %v634_v58 = vmul.f32 %v3105_v53, %v3105_v53 }
  0x93   : > { %4163 = vst [vmem:[#allocation32_spill] sm:$0xff] %v3194_v60  ;;  %v694_v32 = vadd.f32 %v693_v6, %v623_v46  ;;  %v636_v28 = vmul.f32 %v3131_v49, %v3131_v49  ;;  %v674_v1 = vadd.f32 %v673_v43, %v626_v10  ;;  %v716_v55 = vadd.f32 %v715_v24, %v628_v13 }
  0x94   : > { %4166 = vst [vmem:[#allocation33_spill] sm:$0xff] %v3204_v16  ;;  %v736_v59 = vadd.f32 %v735_v25, %v625_v26  ;;  %v4167_v18 = vunpack.c.l.bf16 %v2777_v51  ;;  %v4168_v33 = vunpack.c.l.bf16 %v2792_v9  ;;  %v4169_v14 = vunpack.c.l.bf16 %v2801_v50 }
  0x95   : > { %v4170_v10 = vunpack.c.l.bf16 %v2810_v22  ;;  %v638_v25 = vmul.f32 %v3141_v57, %v3141_v57  ;;  %v640_v26 = vmul.f32 %v3167_v19, %v3167_v19  ;;  %v675_v6 = vadd.f32 %v674_v1, %v630_v34 }
  0x96   : > { %v3221_v15 = vsub.f32 %v4167_v18, %v2954_v7  ;;  %v3226_v42 = vsub.f32 %v4168_v33, %v2958_v20  ;;  %v3231_v46 = vsub.f32 %v4169_v14, %v2954_v7  ;;  %v717_v38 = vadd.f32 %v716_v55, %v632_v21 }
  0x97   : > { %v3236_v13 = vsub.f32 %v4170_v10, %v2958_v20  ;;  %v631_v43 = vmul.f32 %v3090_v29, %v3090_v29  ;;  %v633_v24 = vmul.f32 %v3100_v52, %v3100_v52  ;;  %v642_v18 = vmul.f32 %v3189_v63, %v3189_v63 }
  0x98   : > { %v695_v33 = vadd.f32 %v694_v32, %v627_v56  ;;  %v644_v14 = vmul.f32 %v3199_v11, %v3199_v11  ;;  %v676_v10 = vadd.f32 %v675_v6, %v634_v58  ;;  %v718_v37 = vadd.f32 %v717_v38, %v636_v28 }
  0x99   : > { %v737_v17 = vadd.f32 %v736_v59, %v629_v54  ;;  %v4171_v34 = vunpack.c.l.bf16 %v2819_v35  ;;  %v4172_v1 = vunpack.c.l.bf16 %v2834_v5  ;;  %v4173_v52 = vunpack.c.l.bf16 %v2843_v4 }
  0x9a   : > { %v4174_v58 = vunpack.c.l.bf16 %v2852_v12  ;;  %v646_v54 = vmul.f32 %v3221_v15, %v3221_v15  ;;  %v648_v28 = vmul.f32 %v3226_v42, %v3226_v42  ;;  %v677_v59 = vadd.f32 %v676_v10, %v638_v25 }
  0x9b   : > { %v3253_v21 = vsub.f32 %v4171_v34, %v2954_v7  ;;  %v3258_v55 = vsub.f32 %v4172_v1, %v2958_v20  ;;  %v3263_v56 = vsub.f32 %v4173_v52, %v2954_v7  ;;  %v719_v6 = vadd.f32 %v718_v37, %v640_v26 }
  0x9c   : > { %v3268_v32 = vsub.f32 %v4174_v58, %v2958_v20  ;;  %v635_v38 = vmul.f32 %v3110_v41, %v3110_v41  ;;  %v637_v52 = vmul.f32 %v3136_v3, %v3136_v3  ;;  %v650_v34 = vmul.f32 %v3231_v46, %v3231_v46 }
  0x9d   : > { %v696_v1 = vadd.f32 %v695_v33, %v631_v43  ;;  %v652_v58 = vmul.f32 %v3236_v13, %v3236_v13  ;;  %v678_v29 = vadd.f32 %v677_v59, %v642_v18  ;;  %v720_v47 = vadd.f32 %v719_v6, %v644_v14 }
  0x9e   : > { %v738_v61 = vadd.f32 %v737_v17, %v633_v24  ;;  %v4175_v25 = vunpack.c.l.bf16 %v2873_v27  ;;  %v4176_v26 = vunpack.c.l.bf16 %v2882_v30  ;;  %v4177_v3 = vunpack.c.l.bf16 %v2907_v8 }
  0x9f   : > { %v4178_v18 = vunpack.c.l.bf16 %v2916_v44  ;;  %v654_v17 = vmul.f32 %v3253_v21, %v3253_v21  ;;  %v656_v24 = vmul.f32 %v3258_v55, %v3258_v55  ;;  %v679_v14 = vadd.f32 %v678_v29, %v646_v54 }
  0xa0   : > { %v3285_v37 = vsub.f32 %v4175_v25, %v2954_v7  ;;  %v3290_v10 = vsub.f32 %v4176_v26, %v2958_v20  ;;  %v3295_v43 = vsub.f32 %v4177_v3, %v2954_v7  ;;  %v721_v59 = vadd.f32 %v720_v47, %v648_v28  ;;  %v2323_v26 = vld [vmem:[%s3992_s4 + $0x8] sm:$0xff]  }
  0xa1   : > { %v3300_v33 = vsub.f32 %v4178_v18, %v2958_v20  ;;  %v639_v6 = vmul.f32 %v3146_v62, %v3146_v62  ;;  %v641_v7 = vmul.f32 %v3172_v2, %v3172_v2  ;;  %v658_v3 = vmul.f32 %v3263_v56, %v3263_v56  ;;  %v2322_v20 = vld [vmem:[%s3992_s4] sm:$0xff]  }
  0xa2   : > { %v697_v25 = vadd.f32 %v696_v1, %v635_v38  ;;  %v660_v47 = vmul.f32 %v3268_v32, %v3268_v32  ;;  %v680_v29 = vadd.f32 %v679_v14, %v650_v34  ;;  %v722_v54 = vadd.f32 %v721_v59, %v652_v58  ;;  %2182 = vmatprep.subr.bf16.mxu0 %v2322_v20  ;;  %v2324_v59 = vld [vmem:[%s3992_s4 + $0x10] sm:$0xff]  }
  0xa3   : > { %v739_v28 = vadd.f32 %v738_v61, %v637_v52  ;;  %v4179_v18 = vunpack.c.h.bf16 %v2777_v51  ;;  %v4181_v38 = vunpack.c.h.bf16 %v2792_v9  ;;  %v643_v62 = vmul.f32 %v3194_v60, %v3194_v60  ;;  %2262 = vmatprep.subr.bf16.mxu1 %v2322_v20  ;;  %2183 = vmatpush3.bf16.msra.mxu0 %v2322_v20 }
  0xa4   : > { %v662_v34 = vmul.f32 %v3285_v37, %v3285_v37  ;;  %v664_v61 = vmul.f32 %v3290_v10, %v3290_v10  ;;  %v681_v52 = vadd.f32 %v680_v29, %v654_v17  ;;  %v723_v51 = vadd.f32 %v722_v54, %v656_v24  ;;  %2270 = vmatpush3.bf16.msra.mxu1 %v2322_v20 }
  0xa5   : > { %v3323_v2 = vsub.f32 %v4179_v18, %v2956_v31  ;;  %v3328_v1 = vsub.f32 %v4181_v38, %v2960_v36  ;;  %v645_v58 = vmul.f32 %v3204_v16, %v3204_v16  ;;  %v666_v9 = vmul.f32 %v3295_v43, %v3295_v43  ;;  %2184 = vmatprep.subr.bf16.mxu0 %v2323_v26 }
  0xa6   : > { %v698_v14 = vadd.f32 %v697_v25, %v639_v6  ;;  %v668_v18 = vmul.f32 %v3300_v33, %v3300_v33  ;;  %v682_v38 = vadd.f32 %v681_v52, %v658_v3  ;;  %v724_v17 = vadd.f32 %v723_v51, %v660_v47  ;;  %2263 = vmatprep.subr.bf16.mxu1 %v2323_v26 }
  0xa7   : > { %4180 = vst [vmem:[#allocation34_spill] sm:$0xff] %v3323_v2  ;;  %4182 = vst [vmem:[#allocation35_spill] sm:$0xff] %v3328_v1  ;;  %v740_v24 = vadd.f32 %v739_v28, %v641_v7  ;;  %v4184_v54 = vunpack.c.h.bf16 %v2801_v50  ;;  %2185 = vmatpush3.bf16.msra.mxu0 %v2323_v26  ;;  %v4186_v60 = vunpack.c.h.bf16 %v2810_v22  ;;  %v647_v7 = vmul.f32 %v3323_v2, %v3323_v2  ;;  %v2325_v50 = vld [vmem:[%s3992_s4 + $0x18] sm:$0xff]   ;;  %v4210_v2 = vld [vmem:[#allocation16_spill] sm:$0xff] }
  0xa8   : > { %v683_v6 = vadd.f32 %v682_v38, %v662_v34  ;;  %v725_v25 = vadd.f32 %v724_v17, %v664_v61  ;;  %v699_v3 = vadd.f32 %v698_v14, %v643_v62  ;;  %2271 = vmatpush3.bf16.msra.mxu1 %v2323_v26  ;;  %2186 = vmatprep.subr.bf16.mxu0 %v2324_v59  ;;  %v4188_v22 = vunpack.c.h.bf16 %v2819_v35  ;;  %v2326_v35 = vld [vmem:[%s3992_s4 + $0x20] sm:$0xff]  }
  0xa9   : > { %v3350_v16 = vsub.f32 %v4184_v54, %v2956_v31  ;;  %v3357_v41 = vsub.f32 %v4186_v60, %v2960_v36  ;;  %v649_v47 = vmul.f32 %v3328_v1, %v3328_v1  ;;  %v741_v61 = vadd.f32 %v740_v24, %v645_v58  ;;  %2264 = vmatprep.subr.bf16.mxu1 %v2324_v59 }
  0xaa   : > { %v684_v28 = vadd.f32 %v683_v6, %v666_v9  ;;  %v726_v34 = vadd.f32 %v725_v25, %v668_v18  ;;  %v3369_v60 = vsub.f32 %v4188_v22, %v2956_v31  ;;  %v4191_v14 = vunpack.c.h.bf16 %v2834_v5 }
  0xab   : > { %4185 = vst [vmem:[#allocation37_spill] sm:$0xff] %v3350_v16  ;;  %4187 = vst [vmem:[#allocation38_spill] sm:$0xff] %v3357_v41  ;;  %2187 = vmatpush3.bf16.msra.mxu0 %v2324_v59  ;;  %v651_v58 = vmul.f32 %v3350_v16, %v3350_v16  ;;  %v700_v9 = vadd.f32 %v699_v3, %v647_v7  ;;  %v653_v18 = vmul.f32 %v3357_v41, %v3357_v41  ;;  %v4211_v16 = vld [vmem:[#allocation14_spill] sm:$0xff] }
  0xac   : > { %4189 = vst [vmem:[#allocation39_spill] sm:$0xff] %v3369_v60  ;;  %v685_v52 = vrot.slane %v684_v28, 4  ;;  %v727_v62 = vrot.slane %v726_v34, 4  ;;  %v3378_v38 = vsub.f32 %v4191_v14, %v2960_v36  ;;  %2272 = vmatpush3.bf16.msra.mxu1 %v2324_v59  ;;  %2188 = vmatprep.subr.bf16.mxu0 %v2325_v50  ;;  %v742_v54 = vadd.f32 %v741_v61, %v649_v47 }
  0xad   : > { %2265 = vmatprep.subr.bf16.mxu1 %v2325_v50  ;;  %v4193_v5 = vunpack.c.h.bf16 %v2843_v4  ;;  %v4196_v22 = vunpack.c.h.bf16 %v2852_v12  ;;  %v655_v47 = vmul.f32 %v3369_v60, %v3369_v60  ;;  %v2327_v4 = vld [vmem:[%s3992_s4 + $0x28] sm:$0xff]   ;;  %v4198_v12 = vunpack.c.h.bf16 %v2873_v27  ;;  %v2328_v27 = vld [vmem:[%s3992_s4 + $0x30] sm:$0xff]  }
  0xae   : > { %4192 = vst [vmem:[#allocation41_spill] sm:$0xff] %v3378_v38  ;;  %v686_v17 = vadd.f32 %v685_v52, %v684_v28  ;;  %v728_v24 = vadd.f32 %v727_v62, %v726_v34  ;;  %v701_v28 = vadd.f32 %v700_v9, %v651_v58  ;;  %v657_v34 = vmul.f32 %v3378_v38, %v3378_v38 }
  0xaf   : > { %v3390_v6 = vsub.f32 %v4193_v5, %v2956_v31  ;;  %2189 = vmatpush3.bf16.msra.mxu0 %v2325_v50  ;;  %v3399_v14 = vsub.f32 %v4196_v22, %v2960_v36  ;;  %v743_v62 = vadd.f32 %v742_v54, %v653_v18  ;;  %v3411_v5 = vsub.f32 %v4198_v12, %v2956_v31 }
  0xb0   : > { %v687_v25 = vrot.slane %v686_v17, 2  ;;  %v729_v7 = vrot.slane %v728_v24, 2  ;;  %2273 = vmatpush3.bf16.msra.mxu1 %v2325_v50  ;;  %2190 = vmatprep.subr.bf16.mxu0 %v2326_v35  ;;  %v4200_v60 = vunpack.c.h.bf16 %v2882_v30  ;;  %v4202_v30 = vunpack.c.h.bf16 %v2907_v8 }
  0xb1   : > { %4194 = vst [vmem:[#allocation42_spill] sm:$0xff] %v3390_v6  ;;  %4197 = vst [vmem:[#allocation44_spill] sm:$0xff] %v3399_v14  ;;  %2266 = vmatprep.subr.bf16.mxu1 %v2326_v35  ;;  %v659_v18 = vmul.f32 %v3390_v6, %v3390_v6  ;;  %v4204_v6 = vunpack.c.h.bf16 %v2916_v44 }
  0xb2   : > { %v688_v61 = vadd.f32 %v687_v25, %v686_v17  ;;  %v730_v52 = vadd.f32 %v729_v7, %v728_v24  ;;  %4199 = vst [vmem:[#allocation45_spill] sm:$0xff] %v3411_v5  ;;  %v3420_v38 = vsub.f32 %v4200_v60, %v2960_v36  ;;  %v702_v17 = vadd.f32 %v701_v28, %v655_v47 }
  0xb3   : > { %v3345_v29 = vpop.permute.xlu1 %858  ;;  %v3352_v20 = vpop.permute.xlu0 %848  ;;  %2191 = vmatpush3.bf16.msra.mxu0 %v2326_v35  ;;  %v661_v24 = vmul.f32 %v3399_v14, %v3399_v14  ;;  %v744_v7 = vadd.f32 %v743_v62, %v657_v34  ;;  %v3432_v60 = vsub.f32 %v4202_v30, %v2956_v31  ;;  %v3441_v14 = vsub.f32 %v4204_v6, %v2960_v36 }
  0xb4   : > { %4183 = vst [vmem:[#allocation36_spill] sm:$0xff] %v3345_v29  ;;  %v689_v22 = vrot.slane %v688_v61, 1  ;;  %v731_v58 = vrot.slane %v730_v52, 1  ;;  %4201 = vst [vmem:[#allocation46_spill] sm:$0xff] %v3420_v38  ;;  %2274 = vmatpush3.bf16.msra.mxu1 %v2326_v35  ;;  %2192 = vmatprep.subr.bf16.mxu0 %v2327_v4  ;;  %v663_v34 = vmul.f32 %v3411_v5, %v3411_v5  ;;  %v4209_v5 = vld [vmem:[#allocation12_spill] sm:$0xff] }
  0xb5   : > { %2267 = vmatprep.subr.bf16.mxu1 %v2327_v4  ;;  %4203 = vst [vmem:[#allocation47_spill] sm:$0xff] %v3432_v60  ;;  %4205 = vst [vmem:[#allocation48_spill] sm:$0xff] %v3441_v14  ;;  %v665_v8 = vmul.f32 %v3420_v38, %v3420_v38  ;;  %v745_v31 = vadd.f32 %v744_v7, %v661_v24  ;;  %v667_v44 = vmul.f32 %v3432_v60, %v3432_v60 }
  0xb6   : > { %v690_v54 = vadd.f32 %v689_v22, %v688_v61  ;;  %v732_v25 = vadd.f32 %v731_v58, %v730_v52  ;;  %v703_v61 = vadd.f32 %v702_v17, %v659_v18  ;;  %v669_v6 = vmul.f32 %v3441_v14, %v3441_v14 }
  0xb7   : > { %v3371_v26 = vpop.permute.xlu1 %863  ;;  %v3373_v51 = vpop.permute.xlu0 %853  ;;  %2193 = vmatpush3.bf16.msra.mxu0 %v2327_v4 }
  0xb8   : > { %4190 = vst [vmem:[#allocation40_spill] sm:$0xff] %v3373_v51  ;;  %v754_v12 = vmul.f32 0.0078125, %v690_v54  ;;  %v756_v47 = vmul.f32 0.0078125, %v732_v25  ;;  %2275 = vmatpush3.bf16.msra.mxu1 %v2327_v4  ;;  %2194 = vmatprep.subr.bf16.mxu0 %v2328_v27  ;;  %v704_v36 = vadd.f32 %v703_v61, %v663_v34  ;;  %v746_v4 = vadd.f32 %v745_v31, %v665_v8  ;;  %v4206_v8 = vld [vmem:[#allocation6_spill] sm:$0xff] }
  0xb9   : > { %2268 = vmatprep.subr.bf16.mxu1 %v2328_v27 }
  0xba   : > { %v758_v52 = vadd.f32 1e-05, %v754_v12  ;;  %v760_v62 = vadd.f32 1e-05, %v756_v47  ;;  %v705_v17 = vadd.f32 %v704_v36, %v667_v44  ;;  %v747_v54 = vadd.f32 %v746_v4, %v669_v6  ;;  %v4208_v44 = vld [vmem:[#allocation10_spill] sm:$0xff]  ;;  %v2329_v6 = vld [vmem:[%s3992_s4 + $0x38] sm:$0xff]  }
  0xbb   : > { %v3392_v59 = vpop.permute.xlu1 %1013  ;;  %v3394_v3 = vpop.permute.xlu0 %1008  ;;  %2195 = vmatpush3.bf16.msra.mxu0 %v2328_v27 }
  0xbc   : > { %4195 = vst [vmem:[#allocation43_spill] sm:$0xff] %v3394_v3  ;;  %2330 = vrsqrt.f32 %v758_v52  ;;  %2276 = vmatpush3.bf16.msra.mxu1 %v2328_v27  ;;  %v706_v25 = vrot.slane %v705_v17, 4  ;;  %v748_v7 = vrot.slane %v747_v54, 4  ;;  %v4207_v52 = vld [vmem:[#allocation8_spill] sm:$0xff]  ;;  %2196 = vmatprep.subr.bf16.mxu0 %v2329_v6 }
  0xbd   : > { %2332 = vrsqrt.f32 %v760_v62  ;;  %2269 = vmatprep.subr.bf16.mxu1 %v2329_v6 }
  0xbe   : > { %v707_v34 = vadd.f32 %v706_v25, %v705_v17  ;;  %v749_v61 = vadd.f32 %v748_v7, %v747_v54 }
  0xbf   : > { %v3413_v50 = vpop.permute.xlu1 %873  ;;  %v3415_v9 = vpop.permute.xlu0 %868  ;;  %2197 = vmatpush3.bf16.msra.mxu0 %v2329_v6 }
  0xc0   : > { %v708_v38 = vrot.slane %v707_v34, 2  ;;  %v750_v25 = vrot.slane %v749_v61, 2  ;;  %2277 = vmatpush3.bf16.msra.mxu1 %v2329_v6 }
  0xc2   : > { %v709_v1 = vadd.f32 %v708_v38, %v707_v34 }
  0xc3   : > { %v3434_v35 = vpop.permute.xlu1 %1023  ;;  %v3436_v28 = vpop.permute.xlu0 %1018 }
  0xc4   : > { %v710_v6 = vrot.slane %v709_v1, 1 }
  0xc6   : > { %v3461_v12 = vpop.eup %2330 }
  0xc7   : > { %v3447_v22 = vpop.permute.xlu1 %883  ;;  %v3449_v58 = vpop.permute.xlu0 %878  ;;  %v766_v31 = vmul.f32 %v3461_v12, %v4206_v8  ;;  %v770_v36 = vmul.f32 %v3461_v12, %v4208_v44 }
  0xc8   : > { %v3465_v27 = vpop.eup %2332 }
  0xc9   : > { %v768_v62 = vmul.f32 %v3465_v27, %v4207_v52  ;;  %v772_v17 = vmul.f32 %v3465_v27, %v4209_v5  ;;  %v926_v7 = vmul.f32 %v3352_v20, %v766_v31  ;;  %v930_v52 = vmul.f32 %v3373_v51, %v770_v36 }
  0xca   : > { %v776_v41 = vmul.f32 %v3465_v27, %v4210_v2  ;;  %v780_v31 = vmul.f32 %v3465_v27, %v3035_v23  ;;  %v751_v36 = vadd.f32 %v750_v25, %v749_v61 }
  0xcb   : > { %v3455_v18 = vpop.permute.xlu1 %1033  ;;  %v3457_v24 = vpop.permute.xlu0 %1028  ;;  %v928_v8 = vmul.f32 %v3352_v20, %v768_v62  ;;  %v932_v44 = vmul.f32 %v3373_v51, %v772_v17  ;;  %v1090_v14 = vadd.f32 %v3392_v59, %v930_v52  ;;  %v1086_v60 = vadd.f32 %v3394_v3, %v926_v7  ;;  %v4212_v51 = vld [vmem:[#allocation18_spill] sm:$0xff] }
  0xcc   : > { %v774_v17 = vmul.f32 %v3461_v12, %v4211_v16  ;;  %v778_v52 = vmul.f32 %v3461_v12, %v4212_v51  ;;  %v936_v2 = vmul.f32 %v3345_v29, %v776_v41  ;;  %v940_v23 = vmul.f32 %v3371_v26, %v780_v31 }
  0xcd   : > { %v1088_v5 = vadd.f32 %v3394_v3, %v928_v8  ;;  %v1092_v62 = vadd.f32 %v3392_v59, %v932_v44  ;;  %v1150_v34 = vpack.c.bf16 %v1090_v14, %v1086_v60  ;;  %v752_v3 = vrot.slane %v751_v36, 1  ;;  %v4213_v44 = vld [vmem:[#allocation22_spill] sm:$0xff] }
  0xce   : > { %v934_v61 = vmul.f32 %v3345_v29, %v774_v17  ;;  %v938_v25 = vmul.f32 %v3371_v26, %v778_v52  ;;  %v786_v16 = vmul.f32 %v3461_v12, %v3065_v45  ;;  %v788_v51 = vmul.f32 %v3465_v27, %v3075_v0 }
  0xcf   : > { %v3459_v30 = vpop.permute.xlu1 %893  ;;  %v3463_v47 = vpop.permute.xlu0 %888  ;;  %v1152_v38 = vpack.c.bf16 %v1092_v62, %v1088_v5  ;;  %1205 = vxpose.xlu0.c.b16.start [1/8] %v1150_v34, 128  ;;  %v1100_v14 = vadd.f32 %v3434_v35, %v940_v23  ;;  %v1096_v60 = vadd.f32 %v3436_v28, %v936_v2  ;;  %v782_v41 = vmul.f32 %v3461_v12, %v3045_v40 }
  0xd0   : > { %v784_v5 = vmul.f32 %v3465_v27, %v4213_v44  ;;  %v1098_v31 = vadd.f32 %v3434_v35, %v938_v25  ;;  %v1094_v62 = vadd.f32 %v3436_v28, %v934_v61  ;;  %v711_v45 = vadd.f32 %v710_v6, %v709_v1 }
  0xd1   : > { %1237 = vxpose.xlu1.c.b16.start [1/8] %v1152_v38, 128  ;;  %v753_v0 = vadd.f32 %v752_v3, %v751_v36  ;;  %v946_v38 = vmul.f32 %v3413_v50, %v786_v16  ;;  %v1156_v34 = vpack.c.bf16 %v1100_v14, %v1096_v60  ;;  %v948_v2 = vmul.f32 %v3413_v50, %v788_v51 }
  0xd2   : > { %v942_v40 = vmul.f32 %v3415_v9, %v782_v41  ;;  %v944_v23 = vmul.f32 %v3415_v9, %v784_v5  ;;  %v1154_v44 = vpack.c.bf16 %v1098_v31, %v1094_v62  ;;  %v755_v29 = vmul.f32 0.0078125, %v711_v45 }
  0xd3   : > { %v3476_v4 = vpop.permute.xlu1 %1043  ;;  %v3480_v54 = vpop.permute.xlu0 %1038  ;;  %v1106_v61 = vadd.f32 %v3455_v18, %v946_v38  ;;  %v1108_v1 = vadd.f32 %v3455_v18, %v948_v2  ;;  %v794_v25 = vmul.f32 %v3461_v12, %v3105_v53  ;;  %v796_v16 = vmul.f32 %v3465_v27, %v3131_v49 }
  0xd4   : > { %1206 = vxpose.xlu0.c.b16.cont [2/8] %v1154_v44, 128  ;;  %v1102_v6 = vadd.f32 %v3457_v24, %v942_v40  ;;  %v1104_v3 = vadd.f32 %v3457_v24, %v944_v23  ;;  %v790_v51 = vmul.f32 %v3461_v12, %v3085_v48  ;;  %v792_v14 = vmul.f32 %v3465_v27, %v3095_v39 }
  0xd5   : > { %1238 = vxpose.xlu1.c.b16.cont [2/8] %v1156_v34, 128  ;;  %v757_v41 = vmul.f32 0.0078125, %v753_v0  ;;  %v759_v5 = vadd.f32 1e-05, %v755_v29  ;;  %v954_v45 = vmul.f32 %v3447_v22, %v794_v25  ;;  %v956_v38 = vmul.f32 %v3447_v22, %v796_v16 }
  0xd6   : > { %v1160_v31 = vpack.c.bf16 %v1108_v1, %v1104_v3  ;;  %v1158_v62 = vpack.c.bf16 %v1106_v61, %v1102_v6  ;;  %v950_v53 = vmul.f32 %v3449_v58, %v790_v51  ;;  %v952_v49 = vmul.f32 %v3449_v58, %v792_v14 }
  0xd7   : > { %v3498_v7 = vpop.permute.xlu1 %903  ;;  %v3500_v8 = vpop.permute.xlu0 %898  ;;  %v761_v34 = vadd.f32 1e-05, %v757_v41  ;;  %v804_v48 = vmul.f32 %v3465_v27, %v3199_v11  ;;  %v800_v39 = vmul.f32 %v3465_v27, %v3167_v19  ;;  %v1114_v0 = vadd.f32 %v3476_v4, %v954_v45 }
  0xd8   : > { %1207 = vxpose.xlu0.c.b16.cont [3/8] %v1158_v62, 128  ;;  %v1116_v2 = vadd.f32 %v3476_v4, %v956_v38  ;;  %v1110_v40 = vadd.f32 %v3480_v54, %v950_v53  ;;  %v1112_v23 = vadd.f32 %v3480_v54, %v952_v49  ;;  %v802_v11 = vmul.f32 %v3461_v12, %v3189_v63 }
  0xd9   : > { %1239 = vxpose.xlu1.c.b16.cont [3/8] %v1160_v31, 128  ;;  %v798_v19 = vmul.f32 %v3461_v12, %v3141_v57  ;;  %2334 = vrsqrt.f32 %v759_v5  ;;  %v964_v61 = vmul.f32 %v3459_v30, %v804_v48  ;;  %v960_v1 = vmul.f32 %v3463_v47, %v800_v39 }
  0xda   : > { %2336 = vrsqrt.f32 %v761_v34  ;;  %v1164_v6 = vpack.c.bf16 %v1116_v2, %v1112_v23  ;;  %v1162_v3 = vpack.c.bf16 %v1114_v0, %v1110_v40  ;;  %v962_v25 = vmul.f32 %v3459_v30, %v802_v11 }
  0xdb   : > { %v3518_v17 = vpop.permute.xlu1 %1053  ;;  %v3520_v52 = vpop.permute.xlu0 %1048  ;;  %v958_v16 = vmul.f32 %v3463_v47, %v798_v19  ;;  %v810_v51 = vmul.f32 %v3461_v12, %v3231_v46  ;;  %v812_v57 = vmul.f32 %v3465_v27, %v3236_v13  ;;  %v806_v31 = vmul.f32 %v3461_v12, %v3221_v15 }
  0xdc   : > { %1208 = vxpose.xlu0.c.b16.cont [4/8] %v1162_v3, 128  ;;  %v1124_v63 = vadd.f32 %v3518_v17, %v964_v61  ;;  %v1120_v41 = vadd.f32 %v3520_v52, %v960_v1  ;;  %v808_v62 = vmul.f32 %v3465_v27, %v3226_v42  ;;  %v1122_v46 = vadd.f32 %v3518_v17, %v962_v25  ;;  %v4214_v1 = vld [vmem:[#allocation7_spill] sm:$0xff] }
  0xdd   : > { %1240 = vxpose.xlu1.c.b16.cont [4/8] %v1164_v6, 128  ;;  %v1118_v45 = vadd.f32 %v3520_v52, %v958_v16  ;;  %v970_v13 = vmul.f32 %v3498_v7, %v810_v51  ;;  %v972_v38 = vmul.f32 %v3498_v7, %v812_v57  ;;  %v966_v49 = vmul.f32 %v3500_v8, %v806_v31  ;;  %v4215_v3 = vld [vmem:[#allocation11_spill] sm:$0xff]  ;;  %v4216_v57 = vld [vmem:[#allocation9_spill] sm:$0xff] }
  0xde   : > { %v1168_v53 = vpack.c.bf16 %v1124_v63, %v1120_v41  ;;  %v968_v34 = vmul.f32 %v3500_v8, %v808_v62  ;;  %v818_v48 = vmul.f32 %v3461_v12, %v3263_v56  ;;  %v820_v0 = vmul.f32 %v3465_v27, %v3268_v32 }
  0xdf   : > { %v3530_v36 = vpop.permute.xlu1 %913  ;;  %v3540_v60 = vpop.permute.xlu0 %908  ;;  %v1166_v15 = vpack.c.bf16 %v1122_v46, %v1118_v45  ;;  %v814_v2 = vmul.f32 %v3461_v12, %v3253_v21  ;;  %v816_v40 = vmul.f32 %v3465_v27, %v3258_v55  ;;  %v826_v21 = vmul.f32 %v3461_v12, %v3295_v43 }
  0xe0   : > { %v828_v55 = vmul.f32 %v3465_v27, %v3300_v33  ;;  %v822_v16 = vmul.f32 %v3461_v12, %v3285_v37  ;;  %v824_v51 = vmul.f32 %v3465_v27, %v3290_v10  ;;  %v978_v43 = vmul.f32 %v3530_v36, %v818_v48  ;;  %v4217_v48 = vld [vmem:[#allocation13_spill] sm:$0xff] }
  0xe1   : > { %1241 = vxpose.xlu1.c.b16.cont [5/8] %v1168_v53, 128  ;;  %1209 = vxpose.xlu0.c.b16.cont [5/8] %v1166_v15, 128  ;;  %v980_v41 = vmul.f32 %v3530_v36, %v820_v0  ;;  %v974_v33 = vmul.f32 %v3540_v60, %v814_v2  ;;  %v976_v31 = vmul.f32 %v3540_v60, %v816_v40  ;;  %v4218_v40 = vld [vmem:[#allocation15_spill] sm:$0xff] }
  0xe3   : > { %v3550_v29 = vpop.permute.xlu1 %1063  ;;  %v3556_v44 = vpop.permute.xlu0 %1058 }
  0xe4   : > { %v3590_v42 = vpop.eup %2334  ;;  %v1130_v23 = vadd.f32 %v3550_v29, %v970_v13  ;;  %v1132_v19 = vadd.f32 %v3550_v29, %v972_v38  ;;  %v1126_v61 = vadd.f32 %v3556_v44, %v966_v49  ;;  %v1128_v32 = vadd.f32 %v3556_v44, %v968_v34 }
  0xe5   : > { %v3601_v56 = vpop.eup %2336  ;;  %v767_v6 = vmul.f32 %v3590_v42, %v4214_v1  ;;  %v771_v25 = vmul.f32 %v3590_v42, %v4215_v3 }
  0xe6   : > { %v769_v63 = vmul.f32 %v3601_v56, %v4216_v57  ;;  %v1172_v46 = vpack.c.bf16 %v1132_v19, %v1128_v32  ;;  %v1170_v45 = vpack.c.bf16 %v1130_v23, %v1126_v61  ;;  %v773_v15 = vmul.f32 %v3601_v56, %v4217_v48  ;;  %v4219_v32 = vld [vmem:[#allocation17_spill] sm:$0xff] }
  0xe7   : > { %v3568_v14 = vpop.permute.xlu1 %923  ;;  %v3574_v5 = vpop.permute.xlu0 %918  ;;  %v775_v23 = vmul.f32 %v3590_v42, %v4218_v40  ;;  %v4226_v48 = vld [vmem:[#allocation21_spill] sm:$0xff] }
  0xe8   : > { %v986_v62 = vmul.f32 %v3568_v14, %v826_v21  ;;  %v988_v37 = vmul.f32 %v3568_v14, %v828_v55  ;;  %v982_v53 = vmul.f32 %v3574_v5, %v822_v16  ;;  %v984_v49 = vmul.f32 %v3574_v5, %v824_v51  ;;  %1242 = vxpose.xlu1.c.b16.cont [6/8] %v1172_v46, 128  ;;  %v4220_v55 = vld [vmem:[#allocation19_spill] sm:$0xff] }
  0xe9   : > { %1210 = vxpose.xlu0.c.b16.cont [6/8] %v1170_v45, 128  ;;  %v777_v21 = vmul.f32 %v3601_v56, %v4219_v32  ;;  %v779_v1 = vmul.f32 %v3590_v42, %v4220_v55  ;;  %v927_v51 = vmul.f32 %v3352_v20, %v767_v6  ;;  %v929_v57 = vmul.f32 %v3352_v20, %v769_v63 }
  0xeb   : > { %v3588_v39 = vpop.permute.xlu1 %1073  ;;  %v3599_v11 = vpop.permute.xlu0 %1068 }
  0xec   : > { %v1138_v10 = vadd.f32 %v3588_v39, %v978_v43  ;;  %v1140_v12 = vadd.f32 %v3588_v39, %v980_v41  ;;  %v1134_v27 = vadd.f32 %v3599_v11, %v974_v33  ;;  %v1136_v34 = vadd.f32 %v3599_v11, %v976_v31  ;;  %v4221_v43 = vld [vmem:[#allocation20_spill] sm:$0xff] }
  0xed   : > { %v781_v41 = vmul.f32 %v3601_v56, %v4221_v43  ;;  %v4222_v33 = vld [vmem:[#allocation40_spill] sm:$0xff]  ;;  %v4230_v43 = vld [vmem:[#allocation29_spill] sm:$0xff] }
  0xee   : > { %v1176_v3 = vpack.c.bf16 %v1140_v12, %v1136_v34  ;;  %v1174_v16 = vpack.c.bf16 %v1138_v10, %v1134_v27  ;;  %v931_v31 = vmul.f32 %v4222_v33, %v771_v25  ;;  %v4224_v12 = vld [vmem:[#allocation43_spill] sm:$0xff]  ;;  %v939_v27 = vmul.f32 %v3371_v26, %v779_v1 }
  0xef   : > { %v3625_v13 = vpop.permute.xlu1 %1083  ;;  %v3631_v38 = vpop.permute.xlu0 %1078  ;;  %v1087_v20 = vadd.f32 %v4224_v12, %v927_v51  ;;  %v1089_v63 = vadd.f32 %v4224_v12, %v929_v57  ;;  %v941_v25 = vmul.f32 %v3371_v26, %v781_v41  ;;  %v4229_v51 = vld [vmem:[#allocation28_spill] sm:$0xff]  ;;  %v797_v41 = vmul.f32 %v3601_v56, %v4230_v43 }
  0xf0   : > { %v1146_v0 = vadd.f32 %v3625_v13, %v986_v62  ;;  %v1148_v2 = vadd.f32 %v3625_v13, %v988_v37  ;;  %v1142_v19 = vadd.f32 %v3631_v38, %v982_v53  ;;  %v1144_v61 = vadd.f32 %v3631_v38, %v984_v49  ;;  %1243 = vxpose.xlu1.c.b16.cont [7/8] %v1176_v3, 128  ;;  %v4223_v37 = vld [vmem:[#allocation24_spill] sm:$0xff]  ;;  %v4225_v49 = vld [vmem:[#allocation25_spill] sm:$0xff] }
  0xf1   : > { %v933_v62 = vmul.f32 %v4222_v33, %v773_v15  ;;  %1211 = vxpose.xlu0.c.b16.cont [7/8] %v1174_v16, 128  ;;  %v787_v53 = vmul.f32 %v3590_v42, %v4223_v37  ;;  %v1091_v10 = vadd.f32 %v3392_v59, %v931_v31  ;;  %v789_v34 = vmul.f32 %v3601_v56, %v4225_v49  ;;  %v4231_v31 = vld [vmem:[#allocation26_spill] sm:$0xff] }
  0xf2   : > { %v1180_v46 = vpack.c.bf16 %v1148_v2, %v1144_v61  ;;  %v1178_v45 = vpack.c.bf16 %v1146_v0, %v1142_v19  ;;  %v783_v15 = vmul.f32 %v3590_v42, %v4226_v48  ;;  %v4227_v0 = vld [vmem:[#allocation36_spill] sm:$0xff]  ;;  %v4228_v19 = vld [vmem:[#allocation23_spill] sm:$0xff]  ;;  %v1099_v32 = vadd.f32 %v3434_v35, %v939_v27 }
  0xf3   : > { %v1093_v6 = vadd.f32 %v3392_v59, %v933_v62  ;;  %v935_v2 = vmul.f32 %v4227_v0, %v775_v23  ;;  %v937_v40 = vmul.f32 %v4227_v0, %v777_v21  ;;  %v785_v59 = vmul.f32 %v3601_v56, %v4228_v19  ;;  %v4232_v62 = vld [vmem:[#allocation27_spill] sm:$0xff] }
  0xf4   : > { %1244 = vxpose.xlu1.c.b16.end [8/8] %v1180_v46, 128  ;;  %v947_v61 = vmul.f32 %v3413_v50, %v787_v53  ;;  %v1101_v26 = vadd.f32 %v3434_v35, %v941_v25  ;;  %v1151_v16 = vpack.c.bf16 %v1091_v10, %v1087_v20  ;;  %v949_v23 = vmul.f32 %v3413_v50, %v789_v34  ;;  %v4235_v25 = vld [vmem:[#allocation30_spill] sm:$0xff]  ;;  %v4236_v48 = vld [vmem:[#allocation31_spill] sm:$0xff] }
  0xf5   : > { %1212 = vxpose.xlu0.c.b16.end [8/8] %v1178_v45, 128  ;;  %v1095_v55 = vadd.f32 %v3436_v28, %v935_v2  ;;  %v1097_v1 = vadd.f32 %v3436_v28, %v937_v40  ;;  %v1153_v3 = vpack.c.bf16 %v1093_v6, %v1089_v63  ;;  %v943_v21 = vmul.f32 %v3415_v9, %v783_v15  ;;  %v4233_v45 = vld [vmem:[#allocation32_spill] sm:$0xff]  ;;  %v4234_v63 = vld [vmem:[#allocation33_spill] sm:$0xff] }
  0xf6   : > { %v795_v57 = vmul.f32 %v3590_v42, %v4229_v51  ;;  %v945_v33 = vmul.f32 %v3415_v9, %v785_v59  ;;  %v791_v35 = vmul.f32 %v3590_v42, %v4231_v31  ;;  %v793_v28 = vmul.f32 %v3601_v56, %v4232_v62  ;;  %v4241_v51 = vld [vmem:[#allocation42_spill] sm:$0xff]  ;;  %v4242_v62 = vld [vmem:[#allocation44_spill] sm:$0xff] }
  0xf7   : > { %v1107_v50 = vadd.f32 %v3455_v18, %v947_v61  ;;  %v1109_v46 = vadd.f32 %v3455_v18, %v949_v23  ;;  %v803_v37 = vmul.f32 %v3590_v42, %v4233_v45  ;;  %v1103_v53 = vadd.f32 %v3457_v24, %v943_v21  ;;  %v4240_v23 = vld [vmem:[#allocation35_spill] sm:$0xff] }
  0xf8   : > { %1253 = vxpose.xlu1.c.b16.start [1/8] %v1153_v3, 128  ;;  %v1105_v10 = vadd.f32 %v3457_v24, %v945_v33  ;;  %v1157_v9 = vpack.c.bf16 %v1101_v26, %v1097_v1  ;;  %v1155_v6 = vpack.c.bf16 %v1099_v32, %v1095_v55  ;;  %v955_v12 = vmul.f32 %v3447_v22, %v795_v57  ;;  %v4237_v32 = vld [vmem:[#allocation37_spill] sm:$0xff]  ;;  %v4238_v55 = vld [vmem:[#allocation38_spill] sm:$0xff] }
  0xf9   : > { %1221 = vxpose.xlu0.c.b16.start [1/8] %v1151_v16, 128  ;;  %v957_v20 = vmul.f32 %v3447_v22, %v797_v41  ;;  %v805_v27 = vmul.f32 %v3601_v56, %v4234_v63  ;;  %v799_v49 = vmul.f32 %v3590_v42, %v4235_v25  ;;  %v951_v18 = vmul.f32 %v3449_v58, %v791_v35  ;;  %v4239_v16 = vld [vmem:[#allocation34_spill] sm:$0xff] }
  0xfa   : > { %v953_v34 = vmul.f32 %v3449_v58, %v793_v28  ;;  %v801_v15 = vmul.f32 %v3601_v56, %v4236_v48  ;;  %v963_v24 = vmul.f32 %v3459_v30, %v803_v37  ;;  %v1115_v0 = vadd.f32 %v3476_v4, %v955_v12  ;;  %v4244_v37 = vld [vmem:[#allocation41_spill] sm:$0xff] }
  0xfb   : > { %v1117_v22 = vadd.f32 %v3476_v4, %v957_v20  ;;  %v1111_v2 = vadd.f32 %v3480_v54, %v951_v18  ;;  %v1161_v19 = vpack.c.bf16 %v1109_v46, %v1105_v10  ;;  %v1159_v59 = vpack.c.bf16 %v1107_v50, %v1103_v53  ;;  %v4243_v50 = vld [vmem:[#allocation39_spill] sm:$0xff]  ;;  %v4247_v48 = vld [vmem:[#allocation45_spill] sm:$0xff] }
  0xfc   : > { %1254 = vxpose.xlu1.c.b16.cont [2/8] %v1157_v9, 128  ;;  %v1113_v40 = vadd.f32 %v3480_v54, %v953_v34  ;;  %v965_v61 = vmul.f32 %v3459_v30, %v805_v27  ;;  %v959_v58 = vmul.f32 %v3463_v47, %v799_v49  ;;  %v811_v26 = vmul.f32 %v3590_v42, %v4237_v32  ;;  %v4245_v27 = vld [vmem:[#allocation47_spill] sm:$0xff]  ;;  %v4246_v49 = vld [vmem:[#allocation48_spill] sm:$0xff] }
  0xfd   : > { %1222 = vxpose.xlu0.c.b16.cont [2/8] %v1155_v6, 128  ;;  %v813_v1 = vmul.f32 %v3601_v56, %v4238_v55  ;;  %v961_v3 = vmul.f32 %v3463_v47, %v801_v15  ;;  %v807_v4 = vmul.f32 %v3590_v42, %v4239_v16  ;;  %v809_v54 = vmul.f32 %v3601_v56, %v4240_v23  ;;  %v4248_v15 = vld [vmem:[#allocation46_spill] sm:$0xff] }
  0xfe   : > { %v1123_v30 = vadd.f32 %v3518_v17, %v963_v24  ;;  %v1125_v21 = vadd.f32 %v3518_v17, %v965_v61  ;;  %v819_v57 = vmul.f32 %v3590_v42, %v4241_v51  ;;  %v1119_v43 = vadd.f32 %v3520_v52, %v959_v58 }
  0xff   : > { %v1121_v41 = vadd.f32 %v3520_v52, %v961_v3  ;;  %v1165_v47 = vpack.c.bf16 %v1117_v22, %v1113_v40  ;;  %v1163_v33 = vpack.c.bf16 %v1115_v0, %v1111_v2  ;;  %v971_v31 = vmul.f32 %v3498_v7, %v811_v26 }
 0x100   : > { %1255 = vxpose.xlu1.c.b16.cont [3/8] %v1161_v19, 128  ;;  %v973_v35 = vmul.f32 %v3498_v7, %v813_v1  ;;  %v821_v28 = vmul.f32 %v3601_v56, %v4242_v62  ;;  %v815_v46 = vmul.f32 %v3590_v42, %v4243_v50  ;;  %v967_v17 = vmul.f32 %v3500_v8, %v807_v4 }
 0x101   : > { %1223 = vxpose.xlu0.c.b16.cont [3/8] %v1159_v59, 128  ;;  %v969_v45 = vmul.f32 %v3500_v8, %v809_v54  ;;  %v817_v53 = vmul.f32 %v3601_v56, %v4244_v37  ;;  %v979_v52 = vmul.f32 %v3530_v36, %v819_v57  ;;  %v1131_v10 = vadd.f32 %v3550_v29, %v971_v31 }
 0x102   : > { %v1133_v7 = vadd.f32 %v3550_v29, %v973_v35  ;;  %v1127_v9 = vadd.f32 %v3556_v44, %v967_v17  ;;  %v1169_v12 = vpack.c.bf16 %v1125_v21, %v1121_v41  ;;  %v1167_v20 = vpack.c.bf16 %v1123_v30, %v1119_v43 }
 0x103   : > { %v1129_v6 = vadd.f32 %v3556_v44, %v969_v45  ;;  %v981_v63 = vmul.f32 %v3530_v36, %v821_v28  ;;  %v975_v8 = vmul.f32 %v3540_v60, %v815_v46  ;;  %v827_v25 = vmul.f32 %v3590_v42, %v4245_v27 }
 0x104   : > { %1256 = vxpose.xlu1.c.b16.cont [4/8] %v1165_v47, 128  ;;  %v829_v18 = vmul.f32 %v3601_v56, %v4246_v49  ;;  %v977_v34 = vmul.f32 %v3540_v60, %v817_v53  ;;  %v823_v29 = vmul.f32 %v3590_v42, %v4247_v48  ;;  %v825_v44 = vmul.f32 %v3601_v56, %v4248_v15 }
 0x105   : > { %1224 = vxpose.xlu0.c.b16.cont [4/8] %v1163_v33, 128  ;;  %v1139_v36 = vadd.f32 %v3588_v39, %v979_v52  ;;  %v1141_v24 = vadd.f32 %v3588_v39, %v981_v63  ;;  %v1135_v0 = vadd.f32 %v3599_v11, %v975_v8  ;;  %v1173_v2 = vpack.c.bf16 %v1133_v7, %v1129_v6  ;;  %v2111_v6 = vld [vmem:[%s3766_s12 + $0x8] sm:$0xff]   ;;  %v2126_v63 = vld [vmem:[%s3766_s12 + $0x80] sm:$0xff]  }
 0x106   : > { %v1137_v22 = vadd.f32 %v3599_v11, %v977_v34  ;;  %v1171_v40 = vpack.c.bf16 %v1131_v10, %v1127_v9  ;;  %v987_v60 = vmul.f32 %v3568_v14, %v827_v25  ;;  %v989_v19 = vmul.f32 %v3568_v14, %v829_v18  ;;  %v3775_v8 = vld [vmem:[%s3993_s5] ss:$0 sm:$0xff] }
 0x107   : > { %v983_v42 = vmul.f32 %v3574_v5, %v823_v29  ;;  %v985_v56 = vmul.f32 %v3574_v5, %v825_v44  ;;  %v1175_v32 = vpack.c.bf16 %v1139_v36, %v1135_v0  ;;  %v1989_v27 = vunpack.c.l.bf16 %v2111_v6 }
 0x108   : > { %1257 = vxpose.xlu1.c.b16.cont [5/8] %v1169_v12, 128  ;;  %v1147_v59 = vadd.f32 %v3625_v13, %v987_v60  ;;  %v1149_v39 = vadd.f32 %v3625_v13, %v989_v19  ;;  %v1177_v58 = vpack.c.bf16 %v1141_v24, %v1137_v22  ;;  %v2127_v12 = vld [vmem:[%s3766_s12 + $0x88] sm:$0xff]   ;;  %v2049_v48 = vunpack.c.l.bf16 %v2126_v63 }
 0x109   : > { %1225 = vxpose.xlu0.c.b16.cont [5/8] %v1167_v20, 128  ;;  %v1143_v61 = vadd.f32 %v3631_v38, %v983_v42  ;;  %v1145_v11 = vadd.f32 %v3631_v38, %v985_v56  ;;  %v1984_v20 = vld [vmem:[%s3766_s12] sm:$0xff]   ;;  %v2053_v25 = vunpack.c.l.bf16 %v2127_v12  ;;  %v1990_v24 = vunpack.c.h.bf16 %v2111_v6 }
 0x10a   : > { %v1985_v34 = vunpack.c.l.bf16 %v1984_v20  ;;  %v2054_v0 = vunpack.c.h.bf16 %v2127_v12  ;;  %v1986_v19 = vunpack.c.h.bf16 %v1984_v20  ;;  %v2050_v42 = vunpack.c.h.bf16 %v2126_v63 }
 0x10b   : > { %v1181_v26 = vpack.c.bf16 %v1149_v39, %v1145_v11  ;;  %v1179_v14 = vpack.c.bf16 %v1147_v59, %v1143_v61 }
 0x10c   : > { %1258 = vxpose.xlu1.c.b16.cont [6/8] %v1173_v2, 128 }
 0x10d   : > { %1226 = vxpose.xlu0.c.b16.cont [6/8] %v1171_v40, 128 }
 0x110   : > { %1259 = vxpose.xlu1.c.b16.cont [7/8] %v1177_v58, 128 }
 0x111   : > { %1227 = vxpose.xlu0.c.b16.cont [7/8] %v1175_v32, 128 }
 0x114   : > { %1260 = vxpose.xlu1.c.b16.end [8/8] %v1181_v26, 128 }
 0x115   : > { %1228 = vxpose.xlu0.c.b16.end [8/8] %v1179_v14, 128 }
 0x13e   : > { %v1245_v55 = vpop.trf.xlu1 }
 0x13f   : > { %v1213_v5 = vpop.trf.xlu0  ;;  %2230 = vmatprep.mubr.bf16.mxu1 %v1245_v55 }
 0x140   : > { %2198 = vmatprep.mubr.bf16.mxu0 %v1213_v5  ;;  %v2113_v5 = vld [vmem:[%s3766_s12 + $0x18] sm:$0xff]  }
 0x142   : > { %v1246_v1 = vpop.trf.xlu1 }
 0x143   : > { %v1214_v3 = vpop.trf.xlu0  ;;  %2231 = vmatmul.mubr.bf16.vlgmr.msra.gmra.mrb[0].mxu1 %v1246_v1  ;;  %v2129_v1 = vld [vmem:[%s3766_s12 + $0x98] sm:$0xff]  }
 0x144   : > { %2199 = vmatmul.mubr.bf16.vlgmr.msra.gmra.mrb[0].mxu0 %v1214_v3 }
 0x146   : > { %v1247_v13 = vpop.trf.xlu1 }
 0x147   : > { %v1215_v16 = vpop.trf.xlu0  ;;  %2234 = vmatprep.mubr.bf16.mxu1 %v1247_v13 }
 0x148   : > { %2202 = vmatprep.mubr.bf16.mxu0 %v1215_v16  ;;  %v2112_v16 = vld [vmem:[%s3766_s12 + $0x10] sm:$0xff]  }
 0x14a   : > { %v1248_v38 = vpop.trf.xlu1 }
 0x14b   : > { %v1216_v4 = vpop.trf.xlu0  ;;  %2235 = vmatmul.mubr.bf16.gmra.mrb[4].mxu1 %v1248_v38  ;;  %v2128_v38 = vld [vmem:[%s3766_s12 + $0x90] sm:$0xff]  }
 0x14c   : > { %2203 = vmatmul.mubr.bf16.gmra.mrb[4].mxu0 %v1216_v4 }
 0x14e   : > { %v1249_v23 = vpop.trf.xlu1 }
 0x14f   : > { %v1217_v54 = vpop.trf.xlu0  ;;  %2238 = vmatprep.mubr.bf16.mxu1 %v1249_v23 }
 0x150   : > { %2206 = vmatprep.mubr.bf16.mxu0 %v1217_v54  ;;  %v1997_v54 = vunpack.c.l.bf16 %v2113_v5 }
 0x152   : > { %v1250_v30 = vpop.trf.xlu1 }
 0x153   : > { %v1218_v21 = vpop.trf.xlu0  ;;  %2239 = vmatmul.mubr.bf16.gmra.mrb[8].mxu1 %v1250_v30  ;;  %v2061_v30 = vunpack.c.l.bf16 %v2129_v1 }
 0x154   : > { %2207 = vmatmul.mubr.bf16.gmra.mrb[8].mxu0 %v1218_v21 }
 0x156   : > { %v1251_v51 = vpop.trf.xlu1 }
 0x157   : > { %v1219_v57 = vpop.trf.xlu0  ;;  %2242 = vmatprep.mubr.bf16.mxu1 %v1251_v51 }
 0x158   : > { %2210 = vmatprep.mubr.bf16.mxu0 %v1219_v57  ;;  %v1993_v57 = vunpack.c.l.bf16 %v2112_v16 }
 0x15a   : > { %v1252_v43 = vpop.trf.xlu1 }
 0x15b   : > { %v1220_v41 = vpop.trf.xlu0  ;;  %2243 = vmatmul.mubr.bf16.gmra.mrb[12].mxu1 %v1252_v43  ;;  %v2057_v43 = vunpack.c.l.bf16 %v2128_v38 }
 0x15c   : > { %2211 = vmatmul.mubr.bf16.gmra.mrb[12].mxu0 %v1220_v41 }
 0x15e   : > { %v1261_v47 = vpop.trf.xlu1 }
 0x15f   : > { %v1229_v33 = vpop.trf.xlu0  ;;  %2246 = vmatprep.mubr.bf16.mxu1 %v1261_v47 }
 0x160   : > { %2214 = vmatprep.mubr.bf16.mxu0 %v1229_v33 }
 0x162   : > { %v1262_v31 = vpop.trf.xlu1 }
 0x163   : > { %v1230_v35 = vpop.trf.xlu0  ;;  %2247 = vmatmul.mubr.bf16.gmra.mrb[16].mxu1 %v1262_v31 }
 0x164   : > { %2215 = vmatmul.mubr.bf16.gmra.mrb[16].mxu0 %v1230_v35  ;;  %v1998_v35 = vunpack.c.h.bf16 %v2113_v5 }
 0x166   : > { %v1263_v62 = vpop.trf.xlu1 }
 0x167   : > { %v1231_v28 = vpop.trf.xlu0  ;;  %2250 = vmatprep.mubr.bf16.mxu1 %v1263_v62  ;;  %v2062_v62 = vunpack.c.h.bf16 %v2129_v1 }
 0x168   : > { %2218 = vmatprep.mubr.bf16.mxu0 %v1231_v28 }
 0x16a   : > { %v1264_v50 = vpop.trf.xlu1 }
 0x16b   : > { %v1232_v46 = vpop.trf.xlu0  ;;  %2251 = vmatmul.mubr.bf16.gmra.mrb[20].mxu1 %v1264_v50 }
 0x16c   : > { %2219 = vmatmul.mubr.bf16.gmra.mrb[20].mxu0 %v1232_v46 }
 0x16e   : > { %v1265_v17 = vpop.trf.xlu1 }
 0x16f   : > { %v1233_v45 = vpop.trf.xlu0  ;;  %2254 = vmatprep.mubr.bf16.mxu1 %v1265_v17 }
 0x170   : > { %2222 = vmatprep.mubr.bf16.mxu0 %v1233_v45  ;;  %v1994_v45 = vunpack.c.h.bf16 %v2112_v16 }
 0x172   : > { %v1266_v37 = vpop.trf.xlu1 }
 0x173   : > { %v1234_v53 = vpop.trf.xlu0  ;;  %2255 = vmatmul.mubr.bf16.gmra.mrb[24].mxu1 %v1266_v37  ;;  %v2058_v37 = vunpack.c.h.bf16 %v2128_v38 }
 0x174   : > { %2223 = vmatmul.mubr.bf16.gmra.mrb[24].mxu0 %v1234_v53 }
 0x176   : > { %v1267_v52 = vpop.trf.xlu1 }
 0x177   : > { %v1235_v10 = vpop.trf.xlu0  ;;  %2258 = vmatprep.mubr.bf16.mxu1 %v1267_v52 }
 0x178   : > { %2226 = vmatprep.mubr.bf16.mxu0 %v1235_v10 }
 0x17a   : > { %v1268_v7 = vpop.trf.xlu1 }
 0x17b   : > { %v1236_v9 = vpop.trf.xlu0  ;;  %2259 = vmatmul.mubr.bf16.gmra.mrb[28].mxu1 %v1268_v7 }
 0x17c   : > { %2227 = vmatmul.mubr.bf16.gmra.mrb[28].mxu0 %v1236_v9 }
 0x216   : > { %v2232_v18 = vpop.f32.mrb[0].mxu1 }
 0x217   : > { %v2200_v49 = vpop.f32.mrb[0].mxu0  ;;  %v1488_v15 = vadd.f32 %v2232_v18, %v3775_v8  ;;  %v1479_v36 = vpop.f32.mrb[1].mxu1 }
 0x218   : > { %v1360_v29 = vadd.f32 %v2200_v49, %v3775_v8  ;;  %v1351_v44 = vpop.f32.mrb[1].mxu0  ;;  %v1480_v2 = vadd.f32 %v3775_v8, %v1479_v36  ;;  %v2233_v60 = vpop.f32.mrb[2].mxu1  ;;  %v2131_v49 = vld [vmem:[%s3766_s12 + $0xa8] sm:$0xff]  }
 0x219   : > { %v1352_v22 = vadd.f32 %v3775_v8, %v1351_v44  ;;  %v2201_v40 = vpop.f32.mrb[2].mxu0  ;;  %v1768_v59 = vmul.f32 %v2053_v25, %v1488_v15  ;;  %v1491_v61 = vadd.f32 %v2233_v60, %v3775_v8  ;;  %v1482_v58 = vpop.f32.mrb[3].mxu1  ;;  %v2115_v25 = vld [vmem:[%s3766_s12 + $0x28] sm:$0xff]  }
 0x21a   : > { %v1736_v56 = vmul.f32 %v1989_v27, %v1360_v29  ;;  %v1363_v39 = vadd.f32 %v2201_v40, %v3775_v8  ;;  %v1354_v11 = vpop.f32.mrb[3].mxu0  ;;  %v1766_v26 = vmul.f32 %v2049_v48, %v1480_v2  ;;  %v1483_v55 = vadd.f32 %v3775_v8, %v1482_v58  ;;  %v2114_v48 = vld [vmem:[%s3766_s12 + $0x20] sm:$0xff]  }
 0x21b   : > { %v1734_v32 = vmul.f32 %v1985_v34, %v1352_v22  ;;  %v1355_v14 = vadd.f32 %v3775_v8, %v1354_v11  ;;  %1832 = vst [vmem:[%s3790_s29 + $0x110] sm:$0xff] %v1768_v59  ;;  %v1769_v13 = vmul.f32 %v2054_v0, %v1491_v61  ;;  %v2130_v29 = vld [vmem:[%s3766_s12 + $0xa0] sm:$0xff]   ;;  %v2005_v36 = vunpack.c.l.bf16 %v2115_v25 }
 0x21c   : > { %1800 = vst [vmem:[%s3790_s29 + $0x10] sm:$0xff] %v1736_v56  ;;  %v1737_v3 = vmul.f32 %v1990_v24, %v1363_v39  ;;  %1830 = vst [vmem:[%s3790_s29 + $0x100] sm:$0xff] %v1766_v26  ;;  %v1767_v23 = vmul.f32 %v2050_v42, %v1483_v55  ;;  %v2069_v24 = vunpack.c.l.bf16 %v2131_v49  ;;  %v2001_v2 = vunpack.c.l.bf16 %v2114_v48 }
 0x21d   : > { %1798 = vst [vmem:[%s3790_s29] sm:$0xff] %v1734_v32  ;;  %v1735_v4 = vmul.f32 %v1986_v19, %v1355_v14  ;;  %1833 = vst [vmem:[%s3790_s29 + $0x118] sm:$0xff] %v1769_v13  ;;  %v2065_v40 = vunpack.c.l.bf16 %v2130_v29  ;;  %v2006_v59 = vunpack.c.h.bf16 %v2115_v25  ;;  %v2070_v39 = vunpack.c.h.bf16 %v2131_v49 }
 0x21e   : > { %1801 = vst [vmem:[%s3790_s29 + $0x18] sm:$0xff] %v1737_v3  ;;  %1831 = vst [vmem:[%s3790_s29 + $0x108] sm:$0xff] %v1767_v23  ;;  %v2236_v51 = vpop.f32.mrb[4].mxu1  ;;  %v2002_v26 = vunpack.c.h.bf16 %v2114_v48  ;;  %v2066_v14 = vunpack.c.h.bf16 %v2130_v29 }
 0x21f   : > { %1799 = vst [vmem:[%s3790_s29 + $0x8] sm:$0xff] %v1735_v4  ;;  %v2204_v21 = vpop.f32.mrb[4].mxu0  ;;  %v1504_v47 = vadd.f32 %v2236_v51, %v3775_v8  ;;  %v1495_v31 = vpop.f32.mrb[5].mxu1 }
 0x220   : > { %v1376_v41 = vadd.f32 %v2204_v21, %v3775_v8  ;;  %v1367_v33 = vpop.f32.mrb[5].mxu0  ;;  %v1496_v50 = vadd.f32 %v3775_v8, %v1495_v31  ;;  %v2237_v17 = vpop.f32.mrb[6].mxu1  ;;  %v2133_v21 = vld [vmem:[%s3766_s12 + $0xb8] sm:$0xff]  }
 0x221   : > { %v1368_v28 = vadd.f32 %v3775_v8, %v1367_v33  ;;  %v2205_v46 = vpop.f32.mrb[6].mxu0  ;;  %v1772_v52 = vmul.f32 %v2061_v30, %v1504_v47  ;;  %v1507_v7 = vadd.f32 %v2237_v17, %v3775_v8  ;;  %v1498_v6 = vpop.f32.mrb[7].mxu1  ;;  %v2117_v30 = vld [vmem:[%s3766_s12 + $0x38] sm:$0xff]  }
 0x222   : > { %v1740_v53 = vmul.f32 %v1997_v54, %v1376_v41  ;;  %v1379_v10 = vadd.f32 %v2205_v46, %v3775_v8  ;;  %v1370_v9 = vpop.f32.mrb[7].mxu0  ;;  %v1770_v20 = vmul.f32 %v2057_v43, %v1496_v50  ;;  %v1499_v27 = vadd.f32 %v3775_v8, %v1498_v6  ;;  %v2116_v43 = vld [vmem:[%s3766_s12 + $0x30] sm:$0xff]  }
 0x223   : > { %v1738_v12 = vmul.f32 %v1993_v57, %v1368_v28  ;;  %v1371_v63 = vadd.f32 %v3775_v8, %v1370_v9  ;;  %1836 = vst [vmem:[%s3790_s29 + $0x130] sm:$0xff] %v1772_v52  ;;  %v1773_v34 = vmul.f32 %v2062_v62, %v1507_v7  ;;  %v2132_v41 = vld [vmem:[%s3766_s12 + $0xb0] sm:$0xff]   ;;  %v2013_v31 = vunpack.c.l.bf16 %v2117_v30 }
 0x224   : > { %1804 = vst [vmem:[%s3790_s29 + $0x30] sm:$0xff] %v1740_v53  ;;  %v1741_v18 = vmul.f32 %v1998_v35, %v1379_v10  ;;  %1834 = vst [vmem:[%s3790_s29 + $0x120] sm:$0xff] %v1770_v20  ;;  %v1771_v44 = vmul.f32 %v2058_v37, %v1499_v27  ;;  %v2077_v35 = vunpack.c.l.bf16 %v2133_v21  ;;  %v2009_v50 = vunpack.c.l.bf16 %v2116_v43 }
 0x225   : > { %1802 = vst [vmem:[%s3790_s29 + $0x20] sm:$0xff] %v1738_v12  ;;  %v1739_v15 = vmul.f32 %v1994_v45, %v1371_v63  ;;  %1837 = vst [vmem:[%s3790_s29 + $0x138] sm:$0xff] %v1773_v34  ;;  %v2073_v46 = vunpack.c.l.bf16 %v2132_v41  ;;  %v2014_v52 = vunpack.c.h.bf16 %v2117_v30  ;;  %v2078_v10 = vunpack.c.h.bf16 %v2133_v21 }
 0x226   : > { %1805 = vst [vmem:[%s3790_s29 + $0x38] sm:$0xff] %v1741_v18  ;;  %1835 = vst [vmem:[%s3790_s29 + $0x128] sm:$0xff] %v1771_v44  ;;  %v2240_v22 = vpop.f32.mrb[8].mxu1  ;;  %v2010_v20 = vunpack.c.h.bf16 %v2116_v43  ;;  %v2074_v63 = vunpack.c.h.bf16 %v2132_v41 }
 0x227   : > { %1803 = vst [vmem:[%s3790_s29 + $0x28] sm:$0xff] %v1739_v15  ;;  %v2208_v0 = vpop.f32.mrb[8].mxu0  ;;  %v1520_v19 = vadd.f32 %v2240_v22, %v3775_v8  ;;  %v1511_v56 = vpop.f32.mrb[9].mxu1 }
 0x228   : > { %v1392_v60 = vadd.f32 %v2208_v0, %v3775_v8  ;;  %v1383_v42 = vpop.f32.mrb[9].mxu0  ;;  %v1512_v11 = vadd.f32 %v3775_v8, %v1511_v56  ;;  %v2241_v32 = vpop.f32.mrb[10].mxu1  ;;  %v2135_v0 = vld [vmem:[%s3766_s12 + $0xc8] sm:$0xff]  }
 0x229   : > { %v1384_v61 = vadd.f32 %v3775_v8, %v1383_v42  ;;  %v2209_v58 = vpop.f32.mrb[10].mxu0  ;;  %v1776_v5 = vmul.f32 %v2069_v24, %v1520_v19  ;;  %v1523_v3 = vadd.f32 %v2241_v32, %v3775_v8  ;;  %v1514_v16 = vpop.f32.mrb[11].mxu1  ;;  %v2119_v24 = vld [vmem:[%s3766_s12 + $0x48] sm:$0xff]  }
 0x22a   : > { %v1744_v55 = vmul.f32 %v2005_v36, %v1392_v60  ;;  %v1395_v1 = vadd.f32 %v2209_v58, %v3775_v8  ;;  %v1386_v13 = vpop.f32.mrb[11].mxu0  ;;  %v1774_v4 = vmul.f32 %v2065_v40, %v1512_v11  ;;  %v1515_v54 = vadd.f32 %v3775_v8, %v1514_v16  ;;  %v2118_v40 = vld [vmem:[%s3766_s12 + $0x40] sm:$0xff]  }
 0x22b   : > { %v1742_v38 = vmul.f32 %v2001_v2, %v1384_v61  ;;  %v1387_v23 = vadd.f32 %v3775_v8, %v1386_v13  ;;  %1840 = vst [vmem:[%s3790_s29 + $0x150] sm:$0xff] %v1776_v5  ;;  %v1777_v57 = vmul.f32 %v2070_v39, %v1523_v3  ;;  %v2134_v60 = vld [vmem:[%s3766_s12 + $0xc0] sm:$0xff]   ;;  %v2021_v56 = vunpack.c.l.bf16 %v2119_v24 }
 0x22c   : > { %1808 = vst [vmem:[%s3790_s29 + $0x50] sm:$0xff] %v1744_v55  ;;  %v1745_v51 = vmul.f32 %v2006_v59, %v1395_v1  ;;  %1838 = vst [vmem:[%s3790_s29 + $0x140] sm:$0xff] %v1774_v4  ;;  %v1775_v33 = vmul.f32 %v2066_v14, %v1515_v54  ;;  %v2085_v59 = vunpack.c.l.bf16 %v2135_v0  ;;  %v2017_v11 = vunpack.c.l.bf16 %v2118_v40 }
 0x22d   : > { %1806 = vst [vmem:[%s3790_s29 + $0x40] sm:$0xff] %v1742_v38  ;;  %v1743_v47 = vmul.f32 %v2002_v26, %v1387_v23  ;;  %1841 = vst [vmem:[%s3790_s29 + $0x158] sm:$0xff] %v1777_v57  ;;  %v2081_v58 = vunpack.c.l.bf16 %v2134_v60  ;;  %v2022_v5 = vunpack.c.h.bf16 %v2119_v24  ;;  %v2086_v1 = vunpack.c.h.bf16 %v2135_v0 }
 0x22e   : > { %1809 = vst [vmem:[%s3790_s29 + $0x58] sm:$0xff] %v1745_v51  ;;  %1839 = vst [vmem:[%s3790_s29 + $0x148] sm:$0xff] %v1775_v33  ;;  %v2244_v28 = vpop.f32.mrb[12].mxu1  ;;  %v2018_v4 = vunpack.c.h.bf16 %v2118_v40  ;;  %v2082_v23 = vunpack.c.h.bf16 %v2134_v60 }
 0x22f   : > { %1807 = vst [vmem:[%s3790_s29 + $0x48] sm:$0xff] %v1743_v47  ;;  %v2212_v62 = vpop.f32.mrb[12].mxu0  ;;  %v1536_v45 = vadd.f32 %v2244_v28, %v3775_v8  ;;  %v1527_v53 = vpop.f32.mrb[13].mxu1 }
 0x230   : > { %v1408_v17 = vadd.f32 %v2212_v62, %v3775_v8  ;;  %v1399_v37 = vpop.f32.mrb[13].mxu0  ;;  %v1528_v9 = vadd.f32 %v3775_v8, %v1527_v53  ;;  %v2245_v12 = vpop.f32.mrb[14].mxu1  ;;  %v2137_v62 = vld [vmem:[%s3766_s12 + $0xd8] sm:$0xff]  }
 0x231   : > { %v1400_v7 = vadd.f32 %v3775_v8, %v1399_v37  ;;  %v2213_v6 = vpop.f32.mrb[14].mxu0  ;;  %v1780_v25 = vmul.f32 %v2077_v35, %v1536_v45  ;;  %v1539_v18 = vadd.f32 %v2245_v12, %v3775_v8  ;;  %v1530_v48 = vpop.f32.mrb[15].mxu1  ;;  %v2121_v35 = vld [vmem:[%s3766_s12 + $0x58] sm:$0xff]  }
 0x232   : > { %v1748_v27 = vmul.f32 %v2013_v31, %v1408_v17  ;;  %v1411_v49 = vadd.f32 %v2213_v6, %v3775_v8  ;;  %v1402_v34 = vpop.f32.mrb[15].mxu0  ;;  %v1778_v15 = vmul.f32 %v2073_v46, %v1528_v9  ;;  %v1531_v36 = vadd.f32 %v3775_v8, %v1530_v48  ;;  %v2120_v46 = vld [vmem:[%s3766_s12 + $0x50] sm:$0xff]  }
 0x233   : > { %v1746_v29 = vmul.f32 %v2009_v50, %v1400_v7  ;;  %v1403_v44 = vadd.f32 %v3775_v8, %v1402_v34  ;;  %1844 = vst [vmem:[%s3790_s29 + $0x170] sm:$0xff] %v1780_v25  ;;  %v1781_v2 = vmul.f32 %v2078_v10, %v1539_v18  ;;  %v2136_v17 = vld [vmem:[%s3766_s12 + $0xd0] sm:$0xff]   ;;  %v2029_v53 = vunpack.c.l.bf16 %v2121_v35 }
 0x234   : > { %1812 = vst [vmem:[%s3790_s29 + $0x70] sm:$0xff] %v1748_v27  ;;  %v1749_v22 = vmul.f32 %v2014_v52, %v1411_v49  ;;  %1842 = vst [vmem:[%s3790_s29 + $0x160] sm:$0xff] %v1778_v15  ;;  %v1779_v42 = vmul.f32 %v2074_v63, %v1531_v36  ;;  %v2093_v52 = vunpack.c.l.bf16 %v2137_v62  ;;  %v2025_v9 = vunpack.c.l.bf16 %v2120_v46 }
 0x235   : > { %1810 = vst [vmem:[%s3790_s29 + $0x60] sm:$0xff] %v1746_v29  ;;  %v1747_v19 = vmul.f32 %v2010_v20, %v1403_v44  ;;  %1845 = vst [vmem:[%s3790_s29 + $0x178] sm:$0xff] %v1781_v2  ;;  %v2089_v6 = vunpack.c.l.bf16 %v2136_v17  ;;  %v2030_v25 = vunpack.c.h.bf16 %v2121_v35  ;;  %v2094_v49 = vunpack.c.h.bf16 %v2137_v62 }
 0x236   : > { %1813 = vst [vmem:[%s3790_s29 + $0x78] sm:$0xff] %v1749_v22  ;;  %1843 = vst [vmem:[%s3790_s29 + $0x168] sm:$0xff] %v1779_v42  ;;  %v2248_v61 = vpop.f32.mrb[16].mxu1  ;;  %v2026_v15 = vunpack.c.h.bf16 %v2120_v46  ;;  %v2090_v44 = vunpack.c.h.bf16 %v2136_v17 }
 0x237   : > { %1811 = vst [vmem:[%s3790_s29 + $0x68] sm:$0xff] %v1747_v19  ;;  %v2216_v39 = vpop.f32.mrb[16].mxu0  ;;  %v1552_v26 = vadd.f32 %v2248_v61, %v3775_v8  ;;  %v1543_v55 = vpop.f32.mrb[17].mxu1 }
 0x238   : > { %v1424_v32 = vadd.f32 %v2216_v39, %v3775_v8  ;;  %v1415_v14 = vpop.f32.mrb[17].mxu0  ;;  %v1544_v13 = vadd.f32 %v3775_v8, %v1543_v55  ;;  %v2249_v38 = vpop.f32.mrb[18].mxu1  ;;  %v2139_v39 = vld [vmem:[%s3766_s12 + $0xe8] sm:$0xff]  }
 0x239   : > { %v1416_v3 = vadd.f32 %v3775_v8, %v1415_v14  ;;  %v2217_v16 = vpop.f32.mrb[18].mxu0  ;;  %v1784_v30 = vmul.f32 %v2085_v59, %v1552_v26  ;;  %v1555_v51 = vadd.f32 %v2249_v38, %v3775_v8  ;;  %v1546_v43 = vpop.f32.mrb[19].mxu1  ;;  %v2123_v59 = vld [vmem:[%s3766_s12 + $0x68] sm:$0xff]  }
 0x23a   : > { %v1752_v54 = vmul.f32 %v2021_v56, %v1424_v32  ;;  %v1427_v21 = vadd.f32 %v2217_v16, %v3775_v8  ;;  %v1418_v57 = vpop.f32.mrb[19].mxu0  ;;  %v1782_v47 = vmul.f32 %v2081_v58, %v1544_v13  ;;  %v1547_v31 = vadd.f32 %v3775_v8, %v1546_v43  ;;  %v2122_v58 = vld [vmem:[%s3766_s12 + $0x60] sm:$0xff]  }
 0x23b   : > { %v1750_v41 = vmul.f32 %v2017_v11, %v1416_v3  ;;  %v1419_v33 = vadd.f32 %v3775_v8, %v1418_v57  ;;  %1848 = vst [vmem:[%s3790_s29 + $0x190] sm:$0xff] %v1784_v30  ;;  %v1785_v50 = vmul.f32 %v2086_v1, %v1555_v51  ;;  %v2138_v32 = vld [vmem:[%s3766_s12 + $0xe0] sm:$0xff]   ;;  %v2037_v55 = vunpack.c.l.bf16 %v2123_v59 }
 0x23c   : > { %1816 = vst [vmem:[%s3790_s29 + $0x90] sm:$0xff] %v1752_v54  ;;  %v1753_v28 = vmul.f32 %v2022_v5, %v1427_v21  ;;  %1846 = vst [vmem:[%s3790_s29 + $0x180] sm:$0xff] %v1782_v47  ;;  %v1783_v37 = vmul.f32 %v2082_v23, %v1547_v31  ;;  %v2101_v5 = vunpack.c.l.bf16 %v2139_v39  ;;  %v2033_v13 = vunpack.c.l.bf16 %v2122_v58 }
 0x23d   : > { %1814 = vst [vmem:[%s3790_s29 + $0x80] sm:$0xff] %v1750_v41  ;;  %v1751_v45 = vmul.f32 %v2018_v4, %v1419_v33  ;;  %1849 = vst [vmem:[%s3790_s29 + $0x198] sm:$0xff] %v1785_v50  ;;  %v2097_v16 = vunpack.c.l.bf16 %v2138_v32  ;;  %v2038_v30 = vunpack.c.h.bf16 %v2123_v59  ;;  %v2102_v21 = vunpack.c.h.bf16 %v2139_v39 }
 0x23e   : > { %1817 = vst [vmem:[%s3790_s29 + $0x98] sm:$0xff] %v1753_v28  ;;  %1847 = vst [vmem:[%s3790_s29 + $0x188] sm:$0xff] %v1783_v37  ;;  %v2252_v7 = vpop.f32.mrb[20].mxu1  ;;  %v2034_v47 = vunpack.c.h.bf16 %v2122_v58  ;;  %v2098_v33 = vunpack.c.h.bf16 %v2138_v32 }
 0x23f   : > { %1815 = vst [vmem:[%s3790_s29 + $0x88] sm:$0xff] %v1751_v45  ;;  %v2220_v10 = vpop.f32.mrb[20].mxu0  ;;  %v1568_v20 = vadd.f32 %v2252_v7, %v3775_v8  ;;  %v1559_v27 = vpop.f32.mrb[21].mxu1 }
 0x240   : > { %v1440_v12 = vadd.f32 %v2220_v10, %v3775_v8  ;;  %v1431_v63 = vpop.f32.mrb[21].mxu0  ;;  %v1560_v34 = vadd.f32 %v3775_v8, %v1559_v27  ;;  %v2253_v29 = vpop.f32.mrb[22].mxu1  ;;  %v2141_v10 = vld [vmem:[%s3766_s12 + $0xf8] sm:$0xff]  }
 0x241   : > { %v1432_v18 = vadd.f32 %v3775_v8, %v1431_v63  ;;  %v2221_v48 = vpop.f32.mrb[22].mxu0  ;;  %v1788_v24 = vmul.f32 %v2093_v52, %v1568_v20  ;;  %v1571_v22 = vadd.f32 %v2253_v29, %v3775_v8  ;;  %v1562_v40 = vpop.f32.mrb[23].mxu1  ;;  %v2125_v52 = vld [vmem:[%s3766_s12 + $0x78] sm:$0xff]  }
 0x242   : > { %v1756_v36 = vmul.f32 %v2029_v53, %v1440_v12  ;;  %v1443_v0 = vadd.f32 %v2221_v48, %v3775_v8  ;;  %v1434_v2 = vpop.f32.mrb[23].mxu0  ;;  %v1786_v19 = vmul.f32 %v2089_v6, %v1560_v34  ;;  %v1563_v56 = vadd.f32 %v3775_v8, %v1562_v40  ;;  %v2124_v6 = vld [vmem:[%s3766_s12 + $0x70] sm:$0xff]  }
 0x243   : > { %v1754_v60 = vmul.f32 %v2025_v9, %v1432_v18  ;;  %v1435_v42 = vadd.f32 %v3775_v8, %v1434_v2  ;;  %1852 = vst [vmem:[%s3790_s29 + $0x1b0] sm:$0xff] %v1788_v24  ;;  %v1789_v11 = vmul.f32 %v2094_v49, %v1571_v22  ;;  %v2140_v12 = vld [vmem:[%s3766_s12 + $0xf0] sm:$0xff]   ;;  %v2045_v27 = vunpack.c.l.bf16 %v2125_v52 }
 0x244   : > { %1820 = vst [vmem:[%s3790_s29 + $0xb0] sm:$0xff] %v1756_v36  ;;  %v1757_v61 = vmul.f32 %v2030_v25, %v1443_v0  ;;  %1850 = vst [vmem:[%s3790_s29 + $0x1a0] sm:$0xff] %v1786_v19  ;;  %v1787_v14 = vmul.f32 %v2090_v44, %v1563_v56  ;;  %v2109_v25 = vunpack.c.l.bf16 %v2141_v10  ;;  %v2041_v34 = vunpack.c.l.bf16 %v2124_v6 }
 0x245   : > { %1818 = vst [vmem:[%s3790_s29 + $0xa0] sm:$0xff] %v1754_v60  ;;  %v1755_v26 = vmul.f32 %v2026_v15, %v1435_v42  ;;  %1853 = vst [vmem:[%s3790_s29 + $0x1b8] sm:$0xff] %v1789_v11  ;;  %v2105_v48 = vunpack.c.l.bf16 %v2140_v12  ;;  %v2046_v24 = vunpack.c.h.bf16 %v2125_v52  ;;  %v2110_v0 = vunpack.c.h.bf16 %v2141_v10 }
 0x246   : > { %1821 = vst [vmem:[%s3790_s29 + $0xb8] sm:$0xff] %v1757_v61  ;;  %1851 = vst [vmem:[%s3790_s29 + $0x1a8] sm:$0xff] %v1787_v14  ;;  %v2256_v3 = vpop.f32.mrb[24].mxu1  ;;  %v2042_v19 = vunpack.c.h.bf16 %v2124_v6  ;;  %v2106_v42 = vunpack.c.h.bf16 %v2140_v12 }
 0x247   : > { %1819 = vst [vmem:[%s3790_s29 + $0xa8] sm:$0xff] %v1755_v26  ;;  %v2224_v1 = vpop.f32.mrb[24].mxu0  ;;  %v1584_v4 = vadd.f32 %v2256_v3, %v3775_v8  ;;  %v1575_v54 = vpop.f32.mrb[25].mxu1 }
 0x248   : > { %v1456_v38 = vadd.f32 %v2224_v1, %v3775_v8  ;;  %v1447_v23 = vpop.f32.mrb[25].mxu0  ;;  %v1576_v57 = vadd.f32 %v3775_v8, %v1575_v54  ;;  %v2257_v41 = vpop.f32.mrb[26].mxu1 }
 0x249   : > { %v1448_v51 = vadd.f32 %v3775_v8, %v1447_v23  ;;  %v2225_v43 = vpop.f32.mrb[26].mxu0  ;;  %v1792_v35 = vmul.f32 %v2101_v5, %v1584_v4  ;;  %v1587_v28 = vadd.f32 %v2257_v41, %v3775_v8  ;;  %v1578_v46 = vpop.f32.mrb[27].mxu1 }
 0x24a   : > { %v1760_v31 = vmul.f32 %v2037_v55, %v1456_v38  ;;  %v1459_v62 = vadd.f32 %v2225_v43, %v3775_v8  ;;  %v1450_v50 = vpop.f32.mrb[27].mxu0  ;;  %v1790_v45 = vmul.f32 %v2097_v16, %v1576_v57  ;;  %v1579_v53 = vadd.f32 %v3775_v8, %v1578_v46 }
 0x24b   : > { %v1758_v17 = vmul.f32 %v2033_v13, %v1448_v51  ;;  %v1451_v37 = vadd.f32 %v3775_v8, %v1450_v50  ;;  %1856 = vst [vmem:[%s3790_s29 + $0x1d0] sm:$0xff] %v1792_v35  ;;  %v1793_v9 = vmul.f32 %v2102_v21, %v1587_v28 }
 0x24c   : > { %1824 = vst [vmem:[%s3790_s29 + $0xd0] sm:$0xff] %v1760_v31  ;;  %v1761_v7 = vmul.f32 %v2038_v30, %v1459_v62  ;;  %1854 = vst [vmem:[%s3790_s29 + $0x1c0] sm:$0xff] %v1790_v45  ;;  %v1791_v63 = vmul.f32 %v2098_v33, %v1579_v53 }
 0x24d   : > { %1822 = vst [vmem:[%s3790_s29 + $0xc0] sm:$0xff] %v1758_v17  ;;  %v1759_v20 = vmul.f32 %v2034_v47, %v1451_v37  ;;  %1857 = vst [vmem:[%s3790_s29 + $0x1d8] sm:$0xff] %v1793_v9 }
 0x24e   : > { %1825 = vst [vmem:[%s3790_s29 + $0xd8] sm:$0xff] %v1761_v7  ;;  %1855 = vst [vmem:[%s3790_s29 + $0x1c8] sm:$0xff] %v1791_v63  ;;  %v2260_v18 = vpop.f32.mrb[28].mxu1 }
 0x24f   : > { %1823 = vst [vmem:[%s3790_s29 + $0xc8] sm:$0xff] %v1759_v20  ;;  %v2228_v49 = vpop.f32.mrb[28].mxu0  ;;  %v1600_v15 = vadd.f32 %v2260_v18, %v3775_v8  ;;  %v1591_v36 = vpop.f32.mrb[29].mxu1 }
 0x250   : > { %v1472_v29 = vadd.f32 %v2228_v49, %v3775_v8  ;;  %v1463_v44 = vpop.f32.mrb[29].mxu0  ;;  %v1592_v2 = vadd.f32 %v3775_v8, %v1591_v36  ;;  %v2261_v60 = vpop.f32.mrb[30].mxu1 }
 0x251   : > { %v1464_v22 = vadd.f32 %v3775_v8, %v1463_v44  ;;  %v2229_v40 = vpop.f32.mrb[30].mxu0  ;;  %v1796_v59 = vmul.f32 %v2109_v25, %v1600_v15  ;;  %v1603_v61 = vadd.f32 %v2261_v60, %v3775_v8  ;;  %v1594_v58 = vpop.f32.mrb[31].mxu1 }
 0x252   : > { %v1764_v56 = vmul.f32 %v2045_v27, %v1472_v29  ;;  %v1475_v39 = vadd.f32 %v2229_v40, %v3775_v8  ;;  %v1466_v11 = vpop.f32.mrb[31].mxu0  ;;  %v1794_v26 = vmul.f32 %v2105_v48, %v1592_v2  ;;  %v1595_v55 = vadd.f32 %v3775_v8, %v1594_v58 }
 0x253   : > { %v1762_v32 = vmul.f32 %v2041_v34, %v1464_v22  ;;  %v1467_v14 = vadd.f32 %v3775_v8, %v1466_v11  ;;  %1860 = vst [vmem:[%s3790_s29 + $0x1f0] sm:$0xff] %v1796_v59  ;;  %v1797_v1 = vmul.f32 %v2110_v0, %v1603_v61 }
 0x254   : > { %1828 = vst [vmem:[%s3790_s29 + $0xf0] sm:$0xff] %v1764_v56  ;;  %v1765_v5 = vmul.f32 %v2046_v24, %v1475_v39  ;;  %1858 = vst [vmem:[%s3790_s29 + $0x1e0] sm:$0xff] %v1794_v26  ;;  %v1795_v13 = vmul.f32 %v2106_v42, %v1595_v55 }
 0x255   : > { %1826 = vst [vmem:[%s3790_s29 + $0xe0] sm:$0xff] %v1762_v32  ;;  %v1763_v3 = vmul.f32 %v2042_v19, %v1467_v14  ;;  %1861 = vst [vmem:[%s3790_s29 + $0x1f8] sm:$0xff] %v1797_v1 }
 0x256   : > { %1829 = vst [vmem:[%s3790_s29 + $0xf8] sm:$0xff] %v1765_v5  ;;  %1859 = vst [vmem:[%s3790_s29 + $0x1e8] sm:$0xff] %v1795_v13 }
 0x257   : > { %1827 = vst [vmem:[%s3790_s29 + $0xe8] sm:$0xff] %v1763_v3 }
 0x258   : > { %2351 = shalt.err (!%p2348_p7)
}
 0x259   : > { %s2352_s12 = scalar_lea.hbm %s3937_s14, 8192  ;;  %s2356_s28 = scalar_lea.hbm %s3994_s6, 65536 }
 0x25a   : > { %p2353_p9 = scmp.ne.s32.totalorder %s3937_s14, %s2352_s12  ;;  %p2357_p12 = scmp.lt.u32.totalorder %s3937_s14, %s3994_s6 }
 0x25b   : > { %p2358_p13 = scmp.lt.u32.totalorder %s2356_s28, %s2352_s12  ;;  %p2360_p1 = scmp.lt.u32.totalorder %s2352_s12, %s3937_s14 }
 0x25c   : > { %p2354_p10 = pnand %p2353_p9, %p2480_p6 }
 0x25d   : > { %p2359_p0 = por %p2358_p13, %p2357_p12 }
 0x25e   : > { %p2355_p11 = pneg %p2354_p10 }
 0x25f   : > { %p2361_p2 = por %p2360_p1, %p2359_p0 }
 0x261   : > { %p2362_p3 = pnand %p2361_p2, %p2355_p11 }
 0x263   : > { %2365 = shalt.err (!%p2362_p3)
}
 0x264   : > { %s2404_s25 = smov 128   ;;  %s2405_s11 = smov 8  }
 0x265   : > { %2278 = dma.vmem_to_hbm [thread:$0]  (%p2480_p6), %s3939_s10, 8192, %s3937_s14, %s1863_s15, %s2404_s25, %s2404_s25, %s2405_s11  }
 0x266 PF: > { %p2284_p4 = scmp.ge.s32.totalorder %s2400_s24, 2  ;;  %s1891_s16 = sand.u32 1, %s2388_s21  }
 0x267   : > { %s1892_s17 = scalar_lea.sflag [#allocation4], %s1891_s16 }
 0x268   : > { %p2281_p5 = pnand %p2284_p4, %p2484_p8 }
 0x26a   : > { %2383 = dma.done.wait (!%p2281_p5), %s1892_s17, 8192  }
 0x26b   : > { %2385 = vsyncadd (!%p2281_p5), %s1892_s17, 4294959104  ;;  %p16_p7 = scmp.ge.s32.totalorder %s2466_s27, 10   ;;  %s4249_s21 = smov %s2392_s22 }
 0x26c   : > { %s4250_s22 = smov %s2396_s23  ;;  %s4251_s23 = smov %s2478_s30 }
 0x26d   : > { %s4252_s24 = smov %s2466_s27  ;;  %18 = sbr.rel (!%p16_p7) target bundleno = 3 (0x3), region = 110 }
 0x274   :  { %1897 = vsyncpa [#allocation4], 1 }
 0x275   :  { %1899 = vsyncpa [#allocation4 + $0x1], 1 }

</bundles_post_ra>
